<compile_context>
chip_gen: v5e
topology: v5e:2x2
jax: 0.10.0
libtpu: 0.0.40
codegen_flags: <defaults>
</compile_context>

<pallas_src>
import functools
import numpy as np
import jax
import jax.numpy as jnp
from jax.experimental import pallas as pl
from jax.experimental.pallas import tpu as pltpu


_CP = pltpu.CompilerParams(
    dimension_semantics=("parallel",),
    vmem_limit_bytes=32 * 1024 * 1024,   # safe on v5e/v6e/v7x; usage here is tiny
)


def _silu(x):
    return x * jax.nn.sigmoid(x)


def _softmax_lastdim(s):
    m = jnp.max(s, axis=-1, keepdims=True)
    e = jnp.exp(s - m)
    return e * pl.reciprocal(jnp.sum(e, axis=-1, keepdims=True), approx=True)


# ----------------------------------------------------------------------------
# Kernel 1: fused Conv3x3+BN+SiLU (cv1) -> Conv3x3+BN+SiLU (cv2), grid=(B,)
# ----------------------------------------------------------------------------
def _conv2_kernel(xp_ref, w1_ref, s1_ref, b1_ref, w2_ref, s2_ref, b2_ref,
                  o_ref, y1p_scr, *, H, W):
    C1 = xp_ref.shape[-1]
    Cm = w1_ref.shape[-1]
    C2 = w2_ref.shape[-1]

    # ---- cv1: in-kernel im2col as 9 shifted tap contractions ----
    acc = jnp.zeros((H, W, Cm), jnp.float32)
    for di in range(3):
        for dj in range(3):
            patch = xp_ref[di:di + H, dj:dj + W, :].astype(jnp.bfloat16)
            wtap = jnp.broadcast_to(w1_ref[di, dj], (H, C1, Cm))
            acc = acc + jnp.einsum('hwc,hcd->hwd', patch, wtap,
                                   preferred_element_type=jnp.float32)
    y1 = _silu(acc * s1_ref[...] + b1_ref[...])

    # ---- zero-pad the cv1 result in VMEM scratch (never touches HBM) ----
    y1p_scr[...] = jnp.zeros(y1p_scr.shape, jnp.float32)
    y1p_scr[1:1 + H, 1:1 + W, :] = y1

    # ---- cv2 ----
    acc2 = jnp.zeros((H, W, C2), jnp.float32)
    for di in range(3):
        for dj in range(3):
            patch = y1p_scr[di:di + H, dj:dj + W, :].astype(jnp.bfloat16)
            wtap = jnp.broadcast_to(w2_ref[di, dj], (H, Cm, C2))
            acc2 = acc2 + jnp.einsum('hwc,hcd->hwd', patch, wtap,
                                     preferred_element_type=jnp.float32)
    o_ref[...] = _silu(acc2 * s2_ref[...] + b2_ref[...])


def conv_bn_silu_x2(x_nhwc, w1, s1, b1, w2, s2, b2):
    B, H, W, C1 = x_nhwc.shape
    Cm, C2 = w1.shape[-1], w2.shape[-1]
    xp = jnp.pad(x_nhwc, ((0, 0), (1, 1), (1, 1), (0, 0)))
    Hp, Wp = H + 2, W + 2
    kern = functools.partial(_conv2_kernel, H=H, W=W)
    return pl.pallas_call(
        kern,
        out_shape=jax.ShapeDtypeStruct((B, H, W, C2), jnp.float32),
        grid=(B,),
        in_specs=[
            pl.BlockSpec((None, Hp, Wp, C1), lambda b: (b, 0, 0, 0)),
            pl.BlockSpec((3, 3, C1, Cm), lambda b: (0, 0, 0, 0)),
            pl.BlockSpec((1, 1, Cm), lambda b: (0, 0, 0)),
            pl.BlockSpec((1, 1, Cm), lambda b: (0, 0, 0)),
            pl.BlockSpec((3, 3, Cm, C2), lambda b: (0, 0, 0, 0)),
            pl.BlockSpec((1, 1, C2), lambda b: (0, 0, 0)),
            pl.BlockSpec((1, 1, C2), lambda b: (0, 0, 0)),
        ],
        out_specs=pl.BlockSpec((None, H, W, C2), lambda b: (b, 0, 0, 0)),
        scratch_shapes=[pltpu.VMEM((Hp, Wp, Cm), jnp.float32)],
        compiler_params=_CP,
    )(xp, w1.astype(jnp.bfloat16), s1.reshape(1, 1, Cm), b1.reshape(1, 1, Cm),
      w2.astype(jnp.bfloat16), s2.reshape(1, 1, C2), b2.reshape(1, 1, C2))


# ----------------------------------------------------------------------------
# Kernel 2: fused q/k/v projection + theta_shift epilogue, grid=(B,)
#   rotate_every_two and the k scaling are folded into the stacked weights:
#   wqkv = [Wq, Wq@R, s*Wk, s*(Wk@R), Wv]  =>  qr = q*cos + (q@R)*sin, etc.
# ----------------------------------------------------------------------------
def _qkv_theta_kernel(y_ref, wqkv_ref, bqkv_ref, sin_ref, cos_ref,
                      q_ref, k_ref, v_ref):
    y = y_ref[...].astype(jnp.bfloat16)
    sin = sin_ref[...]
    cos = cos_ref[...]

    def proj(i):
        return jnp.dot(y, wqkv_ref[i],
                       preferred_element_type=jnp.float32) + bqkv_ref[i]

    q, q_rot = proj(0), proj(1)
    k, k_rot = proj(2), proj(3)     # k scaling already folded into the weights
    q_ref[...] = q * cos + q_rot * sin
    k_ref[...] = k * cos + k_rot * sin
    v_ref[...] = proj(4)


def qkv_theta(yf, wqkv, bqkv, sinf, cosf):
    B, HW, C = yf.shape
    out_sds = jax.ShapeDtypeStruct((B, HW, C), jnp.float32)
    return pl.pallas_call(
        _qkv_theta_kernel,
        out_shape=(out_sds, out_sds, out_sds),
        grid=(B,),
        in_specs=[
            pl.BlockSpec((None, HW, C), lambda b: (b, 0, 0)),
            pl.BlockSpec((5, C, C), lambda b: (0, 0, 0)),
            pl.BlockSpec((5, 1, C), lambda b: (0, 0, 0)),
            pl.BlockSpec((HW, C), lambda b: (0, 0)),
            pl.BlockSpec((HW, C), lambda b: (0, 0)),
        ],
        out_specs=(
            pl.BlockSpec((None, HW, C), lambda b: (b, 0, 0)),
            pl.BlockSpec((None, HW, C), lambda b: (b, 0, 0)),
            pl.BlockSpec((None, HW, C), lambda b: (b, 0, 0)),
        ),
        compiler_params=_CP,
    )(yf, wqkv, bqkv, sinf, cosf)


# ----------------------------------------------------------------------------
# Kernel 3a: width-direction retention, all heads per batch in one block
# ----------------------------------------------------------------------------
def _axis_retention_kernel(q_ref, k_ref, v_ref, m_ref, o_ref):
    q = q_ref[...].astype(jnp.bfloat16)          # (NH*H, W, KD)
    k = k_ref[...].astype(jnp.bfloat16)
    s = jnp.einsum('rik,rjk->rij', q, k,
                   preferred_element_type=jnp.float32) + m_ref[...]
    p = _softmax_lastdim(s).astype(jnp.bfloat16)
    o_ref[...] = jnp.einsum('rij,rjd->rid', p, v_ref[...].astype(jnp.bfloat16),
                            preferred_element_type=jnp.float32)


def width_retention(q, k, v, mask):
    B, R, L, KD = q.shape
    HD = v.shape[-1]
    return pl.pallas_call(
        _axis_retention_kernel,
        out_shape=jax.ShapeDtypeStruct((B, R, L, HD), jnp.float32),
        grid=(B,),
        in_specs=[
            pl.BlockSpec((None, R, L, KD), lambda b: (b, 0, 0, 0)),
            pl.BlockSpec((None, R, L, KD), lambda b: (b, 0, 0, 0)),
            pl.BlockSpec((None, R, L, HD), lambda b: (b, 0, 0, 0)),
            pl.BlockSpec((R, L, L), lambda b: (0, 0, 0)),   # mask hoisted over b
        ],
        out_specs=pl.BlockSpec((None, R, L, HD), lambda b: (b, 0, 0, 0)),
        compiler_params=_CP,
    )(q, k, v, mask)


# ----------------------------------------------------------------------------
# Kernel 3b: height-direction retention + LePE 5x5 dwconv + out_proj + residual
# ----------------------------------------------------------------------------
def _height_lepe_proj_kernel(qh_ref, kh_ref, vw_ref, mh_ref, vc_ref, w5_ref,
                             b5_ref, wo_ref, bo_ref, xres_ref, o_ref, vpad_scr,
                             *, num_heads):
    R, H, KD = qh_ref.shape
    Wd, _, C = vc_ref.shape
    HD = vw_ref.shape[-1]

    # ---- height-direction retention (all heads / all columns in one block) ----
    q = qh_ref[...].astype(jnp.bfloat16)
    k = kh_ref[...].astype(jnp.bfloat16)
    s = jnp.einsum('rik,rjk->rij', q, k,
                   preferred_element_type=jnp.float32) + mh_ref[...]
    p = _softmax_lastdim(s).astype(jnp.bfloat16)
    oh = jnp.einsum('rij,rjd->rid', p, vw_ref[...].astype(jnp.bfloat16),
                    preferred_element_type=jnp.float32)          # (NH*W, H, HD)

    # ---- LePE: depthwise 5x5 (pad 2) on v, in (W, H, C) spatial layout ----
    vpad_scr[...] = jnp.zeros(vpad_scr.shape, jnp.float32)
    vpad_scr[2:2 + Wd, 2:2 + H, :] = vc_ref[...]
    lepe = jnp.zeros((Wd, H, C), jnp.float32)
    for ta in range(5):
        for tb in range(5):
            # spatial layout is transposed -> index the 5x5 taps transposed
            lepe = lepe + vpad_scr[ta:ta + Wd, tb:tb + H, :] * w5_ref[tb, ta]
    lepe = lepe + b5_ref[...]

    # ---- out_proj(retention + lepe) + bias, per-head so no transposes ----
    wo = wo_ref[...]                                             # (C, C) bf16
    out = jnp.zeros((Wd, H, C), jnp.float32) + bo_ref[...]
    for n in range(num_heads):
        oh_n = oh[n * Wd:(n + 1) * Wd].astype(jnp.bfloat16)      # (W, H, HD)
        wo_n = jnp.broadcast_to(wo[n * HD:(n + 1) * HD, :], (Wd, HD, C))
        out = out + jnp.einsum('whd,wdc->whc', oh_n, wo_n,
                               preferred_element_type=jnp.float32)
    out = out + jnp.einsum('whc,wcd->whd', lepe.astype(jnp.bfloat16),
                           jnp.broadcast_to(wo, (Wd, C, C)),
                           preferred_element_type=jnp.float32)

    # ---- bottleneck shortcut ----
    o_ref[...] = out + xres_ref[...]


def height_lepe_out(qh, kh, vwh, mask, vc, w5, b5, wo, bo, xres, num_heads):
    B, R, H, KD = qh.shape
    HD = vwh.shape[-1]
    Wd, C = vc.shape[1], vc.shape[-1]
    kern = functools.partial(_height_lepe_proj_kernel, num_heads=num_heads)
    return pl.pallas_call(
        kern,
        out_shape=jax.ShapeDtypeStruct((B, Wd, H, C), jnp.float32),
        grid=(B,),
        in_specs=[
            pl.BlockSpec((None, R, H, KD), lambda b: (b, 0, 0, 0)),
            pl.BlockSpec((None, R, H, KD), lambda b: (b, 0, 0, 0)),
            pl.BlockSpec((None, R, H, HD), lambda b: (b, 0, 0, 0)),
            pl.BlockSpec((R, H, H), lambda b: (0, 0, 0)),
            pl.BlockSpec((None, Wd, H, C), lambda b: (b, 0, 0, 0)),
            pl.BlockSpec((5, 5, 1, 1, C), lambda b: (0, 0, 0, 0, 0)),
            pl.BlockSpec((1, 1, C), lambda b: (0, 0, 0)),
            pl.BlockSpec((C, C), lambda b: (0, 0)),
            pl.BlockSpec((1, 1, C), lambda b: (0, 0, 0)),
            pl.BlockSpec((None, Wd, H, C), lambda b: (b, 0, 0, 0)),
        ],
        out_specs=pl.BlockSpec((None, Wd, H, C), lambda b: (b, 0, 0, 0)),
        scratch_shapes=[pltpu.VMEM((Wd + 4, H + 4, C), jnp.float32)],
        compiler_params=_CP,
    )(qh, kh, vwh, mask, vc, w5, b5, wo, bo, xres)


# ----------------------------------------------------------------------------
# plain-JAX constants / glue
# ----------------------------------------------------------------------------
def make_relpos(H, W, C, NH):
    """RetNetRelPos2d(C, NH, initial_value=2, heads_range=4), chunkwise path."""
    kd = C // NH
    half = kd // 2
    angle = 1.0 / (10000.0 ** jnp.linspace(0.0, 1.0, half))
    angle = jnp.repeat(angle, 2)                                   # (kd,)
    decay = jnp.log(1.0 - 2.0 ** (-2.0 - 4.0 * jnp.arange(NH, dtype=jnp.float32) / NH))
    idx = jnp.arange(H * W, dtype=jnp.float32)
    sin = jnp.sin(idx[:, None] * angle[None, :])                   # (HW, kd)
    cos = jnp.cos(idx[:, None] * angle[None, :])

    def decay_1d(l):
        i = jnp.arange(l, dtype=jnp.float32)
        m = jnp.abs(i[:, None] - i[None, :])
        return m[None, :, :] * decay[:, None, None]                # (NH, l, l)

    return sin, cos, decay_1d(H), decay_1d(W)


def rotate_matrix(c):
    """R such that x @ R == rotate_every_two(x) on the last (channel) dim."""
    r = np.zeros((c, c), np.float32)
    for i in range(c // 2):
        r[2 * i + 1, 2 * i] = -1.0
        r[2 * i, 2 * i + 1] = 1.0
    return jnp.asarray(r)


def init_params(key, c1, c2, e=0.5):
    c_ = int(c2 * e)
    ks = jax.random.split(key, 20)

    def nrm(k, shape, std=0.05):
        return std * jax.random.normal(k, shape, jnp.float32)

    def bn_fold(kg, kb, km, kv, c):
        gamma = 1.0 + 0.1 * jax.random.normal(kg, (c,), jnp.float32)
        beta = 0.1 * jax.random.normal(kb, (c,), jnp.float32)
        mean = 0.1 * jax.random.normal(km, (c,), jnp.float32)
        var = 1.0 + 0.1 * jax.random.uniform(kv, (c,), jnp.float32)
        scale = gamma / jnp.sqrt(var + 1e-5)
        return scale, beta - mean * scale

    p = {}
    p['w1'] = nrm(ks[0], (3, 3, c1, c_))
    p['s1'], p['b1'] = bn_fold(ks[1], ks[2], ks[3], ks[4], c_)
    p['w2'] = nrm(ks[5], (3, 3, c_, c2))
    p['s2'], p['b2'] = bn_fold(ks[6], ks[7], ks[8], ks[9], c2)
    # VisionRetentionChunk(c2), num_heads=4, value_factor=1
    p['wq'] = nrm(ks[10], (c2, c2)); p['bq'] = nrm(ks[11], (c2,))
    p['wk'] = nrm(ks[12], (c2, c2)); p['bk'] = nrm(ks[13], (c2,))
    p['wv'] = nrm(ks[14], (c2, c2)); p['bv'] = nrm(ks[15], (c2,))
    p['wo'] = nrm(ks[16], (c2, c2)); p['bo'] = jnp.zeros((c2,), jnp.float32)
    p['w_lepe'] = nrm(ks[17], (5, 5, c2)); p['b_lepe'] = nrm(ks[18], (c2,))
    return p


def bottleneck_vrc_forward(x_nchw, p, *, num_heads=4):
    B, C1, H, W = x_nchw.shape
    C = p['w2'].shape[-1]
    NH = num_heads
    KD = C // NH
    HD = C // NH
    scaling = KD ** -0.5

    x_nhwc = jnp.transpose(x_nchw, (0, 2, 3, 1)).astype(jnp.float32)

    # ---- K1: cv1 + cv2 fused ----
    y = conv_bn_silu_x2(x_nhwc, p['w1'], p['s1'], p['b1'],
                        p['w2'], p['s2'], p['b2'])                  # (B, H, W, C)

    # ---- relpos constants ----
    sin, cos, mask_h, mask_w = make_relpos(H, W, C, NH)
    sin_f = jnp.tile(sin, (1, NH))                # (HW, C): same angles per head
    cos_f = jnp.tile(cos, (1, NH))
    mask_w_exp = jnp.repeat(mask_w, H, axis=0)    # (NH*H, W, W)
    mask_h_exp = jnp.repeat(mask_h, W, axis=0)    # (NH*W, H, H)

    # ---- fold rotate_every_two and the k scaling into the projection weights.
    #      theta_shift is linear, so scaling k before theta_shift (as in the
    #      PyTorch reference) == scaling Wk/bk here. ----
    rot = rotate_matrix(C)
    wq, wk, wv = p['wq'], p['wk'], p['wv']
    bq, bk, bv = p['bq'], p['bk'], p['bv']
    wqkv = jnp.stack([wq, wq @ rot, wk * scaling, (wk @ rot) * scaling, wv]
                     ).astype(jnp.bfloat16)                          # (5, C, C)
    bqkv = jnp.stack([bq, bq @ rot, bk * scaling, (bk @ rot) * scaling, bv]
                     )[:, None, :]                                   # (5, 1, C)

    # ---- K2: fused qkv projection + theta_shift ----
    yf = y.reshape(B, H * W, C)
    qr, kr, v = qkv_theta(yf, wqkv, bqkv, sin_f, cos_f)              # (B, HW, C)

    def heads(t, d):                                    # tiny XLA layout glue
        return t.reshape(B, H, W, NH, d).transpose(0, 3, 1, 2, 4)    # (B,NH,H,W,d)

    q5, k5, v5 = heads(qr, KD), heads(kr, KD), heads(v, HD)

    # ---- K3a: width-direction retention ----
    vw = width_retention(q5.reshape(B, NH * H, W, KD),
                         k5.reshape(B, NH * H, W, KD),
                         v5.reshape(B, NH * H, W, HD),
                         mask_w_exp)                                 # (B, NH*H, W, HD)

    # ---- K3b: height-direction retention + LePE + out_proj + residual ----
    qh = q5.transpose(0, 1, 3, 2, 4).reshape(B, NH * W, H, KD)
    kh = k5.transpose(0, 1, 3, 2, 4).reshape(B, NH * W, H, KD)
    vwh = vw.reshape(B, NH, H, W, HD).transpose(0, 1, 3, 2, 4).reshape(B, NH * W, H, HD)
    vc = v.reshape(B, H, W, C).transpose(0, 2, 1, 3)                 # (B, W, H, C)
    xres = jnp.transpose(x_nhwc, (0, 2, 1, 3))                       # (B, W, H, C)

    out_wh = height_lepe_out(qh, kh, vwh, mask_h_exp, vc,
                             p['w_lepe'].reshape(5, 5, 1, 1, C),
                             p['b_lepe'].reshape(1, 1, C),
                             p['wo'].astype(jnp.bfloat16),
                             p['bo'].reshape(1, 1, C),
                             xres, NH)                               # (B, W, H, C)
    return jnp.transpose(out_wh, (0, 3, 2, 1))                       # NCHW


if __name__ == "__main__":
    key = jax.random.PRNGKey(0)
    kx, kp = jax.random.split(key)
    B, C, H, W = 2, 16, 8, 8            # c1 == c2 == 16 (4 heads), 8x8 spatial
    x = jax.random.normal(kx, (B, C, H, W), jnp.float32)
    params = init_params(kp, C, C, e=0.5)
    fwd = jax.jit(functools.partial(bottleneck_vrc_forward, num_heads=4))
    out = fwd(x, params)
    out = jax.block_until_ready(out)
    assert out.shape == (B, C, H, W) and out.dtype == jnp.float32
    print("KERNEL_OK")
</pallas_src>

<mosaic_0001>
module attributes {stable_mosaic.version = 11 : i64} {
  func.func @_qkv_theta_kernel(%arg0: i32, %arg1: memref<1x64x16xf32, #tpu.memory_space<vmem>>, %arg2: memref<5x16x16xbf16, #tpu.memory_space<vmem>>, %arg3: memref<5x1x16xf32, #tpu.memory_space<vmem>>, %arg4: memref<64x16xf32, #tpu.memory_space<vmem>>, %arg5: memref<64x16xf32, #tpu.memory_space<vmem>>, %arg6: memref<1x64x16xf32, #tpu.memory_space<vmem>>, %arg7: memref<1x64x16xf32, #tpu.memory_space<vmem>>, %arg8: memref<1x64x16xf32, #tpu.memory_space<vmem>>) attributes {dimension_semantics = [#tpu.dimension_semantics<parallel>], iteration_bounds = array<i64: 2>, scalar_prefetch = 0 : i64, scratch_operands = 0 : i64, tpu.core_type = #tpu.core_type<tc>, window_params = [{transform_indices = @transform_0, window_bounds = array<i64: 1, 64, 16>}, {pipeline_mode = #tpu.pipeline_mode<synchronous>, transform_indices = @transform_1, window_bounds = array<i64: 5, 16, 16>}, {pipeline_mode = #tpu.pipeline_mode<synchronous>, transform_indices = @transform_2, window_bounds = array<i64: 5, 1, 16>}, {pipeline_mode = #tpu.pipeline_mode<synchronous>, transform_indices = @transform_3, window_bounds = array<i64: 64, 16>}, {pipeline_mode = #tpu.pipeline_mode<synchronous>, transform_indices = @transform_4, window_bounds = array<i64: 64, 16>}, {transform_indices = @transform_5, window_bounds = array<i64: 1, 64, 16>}, {transform_indices = @transform_6, window_bounds = array<i64: 1, 64, 16>}, {transform_indices = @transform_7, window_bounds = array<i64: 1, 64, 16>}]} {
    %c0 = arith.constant 0 : index
    %c0_0 = arith.constant 0 : index
    %c0_1 = arith.constant 0 : index
    %0 = vector.load %arg1[%c0, %c0_0, %c0_1] : memref<1x64x16xf32, #tpu.memory_space<vmem>>, vector<1x64x16xf32>
    %1 = vector.shape_cast %0 : vector<1x64x16xf32> to vector<64x16xf32>
    %2 = arith.truncf %1 : vector<64x16xf32> to vector<64x16xbf16>
    %c0_2 = arith.constant 0 : index
    %c0_3 = arith.constant 0 : index
    %3 = vector.load %arg4[%c0_2, %c0_3] : memref<64x16xf32, #tpu.memory_space<vmem>>, vector<64x16xf32>
    %c0_4 = arith.constant 0 : index
    %c0_5 = arith.constant 0 : index
    %4 = vector.load %arg5[%c0_4, %c0_5] : memref<64x16xf32, #tpu.memory_space<vmem>>, vector<64x16xf32>
    %c0_6 = arith.constant 0 : index
    %c0_7 = arith.constant 0 : index
    %c0_8 = arith.constant 0 : index
    %5 = vector.load %arg2[%c0_6, %c0_7, %c0_8] : memref<5x16x16xbf16, #tpu.memory_space<vmem>>, vector<1x16x16xbf16>
    %6 = vector.shape_cast %5 : vector<1x16x16xbf16> to vector<16x16xbf16>
    %cst = arith.constant dense<0.000000e+00> : vector<64x16xf32>
    %7 = tpu.matmul %2, %6, %cst {dimension_numbers = #tpu.dot_dimension_numbers<[1], [0], [0], [1], [0, 0, 1, 1], [], []>} : vector<64x16xbf16>, vector<16x16xbf16>, vector<64x16xf32> -> vector<64x16xf32>
    %c0_9 = arith.constant 0 : index
    %c0_10 = arith.constant 0 : index
    %c0_11 = arith.constant 0 : index
    %8 = vector.load %arg3[%c0_9, %c0_10, %c0_11] : memref<5x1x16xf32, #tpu.memory_space<vmem>>, vector<1x1x16xf32>
    %9 = vector.shape_cast %8 : vector<1x1x16xf32> to vector<1x16xf32>
    %10 = vector.broadcast %9 : vector<1x16xf32> to vector<64x16xf32>
    %11 = arith.addf %7, %10 : vector<64x16xf32>
    %c1 = arith.constant 1 : index
    %c0_12 = arith.constant 0 : index
    %c0_13 = arith.constant 0 : index
    %12 = vector.load %arg2[%c1, %c0_12, %c0_13] : memref<5x16x16xbf16, #tpu.memory_space<vmem>>, vector<1x16x16xbf16>
    %13 = vector.shape_cast %12 : vector<1x16x16xbf16> to vector<16x16xbf16>
    %cst_14 = arith.constant dense<0.000000e+00> : vector<64x16xf32>
    %14 = tpu.matmul %2, %13, %cst_14 {dimension_numbers = #tpu.dot_dimension_numbers<[1], [0], [0], [1], [0, 0, 1, 1], [], []>} : vector<64x16xbf16>, vector<16x16xbf16>, vector<64x16xf32> -> vector<64x16xf32>
    %c1_15 = arith.constant 1 : index
    %c0_16 = arith.constant 0 : index
    %c0_17 = arith.constant 0 : index
    %15 = vector.load %arg3[%c1_15, %c0_16, %c0_17] : memref<5x1x16xf32, #tpu.memory_space<vmem>>, vector<1x1x16xf32>
    %16 = vector.shape_cast %15 : vector<1x1x16xf32> to vector<1x16xf32>
    %17 = vector.broadcast %16 : vector<1x16xf32> to vector<64x16xf32>
    %18 = arith.addf %14, %17 : vector<64x16xf32>
    %c2 = arith.constant 2 : index
    %c0_18 = arith.constant 0 : index
    %c0_19 = arith.constant 0 : index
    %19 = vector.load %arg2[%c2, %c0_18, %c0_19] : memref<5x16x16xbf16, #tpu.memory_space<vmem>>, vector<1x16x16xbf16>
    %20 = vector.shape_cast %19 : vector<1x16x16xbf16> to vector<16x16xbf16>
    %cst_20 = arith.constant dense<0.000000e+00> : vector<64x16xf32>
    %21 = tpu.matmul %2, %20, %cst_20 {dimension_numbers = #tpu.dot_dimension_numbers<[1], [0], [0], [1], [0, 0, 1, 1], [], []>} : vector<64x16xbf16>, vector<16x16xbf16>, vector<64x16xf32> -> vector<64x16xf32>
    %c2_21 = arith.constant 2 : index
    %c0_22 = arith.constant 0 : index
    %c0_23 = arith.constant 0 : index
    %22 = vector.load %arg3[%c2_21, %c0_22, %c0_23] : memref<5x1x16xf32, #tpu.memory_space<vmem>>, vector<1x1x16xf32>
    %23 = vector.shape_cast %22 : vector<1x1x16xf32> to vector<1x16xf32>
    %24 = vector.broadcast %23 : vector<1x16xf32> to vector<64x16xf32>
    %25 = arith.addf %21, %24 : vector<64x16xf32>
    %c3 = arith.constant 3 : index
    %c0_24 = arith.constant 0 : index
    %c0_25 = arith.constant 0 : index
    %26 = vector.load %arg2[%c3, %c0_24, %c0_25] : memref<5x16x16xbf16, #tpu.memory_space<vmem>>, vector<1x16x16xbf16>
    %27 = vector.shape_cast %26 : vector<1x16x16xbf16> to vector<16x16xbf16>
    %cst_26 = arith.constant dense<0.000000e+00> : vector<64x16xf32>
    %28 = tpu.matmul %2, %27, %cst_26 {dimension_numbers = #tpu.dot_dimension_numbers<[1], [0], [0], [1], [0, 0, 1, 1], [], []>} : vector<64x16xbf16>, vector<16x16xbf16>, vector<64x16xf32> -> vector<64x16xf32>
    %c3_27 = arith.constant 3 : index
    %c0_28 = arith.constant 0 : index
    %c0_29 = arith.constant 0 : index
    %29 = vector.load %arg3[%c3_27, %c0_28, %c0_29] : memref<5x1x16xf32, #tpu.memory_space<vmem>>, vector<1x1x16xf32>
    %30 = vector.shape_cast %29 : vector<1x1x16xf32> to vector<1x16xf32>
    %31 = vector.broadcast %30 : vector<1x16xf32> to vector<64x16xf32>
    %32 = arith.addf %28, %31 : vector<64x16xf32>
    %33 = arith.mulf %11, %4 : vector<64x16xf32>
    %34 = arith.mulf %18, %3 : vector<64x16xf32>
    %35 = arith.addf %33, %34 : vector<64x16xf32>
    %c0_30 = arith.constant 0 : index
    %c0_31 = arith.constant 0 : index
    %c0_32 = arith.constant 0 : index
    %36 = vector.load %arg6[%c0_30, %c0_31, %c0_32] : memref<1x64x16xf32, #tpu.memory_space<vmem>>, vector<1x64x16xf32>
    %37 = vector.shape_cast %36 : vector<1x64x16xf32> to vector<64x16xf32>
    %38 = vector.shape_cast %35 : vector<64x16xf32> to vector<1x64x16xf32>
    tpu.vector_store %arg6[%c0_30, %c0_31, %c0_32], %38 {strides = array<i32>} : memref<1x64x16xf32, #tpu.memory_space<vmem>>, vector<1x64x16xf32>,
    %39 = arith.mulf %25, %4 : vector<64x16xf32>
    %40 = arith.mulf %32, %3 : vector<64x16xf32>
    %41 = arith.addf %39, %40 : vector<64x16xf32>
    %c0_33 = arith.constant 0 : index
    %c0_34 = arith.constant 0 : index
    %c0_35 = arith.constant 0 : index
    %42 = vector.load %arg7[%c0_33, %c0_34, %c0_35] : memref<1x64x16xf32, #tpu.memory_space<vmem>>, vector<1x64x16xf32>
    %43 = vector.shape_cast %42 : vector<1x64x16xf32> to vector<64x16xf32>
    %44 = vector.shape_cast %41 : vector<64x16xf32> to vector<1x64x16xf32>
    tpu.vector_store %arg7[%c0_33, %c0_34, %c0_35], %44 {strides = array<i32>} : memref<1x64x16xf32, #tpu.memory_space<vmem>>, vector<1x64x16xf32>,
    %c4 = arith.constant 4 : index
    %c0_36 = arith.constant 0 : index
    %c0_37 = arith.constant 0 : index
    %45 = vector.load %arg2[%c4, %c0_36, %c0_37] : memref<5x16x16xbf16, #tpu.memory_space<vmem>>, vector<1x16x16xbf16>
    %46 = vector.shape_cast %45 : vector<1x16x16xbf16> to vector<16x16xbf16>
    %cst_38 = arith.constant dense<0.000000e+00> : vector<64x16xf32>
    %47 = tpu.matmul %2, %46, %cst_38 {dimension_numbers = #tpu.dot_dimension_numbers<[1], [0], [0], [1], [0, 0, 1, 1], [], []>} : vector<64x16xbf16>, vector<16x16xbf16>, vector<64x16xf32> -> vector<64x16xf32>
    %c4_39 = arith.constant 4 : index
    %c0_40 = arith.constant 0 : index
    %c0_41 = arith.constant 0 : index
    %48 = vector.load %arg3[%c4_39, %c0_40, %c0_41] : memref<5x1x16xf32, #tpu.memory_space<vmem>>, vector<1x1x16xf32>
    %49 = vector.shape_cast %48 : vector<1x1x16xf32> to vector<1x16xf32>
    %50 = vector.broadcast %49 : vector<1x16xf32> to vector<64x16xf32>
    %51 = arith.addf %47, %50 : vector<64x16xf32>
    %c0_42 = arith.constant 0 : index
    %c0_43 = arith.constant 0 : index
    %c0_44 = arith.constant 0 : index
    %52 = vector.load %arg8[%c0_42, %c0_43, %c0_44] : memref<1x64x16xf32, #tpu.memory_space<vmem>>, vector<1x64x16xf32>
    %53 = vector.shape_cast %52 : vector<1x64x16xf32> to vector<64x16xf32>
    %54 = vector.shape_cast %51 : vector<64x16xf32> to vector<1x64x16xf32>
    tpu.vector_store %arg8[%c0_42, %c0_43, %c0_44], %54 {strides = array<i32>} : memref<1x64x16xf32, #tpu.memory_space<vmem>>, vector<1x64x16xf32>,
    return
  }
  func.func @transform_0(%arg0: i32) -> (i32, i32, i32) {
    %c0_i32 = arith.constant 0 : i32
    %c0_i32_0 = arith.constant 0 : i32
    %c0_i32_1 = arith.constant 0 : i32
    return %arg0, %c0_i32, %c0_i32_0 : i32, i32, i32
  }
  func.func @transform_1(%arg0: i32) -> (i32, i32, i32) {
    %c0_i32 = arith.constant 0 : i32
    %c0_i32_0 = arith.constant 0 : i32
    %c0_i32_1 = arith.constant 0 : i32
    %c0_i32_2 = arith.constant 0 : i32
    return %c0_i32, %c0_i32_0, %c0_i32_1 : i32, i32, i32
  }
  func.func @transform_2(%arg0: i32) -> (i32, i32, i32) {
    %c0_i32 = arith.constant 0 : i32
    %c0_i32_0 = arith.constant 0 : i32
    %c0_i32_1 = arith.constant 0 : i32
    %c0_i32_2 = arith.constant 0 : i32
    return %c0_i32, %c0_i32_0, %c0_i32_1 : i32, i32, i32
  }
  func.func @transform_3(%arg0: i32) -> (i32, i32) {
    %c0_i32 = arith.constant 0 : i32
    %c0_i32_0 = arith.constant 0 : i32
    %c0_i32_1 = arith.constant 0 : i32
    return %c0_i32, %c0_i32_0 : i32, i32
  }
  func.func @transform_4(%arg0: i32) -> (i32, i32) {
    %c0_i32 = arith.constant 0 : i32
    %c0_i32_0 = arith.constant 0 : i32
    %c0_i32_1 = arith.constant 0 : i32
    return %c0_i32, %c0_i32_0 : i32, i32
  }
  func.func @transform_5(%arg0: i32) -> (i32, i32, i32) {
    %c0_i32 = arith.constant 0 : i32
    %c0_i32_0 = arith.constant 0 : i32
    %c0_i32_1 = arith.constant 0 : i32
    return %arg0, %c0_i32, %c0_i32_0 : i32, i32, i32
  }
  func.func @transform_6(%arg0: i32) -> (i32, i32, i32) {
    %c0_i32 = arith.constant 0 : i32
    %c0_i32_0 = arith.constant 0 : i32
    %c0_i32_1 = arith.constant 0 : i32
    return %arg0, %c0_i32, %c0_i32_0 : i32, i32, i32
  }
  func.func @transform_7(%arg0: i32) -> (i32, i32, i32) {
    %c0_i32 = arith.constant 0 : i32
    %c0_i32_0 = arith.constant 0 : i32
    %c0_i32_1 = arith.constant 0 : i32
    return %arg0, %c0_i32, %c0_i32_0 : i32, i32, i32
  }
}

module attributes {stable_mosaic.version = 11 : i64} {
  func.func @_conv2_kernel(%arg0: i32, %arg1: memref<1x10x10x16xf32, #tpu.memory_space<vmem>>, %arg2: memref<3x3x16x8xbf16, #tpu.memory_space<vmem>>, %arg3: memref<1x1x8xf32, #tpu.memory_space<vmem>>, %arg4: memref<1x1x8xf32, #tpu.memory_space<vmem>>, %arg5: memref<3x3x8x16xbf16, #tpu.memory_space<vmem>>, %arg6: memref<1x1x16xf32, #tpu.memory_space<vmem>>, %arg7: memref<1x1x16xf32, #tpu.memory_space<vmem>>, %arg8: memref<1x8x8x16xf32, #tpu.memory_space<vmem>>, %arg9: memref<10x10x8xf32, #tpu.memory_space<vmem>>) attributes {dimension_semantics = [#tpu.dimension_semantics<parallel>], iteration_bounds = array<i64: 2>, scalar_prefetch = 0 : i64, scratch_operands = 1 : i64, tpu.core_type = #tpu.core_type<tc>, window_params = [{transform_indices = @transform_0, window_bounds = array<i64: 1, 10, 10, 16>}, {pipeline_mode = #tpu.pipeline_mode<synchronous>, transform_indices = @transform_1, window_bounds = array<i64: 3, 3, 16, 8>}, {pipeline_mode = #tpu.pipeline_mode<synchronous>, transform_indices = @transform_2, window_bounds = array<i64: 1, 1, 8>}, {pipeline_mode = #tpu.pipeline_mode<synchronous>, transform_indices = @transform_3, window_bounds = array<i64: 1, 1, 8>}, {pipeline_mode = #tpu.pipeline_mode<synchronous>, transform_indices = @transform_4, window_bounds = array<i64: 3, 3, 8, 16>}, {pipeline_mode = #tpu.pipeline_mode<synchronous>, transform_indices = @transform_5, window_bounds = array<i64: 1, 1, 16>}, {pipeline_mode = #tpu.pipeline_mode<synchronous>, transform_indices = @transform_6, window_bounds = array<i64: 1, 1, 16>}, {transform_indices = @transform_7, window_bounds = array<i64: 1, 8, 8, 16>}]} {
    %cst = arith.constant 0.000000e+00 : f32
    %0 = vector.broadcast %cst : f32 to vector<8x8x8xf32>
    %c0 = arith.constant 0 : index
    %c0_0 = arith.constant 0 : index
    %c0_1 = arith.constant 0 : index
    %c0_2 = arith.constant 0 : index
    %1 = vector.load %arg1[%c0, %c0_0, %c0_1, %c0_2] : memref<1x10x10x16xf32, #tpu.memory_space<vmem>>, vector<1x8x8x16xf32>
    %2 = vector.shape_cast %1 : vector<1x8x8x16xf32> to vector<8x8x16xf32>
    %3 = arith.truncf %2 : vector<8x8x16xf32> to vector<8x8x16xbf16>
    %c0_3 = arith.constant 0 : index
    %c0_4 = arith.constant 0 : index
    %c0_5 = arith.constant 0 : index
    %c0_6 = arith.constant 0 : index
    %4 = vector.load %arg2[%c0_3, %c0_4, %c0_5, %c0_6] : memref<3x3x16x8xbf16, #tpu.memory_space<vmem>>, vector<1x1x16x8xbf16>
    %5 = vector.shape_cast %4 : vector<1x1x16x8xbf16> to vector<16x8xbf16>
    %6 = vector.shape_cast %5 : vector<16x8xbf16> to vector<1x16x8xbf16>
    %7 = vector.broadcast %6 : vector<1x16x8xbf16> to vector<8x16x8xbf16>
    "tpu.trace_start"() <{level = 10 : i32, message = "hwc,hcd->hwd"}> : () -> ()
    %cst_7 = arith.constant dense<0.000000e+00> : vector<8x8x8xf32>
    %8 = tpu.matmul %3, %7, %cst_7 {dimension_numbers = #tpu.dot_dimension_numbers<[2], [1], [1], [2], [0, 0, 0, 1, 1, 2], [0], [0]>} : vector<8x8x16xbf16>, vector<8x16x8xbf16>, vector<8x8x8xf32> -> vector<8x8x8xf32>
    "tpu.trace_stop"() : () -> ()
    %9 = arith.addf %0, %8 : vector<8x8x8xf32>
    %c0_8 = arith.constant 0 : index
    %c0_9 = arith.constant 0 : index
    %c1 = arith.constant 1 : index
    %c0_10 = arith.constant 0 : index
    %10 = vector.load %arg1[%c0_8, %c0_9, %c1, %c0_10] : memref<1x10x10x16xf32, #tpu.memory_space<vmem>>, vector<1x8x8x16xf32>
    %11 = vector.shape_cast %10 : vector<1x8x8x16xf32> to vector<8x8x16xf32>
    %12 = arith.truncf %11 : vector<8x8x16xf32> to vector<8x8x16xbf16>
    %c0_11 = arith.constant 0 : index
    %c1_12 = arith.constant 1 : index
    %c0_13 = arith.constant 0 : index
    %c0_14 = arith.constant 0 : index
    %13 = vector.load %arg2[%c0_11, %c1_12, %c0_13, %c0_14] : memref<3x3x16x8xbf16, #tpu.memory_space<vmem>>, vector<1x1x16x8xbf16>
    %14 = vector.shape_cast %13 : vector<1x1x16x8xbf16> to vector<16x8xbf16>
    %15 = vector.shape_cast %14 : vector<16x8xbf16> to vector<1x16x8xbf16>
    %16 = vector.broadcast %15 : vector<1x16x8xbf16> to vector<8x16x8xbf16>
    "tpu.trace_start"() <{level = 10 : i32, message = "hwc,hcd->hwd"}> : () -> ()
    %cst_15 = arith.constant dense<0.000000e+00> : vector<8x8x8xf32>
    %17 = tpu.matmul %12, %16, %cst_15 {dimension_numbers = #tpu.dot_dimension_numbers<[2], [1], [1], [2], [0, 0, 0, 1, 1, 2], [0], [0]>} : vector<8x8x16xbf16>, vector<8x16x8xbf16>, vector<8x8x8xf32> -> vector<8x8x8xf32>
    "tpu.trace_stop"() : () -> ()
    %18 = arith.addf %9, %17 : vector<8x8x8xf32>
    %c0_16 = arith.constant 0 : index
    %c0_17 = arith.constant 0 : index
    %c2 = arith.constant 2 : index
    %c0_18 = arith.constant 0 : index
    %19 = vector.load %arg1[%c0_16, %c0_17, %c2, %c0_18] : memref<1x10x10x16xf32, #tpu.memory_space<vmem>>, vector<1x8x8x16xf32>
    %20 = vector.shape_cast %19 : vector<1x8x8x16xf32> to vector<8x8x16xf32>
    %21 = arith.truncf %20 : vector<8x8x16xf32> to vector<8x8x16xbf16>
    %c0_19 = arith.constant 0 : index
    %c2_20 = arith.constant 2 : index
    %c0_21 = arith.constant 0 : index
    %c0_22 = arith.constant 0 : index
    %22 = vector.load %arg2[%c0_19, %c2_20, %c0_21, %c0_22] : memref<3x3x16x8xbf16, #tpu.memory_space<vmem>>, vector<1x1x16x8xbf16>
    %23 = vector.shape_cast %22 : vector<1x1x16x8xbf16> to vector<16x8xbf16>
    %24 = vector.shape_cast %23 : vector<16x8xbf16> to vector<1x16x8xbf16>
    %25 = vector.broadcast %24 : vector<1x16x8xbf16> to vector<8x16x8xbf16>
    "tpu.trace_start"() <{level = 10 : i32, message = "hwc,hcd->hwd"}> : () -> ()
    %cst_23 = arith.constant dense<0.000000e+00> : vector<8x8x8xf32>
    %26 = tpu.matmul %21, %25, %cst_23 {dimension_numbers = #tpu.dot_dimension_numbers<[2], [1], [1], [2], [0, 0, 0, 1, 1, 2], [0], [0]>} : vector<8x8x16xbf16>, vector<8x16x8xbf16>, vector<8x8x8xf32> -> vector<8x8x8xf32>
    "tpu.trace_stop"() : () -> ()
    %27 = arith.addf %18, %26 : vector<8x8x8xf32>
    %c0_24 = arith.constant 0 : index
    %c1_25 = arith.constant 1 : index
    %c0_26 = arith.constant 0 : index
    %c0_27 = arith.constant 0 : index
    %28 = vector.load %arg1[%c0_24, %c1_25, %c0_26, %c0_27] : memref<1x10x10x16xf32, #tpu.memory_space<vmem>>, vector<1x8x8x16xf32>
    %29 = vector.shape_cast %28 : vector<1x8x8x16xf32> to vector<8x8x16xf32>
    %30 = arith.truncf %29 : vector<8x8x16xf32> to vector<8x8x16xbf16>
    %c1_28 = arith.constant 1 : index
    %c0_29 = arith.constant 0 : index
    %c0_30 = arith.constant 0 : index
    %c0_31 = arith.constant 0 : index
    %31 = vector.load %arg2[%c1_28, %c0_29, %c0_30, %c0_31] : memref<3x3x16x8xbf16, #tpu.memory_space<vmem>>, vector<1x1x16x8xbf16>
    %32 = vector.shape_cast %31 : vector<1x1x16x8xbf16> to vector<16x8xbf16>
    %33 = vector.shape_cast %32 : vector<16x8xbf16> to vector<1x16x8xbf16>
    %34 = vector.broadcast %33 : vector<1x16x8xbf16> to vector<8x16x8xbf16>
    "tpu.trace_start"() <{level = 10 : i32, message = "hwc,hcd->hwd"}> : () -> ()
    %cst_32 = arith.constant dense<0.000000e+00> : vector<8x8x8xf32>
    %35 = tpu.matmul %30, %34, %cst_32 {dimension_numbers = #tpu.dot_dimension_numbers<[2], [1], [1], [2], [0, 0, 0, 1, 1, 2], [0], [0]>} : vector<8x8x16xbf16>, vector<8x16x8xbf16>, vector<8x8x8xf32> -> vector<8x8x8xf32>
    "tpu.trace_stop"() : () -> ()
    %36 = arith.addf %27, %35 : vector<8x8x8xf32>
    %c0_33 = arith.constant 0 : index
    %c1_34 = arith.constant 1 : index
    %c1_35 = arith.constant 1 : index
    %c0_36 = arith.constant 0 : index
    %37 = vector.load %arg1[%c0_33, %c1_34, %c1_35, %c0_36] : memref<1x10x10x16xf32, #tpu.memory_space<vmem>>, vector<1x8x8x16xf32>
    %38 = vector.shape_cast %37 : vector<1x8x8x16xf32> to vector<8x8x16xf32>
    %39 = arith.truncf %38 : vector<8x8x16xf32> to vector<8x8x16xbf16>
    %c1_37 = arith.constant 1 : index
    %c1_38 = arith.constant 1 : index
    %c0_39 = arith.constant 0 : index
    %c0_40 = arith.constant 0 : index
    %40 = vector.load %arg2[%c1_37, %c1_38, %c0_39, %c0_40] : memref<3x3x16x8xbf16, #tpu.memory_space<vmem>>, vector<1x1x16x8xbf16>
    %41 = vector.shape_cast %40 : vector<1x1x16x8xbf16> to vector<16x8xbf16>
    %42 = vector.shape_cast %41 : vector<16x8xbf16> to vector<1x16x8xbf16>
    %43 = vector.broadcast %42 : vector<1x16x8xbf16> to vector<8x16x8xbf16>
    "tpu.trace_start"() <{level = 10 : i32, message = "hwc,hcd->hwd"}> : () -> ()
    %cst_41 = arith.constant dense<0.000000e+00> : vector<8x8x8xf32>
    %44 = tpu.matmul %39, %43, %cst_41 {dimension_numbers = #tpu.dot_dimension_numbers<[2], [1], [1], [2], [0, 0, 0, 1, 1, 2], [0], [0]>} : vector<8x8x16xbf16>, vector<8x16x8xbf16>, vector<8x8x8xf32> -> vector<8x8x8xf32>
    "tpu.trace_stop"() : () -> ()
    %45 = arith.addf %36, %44 : vector<8x8x8xf32>
    %c0_42 = arith.constant 0 : index
    %c1_43 = arith.constant 1 : index
    %c2_44 = arith.constant 2 : index
    %c0_45 = arith.constant 0 : index
    %46 = vector.load %arg1[%c0_42, %c1_43, %c2_44, %c0_45] : memref<1x10x10x16xf32, #tpu.memory_space<vmem>>, vector<1x8x8x16xf32>
    %47 = vector.shape_cast %46 : vector<1x8x8x16xf32> to vector<8x8x16xf32>
    %48 = arith.truncf %47 : vector<8x8x16xf32> to vector<8x8x16xbf16>
    %c1_46 = arith.constant 1 : index
    %c2_47 = arith.constant 2 : index
    %c0_48 = arith.constant 0 : index
    %c0_49 = arith.constant 0 : index
    %49 = vector.load %arg2[%c1_46, %c2_47, %c0_48, %c0_49] : memref<3x3x16x8xbf16, #tpu.memory_space<vmem>>, vector<1x1x16x8xbf16>
    %50 = vector.shape_cast %49 : vector<1x1x16x8xbf16> to vector<16x8xbf16>
    %51 = vector.shape_cast %50 : vector<16x8xbf16> to vector<1x16x8xbf16>
    %52 = vector.broadcast %51 : vector<1x16x8xbf16> to vector<8x16x8xbf16>
    "tpu.trace_start"() <{level = 10 : i32, message = "hwc,hcd->hwd"}> : () -> ()
    %cst_50 = arith.constant dense<0.000000e+00> : vector<8x8x8xf32>
    %53 = tpu.matmul %48, %52, %cst_50 {dimension_numbers = #tpu.dot_dimension_numbers<[2], [1], [1], [2], [0, 0, 0, 1, 1, 2], [0], [0]>} : vector<8x8x16xbf16>, vector<8x16x8xbf16>, vector<8x8x8xf32> -> vector<8x8x8xf32>
    "tpu.trace_stop"() : () -> ()
    %54 = arith.addf %45, %53 : vector<8x8x8xf32>
    %c0_51 = arith.constant 0 : index
    %c2_52 = arith.constant 2 : index
    %c0_53 = arith.constant 0 : index
    %c0_54 = arith.constant 0 : index
    %55 = vector.load %arg1[%c0_51, %c2_52, %c0_53, %c0_54] : memref<1x10x10x16xf32, #tpu.memory_space<vmem>>, vector<1x8x8x16xf32>
    %56 = vector.shape_cast %55 : vector<1x8x8x16xf32> to vector<8x8x16xf32>
    %57 = arith.truncf %56 : vector<8x8x16xf32> to vector<8x8x16xbf16>
    %c2_55 = arith.constant 2 : index
    %c0_56 = arith.constant 0 : index
    %c0_57 = arith.constant 0 : index
    %c0_58 = arith.constant 0 : index
    %58 = vector.load %arg2[%c2_55, %c0_56, %c0_57, %c0_58] : memref<3x3x16x8xbf16, #tpu.memory_space<vmem>>, vector<1x1x16x8xbf16>
    %59 = vector.shape_cast %58 : vector<1x1x16x8xbf16> to vector<16x8xbf16>
    %60 = vector.shape_cast %59 : vector<16x8xbf16> to vector<1x16x8xbf16>
    %61 = vector.broadcast %60 : vector<1x16x8xbf16> to vector<8x16x8xbf16>
    "tpu.trace_start"() <{level = 10 : i32, message = "hwc,hcd->hwd"}> : () -> ()
    %cst_59 = arith.constant dense<0.000000e+00> : vector<8x8x8xf32>
    %62 = tpu.matmul %57, %61, %cst_59 {dimension_numbers = #tpu.dot_dimension_numbers<[2], [1], [1], [2], [0, 0, 0, 1, 1, 2], [0], [0]>} : vector<8x8x16xbf16>, vector<8x16x8xbf16>, vector<8x8x8xf32> -> vector<8x8x8xf32>
    "tpu.trace_stop"() : () -> ()
    %63 = arith.addf %54, %62 : vector<8x8x8xf32>
    %c0_60 = arith.constant 0 : index
    %c2_61 = arith.constant 2 : index
    %c1_62 = arith.constant 1 : index
    %c0_63 = arith.constant 0 : index
    %64 = vector.load %arg1[%c0_60, %c2_61, %c1_62, %c0_63] : memref<1x10x10x16xf32, #tpu.memory_space<vmem>>, vector<1x8x8x16xf32>
    %65 = vector.shape_cast %64 : vector<1x8x8x16xf32> to vector<8x8x16xf32>
    %66 = arith.truncf %65 : vector<8x8x16xf32> to vector<8x8x16xbf16>
    %c2_64 = arith.constant 2 : index
    %c1_65 = arith.constant 1 : index
    %c0_66 = arith.constant 0 : index
    %c0_67 = arith.constant 0 : index
    %67 = vector.load %arg2[%c2_64, %c1_65, %c0_66, %c0_67] : memref<3x3x16x8xbf16, #tpu.memory_space<vmem>>, vector<1x1x16x8xbf16>
    %68 = vector.shape_cast %67 : vector<1x1x16x8xbf16> to vector<16x8xbf16>
    %69 = vector.shape_cast %68 : vector<16x8xbf16> to vector<1x16x8xbf16>
    %70 = vector.broadcast %69 : vector<1x16x8xbf16> to vector<8x16x8xbf16>
    "tpu.trace_start"() <{level = 10 : i32, message = "hwc,hcd->hwd"}> : () -> ()
    %cst_68 = arith.constant dense<0.000000e+00> : vector<8x8x8xf32>
    %71 = tpu.matmul %66, %70, %cst_68 {dimension_numbers = #tpu.dot_dimension_numbers<[2], [1], [1], [2], [0, 0, 0, 1, 1, 2], [0], [0]>} : vector<8x8x16xbf16>, vector<8x16x8xbf16>, vector<8x8x8xf32> -> vector<8x8x8xf32>
    "tpu.trace_stop"() : () -> ()
    %72 = arith.addf %63, %71 : vector<8x8x8xf32>
    %c0_69 = arith.constant 0 : index
    %c2_70 = arith.constant 2 : index
    %c2_71 = arith.constant 2 : index
    %c0_72 = arith.constant 0 : index
    %73 = vector.load %arg1[%c0_69, %c2_70, %c2_71, %c0_72] : memref<1x10x10x16xf32, #tpu.memory_space<vmem>>, vector<1x8x8x16xf32>
    %74 = vector.shape_cast %73 : vector<1x8x8x16xf32> to vector<8x8x16xf32>
    %75 = arith.truncf %74 : vector<8x8x16xf32> to vector<8x8x16xbf16>
    %c2_73 = arith.constant 2 : index
    %c2_74 = arith.constant 2 : index
    %c0_75 = arith.constant 0 : index
    %c0_76 = arith.constant 0 : index
    %76 = vector.load %arg2[%c2_73, %c2_74, %c0_75, %c0_76] : memref<3x3x16x8xbf16, #tpu.memory_space<vmem>>, vector<1x1x16x8xbf16>
    %77 = vector.shape_cast %76 : vector<1x1x16x8xbf16> to vector<16x8xbf16>
    %78 = vector.shape_cast %77 : vector<16x8xbf16> to vector<1x16x8xbf16>
    %79 = vector.broadcast %78 : vector<1x16x8xbf16> to vector<8x16x8xbf16>
    "tpu.trace_start"() <{level = 10 : i32, message = "hwc,hcd->hwd"}> : () -> ()
    %cst_77 = arith.constant dense<0.000000e+00> : vector<8x8x8xf32>
    %80 = tpu.matmul %75, %79, %cst_77 {dimension_numbers = #tpu.dot_dimension_numbers<[2], [1], [1], [2], [0, 0, 0, 1, 1, 2], [0], [0]>} : vector<8x8x16xbf16>, vector<8x16x8xbf16>, vector<8x8x8xf32> -> vector<8x8x8xf32>
    "tpu.trace_stop"() : () -> ()
    %81 = arith.addf %72, %80 : vector<8x8x8xf32>
    %c0_78 = arith.constant 0 : index
    %c0_79 = arith.constant 0 : index
    %c0_80 = arith.constant 0 : index
    %82 = vector.load %arg3[%c0_78, %c0_79, %c0_80] : memref<1x1x8xf32, #tpu.memory_space<vmem>>, vector<1x1x8xf32>
    %83 = vector.broadcast %82 : vector<1x1x8xf32> to vector<8x8x8xf32>
    %84 = arith.mulf %81, %83 : vector<8x8x8xf32>
    %c0_81 = arith.constant 0 : index
    %c0_82 = arith.constant 0 : index
    %c0_83 = arith.constant 0 : index
    %85 = vector.load %arg4[%c0_81, %c0_82, %c0_83] : memref<1x1x8xf32, #tpu.memory_space<vmem>>, vector<1x1x8xf32>
    %86 = vector.broadcast %85 : vector<1x1x8xf32> to vector<8x8x8xf32>
    %87 = arith.addf %84, %86 : vector<8x8x8xf32>
    %88 = arith.negf %87 : vector<8x8x8xf32>
    %89 = math.exp %88 : vector<8x8x8xf32>
    %cst_84 = arith.constant 1.000000e+00 : f32
    %90 = vector.broadcast %cst_84 : f32 to vector<8x8x8xf32>
    %91 = arith.addf %90, %89 : vector<8x8x8xf32>
    %92 = arith.divf %90, %91 : vector<8x8x8xf32>
    %93 = arith.mulf %87, %92 : vector<8x8x8xf32>
    %cst_85 = arith.constant 0.000000e+00 : f32
    %94 = vector.broadcast %cst_85 : f32 to vector<10x10x8xf32>
    %c0_86 = arith.constant 0 : index
    %c0_87 = arith.constant 0 : index
    %c0_88 = arith.constant 0 : index
    %95 = vector.load %arg9[%c0_86, %c0_87, %c0_88] : memref<10x10x8xf32, #tpu.memory_space<vmem>>, vector<10x10x8xf32>
    tpu.vector_store %arg9[%c0_86, %c0_87, %c0_88], %94 {strides = array<i32>} : memref<10x10x8xf32, #tpu.memory_space<vmem>>, vector<10x10x8xf32>,
    %c1_89 = arith.constant 1 : index
    %c1_90 = arith.constant 1 : index
    %c0_91 = arith.constant 0 : index
    %96 = vector.load %arg9[%c1_89, %c1_90, %c0_91] : memref<10x10x8xf32, #tpu.memory_space<vmem>>, vector<8x8x8xf32>
    tpu.vector_store %arg9[%c1_89, %c1_90, %c0_91], %93 {strides = array<i32>} : memref<10x10x8xf32, #tpu.memory_space<vmem>>, vector<8x8x8xf32>,
    %cst_92 = arith.constant 0.000000e+00 : f32
    %97 = vector.broadcast %cst_92 : f32 to vector<8x8x16xf32>
    %c0_93 = arith.constant 0 : index
    %c0_94 = arith.constant 0 : index
    %c0_95 = arith.constant 0 : index
    %98 = vector.load %arg9[%c0_93, %c0_94, %c0_95] : memref<10x10x8xf32, #tpu.memory_space<vmem>>, vector<8x8x8xf32>
    %99 = arith.truncf %98 : vector<8x8x8xf32> to vector<8x8x8xbf16>
    %c0_96 = arith.constant 0 : index
    %c0_97 = arith.constant 0 : index
    %c0_98 = arith.constant 0 : index
    %c0_99 = arith.constant 0 : index
    %100 = vector.load %arg5[%c0_96, %c0_97, %c0_98, %c0_99] : memref<3x3x8x16xbf16, #tpu.memory_space<vmem>>, vector<1x1x8x16xbf16>
    %101 = vector.shape_cast %100 : vector<1x1x8x16xbf16> to vector<8x16xbf16>
    %102 = vector.shape_cast %101 : vector<8x16xbf16> to vector<1x8x16xbf16>
    %103 = vector.broadcast %102 : vector<1x8x16xbf16> to vector<8x8x16xbf16>
    "tpu.trace_start"() <{level = 10 : i32, message = "hwc,hcd->hwd"}> : () -> ()
    %cst_100 = arith.constant dense<0.000000e+00> : vector<8x8x16xf32>
    %104 = tpu.matmul %99, %103, %cst_100 {dimension_numbers = #tpu.dot_dimension_numbers<[2], [1], [1], [2], [0, 0, 0, 1, 1, 2], [0], [0]>} : vector<8x8x8xbf16>, vector<8x8x16xbf16>, vector<8x8x16xf32> -> vector<8x8x16xf32>
    "tpu.trace_stop"() : () -> ()
    %105 = arith.addf %97, %104 : vector<8x8x16xf32>
    %c0_101 = arith.constant 0 : index
    %c1_102 = arith.constant 1 : index
    %c0_103 = arith.constant 0 : index
    %106 = vector.load %arg9[%c0_101, %c1_102, %c0_103] : memref<10x10x8xf32, #tpu.memory_space<vmem>>, vector<8x8x8xf32>
    %107 = arith.truncf %106 : vector<8x8x8xf32> to vector<8x8x8xbf16>
    %c0_104 = arith.constant 0 : index
    %c1_105 = arith.constant 1 : index
    %c0_106 = arith.constant 0 : index
    %c0_107 = arith.constant 0 : index
    %108 = vector.load %arg5[%c0_104, %c1_105, %c0_106, %c0_107] : memref<3x3x8x16xbf16, #tpu.memory_space<vmem>>, vector<1x1x8x16xbf16>
    %109 = vector.shape_cast %108 : vector<1x1x8x16xbf16> to vector<8x16xbf16>
    %110 = vector.shape_cast %109 : vector<8x16xbf16> to vector<1x8x16xbf16>
    %111 = vector.broadcast %110 : vector<1x8x16xbf16> to vector<8x8x16xbf16>
    "tpu.trace_start"() <{level = 10 : i32, message = "hwc,hcd->hwd"}> : () -> ()
    %cst_108 = arith.constant dense<0.000000e+00> : vector<8x8x16xf32>
    %112 = tpu.matmul %107, %111, %cst_108 {dimension_numbers = #tpu.dot_dimension_numbers<[2], [1], [1], [2], [0, 0, 0, 1, 1, 2], [0], [0]>} : vector<8x8x8xbf16>, vector<8x8x16xbf16>, vector<8x8x16xf32> -> vector<8x8x16xf32>
    "tpu.trace_stop"() : () -> ()
    %113 = arith.addf %105, %112 : vector<8x8x16xf32>
    %c0_109 = arith.constant 0 : index
    %c2_110 = arith.constant 2 : index
    %c0_111 = arith.constant 0 : index
    %114 = vector.load %arg9[%c0_109, %c2_110, %c0_111] : memref<10x10x8xf32, #tpu.memory_space<vmem>>, vector<8x8x8xf32>
    %115 = arith.truncf %114 : vector<8x8x8xf32> to vector<8x8x8xbf16>
    %c0_112 = arith.constant 0 : index
    %c2_113 = arith.constant 2 : index
    %c0_114 = arith.constant 0 : index
    %c0_115 = arith.constant 0 : index
    %116 = vector.load %arg5[%c0_112, %c2_113, %c0_114, %c0_115] : memref<3x3x8x16xbf16, #tpu.memory_space<vmem>>, vector<1x1x8x16xbf16>
    %117 = vector.shape_cast %116 : vector<1x1x8x16xbf16> to vector<8x16xbf16>
    %118 = vector.shape_cast %117 : vector<8x16xbf16> to vector<1x8x16xbf16>
    %119 = vector.broadcast %118 : vector<1x8x16xbf16> to vector<8x8x16xbf16>
    "tpu.trace_start"() <{level = 10 : i32, message = "hwc,hcd->hwd"}> : () -> ()
    %cst_116 = arith.constant dense<0.000000e+00> : vector<8x8x16xf32>
    %120 = tpu.matmul %115, %119, %cst_116 {dimension_numbers = #tpu.dot_dimension_numbers<[2], [1], [1], [2], [0, 0, 0, 1, 1, 2], [0], [0]>} : vector<8x8x8xbf16>, vector<8x8x16xbf16>, vector<8x8x16xf32> -> vector<8x8x16xf32>
    "tpu.trace_stop"() : () -> ()
    %121 = arith.addf %113, %120 : vector<8x8x16xf32>
    %c1_117 = arith.constant 1 : index
    %c0_118 = arith.constant 0 : index
    %c0_119 = arith.constant 0 : index
    %122 = vector.load %arg9[%c1_117, %c0_118, %c0_119] : memref<10x10x8xf32, #tpu.memory_space<vmem>>, vector<8x8x8xf32>
    %123 = arith.truncf %122 : vector<8x8x8xf32> to vector<8x8x8xbf16>
    %c1_120 = arith.constant 1 : index
    %c0_121 = arith.constant 0 : index
    %c0_122 = arith.constant 0 : index
    %c0_123 = arith.constant 0 : index
    %124 = vector.load %arg5[%c1_120, %c0_121, %c0_122, %c0_123] : memref<3x3x8x16xbf16, #tpu.memory_space<vmem>>, vector<1x1x8x16xbf16>
    %125 = vector.shape_cast %124 : vector<1x1x8x16xbf16> to vector<8x16xbf16>
    %126 = vector.shape_cast %125 : vector<8x16xbf16> to vector<1x8x16xbf16>
    %127 = vector.broadcast %126 : vector<1x8x16xbf16> to vector<8x8x16xbf16>
    "tpu.trace_start"() <{level = 10 : i32, message = "hwc,hcd->hwd"}> : () -> ()
    %cst_124 = arith.constant dense<0.000000e+00> : vector<8x8x16xf32>
    %128 = tpu.matmul %123, %127, %cst_124 {dimension_numbers = #tpu.dot_dimension_numbers<[2], [1], [1], [2], [0, 0, 0, 1, 1, 2], [0], [0]>} : vector<8x8x8xbf16>, vector<8x8x16xbf16>, vector<8x8x16xf32> -> vector<8x8x16xf32>
    "tpu.trace_stop"() : () -> ()
    %129 = arith.addf %121, %128 : vector<8x8x16xf32>
    %c1_125 = arith.constant 1 : index
    %c1_126 = arith.constant 1 : index
    %c0_127 = arith.constant 0 : index
    %130 = vector.load %arg9[%c1_125, %c1_126, %c0_127] : memref<10x10x8xf32, #tpu.memory_space<vmem>>, vector<8x8x8xf32>
    %131 = arith.truncf %130 : vector<8x8x8xf32> to vector<8x8x8xbf16>
    %c1_128 = arith.constant 1 : index
    %c1_129 = arith.constant 1 : index
    %c0_130 = arith.constant 0 : index
    %c0_131 = arith.constant 0 : index
    %132 = vector.load %arg5[%c1_128, %c1_129, %c0_130, %c0_131] : memref<3x3x8x16xbf16, #tpu.memory_space<vmem>>, vector<1x1x8x16xbf16>
    %133 = vector.shape_cast %132 : vector<1x1x8x16xbf16> to vector<8x16xbf16>
    %134 = vector.shape_cast %133 : vector<8x16xbf16> to vector<1x8x16xbf16>
    %135 = vector.broadcast %134 : vector<1x8x16xbf16> to vector<8x8x16xbf16>
    "tpu.trace_start"() <{level = 10 : i32, message = "hwc,hcd->hwd"}> : () -> ()
    %cst_132 = arith.constant dense<0.000000e+00> : vector<8x8x16xf32>
    %136 = tpu.matmul %131, %135, %cst_132 {dimension_numbers = #tpu.dot_dimension_numbers<[2], [1], [1], [2], [0, 0, 0, 1, 1, 2], [0], [0]>} : vector<8x8x8xbf16>, vector<8x8x16xbf16>, vector<8x8x16xf32> -> vector<8x8x16xf32>
    "tpu.trace_stop"() : () -> ()
    %137 = arith.addf %129, %136 : vector<8x8x16xf32>
    %c1_133 = arith.constant 1 : index
    %c2_134 = arith.constant 2 : index
    %c0_135 = arith.constant 0 : index
    %138 = vector.load %arg9[%c1_133, %c2_134, %c0_135] : memref<10x10x8xf32, #tpu.memory_space<vmem>>, vector<8x8x8xf32>
    %139 = arith.truncf %138 : vector<8x8x8xf32> to vector<8x8x8xbf16>
    %c1_136 = arith.constant 1 : index
    %c2_137 = arith.constant 2 : index
    %c0_138 = arith.constant 0 : index
    %c0_139 = arith.constant 0 : index
    %140 = vector.load %arg5[%c1_136, %c2_137, %c0_138, %c0_139] : memref<3x3x8x16xbf16, #tpu.memory_space<vmem>>, vector<1x1x8x16xbf16>
    %141 = vector.shape_cast %140 : vector<1x1x8x16xbf16> to vector<8x16xbf16>
    %142 = vector.shape_cast %141 : vector<8x16xbf16> to vector<1x8x16xbf16>
    %143 = vector.broadcast %142 : vector<1x8x16xbf16> to vector<8x8x16xbf16>
    "tpu.trace_start"() <{level = 10 : i32, message = "hwc,hcd->hwd"}> : () -> ()
    %cst_140 = arith.constant dense<0.000000e+00> : vector<8x8x16xf32>
    %144 = tpu.matmul %139, %143, %cst_140 {dimension_numbers = #tpu.dot_dimension_numbers<[2], [1], [1], [2], [0, 0, 0, 1, 1, 2], [0], [0]>} : vector<8x8x8xbf16>, vector<8x8x16xbf16>, vector<8x8x16xf32> -> vector<8x8x16xf32>
    "tpu.trace_stop"() : () -> ()
    %145 = arith.addf %137, %144 : vector<8x8x16xf32>
    %c2_141 = arith.constant 2 : index
    %c0_142 = arith.constant 0 : index
    %c0_143 = arith.constant 0 : index
    %146 = vector.load %arg9[%c2_141, %c0_142, %c0_143] : memref<10x10x8xf32, #tpu.memory_space<vmem>>, vector<8x8x8xf32>
    %147 = arith.truncf %146 : vector<8x8x8xf32> to vector<8x8x8xbf16>
    %c2_144 = arith.constant 2 : index
    %c0_145 = arith.constant 0 : index
    %c0_146 = arith.constant 0 : index
    %c0_147 = arith.constant 0 : index
    %148 = vector.load %arg5[%c2_144, %c0_145, %c0_146, %c0_147] : memref<3x3x8x16xbf16, #tpu.memory_space<vmem>>, vector<1x1x8x16xbf16>
    %149 = vector.shape_cast %148 : vector<1x1x8x16xbf16> to vector<8x16xbf16>
    %150 = vector.shape_cast %149 : vector<8x16xbf16> to vector<1x8x16xbf16>
    %151 = vector.broadcast %150 : vector<1x8x16xbf16> to vector<8x8x16xbf16>
    "tpu.trace_start"() <{level = 10 : i32, message = "hwc,hcd->hwd"}> : () -> ()
    %cst_148 = arith.constant dense<0.000000e+00> : vector<8x8x16xf32>
    %152 = tpu.matmul %147, %151, %cst_148 {dimension_numbers = #tpu.dot_dimension_numbers<[2], [1], [1], [2], [0, 0, 0, 1, 1, 2], [0], [0]>} : vector<8x8x8xbf16>, vector<8x8x16xbf16>, vector<8x8x16xf32> -> vector<8x8x16xf32>
    "tpu.trace_stop"() : () -> ()
    %153 = arith.addf %145, %152 : vector<8x8x16xf32>
    %c2_149 = arith.constant 2 : index
    %c1_150 = arith.constant 1 : index
    %c0_151 = arith.constant 0 : index
    %154 = vector.load %arg9[%c2_149, %c1_150, %c0_151] : memref<10x10x8xf32, #tpu.memory_space<vmem>>, vector<8x8x8xf32>
    %155 = arith.truncf %154 : vector<8x8x8xf32> to vector<8x8x8xbf16>
    %c2_152 = arith.constant 2 : index
    %c1_153 = arith.constant 1 : index
    %c0_154 = arith.constant 0 : index
    %c0_155 = arith.constant 0 : index
    %156 = vector.load %arg5[%c2_152, %c1_153, %c0_154, %c0_155] : memref<3x3x8x16xbf16, #tpu.memory_space<vmem>>, vector<1x1x8x16xbf16>
    %157 = vector.shape_cast %156 : vector<1x1x8x16xbf16> to vector<8x16xbf16>
    %158 = vector.shape_cast %157 : vector<8x16xbf16> to vector<1x8x16xbf16>
    %159 = vector.broadcast %158 : vector<1x8x16xbf16> to vector<8x8x16xbf16>
    "tpu.trace_start"() <{level = 10 : i32, message = "hwc,hcd->hwd"}> : () -> ()
    %cst_156 = arith.constant dense<0.000000e+00> : vector<8x8x16xf32>
    %160 = tpu.matmul %155, %159, %cst_156 {dimension_numbers = #tpu.dot_dimension_numbers<[2], [1], [1], [2], [0, 0, 0, 1, 1, 2], [0], [0]>} : vector<8x8x8xbf16>, vector<8x8x16xbf16>, vector<8x8x16xf32> -> vector<8x8x16xf32>
    "tpu.trace_stop"() : () -> ()
    %161 = arith.addf %153, %160 : vector<8x8x16xf32>
    %c2_157 = arith.constant 2 : index
    %c2_158 = arith.constant 2 : index
    %c0_159 = arith.constant 0 : index
    %162 = vector.load %arg9[%c2_157, %c2_158, %c0_159] : memref<10x10x8xf32, #tpu.memory_space<vmem>>, vector<8x8x8xf32>
    %163 = arith.truncf %162 : vector<8x8x8xf32> to vector<8x8x8xbf16>
    %c2_160 = arith.constant 2 : index
    %c2_161 = arith.constant 2 : index
    %c0_162 = arith.constant 0 : index
    %c0_163 = arith.constant 0 : index
    %164 = vector.load %arg5[%c2_160, %c2_161, %c0_162, %c0_163] : memref<3x3x8x16xbf16, #tpu.memory_space<vmem>>, vector<1x1x8x16xbf16>
    %165 = vector.shape_cast %164 : vector<1x1x8x16xbf16> to vector<8x16xbf16>
    %166 = vector.shape_cast %165 : vector<8x16xbf16> to vector<1x8x16xbf16>
    %167 = vector.broadcast %166 : vector<1x8x16xbf16> to vector<8x8x16xbf16>
    "tpu.trace_start"() <{level = 10 : i32, message = "hwc,hcd->hwd"}> : () -> ()
    %cst_164 = arith.constant dense<0.000000e+00> : vector<8x8x16xf32>
    %168 = tpu.matmul %163, %167, %cst_164 {dimension_numbers = #tpu.dot_dimension_numbers<[2], [1], [1], [2], [0, 0, 0, 1, 1, 2], [0], [0]>} : vector<8x8x8xbf16>, vector<8x8x16xbf16>, vector<8x8x16xf32> -> vector<8x8x16xf32>
    "tpu.trace_stop"() : () -> ()
    %169 = arith.addf %161, %168 : vector<8x8x16xf32>
    %c0_165 = arith.constant 0 : index
    %c0_166 = arith.constant 0 : index
    %c0_167 = arith.constant 0 : index
    %170 = vector.load %arg6[%c0_165, %c0_166, %c0_167] : memref<1x1x16xf32, #tpu.memory_space<vmem>>, vector<1x1x16xf32>
    %171 = vector.broadcast %170 : vector<1x1x16xf32> to vector<8x8x16xf32>
    %172 = arith.mulf %169, %171 : vector<8x8x16xf32>
    %c0_168 = arith.constant 0 : index
    %c0_169 = arith.constant 0 : index
    %c0_170 = arith.constant 0 : index
    %173 = vector.load %arg7[%c0_168, %c0_169, %c0_170] : memref<1x1x16xf32, #tpu.memory_space<vmem>>, vector<1x1x16xf32>
    %174 = vector.broadcast %173 : vector<1x1x16xf32> to vector<8x8x16xf32>
    %175 = arith.addf %172, %174 : vector<8x8x16xf32>
    %176 = arith.negf %175 : vector<8x8x16xf32>
    %177 = math.exp %176 : vector<8x8x16xf32>
    %cst_171 = arith.constant 1.000000e+00 : f32
    %178 = vector.broadcast %cst_171 : f32 to vector<8x8x16xf32>
    %179 = arith.addf %178, %177 : vector<8x8x16xf32>
    %180 = arith.divf %178, %179 : vector<8x8x16xf32>
    %181 = arith.mulf %175, %180 : vector<8x8x16xf32>
    %c0_172 = arith.constant 0 : index
    %c0_173 = arith.constant 0 : index
    %c0_174 = arith.constant 0 : index
    %c0_175 = arith.constant 0 : index
    %182 = vector.load %arg8[%c0_172, %c0_173, %c0_174, %c0_175] : memref<1x8x8x16xf32, #tpu.memory_space<vmem>>, vector<1x8x8x16xf32>
    %183 = vector.shape_cast %182 : vector<1x8x8x16xf32> to vector<8x8x16xf32>
    %184 = vector.shape_cast %181 : vector<8x8x16xf32> to vector<1x8x8x16xf32>
    tpu.vector_store %arg8[%c0_172, %c0_173, %c0_174, %c0_175], %184 {strides = array<i32>} : memref<1x8x8x16xf32, #tpu.memory_space<vmem>>, vector<1x8x8x16xf32>,
    return
  }
  func.func @transform_0(%arg0: i32) -> (i32, i32, i32, i32) {
    %c0_i32 = arith.constant 0 : i32
    %c0_i32_0 = arith.constant 0 : i32
    %c0_i32_1 = arith.constant 0 : i32
    %c0_i32_2 = arith.constant 0 : i32
    return %arg0, %c0_i32, %c0_i32_0, %c0_i32_1 : i32, i32, i32, i32
  }
  func.func @transform_1(%arg0: i32) -> (i32, i32, i32, i32) {
    %c0_i32 = arith.constant 0 : i32
    %c0_i32_0 = arith.constant 0 : i32
    %c0_i32_1 = arith.constant 0 : i32
    %c0_i32_2 = arith.constant 0 : i32
    %c0_i32_3 = arith.constant 0 : i32
    return %c0_i32, %c0_i32_0, %c0_i32_1, %c0_i32_2 : i32, i32, i32, i32
  }
  func.func @transform_2(%arg0: i32) -> (i32, i32, i32) {
    %c0_i32 = arith.constant 0 : i32
    %c0_i32_0 = arith.constant 0 : i32
    %c0_i32_1 = arith.constant 0 : i32
    %c0_i32_2 = arith.constant 0 : i32
    return %c0_i32, %c0_i32_0, %c0_i32_1 : i32, i32, i32
  }
  func.func @transform_3(%arg0: i32) -> (i32, i32, i32) {
    %c0_i32 = arith.constant 0 : i32
    %c0_i32_0 = arith.constant 0 : i32
    %c0_i32_1 = arith.constant 0 : i32
    %c0_i32_2 = arith.constant 0 : i32
    return %c0_i32, %c0_i32_0, %c0_i32_1 : i32, i32, i32
  }
  func.func @transform_4(%arg0: i32) -> (i32, i32, i32, i32) {
    %c0_i32 = arith.constant 0 : i32
    %c0_i32_0 = arith.constant 0 : i32
    %c0_i32_1 = arith.constant 0 : i32
    %c0_i32_2 = arith.constant 0 : i32
    %c0_i32_3 = arith.constant 0 : i32
    return %c0_i32, %c0_i32_0, %c0_i32_1, %c0_i32_2 : i32, i32, i32, i32
  }
  func.func @transform_5(%arg0: i32) -> (i32, i32, i32) {
    %c0_i32 = arith.constant 0 : i32
    %c0_i32_0 = arith.constant 0 : i32
    %c0_i32_1 = arith.constant 0 : i32
    %c0_i32_2 = arith.constant 0 : i32
    return %c0_i32, %c0_i32_0, %c0_i32_1 : i32, i32, i32
  }
  func.func @transform_6(%arg0: i32) -> (i32, i32, i32) {
    %c0_i32 = arith.constant 0 : i32
    %c0_i32_0 = arith.constant 0 : i32
    %c0_i32_1 = arith.constant 0 : i32
    %c0_i32_2 = arith.constant 0 : i32
    return %c0_i32, %c0_i32_0, %c0_i32_1 : i32, i32, i32
  }
  func.func @transform_7(%arg0: i32) -> (i32, i32, i32, i32) {
    %c0_i32 = arith.constant 0 : i32
    %c0_i32_0 = arith.constant 0 : i32
    %c0_i32_1 = arith.constant 0 : i32
    %c0_i32_2 = arith.constant 0 : i32
    return %arg0, %c0_i32, %c0_i32_0, %c0_i32_1 : i32, i32, i32, i32
  }
}

module attributes {stable_mosaic.version = 11 : i64} {
  func.func @_axis_retention_kernel(%arg0: i32, %arg1: memref<1x32x8x4xf32, #tpu.memory_space<vmem>>, %arg2: memref<1x32x8x4xf32, #tpu.memory_space<vmem>>, %arg3: memref<1x32x8x4xf32, #tpu.memory_space<vmem>>, %arg4: memref<32x8x8xf32, #tpu.memory_space<vmem>>, %arg5: memref<1x32x8x4xf32, #tpu.memory_space<vmem>>) attributes {dimension_semantics = [#tpu.dimension_semantics<parallel>], iteration_bounds = array<i64: 2>, scalar_prefetch = 0 : i64, scratch_operands = 0 : i64, tpu.core_type = #tpu.core_type<tc>, window_params = [{transform_indices = @transform_0, window_bounds = array<i64: 1, 32, 8, 4>}, {transform_indices = @transform_1, window_bounds = array<i64: 1, 32, 8, 4>}, {transform_indices = @transform_2, window_bounds = array<i64: 1, 32, 8, 4>}, {pipeline_mode = #tpu.pipeline_mode<synchronous>, transform_indices = @transform_3, window_bounds = array<i64: 32, 8, 8>}, {transform_indices = @transform_4, window_bounds = array<i64: 1, 32, 8, 4>}]} {
    %c0 = arith.constant 0 : index
    %c0_0 = arith.constant 0 : index
    %c0_1 = arith.constant 0 : index
    %c0_2 = arith.constant 0 : index
    %0 = vector.load %arg1[%c0, %c0_0, %c0_1, %c0_2] : memref<1x32x8x4xf32, #tpu.memory_space<vmem>>, vector<1x32x8x4xf32>
    %1 = vector.shape_cast %0 : vector<1x32x8x4xf32> to vector<32x8x4xf32>
    %2 = arith.truncf %1 : vector<32x8x4xf32> to vector<32x8x4xbf16>
    %c0_3 = arith.constant 0 : index
    %c0_4 = arith.constant 0 : index
    %c0_5 = arith.constant 0 : index
    %c0_6 = arith.constant 0 : index
    %3 = vector.load %arg2[%c0_3, %c0_4, %c0_5, %c0_6] : memref<1x32x8x4xf32, #tpu.memory_space<vmem>>, vector<1x32x8x4xf32>
    %4 = vector.shape_cast %3 : vector<1x32x8x4xf32> to vector<32x8x4xf32>
    %5 = arith.truncf %4 : vector<32x8x4xf32> to vector<32x8x4xbf16>
    "tpu.trace_start"() <{level = 10 : i32, message = "rik,rjk->rij"}> : () -> ()
    %cst = arith.constant dense<0.000000e+00> : vector<32x8x8xf32>
    %6 = tpu.matmul %2, %5, %cst {dimension_numbers = #tpu.dot_dimension_numbers<[2], [2], [1], [1], [0, 0, 0, 1, 1, 1], [0], [0]>} : vector<32x8x4xbf16>, vector<32x8x4xbf16>, vector<32x8x8xf32> -> vector<32x8x8xf32>
    "tpu.trace_stop"() : () -> ()
    %c0_7 = arith.constant 0 : index
    %c0_8 = arith.constant 0 : index
    %c0_9 = arith.constant 0 : index
    %7 = vector.load %arg4[%c0_7, %c0_8, %c0_9] : memref<32x8x8xf32, #tpu.memory_space<vmem>>, vector<32x8x8xf32>
    %8 = arith.addf %6, %7 : vector<32x8x8xf32>
    %cst_10 = arith.constant dense<0xFF800000> : vector<32x8xf32>
    %9 = vector.multi_reduction <maximumf>, %8, %cst_10 [2] : vector<32x8x8xf32> to vector<32x8xf32>
    %10 = vector.shape_cast %9 : vector<32x8xf32> to vector<32x8x1xf32>
    %11 = vector.broadcast %10 : vector<32x8x1xf32> to vector<32x8x8xf32>
    %12 = arith.subf %8, %11 : vector<32x8x8xf32>
    %13 = math.exp %12 : vector<32x8x8xf32>
    %cst_11 = arith.constant dense<0.000000e+00> : vector<32x8xf32>
    %14 = vector.multi_reduction <add>, %13, %cst_11 [2] : vector<32x8x8xf32> to vector<32x8xf32>
    %15 = vector.shape_cast %14 : vector<32x8xf32> to vector<32x8x1xf32>
    %16 = tpu.reciprocal %15 {approx = true} : vector<32x8x1xf32> -> vector<32x8x1xf32>
    %17 = vector.broadcast %16 : vector<32x8x1xf32> to vector<32x8x8xf32>
    %18 = arith.mulf %13, %17 : vector<32x8x8xf32>
    %19 = arith.truncf %18 : vector<32x8x8xf32> to vector<32x8x8xbf16>
    %c0_12 = arith.constant 0 : index
    %c0_13 = arith.constant 0 : index
    %c0_14 = arith.constant 0 : index
    %c0_15 = arith.constant 0 : index
    %20 = vector.load %arg3[%c0_12, %c0_13, %c0_14, %c0_15] : memref<1x32x8x4xf32, #tpu.memory_space<vmem>>, vector<1x32x8x4xf32>
    %21 = vector.shape_cast %20 : vector<1x32x8x4xf32> to vector<32x8x4xf32>
    %22 = arith.truncf %21 : vector<32x8x4xf32> to vector<32x8x4xbf16>
    "tpu.trace_start"() <{level = 10 : i32, message = "rij,rjd->rid"}> : () -> ()
    %cst_16 = arith.constant dense<0.000000e+00> : vector<32x8x4xf32>
    %23 = tpu.matmul %19, %22, %cst_16 {dimension_numbers = #tpu.dot_dimension_numbers<[2], [1], [1], [2], [0, 0, 0, 1, 1, 2], [0], [0]>} : vector<32x8x8xbf16>, vector<32x8x4xbf16>, vector<32x8x4xf32> -> vector<32x8x4xf32>
    "tpu.trace_stop"() : () -> ()
    %c0_17 = arith.constant 0 : index
    %c0_18 = arith.constant 0 : index
    %c0_19 = arith.constant 0 : index
    %c0_20 = arith.constant 0 : index
    %24 = vector.load %arg5[%c0_17, %c0_18, %c0_19, %c0_20] : memref<1x32x8x4xf32, #tpu.memory_space<vmem>>, vector<1x32x8x4xf32>
    %25 = vector.shape_cast %24 : vector<1x32x8x4xf32> to vector<32x8x4xf32>
    %26 = vector.shape_cast %23 : vector<32x8x4xf32> to vector<1x32x8x4xf32>
    tpu.vector_store %arg5[%c0_17, %c0_18, %c0_19, %c0_20], %26 {strides = array<i32>} : memref<1x32x8x4xf32, #tpu.memory_space<vmem>>, vector<1x32x8x4xf32>,
    return
  }
  func.func @transform_0(%arg0: i32) -> (i32, i32, i32, i32) {
    %c0_i32 = arith.constant 0 : i32
    %c0_i32_0 = arith.constant 0 : i32
    %c0_i32_1 = arith.constant 0 : i32
    %c0_i32_2 = arith.constant 0 : i32
    return %arg0, %c0_i32, %c0_i32_0, %c0_i32_1 : i32, i32, i32, i32
  }
  func.func @transform_1(%arg0: i32) -> (i32, i32, i32, i32) {
    %c0_i32 = arith.constant 0 : i32
    %c0_i32_0 = arith.constant 0 : i32
    %c0_i32_1 = arith.constant 0 : i32
    %c0_i32_2 = arith.constant 0 : i32
    return %arg0, %c0_i32, %c0_i32_0, %c0_i32_1 : i32, i32, i32, i32
  }
  func.func @transform_2(%arg0: i32) -> (i32, i32, i32, i32) {
    %c0_i32 = arith.constant 0 : i32
    %c0_i32_0 = arith.constant 0 : i32
    %c0_i32_1 = arith.constant 0 : i32
    %c0_i32_2 = arith.constant 0 : i32
    return %arg0, %c0_i32, %c0_i32_0, %c0_i32_1 : i32, i32, i32, i32
  }
  func.func @transform_3(%arg0: i32) -> (i32, i32, i32) {
    %c0_i32 = arith.constant 0 : i32
    %c0_i32_0 = arith.constant 0 : i32
    %c0_i32_1 = arith.constant 0 : i32
    %c0_i32_2 = arith.constant 0 : i32
    return %c0_i32, %c0_i32_0, %c0_i32_1 : i32, i32, i32
  }
  func.func @transform_4(%arg0: i32) -> (i32, i32, i32, i32) {
    %c0_i32 = arith.constant 0 : i32
    %c0_i32_0 = arith.constant 0 : i32
    %c0_i32_1 = arith.constant 0 : i32
    %c0_i32_2 = arith.constant 0 : i32
    return %arg0, %c0_i32, %c0_i32_0, %c0_i32_1 : i32, i32, i32, i32
  }
}

module attributes {stable_mosaic.version = 11 : i64} {
  func.func @_height_lepe_proj_kernel(%arg0: i32, %arg1: memref<1x32x8x4xf32, #tpu.memory_space<vmem>>, %arg2: memref<1x32x8x4xf32, #tpu.memory_space<vmem>>, %arg3: memref<1x32x8x4xf32, #tpu.memory_space<vmem>>, %arg4: memref<32x8x8xf32, #tpu.memory_space<vmem>>, %arg5: memref<1x8x8x16xf32, #tpu.memory_space<vmem>>, %arg6: memref<5x5x1x1x16xf32, #tpu.memory_space<vmem>>, %arg7: memref<1x1x16xf32, #tpu.memory_space<vmem>>, %arg8: memref<16x16xbf16, #tpu.memory_space<vmem>>, %arg9: memref<1x1x16xf32, #tpu.memory_space<vmem>>, %arg10: memref<1x8x8x16xf32, #tpu.memory_space<vmem>>, %arg11: memref<1x8x8x16xf32, #tpu.memory_space<vmem>>, %arg12: memref<12x12x16xf32, #tpu.memory_space<vmem>>) attributes {dimension_semantics = [#tpu.dimension_semantics<parallel>], iteration_bounds = array<i64: 2>, scalar_prefetch = 0 : i64, scratch_operands = 1 : i64, tpu.core_type = #tpu.core_type<tc>, window_params = [{transform_indices = @transform_0, window_bounds = array<i64: 1, 32, 8, 4>}, {transform_indices = @transform_1, window_bounds = array<i64: 1, 32, 8, 4>}, {transform_indices = @transform_2, window_bounds = array<i64: 1, 32, 8, 4>}, {pipeline_mode = #tpu.pipeline_mode<synchronous>, transform_indices = @transform_3, window_bounds = array<i64: 32, 8, 8>}, {transform_indices = @transform_4, window_bounds = array<i64: 1, 8, 8, 16>}, {pipeline_mode = #tpu.pipeline_mode<synchronous>, transform_indices = @transform_5, window_bounds = array<i64: 5, 5, 1, 1, 16>}, {pipeline_mode = #tpu.pipeline_mode<synchronous>, transform_indices = @transform_6, window_bounds = array<i64: 1, 1, 16>}, {pipeline_mode = #tpu.pipeline_mode<synchronous>, transform_indices = @transform_7, window_bounds = array<i64: 16, 16>}, {pipeline_mode = #tpu.pipeline_mode<synchronous>, transform_indices = @transform_8, window_bounds = array<i64: 1, 1, 16>}, {transform_indices = @transform_9, window_bounds = array<i64: 1, 8, 8, 16>}, {transform_indices = @transform_10, window_bounds = array<i64: 1, 8, 8, 16>}]} {
    %c0 = arith.constant 0 : index
    %c0_0 = arith.constant 0 : index
    %c0_1 = arith.constant 0 : index
    %c0_2 = arith.constant 0 : index
    %0 = vector.load %arg1[%c0, %c0_0, %c0_1, %c0_2] : memref<1x32x8x4xf32, #tpu.memory_space<vmem>>, vector<1x32x8x4xf32>
    %1 = vector.shape_cast %0 : vector<1x32x8x4xf32> to vector<32x8x4xf32>
    %2 = arith.truncf %1 : vector<32x8x4xf32> to vector<32x8x4xbf16>
    %c0_3 = arith.constant 0 : index
    %c0_4 = arith.constant 0 : index
    %c0_5 = arith.constant 0 : index
    %c0_6 = arith.constant 0 : index
    %3 = vector.load %arg2[%c0_3, %c0_4, %c0_5, %c0_6] : memref<1x32x8x4xf32, #tpu.memory_space<vmem>>, vector<1x32x8x4xf32>
    %4 = vector.shape_cast %3 : vector<1x32x8x4xf32> to vector<32x8x4xf32>
    %5 = arith.truncf %4 : vector<32x8x4xf32> to vector<32x8x4xbf16>
    "tpu.trace_start"() <{level = 10 : i32, message = "rik,rjk->rij"}> : () -> ()
    %cst = arith.constant dense<0.000000e+00> : vector<32x8x8xf32>
    %6 = tpu.matmul %2, %5, %cst {dimension_numbers = #tpu.dot_dimension_numbers<[2], [2], [1], [1], [0, 0, 0, 1, 1, 1], [0], [0]>} : vector<32x8x4xbf16>, vector<32x8x4xbf16>, vector<32x8x8xf32> -> vector<32x8x8xf32>
    "tpu.trace_stop"() : () -> ()
    %c0_7 = arith.constant 0 : index
    %c0_8 = arith.constant 0 : index
    %c0_9 = arith.constant 0 : index
    %7 = vector.load %arg4[%c0_7, %c0_8, %c0_9] : memref<32x8x8xf32, #tpu.memory_space<vmem>>, vector<32x8x8xf32>
    %8 = arith.addf %6, %7 : vector<32x8x8xf32>
    %cst_10 = arith.constant dense<0xFF800000> : vector<32x8xf32>
    %9 = vector.multi_reduction <maximumf>, %8, %cst_10 [2] : vector<32x8x8xf32> to vector<32x8xf32>
    %10 = vector.shape_cast %9 : vector<32x8xf32> to vector<32x8x1xf32>
    %11 = vector.broadcast %10 : vector<32x8x1xf32> to vector<32x8x8xf32>
    %12 = arith.subf %8, %11 : vector<32x8x8xf32>
    %13 = math.exp %12 : vector<32x8x8xf32>
    %cst_11 = arith.constant dense<0.000000e+00> : vector<32x8xf32>
    %14 = vector.multi_reduction <add>, %13, %cst_11 [2] : vector<32x8x8xf32> to vector<32x8xf32>
    %15 = vector.shape_cast %14 : vector<32x8xf32> to vector<32x8x1xf32>
    %16 = tpu.reciprocal %15 {approx = true} : vector<32x8x1xf32> -> vector<32x8x1xf32>
    %17 = vector.broadcast %16 : vector<32x8x1xf32> to vector<32x8x8xf32>
    %18 = arith.mulf %13, %17 : vector<32x8x8xf32>
    %19 = arith.truncf %18 : vector<32x8x8xf32> to vector<32x8x8xbf16>
    %c0_12 = arith.constant 0 : index
    %c0_13 = arith.constant 0 : index
    %c0_14 = arith.constant 0 : index
    %c0_15 = arith.constant 0 : index
    %20 = vector.load %arg3[%c0_12, %c0_13, %c0_14, %c0_15] : memref<1x32x8x4xf32, #tpu.memory_space<vmem>>, vector<1x32x8x4xf32>
    %21 = vector.shape_cast %20 : vector<1x32x8x4xf32> to vector<32x8x4xf32>
    %22 = arith.truncf %21 : vector<32x8x4xf32> to vector<32x8x4xbf16>
    "tpu.trace_start"() <{level = 10 : i32, message = "rij,rjd->rid"}> : () -> ()
    %cst_16 = arith.constant dense<0.000000e+00> : vector<32x8x4xf32>
    %23 = tpu.matmul %19, %22, %cst_16 {dimension_numbers = #tpu.dot_dimension_numbers<[2], [1], [1], [2], [0, 0, 0, 1, 1, 2], [0], [0]>} : vector<32x8x8xbf16>, vector<32x8x4xbf16>, vector<32x8x4xf32> -> vector<32x8x4xf32>
    %cst_17 = arith.constant 0.000000e+00 : f32
    "tpu.trace_stop"() : () -> ()
    %24 = vector.broadcast %cst_17 : f32 to vector<12x12x16xf32>
    %c0_18 = arith.constant 0 : index
    %c0_19 = arith.constant 0 : index
    %c0_20 = arith.constant 0 : index
    %25 = vector.load %arg12[%c0_18, %c0_19, %c0_20] : memref<12x12x16xf32, #tpu.memory_space<vmem>>, vector<12x12x16xf32>
    tpu.vector_store %arg12[%c0_18, %c0_19, %c0_20], %24 {strides = array<i32>} : memref<12x12x16xf32, #tpu.memory_space<vmem>>, vector<12x12x16xf32>,
    %c0_21 = arith.constant 0 : index
    %c0_22 = arith.constant 0 : index
    %c0_23 = arith.constant 0 : index
    %c0_24 = arith.constant 0 : index
    %26 = vector.load %arg5[%c0_21, %c0_22, %c0_23, %c0_24] : memref<1x8x8x16xf32, #tpu.memory_space<vmem>>, vector<1x8x8x16xf32>
    %27 = vector.shape_cast %26 : vector<1x8x8x16xf32> to vector<8x8x16xf32>
    %c2 = arith.constant 2 : index
    %c2_25 = arith.constant 2 : index
    %c0_26 = arith.constant 0 : index
    %28 = vector.load %arg12[%c2, %c2_25, %c0_26] : memref<12x12x16xf32, #tpu.memory_space<vmem>>, vector<8x8x16xf32>
    tpu.vector_store %arg12[%c2, %c2_25, %c0_26], %27 {strides = array<i32>} : memref<12x12x16xf32, #tpu.memory_space<vmem>>, vector<8x8x16xf32>,
    %cst_27 = arith.constant 0.000000e+00 : f32
    %29 = vector.broadcast %cst_27 : f32 to vector<8x8x16xf32>
    %c0_28 = arith.constant 0 : index
    %c0_29 = arith.constant 0 : index
    %c0_30 = arith.constant 0 : index
    %30 = vector.load %arg12[%c0_28, %c0_29, %c0_30] : memref<12x12x16xf32, #tpu.memory_space<vmem>>, vector<8x8x16xf32>
    %c0_31 = arith.constant 0 : index
    %c0_32 = arith.constant 0 : index
    %c0_33 = arith.constant 0 : index
    %c0_34 = arith.constant 0 : index
    %c0_35 = arith.constant 0 : index
    %31 = vector.load %arg6[%c0_31, %c0_32, %c0_33, %c0_34, %c0_35] : memref<5x5x1x1x16xf32, #tpu.memory_space<vmem>>, vector<1x1x1x1x16xf32>
    %32 = vector.shape_cast %31 : vector<1x1x1x1x16xf32> to vector<1x1x16xf32>
    %33 = vector.broadcast %32 : vector<1x1x16xf32> to vector<8x8x16xf32>
    %34 = arith.mulf %30, %33 : vector<8x8x16xf32>
    %35 = arith.addf %29, %34 : vector<8x8x16xf32>
    %c0_36 = arith.constant 0 : index
    %c1 = arith.constant 1 : index
    %c0_37 = arith.constant 0 : index
    %36 = vector.load %arg12[%c0_36, %c1, %c0_37] : memref<12x12x16xf32, #tpu.memory_space<vmem>>, vector<8x8x16xf32>
    %c1_38 = arith.constant 1 : index
    %c0_39 = arith.constant 0 : index
    %c0_40 = arith.constant 0 : index
    %c0_41 = arith.constant 0 : index
    %c0_42 = arith.constant 0 : index
    %37 = vector.load %arg6[%c1_38, %c0_39, %c0_40, %c0_41, %c0_42] : memref<5x5x1x1x16xf32, #tpu.memory_space<vmem>>, vector<1x1x1x1x16xf32>
    %38 = vector.shape_cast %37 : vector<1x1x1x1x16xf32> to vector<1x1x16xf32>
    %39 = vector.broadcast %38 : vector<1x1x16xf32> to vector<8x8x16xf32>
    %40 = arith.mulf %36, %39 : vector<8x8x16xf32>
    %41 = arith.addf %35, %40 : vector<8x8x16xf32>
    %c0_43 = arith.constant 0 : index
    %c2_44 = arith.constant 2 : index
    %c0_45 = arith.constant 0 : index
    %42 = vector.load %arg12[%c0_43, %c2_44, %c0_45] : memref<12x12x16xf32, #tpu.memory_space<vmem>>, vector<8x8x16xf32>
    %c2_46 = arith.constant 2 : index
    %c0_47 = arith.constant 0 : index
    %c0_48 = arith.constant 0 : index
    %c0_49 = arith.constant 0 : index
    %c0_50 = arith.constant 0 : index
    %43 = vector.load %arg6[%c2_46, %c0_47, %c0_48, %c0_49, %c0_50] : memref<5x5x1x1x16xf32, #tpu.memory_space<vmem>>, vector<1x1x1x1x16xf32>
    %44 = vector.shape_cast %43 : vector<1x1x1x1x16xf32> to vector<1x1x16xf32>
    %45 = vector.broadcast %44 : vector<1x1x16xf32> to vector<8x8x16xf32>
    %46 = arith.mulf %42, %45 : vector<8x8x16xf32>
    %47 = arith.addf %41, %46 : vector<8x8x16xf32>
    %c0_51 = arith.constant 0 : index
    %c3 = arith.constant 3 : index
    %c0_52 = arith.constant 0 : index
    %48 = vector.load %arg12[%c0_51, %c3, %c0_52] : memref<12x12x16xf32, #tpu.memory_space<vmem>>, vector<8x8x16xf32>
    %c3_53 = arith.constant 3 : index
    %c0_54 = arith.constant 0 : index
    %c0_55 = arith.constant 0 : index
    %c0_56 = arith.constant 0 : index
    %c0_57 = arith.constant 0 : index
    %49 = vector.load %arg6[%c3_53, %c0_54, %c0_55, %c0_56, %c0_57] : memref<5x5x1x1x16xf32, #tpu.memory_space<vmem>>, vector<1x1x1x1x16xf32>
    %50 = vector.shape_cast %49 : vector<1x1x1x1x16xf32> to vector<1x1x16xf32>
    %51 = vector.broadcast %50 : vector<1x1x16xf32> to vector<8x8x16xf32>
    %52 = arith.mulf %48, %51 : vector<8x8x16xf32>
    %53 = arith.addf %47, %52 : vector<8x8x16xf32>
    %c0_58 = arith.constant 0 : index
    %c4 = arith.constant 4 : index
    %c0_59 = arith.constant 0 : index
    %54 = vector.load %arg12[%c0_58, %c4, %c0_59] : memref<12x12x16xf32, #tpu.memory_space<vmem>>, vector<8x8x16xf32>
    %c4_60 = arith.constant 4 : index
    %c0_61 = arith.constant 0 : index
    %c0_62 = arith.constant 0 : index
    %c0_63 = arith.constant 0 : index
    %c0_64 = arith.constant 0 : index
    %55 = vector.load %arg6[%c4_60, %c0_61, %c0_62, %c0_63, %c0_64] : memref<5x5x1x1x16xf32, #tpu.memory_space<vmem>>, vector<1x1x1x1x16xf32>
    %56 = vector.shape_cast %55 : vector<1x1x1x1x16xf32> to vector<1x1x16xf32>
    %57 = vector.broadcast %56 : vector<1x1x16xf32> to vector<8x8x16xf32>
    %58 = arith.mulf %54, %57 : vector<8x8x16xf32>
    %59 = arith.addf %53, %58 : vector<8x8x16xf32>
    %c1_65 = arith.constant 1 : index
    %c0_66 = arith.constant 0 : index
    %c0_67 = arith.constant 0 : index
    %60 = vector.load %arg12[%c1_65, %c0_66, %c0_67] : memref<12x12x16xf32, #tpu.memory_space<vmem>>, vector<8x8x16xf32>
    %c0_68 = arith.constant 0 : index
    %c1_69 = arith.constant 1 : index
    %c0_70 = arith.constant 0 : index
    %c0_71 = arith.constant 0 : index
    %c0_72 = arith.constant 0 : index
    %61 = vector.load %arg6[%c0_68, %c1_69, %c0_70, %c0_71, %c0_72] : memref<5x5x1x1x16xf32, #tpu.memory_space<vmem>>, vector<1x1x1x1x16xf32>
    %62 = vector.shape_cast %61 : vector<1x1x1x1x16xf32> to vector<1x1x16xf32>
    %63 = vector.broadcast %62 : vector<1x1x16xf32> to vector<8x8x16xf32>
    %64 = arith.mulf %60, %63 : vector<8x8x16xf32>
    %65 = arith.addf %59, %64 : vector<8x8x16xf32>
    %c1_73 = arith.constant 1 : index
    %c1_74 = arith.constant 1 : index
    %c0_75 = arith.constant 0 : index
    %66 = vector.load %arg12[%c1_73, %c1_74, %c0_75] : memref<12x12x16xf32, #tpu.memory_space<vmem>>, vector<8x8x16xf32>
    %c1_76 = arith.constant 1 : index
    %c1_77 = arith.constant 1 : index
    %c0_78 = arith.constant 0 : index
    %c0_79 = arith.constant 0 : index
    %c0_80 = arith.constant 0 : index
    %67 = vector.load %arg6[%c1_76, %c1_77, %c0_78, %c0_79, %c0_80] : memref<5x5x1x1x16xf32, #tpu.memory_space<vmem>>, vector<1x1x1x1x16xf32>
    %68 = vector.shape_cast %67 : vector<1x1x1x1x16xf32> to vector<1x1x16xf32>
    %69 = vector.broadcast %68 : vector<1x1x16xf32> to vector<8x8x16xf32>
    %70 = arith.mulf %66, %69 : vector<8x8x16xf32>
    %71 = arith.addf %65, %70 : vector<8x8x16xf32>
    %c1_81 = arith.constant 1 : index
    %c2_82 = arith.constant 2 : index
    %c0_83 = arith.constant 0 : index
    %72 = vector.load %arg12[%c1_81, %c2_82, %c0_83] : memref<12x12x16xf32, #tpu.memory_space<vmem>>, vector<8x8x16xf32>
    %c2_84 = arith.constant 2 : index
    %c1_85 = arith.constant 1 : index
    %c0_86 = arith.constant 0 : index
    %c0_87 = arith.constant 0 : index
    %c0_88 = arith.constant 0 : index
    %73 = vector.load %arg6[%c2_84, %c1_85, %c0_86, %c0_87, %c0_88] : memref<5x5x1x1x16xf32, #tpu.memory_space<vmem>>, vector<1x1x1x1x16xf32>
    %74 = vector.shape_cast %73 : vector<1x1x1x1x16xf32> to vector<1x1x16xf32>
    %75 = vector.broadcast %74 : vector<1x1x16xf32> to vector<8x8x16xf32>
    %76 = arith.mulf %72, %75 : vector<8x8x16xf32>
    %77 = arith.addf %71, %76 : vector<8x8x16xf32>
    %c1_89 = arith.constant 1 : index
    %c3_90 = arith.constant 3 : index
    %c0_91 = arith.constant 0 : index
    %78 = vector.load %arg12[%c1_89, %c3_90, %c0_91] : memref<12x12x16xf32, #tpu.memory_space<vmem>>, vector<8x8x16xf32>
    %c3_92 = arith.constant 3 : index
    %c1_93 = arith.constant 1 : index
    %c0_94 = arith.constant 0 : index
    %c0_95 = arith.constant 0 : index
    %c0_96 = arith.constant 0 : index
    %79 = vector.load %arg6[%c3_92, %c1_93, %c0_94, %c0_95, %c0_96] : memref<5x5x1x1x16xf32, #tpu.memory_space<vmem>>, vector<1x1x1x1x16xf32>
    %80 = vector.shape_cast %79 : vector<1x1x1x1x16xf32> to vector<1x1x16xf32>
    %81 = vector.broadcast %80 : vector<1x1x16xf32> to vector<8x8x16xf32>
    %82 = arith.mulf %78, %81 : vector<8x8x16xf32>
    %83 = arith.addf %77, %82 : vector<8x8x16xf32>
    %c1_97 = arith.constant 1 : index
    %c4_98 = arith.constant 4 : index
    %c0_99 = arith.constant 0 : index
    %84 = vector.load %arg12[%c1_97, %c4_98, %c0_99] : memref<12x12x16xf32, #tpu.memory_space<vmem>>, vector<8x8x16xf32>
    %c4_100 = arith.constant 4 : index
    %c1_101 = arith.constant 1 : index
    %c0_102 = arith.constant 0 : index
    %c0_103 = arith.constant 0 : index
    %c0_104 = arith.constant 0 : index
    %85 = vector.load %arg6[%c4_100, %c1_101, %c0_102, %c0_103, %c0_104] : memref<5x5x1x1x16xf32, #tpu.memory_space<vmem>>, vector<1x1x1x1x16xf32>
    %86 = vector.shape_cast %85 : vector<1x1x1x1x16xf32> to vector<1x1x16xf32>
    %87 = vector.broadcast %86 : vector<1x1x16xf32> to vector<8x8x16xf32>
    %88 = arith.mulf %84, %87 : vector<8x8x16xf32>
    %89 = arith.addf %83, %88 : vector<8x8x16xf32>
    %c2_105 = arith.constant 2 : index
    %c0_106 = arith.constant 0 : index
    %c0_107 = arith.constant 0 : index
    %90 = vector.load %arg12[%c2_105, %c0_106, %c0_107] : memref<12x12x16xf32, #tpu.memory_space<vmem>>, vector<8x8x16xf32>
    %c0_108 = arith.constant 0 : index
    %c2_109 = arith.constant 2 : index
    %c0_110 = arith.constant 0 : index
    %c0_111 = arith.constant 0 : index
    %c0_112 = arith.constant 0 : index
    %91 = vector.load %arg6[%c0_108, %c2_109, %c0_110, %c0_111, %c0_112] : memref<5x5x1x1x16xf32, #tpu.memory_space<vmem>>, vector<1x1x1x1x16xf32>
    %92 = vector.shape_cast %91 : vector<1x1x1x1x16xf32> to vector<1x1x16xf32>
    %93 = vector.broadcast %92 : vector<1x1x16xf32> to vector<8x8x16xf32>
    %94 = arith.mulf %90, %93 : vector<8x8x16xf32>
    %95 = arith.addf %89, %94 : vector<8x8x16xf32>
    %c2_113 = arith.constant 2 : index
    %c1_114 = arith.constant 1 : index
    %c0_115 = arith.constant 0 : index
    %96 = vector.load %arg12[%c2_113, %c1_114, %c0_115] : memref<12x12x16xf32, #tpu.memory_space<vmem>>, vector<8x8x16xf32>
    %c1_116 = arith.constant 1 : index
    %c2_117 = arith.constant 2 : index
    %c0_118 = arith.constant 0 : index
    %c0_119 = arith.constant 0 : index
    %c0_120 = arith.constant 0 : index
    %97 = vector.load %arg6[%c1_116, %c2_117, %c0_118, %c0_119, %c0_120] : memref<5x5x1x1x16xf32, #tpu.memory_space<vmem>>, vector<1x1x1x1x16xf32>
    %98 = vector.shape_cast %97 : vector<1x1x1x1x16xf32> to vector<1x1x16xf32>
    %99 = vector.broadcast %98 : vector<1x1x16xf32> to vector<8x8x16xf32>
    %100 = arith.mulf %96, %99 : vector<8x8x16xf32>
    %101 = arith.addf %95, %100 : vector<8x8x16xf32>
    %c2_121 = arith.constant 2 : index
    %c2_122 = arith.constant 2 : index
    %c0_123 = arith.constant 0 : index
    %102 = vector.load %arg12[%c2_121, %c2_122, %c0_123] : memref<12x12x16xf32, #tpu.memory_space<vmem>>, vector<8x8x16xf32>
    %c2_124 = arith.constant 2 : index
    %c2_125 = arith.constant 2 : index
    %c0_126 = arith.constant 0 : index
    %c0_127 = arith.constant 0 : index
    %c0_128 = arith.constant 0 : index
    %103 = vector.load %arg6[%c2_124, %c2_125, %c0_126, %c0_127, %c0_128] : memref<5x5x1x1x16xf32, #tpu.memory_space<vmem>>, vector<1x1x1x1x16xf32>
    %104 = vector.shape_cast %103 : vector<1x1x1x1x16xf32> to vector<1x1x16xf32>
    %105 = vector.broadcast %104 : vector<1x1x16xf32> to vector<8x8x16xf32>
    %106 = arith.mulf %102, %105 : vector<8x8x16xf32>
    %107 = arith.addf %101, %106 : vector<8x8x16xf32>
    %c2_129 = arith.constant 2 : index
    %c3_130 = arith.constant 3 : index
    %c0_131 = arith.constant 0 : index
    %108 = vector.load %arg12[%c2_129, %c3_130, %c0_131] : memref<12x12x16xf32, #tpu.memory_space<vmem>>, vector<8x8x16xf32>
    %c3_132 = arith.constant 3 : index
    %c2_133 = arith.constant 2 : index
    %c0_134 = arith.constant 0 : index
    %c0_135 = arith.constant 0 : index
    %c0_136 = arith.constant 0 : index
    %109 = vector.load %arg6[%c3_132, %c2_133, %c0_134, %c0_135, %c0_136] : memref<5x5x1x1x16xf32, #tpu.memory_space<vmem>>, vector<1x1x1x1x16xf32>
    %110 = vector.shape_cast %109 : vector<1x1x1x1x16xf32> to vector<1x1x16xf32>
    %111 = vector.broadcast %110 : vector<1x1x16xf32> to vector<8x8x16xf32>
    %112 = arith.mulf %108, %111 : vector<8x8x16xf32>
    %113 = arith.addf %107, %112 : vector<8x8x16xf32>
    %c2_137 = arith.constant 2 : index
    %c4_138 = arith.constant 4 : index
    %c0_139 = arith.constant 0 : index
    %114 = vector.load %arg12[%c2_137, %c4_138, %c0_139] : memref<12x12x16xf32, #tpu.memory_space<vmem>>, vector<8x8x16xf32>
    %c4_140 = arith.constant 4 : index
    %c2_141 = arith.constant 2 : index
    %c0_142 = arith.constant 0 : index
    %c0_143 = arith.constant 0 : index
    %c0_144 = arith.constant 0 : index
    %115 = vector.load %arg6[%c4_140, %c2_141, %c0_142, %c0_143, %c0_144] : memref<5x5x1x1x16xf32, #tpu.memory_space<vmem>>, vector<1x1x1x1x16xf32>
    %116 = vector.shape_cast %115 : vector<1x1x1x1x16xf32> to vector<1x1x16xf32>
    %117 = vector.broadcast %116 : vector<1x1x16xf32> to vector<8x8x16xf32>
    %118 = arith.mulf %114, %117 : vector<8x8x16xf32>
    %119 = arith.addf %113, %118 : vector<8x8x16xf32>
    %c3_145 = arith.constant 3 : index
    %c0_146 = arith.constant 0 : index
    %c0_147 = arith.constant 0 : index
    %120 = vector.load %arg12[%c3_145, %c0_146, %c0_147] : memref<12x12x16xf32, #tpu.memory_space<vmem>>, vector<8x8x16xf32>
    %c0_148 = arith.constant 0 : index
    %c3_149 = arith.constant 3 : index
    %c0_150 = arith.constant 0 : index
    %c0_151 = arith.constant 0 : index
    %c0_152 = arith.constant 0 : index
    %121 = vector.load %arg6[%c0_148, %c3_149, %c0_150, %c0_151, %c0_152] : memref<5x5x1x1x16xf32, #tpu.memory_space<vmem>>, vector<1x1x1x1x16xf32>
    %122 = vector.shape_cast %121 : vector<1x1x1x1x16xf32> to vector<1x1x16xf32>
    %123 = vector.broadcast %122 : vector<1x1x16xf32> to vector<8x8x16xf32>
    %124 = arith.mulf %120, %123 : vector<8x8x16xf32>
    %125 = arith.addf %119, %124 : vector<8x8x16xf32>
    %c3_153 = arith.constant 3 : index
    %c1_154 = arith.constant 1 : index
    %c0_155 = arith.constant 0 : index
    %126 = vector.load %arg12[%c3_153, %c1_154, %c0_155] : memref<12x12x16xf32, #tpu.memory_space<vmem>>, vector<8x8x16xf32>
    %c1_156 = arith.constant 1 : index
    %c3_157 = arith.constant 3 : index
    %c0_158 = arith.constant 0 : index
    %c0_159 = arith.constant 0 : index
    %c0_160 = arith.constant 0 : index
    %127 = vector.load %arg6[%c1_156, %c3_157, %c0_158, %c0_159, %c0_160] : memref<5x5x1x1x16xf32, #tpu.memory_space<vmem>>, vector<1x1x1x1x16xf32>
    %128 = vector.shape_cast %127 : vector<1x1x1x1x16xf32> to vector<1x1x16xf32>
    %129 = vector.broadcast %128 : vector<1x1x16xf32> to vector<8x8x16xf32>
    %130 = arith.mulf %126, %129 : vector<8x8x16xf32>
    %131 = arith.addf %125, %130 : vector<8x8x16xf32>
    %c3_161 = arith.constant 3 : index
    %c2_162 = arith.constant 2 : index
    %c0_163 = arith.constant 0 : index
    %132 = vector.load %arg12[%c3_161, %c2_162, %c0_163] : memref<12x12x16xf32, #tpu.memory_space<vmem>>, vector<8x8x16xf32>
    %c2_164 = arith.constant 2 : index
    %c3_165 = arith.constant 3 : index
    %c0_166 = arith.constant 0 : index
    %c0_167 = arith.constant 0 : index
    %c0_168 = arith.constant 0 : index
    %133 = vector.load %arg6[%c2_164, %c3_165, %c0_166, %c0_167, %c0_168] : memref<5x5x1x1x16xf32, #tpu.memory_space<vmem>>, vector<1x1x1x1x16xf32>
    %134 = vector.shape_cast %133 : vector<1x1x1x1x16xf32> to vector<1x1x16xf32>
    %135 = vector.broadcast %134 : vector<1x1x16xf32> to vector<8x8x16xf32>
    %136 = arith.mulf %132, %135 : vector<8x8x16xf32>
    %137 = arith.addf %131, %136 : vector<8x8x16xf32>
    %c3_169 = arith.constant 3 : index
    %c3_170 = arith.constant 3 : index
    %c0_171 = arith.constant 0 : index
    %138 = vector.load %arg12[%c3_169, %c3_170, %c0_171] : memref<12x12x16xf32, #tpu.memory_space<vmem>>, vector<8x8x16xf32>
    %c3_172 = arith.constant 3 : index
    %c3_173 = arith.constant 3 : index
    %c0_174 = arith.constant 0 : index
    %c0_175 = arith.constant 0 : index
    %c0_176 = arith.constant 0 : index
    %139 = vector.load %arg6[%c3_172, %c3_173, %c0_174, %c0_175, %c0_176] : memref<5x5x1x1x16xf32, #tpu.memory_space<vmem>>, vector<1x1x1x1x16xf32>
    %140 = vector.shape_cast %139 : vector<1x1x1x1x16xf32> to vector<1x1x16xf32>
    %141 = vector.broadcast %140 : vector<1x1x16xf32> to vector<8x8x16xf32>
    %142 = arith.mulf %138, %141 : vector<8x8x16xf32>
    %143 = arith.addf %137, %142 : vector<8x8x16xf32>
    %c3_177 = arith.constant 3 : index
    %c4_178 = arith.constant 4 : index
    %c0_179 = arith.constant 0 : index
    %144 = vector.load %arg12[%c3_177, %c4_178, %c0_179] : memref<12x12x16xf32, #tpu.memory_space<vmem>>, vector<8x8x16xf32>
    %c4_180 = arith.constant 4 : index
    %c3_181 = arith.constant 3 : index
    %c0_182 = arith.constant 0 : index
    %c0_183 = arith.constant 0 : index
    %c0_184 = arith.constant 0 : index
    %145 = vector.load %arg6[%c4_180, %c3_181, %c0_182, %c0_183, %c0_184] : memref<5x5x1x1x16xf32, #tpu.memory_space<vmem>>, vector<1x1x1x1x16xf32>
    %146 = vector.shape_cast %145 : vector<1x1x1x1x16xf32> to vector<1x1x16xf32>
    %147 = vector.broadcast %146 : vector<1x1x16xf32> to vector<8x8x16xf32>
    %148 = arith.mulf %144, %147 : vector<8x8x16xf32>
    %149 = arith.addf %143, %148 : vector<8x8x16xf32>
    %c4_185 = arith.constant 4 : index
    %c0_186 = arith.constant 0 : index
    %c0_187 = arith.constant 0 : index
    %150 = vector.load %arg12[%c4_185, %c0_186, %c0_187] : memref<12x12x16xf32, #tpu.memory_space<vmem>>, vector<8x8x16xf32>
    %c0_188 = arith.constant 0 : index
    %c4_189 = arith.constant 4 : index
    %c0_190 = arith.constant 0 : index
    %c0_191 = arith.constant 0 : index
    %c0_192 = arith.constant 0 : index
    %151 = vector.load %arg6[%c0_188, %c4_189, %c0_190, %c0_191, %c0_192] : memref<5x5x1x1x16xf32, #tpu.memory_space<vmem>>, vector<1x1x1x1x16xf32>
    %152 = vector.shape_cast %151 : vector<1x1x1x1x16xf32> to vector<1x1x16xf32>
    %153 = vector.broadcast %152 : vector<1x1x16xf32> to vector<8x8x16xf32>
    %154 = arith.mulf %150, %153 : vector<8x8x16xf32>
    %155 = arith.addf %149, %154 : vector<8x8x16xf32>
    %c4_193 = arith.constant 4 : index
    %c1_194 = arith.constant 1 : index
    %c0_195 = arith.constant 0 : index
    %156 = vector.load %arg12[%c4_193, %c1_194, %c0_195] : memref<12x12x16xf32, #tpu.memory_space<vmem>>, vector<8x8x16xf32>
    %c1_196 = arith.constant 1 : index
    %c4_197 = arith.constant 4 : index
    %c0_198 = arith.constant 0 : index
    %c0_199 = arith.constant 0 : index
    %c0_200 = arith.constant 0 : index
    %157 = vector.load %arg6[%c1_196, %c4_197, %c0_198, %c0_199, %c0_200] : memref<5x5x1x1x16xf32, #tpu.memory_space<vmem>>, vector<1x1x1x1x16xf32>
    %158 = vector.shape_cast %157 : vector<1x1x1x1x16xf32> to vector<1x1x16xf32>
    %159 = vector.broadcast %158 : vector<1x1x16xf32> to vector<8x8x16xf32>
    %160 = arith.mulf %156, %159 : vector<8x8x16xf32>
    %161 = arith.addf %155, %160 : vector<8x8x16xf32>
    %c4_201 = arith.constant 4 : index
    %c2_202 = arith.constant 2 : index
    %c0_203 = arith.constant 0 : index
    %162 = vector.load %arg12[%c4_201, %c2_202, %c0_203] : memref<12x12x16xf32, #tpu.memory_space<vmem>>, vector<8x8x16xf32>
    %c2_204 = arith.constant 2 : index
    %c4_205 = arith.constant 4 : index
    %c0_206 = arith.constant 0 : index
    %c0_207 = arith.constant 0 : index
    %c0_208 = arith.constant 0 : index
    %163 = vector.load %arg6[%c2_204, %c4_205, %c0_206, %c0_207, %c0_208] : memref<5x5x1x1x16xf32, #tpu.memory_space<vmem>>, vector<1x1x1x1x16xf32>
    %164 = vector.shape_cast %163 : vector<1x1x1x1x16xf32> to vector<1x1x16xf32>
    %165 = vector.broadcast %164 : vector<1x1x16xf32> to vector<8x8x16xf32>
    %166 = arith.mulf %162, %165 : vector<8x8x16xf32>
    %167 = arith.addf %161, %166 : vector<8x8x16xf32>
    %c4_209 = arith.constant 4 : index
    %c3_210 = arith.constant 3 : index
    %c0_211 = arith.constant 0 : index
    %168 = vector.load %arg12[%c4_209, %c3_210, %c0_211] : memref<12x12x16xf32, #tpu.memory_space<vmem>>, vector<8x8x16xf32>
    %c3_212 = arith.constant 3 : index
    %c4_213 = arith.constant 4 : index
    %c0_214 = arith.constant 0 : index
    %c0_215 = arith.constant 0 : index
    %c0_216 = arith.constant 0 : index
    %169 = vector.load %arg6[%c3_212, %c4_213, %c0_214, %c0_215, %c0_216] : memref<5x5x1x1x16xf32, #tpu.memory_space<vmem>>, vector<1x1x1x1x16xf32>
    %170 = vector.shape_cast %169 : vector<1x1x1x1x16xf32> to vector<1x1x16xf32>
    %171 = vector.broadcast %170 : vector<1x1x16xf32> to vector<8x8x16xf32>
    %172 = arith.mulf %168, %171 : vector<8x8x16xf32>
    %173 = arith.addf %167, %172 : vector<8x8x16xf32>
    %c4_217 = arith.constant 4 : index
    %c4_218 = arith.constant 4 : index
    %c0_219 = arith.constant 0 : index
    %174 = vector.load %arg12[%c4_217, %c4_218, %c0_219] : memref<12x12x16xf32, #tpu.memory_space<vmem>>, vector<8x8x16xf32>
    %c4_220 = arith.constant 4 : index
    %c4_221 = arith.constant 4 : index
    %c0_222 = arith.constant 0 : index
    %c0_223 = arith.constant 0 : index
    %c0_224 = arith.constant 0 : index
    %175 = vector.load %arg6[%c4_220, %c4_221, %c0_222, %c0_223, %c0_224] : memref<5x5x1x1x16xf32, #tpu.memory_space<vmem>>, vector<1x1x1x1x16xf32>
    %176 = vector.shape_cast %175 : vector<1x1x1x1x16xf32> to vector<1x1x16xf32>
    %177 = vector.broadcast %176 : vector<1x1x16xf32> to vector<8x8x16xf32>
    %178 = arith.mulf %174, %177 : vector<8x8x16xf32>
    %179 = arith.addf %173, %178 : vector<8x8x16xf32>
    %c0_225 = arith.constant 0 : index
    %c0_226 = arith.constant 0 : index
    %c0_227 = arith.constant 0 : index
    %180 = vector.load %arg7[%c0_225, %c0_226, %c0_227] : memref<1x1x16xf32, #tpu.memory_space<vmem>>, vector<1x1x16xf32>
    %181 = vector.broadcast %180 : vector<1x1x16xf32> to vector<8x8x16xf32>
    %182 = arith.addf %179, %181 : vector<8x8x16xf32>
    %c0_228 = arith.constant 0 : index
    %c0_229 = arith.constant 0 : index
    %183 = vector.load %arg8[%c0_228, %c0_229] : memref<16x16xbf16, #tpu.memory_space<vmem>>, vector<16x16xbf16>
    %cst_230 = arith.constant 0.000000e+00 : f32
    %184 = vector.broadcast %cst_230 : f32 to vector<8x8x16xf32>
    %c0_231 = arith.constant 0 : index
    %c0_232 = arith.constant 0 : index
    %c0_233 = arith.constant 0 : index
    %185 = vector.load %arg9[%c0_231, %c0_232, %c0_233] : memref<1x1x16xf32, #tpu.memory_space<vmem>>, vector<1x1x16xf32>
    %186 = vector.broadcast %185 : vector<1x1x16xf32> to vector<8x8x16xf32>
    %187 = arith.addf %184, %186 : vector<8x8x16xf32>
    %188 = vector.extract_strided_slice %23 {offsets = [0, 0, 0], sizes = [8, 8, 4], strides = [1, 1, 1]} : vector<32x8x4xf32> to vector<8x8x4xf32>
    %189 = arith.truncf %188 : vector<8x8x4xf32> to vector<8x8x4xbf16>
    %190 = vector.extract_strided_slice %183 {offsets = [0, 0], sizes = [4, 16], strides = [1, 1]} : vector<16x16xbf16> to vector<4x16xbf16>
    %191 = vector.shape_cast %190 : vector<4x16xbf16> to vector<1x4x16xbf16>
    %192 = vector.broadcast %191 : vector<1x4x16xbf16> to vector<8x4x16xbf16>
    "tpu.trace_start"() <{level = 10 : i32, message = "whd,wdc->whc"}> : () -> ()
    %cst_234 = arith.constant dense<0.000000e+00> : vector<8x8x16xf32>
    %193 = tpu.matmul %189, %192, %cst_234 {dimension_numbers = #tpu.dot_dimension_numbers<[2], [1], [1], [2], [0, 0, 0, 1, 1, 2], [0], [0]>} : vector<8x8x4xbf16>, vector<8x4x16xbf16>, vector<8x8x16xf32> -> vector<8x8x16xf32>
    "tpu.trace_stop"() : () -> ()
    %194 = arith.addf %187, %193 : vector<8x8x16xf32>
    %195 = vector.extract_strided_slice %23 {offsets = [8, 0, 0], sizes = [8, 8, 4], strides = [1, 1, 1]} : vector<32x8x4xf32> to vector<8x8x4xf32>
    %196 = arith.truncf %195 : vector<8x8x4xf32> to vector<8x8x4xbf16>
    %197 = vector.extract_strided_slice %183 {offsets = [4, 0], sizes = [4, 16], strides = [1, 1]} : vector<16x16xbf16> to vector<4x16xbf16>
    %198 = vector.shape_cast %197 : vector<4x16xbf16> to vector<1x4x16xbf16>
    %199 = vector.broadcast %198 : vector<1x4x16xbf16> to vector<8x4x16xbf16>
    "tpu.trace_start"() <{level = 10 : i32, message = "whd,wdc->whc"}> : () -> ()
    %cst_235 = arith.constant dense<0.000000e+00> : vector<8x8x16xf32>
    %200 = tpu.matmul %196, %199, %cst_235 {dimension_numbers = #tpu.dot_dimension_numbers<[2], [1], [1], [2], [0, 0, 0, 1, 1, 2], [0], [0]>} : vector<8x8x4xbf16>, vector<8x4x16xbf16>, vector<8x8x16xf32> -> vector<8x8x16xf32>
    "tpu.trace_stop"() : () -> ()
    %201 = arith.addf %194, %200 : vector<8x8x16xf32>
    %202 = vector.extract_strided_slice %23 {offsets = [16, 0, 0], sizes = [8, 8, 4], strides = [1, 1, 1]} : vector<32x8x4xf32> to vector<8x8x4xf32>
    %203 = arith.truncf %202 : vector<8x8x4xf32> to vector<8x8x4xbf16>
    %204 = vector.extract_strided_slice %183 {offsets = [8, 0], sizes = [4, 16], strides = [1, 1]} : vector<16x16xbf16> to vector<4x16xbf16>
    %205 = vector.shape_cast %204 : vector<4x16xbf16> to vector<1x4x16xbf16>
    %206 = vector.broadcast %205 : vector<1x4x16xbf16> to vector<8x4x16xbf16>
    "tpu.trace_start"() <{level = 10 : i32, message = "whd,wdc->whc"}> : () -> ()
    %cst_236 = arith.constant dense<0.000000e+00> : vector<8x8x16xf32>
    %207 = tpu.matmul %203, %206, %cst_236 {dimension_numbers = #tpu.dot_dimension_numbers<[2], [1], [1], [2], [0, 0, 0, 1, 1, 2], [0], [0]>} : vector<8x8x4xbf16>, vector<8x4x16xbf16>, vector<8x8x16xf32> -> vector<8x8x16xf32>
    "tpu.trace_stop"() : () -> ()
    %208 = arith.addf %201, %207 : vector<8x8x16xf32>
    %209 = vector.extract_strided_slice %23 {offsets = [24, 0, 0], sizes = [8, 8, 4], strides = [1, 1, 1]} : vector<32x8x4xf32> to vector<8x8x4xf32>
    %210 = arith.truncf %209 : vector<8x8x4xf32> to vector<8x8x4xbf16>
    %211 = vector.extract_strided_slice %183 {offsets = [12, 0], sizes = [4, 16], strides = [1, 1]} : vector<16x16xbf16> to vector<4x16xbf16>
    %212 = vector.shape_cast %211 : vector<4x16xbf16> to vector<1x4x16xbf16>
    %213 = vector.broadcast %212 : vector<1x4x16xbf16> to vector<8x4x16xbf16>
    "tpu.trace_start"() <{level = 10 : i32, message = "whd,wdc->whc"}> : () -> ()
    %cst_237 = arith.constant dense<0.000000e+00> : vector<8x8x16xf32>
    %214 = tpu.matmul %210, %213, %cst_237 {dimension_numbers = #tpu.dot_dimension_numbers<[2], [1], [1], [2], [0, 0, 0, 1, 1, 2], [0], [0]>} : vector<8x8x4xbf16>, vector<8x4x16xbf16>, vector<8x8x16xf32> -> vector<8x8x16xf32>
    "tpu.trace_stop"() : () -> ()
    %215 = arith.addf %208, %214 : vector<8x8x16xf32>
    %216 = arith.truncf %182 : vector<8x8x16xf32> to vector<8x8x16xbf16>
    %217 = vector.shape_cast %183 : vector<16x16xbf16> to vector<1x16x16xbf16>
    %218 = vector.broadcast %217 : vector<1x16x16xbf16> to vector<8x16x16xbf16>
    "tpu.trace_start"() <{level = 10 : i32, message = "whc,wcd->whd"}> : () -> ()
    %cst_238 = arith.constant dense<0.000000e+00> : vector<8x8x16xf32>
    %219 = tpu.matmul %216, %218, %cst_238 {dimension_numbers = #tpu.dot_dimension_numbers<[2], [1], [1], [2], [0, 0, 0, 1, 1, 2], [0], [0]>} : vector<8x8x16xbf16>, vector<8x16x16xbf16>, vector<8x8x16xf32> -> vector<8x8x16xf32>
    "tpu.trace_stop"() : () -> ()
    %220 = arith.addf %215, %219 : vector<8x8x16xf32>
    %c0_239 = arith.constant 0 : index
    %c0_240 = arith.constant 0 : index
    %c0_241 = arith.constant 0 : index
    %c0_242 = arith.constant 0 : index
    %221 = vector.load %arg10[%c0_239, %c0_240, %c0_241, %c0_242] : memref<1x8x8x16xf32, #tpu.memory_space<vmem>>, vector<1x8x8x16xf32>
    %222 = vector.shape_cast %221 : vector<1x8x8x16xf32> to vector<8x8x16xf32>
    %223 = arith.addf %220, %222 : vector<8x8x16xf32>
    %c0_243 = arith.constant 0 : index
    %c0_244 = arith.constant 0 : index
    %c0_245 = arith.constant 0 : index
    %c0_246 = arith.constant 0 : index
    %224 = vector.load %arg11[%c0_243, %c0_244, %c0_245, %c0_246] : memref<1x8x8x16xf32, #tpu.memory_space<vmem>>, vector<1x8x8x16xf32>
    %225 = vector.shape_cast %224 : vector<1x8x8x16xf32> to vector<8x8x16xf32>
    %226 = vector.shape_cast %223 : vector<8x8x16xf32> to vector<1x8x8x16xf32>
    tpu.vector_store %arg11[%c0_243, %c0_244, %c0_245, %c0_246], %226 {strides = array<i32>} : memref<1x8x8x16xf32, #tpu.memory_space<vmem>>, vector<1x8x8x16xf32>,
    return
  }
  func.func @transform_0(%arg0: i32) -> (i32, i32, i32, i32) {
    %c0_i32 = arith.constant 0 : i32
    %c0_i32_0 = arith.constant 0 : i32
    %c0_i32_1 = arith.constant 0 : i32
    %c0_i32_2 = arith.constant 0 : i32
    return %arg0, %c0_i32, %c0_i32_0, %c0_i32_1 : i32, i32, i32, i32
  }
  func.func @transform_1(%arg0: i32) -> (i32, i32, i32, i32) {
    %c0_i32 = arith.constant 0 : i32
    %c0_i32_0 = arith.constant 0 : i32
    %c0_i32_1 = arith.constant 0 : i32
    %c0_i32_2 = arith.constant 0 : i32
    return %arg0, %c0_i32, %c0_i32_0, %c0_i32_1 : i32, i32, i32, i32
  }
  func.func @transform_2(%arg0: i32) -> (i32, i32, i32, i32) {
    %c0_i32 = arith.constant 0 : i32
    %c0_i32_0 = arith.constant 0 : i32
    %c0_i32_1 = arith.constant 0 : i32
    %c0_i32_2 = arith.constant 0 : i32
    return %arg0, %c0_i32, %c0_i32_0, %c0_i32_1 : i32, i32, i32, i32
  }
  func.func @transform_3(%arg0: i32) -> (i32, i32, i32) {
    %c0_i32 = arith.constant 0 : i32
    %c0_i32_0 = arith.constant 0 : i32
    %c0_i32_1 = arith.constant 0 : i32
    %c0_i32_2 = arith.constant 0 : i32
    return %c0_i32, %c0_i32_0, %c0_i32_1 : i32, i32, i32
  }
  func.func @transform_4(%arg0: i32) -> (i32, i32, i32, i32) {
    %c0_i32 = arith.constant 0 : i32
    %c0_i32_0 = arith.constant 0 : i32
    %c0_i32_1 = arith.constant 0 : i32
    %c0_i32_2 = arith.constant 0 : i32
    return %arg0, %c0_i32, %c0_i32_0, %c0_i32_1 : i32, i32, i32, i32
  }
  func.func @transform_5(%arg0: i32) -> (i32, i32, i32, i32, i32) {
    %c0_i32 = arith.constant 0 : i32
    %c0_i32_0 = arith.constant 0 : i32
    %c0_i32_1 = arith.constant 0 : i32
    %c0_i32_2 = arith.constant 0 : i32
    %c0_i32_3 = arith.constant 0 : i32
    %c0_i32_4 = arith.constant 0 : i32
    return %c0_i32, %c0_i32_0, %c0_i32_1, %c0_i32_2, %c0_i32_3 : i32, i32, i32, i32, i32
  }
  func.func @transform_6(%arg0: i32) -> (i32, i32, i32) {
    %c0_i32 = arith.constant 0 : i32
    %c0_i32_0 = arith.constant 0 : i32
    %c0_i32_1 = arith.constant 0 : i32
    %c0_i32_2 = arith.constant 0 : i32
    return %c0_i32, %c0_i32_0, %c0_i32_1 : i32, i32, i32
  }
  func.func @transform_7(%arg0: i32) -> (i32, i32) {
    %c0_i32 = arith.constant 0 : i32
    %c0_i32_0 = arith.constant 0 : i32
    %c0_i32_1 = arith.constant 0 : i32
    return %c0_i32, %c0_i32_0 : i32, i32
  }
  func.func @transform_8(%arg0: i32) -> (i32, i32, i32) {
    %c0_i32 = arith.constant 0 : i32
    %c0_i32_0 = arith.constant 0 : i32
    %c0_i32_1 = arith.constant 0 : i32
    %c0_i32_2 = arith.constant 0 : i32
    return %c0_i32, %c0_i32_0, %c0_i32_1 : i32, i32, i32
  }
  func.func @transform_9(%arg0: i32) -> (i32, i32, i32, i32) {
    %c0_i32 = arith.constant 0 : i32
    %c0_i32_0 = arith.constant 0 : i32
    %c0_i32_1 = arith.constant 0 : i32
    %c0_i32_2 = arith.constant 0 : i32
    return %arg0, %c0_i32, %c0_i32_0, %c0_i32_1 : i32, i32, i32, i32
  }
  func.func @transform_10(%arg0: i32) -> (i32, i32, i32, i32) {
    %c0_i32 = arith.constant 0 : i32
    %c0_i32_0 = arith.constant 0 : i32
    %c0_i32_1 = arith.constant 0 : i32
    %c0_i32_2 = arith.constant 0 : i32
    return %arg0, %c0_i32, %c0_i32_0, %c0_i32_1 : i32, i32, i32, i32
  }
}

</mosaic_0001>

<bundles_post_ra>
// kernel: bottleneck_vrc_forward.5
= control target key start
LH: loop header
LB: loop body
LE: loop exit
PB: predicated region body
PF: predicated region fallthrough
CT: control target
= control target key end

     0   :  { %s892_s24 = smov 0   ;;  %s1138_s0 = inlined_call_operand.vmem [shape: f32[2,64,16], index: 0, kind: input, shape index: {}]   ;;  %s1139_s1 = inlined_call_operand.vmem [shape: bf16[5,16,16], index: 1, kind: input, shape index: {}]   ;;  %s1140_s2 = inlined_call_operand.vmem [shape: f32[5,1,16], index: 2, kind: input, shape index: {}]   ;;  %s1141_s3 = inlined_call_operand.vmem [shape: f32[64,16], index: 3, kind: input, shape index: {}]   ;;  %s1142_s4 = inlined_call_operand.vmem [shape: f32[64,16], index: 4, kind: input, shape index: {}]   ;;  %s1143_s5 = inlined_call_operand.vmem [shape: f32[2,64,16], index: 5, kind: output, shape index: {0}]   ;;  %s1144_s6 = inlined_call_operand.vmem [shape: f32[2,64,16], index: 6, kind: output, shape index: {1}]   ;;  %s1145_s7 = inlined_call_operand.vmem [shape: f32[2,64,16], index: 7, kind: output, shape index: {2}]  }
   0x1 LB: > { %s752_s25 = sadd.s32 4294967295, %s850_s24   ;;  %p756_p0 = scmp.ge.s32.totalorder %s850_s24, 1  ;;  %s850_s24 = sphi %s892_s24, %s18_s24  }
   0x2   : > { %p242_p1 = scmp.lt.s32.totalorder %s850_s24, 3 }
   0x4   : > { %p243_p2 = pnand %p756_p0, %p242_p1 }
   0x5   : > { %p284_p3 = scmp.lt.s32.totalorder (!%p243_p2), %s752_s25, 1 }
   0x6   : > { %246 = sbr.rel (%p243_p2) target bundleno = 230 (0xe6), region = 40 }
   0xb   : > { %v823_v0 = vld [vmem:[%s1139_s1] sm:$0xff]  ;;  %v825_v1 = vld [vmem:[%s1139_s1 + $0x10] sm:$0xff]  ;;  %v826_v2 = vld [vmem:[%s1139_s1 + $0x18] sm:$0xff]  ;;  %s1147_s25 = smov (!%p284_p3, %s752_s25), 1  ;;  %vm345_vm0 = vcmask 130048  }
   0xc   : > { %v824_v3 = vld [vmem:[%s1139_s1 + $0x8] sm:$0xff]  ;;  %v827_v4 = vld [vmem:[%s1139_s1 + $0x20] sm:$0xff]  ;;  %828 = vmatpush.bf16.msra.mxu1 %v823_v0  ;;  %829 = vmatpush.bf16.msra.mxu2 %v823_v0  ;;  %s915_s13 = sshll.u32 %s1147_s25, 6  ;;  %v327_v60 = vld [vmem:[%s1142_s4 + $0x10] sm:$0xff] }
   0xd   : > { %830 = vmatpush.bf16.msra.mxu3 %v823_v0  ;;  %365 = vmatpush.bf16.msra.mxu0 %v823_v0  ;;  %s288_s16 = scalar_lea.vmem %s1138_s0, %s915_s13  ;;  %v950_v23 = vld [vmem:[%s1140_s2] ss:$0 sm:$0xff]  ;;  %v955_v24 = vld [vmem:[%s1140_s2 + $0x1] ss:$0 sm:$0xff]  ;;  %v965_v28 = vld [vmem:[%s1140_s2 + $0x4] ss:$0 sm:$0xff]  ;;  %s978_s30 = scalar_lea.vmem %s1145_s7, %s915_s13 }
   0xe   : > { %v307_v5 = vld [vmem:[%s288_s16 + $0x10] sm:$0xff]  ;;  %v308_v6 = vld [vmem:[%s288_s16 + $0x18] sm:$0xff]  ;;  %v309_v7 = vld [vmem:[%s288_s16 + $0x20] sm:$0xff]  ;;  %s985_s10 = scalar_lea.vmem %s1143_s5, %s915_s13  ;;  %s1015_s22 = scalar_lea.vmem %s1144_s6, %s915_s13 }
   0xf   : > { %v314_v8 = vpack.c.bf16 %v308_v6, %v307_v5  ;;  %v310_v9 = vld [vmem:[%s288_s16 + $0x28] sm:$0xff]  ;;  %v311_v10 = vld [vmem:[%s288_s16 + $0x30] sm:$0xff]  ;;  %v312_v11 = vld [vmem:[%s288_s16 + $0x38] sm:$0xff] }
  0x10   : > { %451 = vmatpush.bf16.msrb.mxu2 %v825_v1  ;;  %408 = vmatpush.bf16.msrb.mxu1 %v824_v3  ;;  %v315_v12 = vpack.c.bf16 %v310_v9, %v309_v7  ;;  %v316_v13 = vpack.c.bf16 %v312_v11, %v311_v10  ;;  %v305_v14 = vld [vmem:[%s288_s16] sm:$0xff]  ;;  %v306_v15 = vld [vmem:[%s288_s16 + $0x8] sm:$0xff]  ;;  %v319_v63 = vld [vmem:[%s1141_s3 + $0x10] sm:$0xff] }
  0x11   : > { %494 = vmatpush.bf16.msrb.mxu3 %v826_v2  ;;  %601 = vmatpush.bf16.msrb.mxu0 %v827_v4  ;;  %v313_v16 = vpack.c.bf16 %v306_v15, %v305_v14  ;;  %v325_v29 = vld [vmem:[%s1142_s4] sm:$0xff]  ;;  %v326_v43 = vld [vmem:[%s1142_s4 + $0x8] sm:$0xff] }
  0x12   : > { %770 = vmatmul.msk.bf16.vlgmr.msra.gmra.mxu1 %vm345_vm0, %v314_v8  ;;  %771 = vmatmul.msk.bf16.vlgmr.msra.gmra.mxu2 %vm345_vm0, %v315_v12  ;;  %v317_v30 = vld [vmem:[%s1141_s3] sm:$0xff]  ;;  %v318_v46 = vld [vmem:[%s1141_s3 + $0x8] sm:$0xff] }
  0x13   : > { %772 = vmatmul.msk.bf16.vlgmr.msra.gmra.mxu3 %vm345_vm0, %v316_v13  ;;  %769 = vmatmul.msk.bf16.vlgmr.msra.gmra.mxu0 %vm345_vm0, %v313_v16  ;;  %v990_v37 = vld [vmem:[%s1140_s2 + $0x2] ss:$0 sm:$0xff]  ;;  %v995_v38 = vld [vmem:[%s1140_s2 + $0x3] ss:$0 sm:$0xff] }
  0x22   : > { %780 = vmatmul.msk.bf16.vlgmr.msrb.gmra.mxu1 %vm345_vm0, %v313_v16  ;;  %791 = vmatmul.msk.bf16.vlgmr.msrb.gmra.mxu2 %vm345_vm0, %v313_v16 }
  0x23   : > { %802 = vmatmul.msk.bf16.vlgmr.msrb.gmra.mxu3 %vm345_vm0, %v313_v16  ;;  %813 = vmatmul.msk.bf16.vlgmr.msrb.gmra.mxu0 %vm345_vm0, %v313_v16  ;;  %v320_v16 = vld [vmem:[%s1141_s3 + $0x18] sm:$0xff] }
  0x32   : > { %781 = vmatmul.msk.bf16.gmra.mxu1 %vm345_vm0, %v314_v8  ;;  %792 = vmatmul.msk.bf16.gmra.mxu2 %vm345_vm0, %v314_v8 }
  0x33   : > { %803 = vmatmul.msk.bf16.gmra.mxu3 %vm345_vm0, %v314_v8  ;;  %814 = vmatmul.msk.bf16.gmra.mxu0 %vm345_vm0, %v314_v8 }
  0x42   : > { %782 = vmatmul.msk.bf16.gmra.mxu1 %vm345_vm0, %v315_v12  ;;  %793 = vmatmul.msk.bf16.gmra.mxu2 %vm345_vm0, %v315_v12 }
  0x43   : > { %804 = vmatmul.msk.bf16.gmra.mxu3 %vm345_vm0, %v315_v12  ;;  %815 = vmatmul.msk.bf16.gmra.mxu0 %vm345_vm0, %v315_v12 }
  0x52   : > { %783 = vmatmul.msk.bf16.gmra.mxu1 %vm345_vm0, %v316_v13  ;;  %794 = vmatmul.msk.bf16.gmra.mxu2 %vm345_vm0, %v316_v13 }
  0x53   : > { %805 = vmatmul.msk.bf16.gmra.mxu3 %vm345_vm0, %v316_v13  ;;  %816 = vmatmul.msk.bf16.gmra.mxu0 %vm345_vm0, %v316_v13  ;;  %v328_v13 = vld [vmem:[%s1142_s4 + $0x18] sm:$0xff] }
  0x8f   : > { %v372_v17 = vpop.f32.mrf.mxu1 }
  0x90   : > { %v367_v18 = vpop.f32.mrf.mxu0  ;;  %v373_v57 = vadd.f32 %v950_v23, %v372_v17 }
  0x91   : > { %v368_v25 = vadd.f32 %v950_v23, %v367_v18 }
  0x92   : > { %v518_v5 = vmul.f32 %v373_v57, %v327_v60 }
  0x93   : > { %v516_v34 = vmul.f32 %v368_v25, %v325_v29 }
  0x95   : > { %v941_v19 = vpop.f32.mrf.mxu2 }
  0x96   : > { %v943_v20 = vpop.f32.mrf.mxu3 }
  0x97   : > { %v945_v21 = vpop.f32.mrf.mxu1 }
  0x98   : > { %v369_v22 = vpop.f32.mrf.mxu0  ;;  %v375_v10 = vadd.f32 %v950_v23, %v945_v21 }
  0x99   : > { %v370_v40 = vadd.f32 %v950_v23, %v369_v22 }
  0x9b   : > { %v517_v52 = vmul.f32 %v370_v40, %v326_v43 }
  0x9d   : > { %v958_v26 = vpop.f32.mrf.mxu2 }
  0x9e   : > { %v960_v27 = vpop.f32.mrf.mxu3 }
  0x9f   : > { %v410_v31 = vpop.f32.mrf.mxu1 }
  0xa0   : > { %v411_v32 = vadd.f32 %v955_v24, %v410_v31  ;;  %v603_v33 = vpop.f32.mrf.mxu0 }
  0xa1   : > { %v604_v36 = vadd.f32 %v965_v28, %v603_v33 }
  0xa2   : > { %v524_v35 = vmul.f32 %v411_v32, %v317_v30 }
  0xa3   : > { %623 = vst.msk [vmem:[%s978_s30] sm:$0xff] %vm345_vm0, %v604_v36 }
  0xa4   : > { %v532_v39 = vadd.f32 %v524_v35, %v516_v34  ;;  %v378_v34 = vadd.f32 %v950_v23, %v941_v19 }
  0xa5   : > { %v453_v41 = vpop.f32.mrf.mxu2 }
  0xa6   : > { %540 = vst.msk [vmem:[%s985_s10] sm:$0xff] %vm345_vm0, %v532_v39  ;;  %v496_v42 = vpop.f32.mrf.mxu3  ;;  %v454_v44 = vadd.f32 %v990_v37, %v453_v41  ;;  %v329_v39 = vld [vmem:[%s1142_s4 + $0x20] sm:$0xff] }
  0xa7   : > { %v497_v45 = vadd.f32 %v995_v38, %v496_v42  ;;  %v412_v47 = vpop.f32.mrf.mxu1  ;;  %v321_v42 = vld [vmem:[%s1141_s3 + $0x20] sm:$0xff] }
  0xa8   : > { %v413_v48 = vadd.f32 %v955_v24, %v412_v47  ;;  %v548_v49 = vmul.f32 %v454_v44, %v325_v29  ;;  %v605_v51 = vpop.f32.mrf.mxu0  ;;  %v519_v29 = vmul.f32 %v375_v10, %v328_v13  ;;  %v520_v47 = vmul.f32 %v378_v34, %v329_v39  ;;  %v323_v10 = vld [vmem:[%s1141_s3 + $0x30] sm:$0xff] }
  0xa9   : > { %v556_v50 = vmul.f32 %v497_v45, %v317_v30  ;;  %v606_v54 = vadd.f32 %v965_v28, %v605_v51 }
  0xaa   : > { %v525_v53 = vmul.f32 %v413_v48, %v318_v46 }
  0xab   : > { %v564_v55 = vadd.f32 %v556_v50, %v548_v49  ;;  %624 = vst.msk [vmem:[%s978_s30 + $0x8] sm:$0xff] %vm345_vm0, %v606_v54 }
  0xac   : > { %v533_v56 = vadd.f32 %v525_v53, %v517_v52  ;;  %v380_v52 = vadd.f32 %v950_v23, %v958_v26 }
  0xad   : > { %572 = vst.msk [vmem:[%s1015_s22] sm:$0xff] %vm345_vm0, %v564_v55  ;;  %v455_v58 = vpop.f32.mrf.mxu2  ;;  %v330_v55 = vld [vmem:[%s1142_s4 + $0x28] sm:$0xff] }
  0xae   : > { %541 = vst.msk [vmem:[%s985_s10 + $0x8] sm:$0xff] %vm345_vm0, %v533_v56  ;;  %v498_v59 = vpop.f32.mrf.mxu3  ;;  %v456_v61 = vadd.f32 %v990_v37, %v455_v58  ;;  %v322_v58 = vld [vmem:[%s1141_s3 + $0x28] sm:$0xff] }
  0xaf   : > { %v499_v62 = vadd.f32 %v995_v38, %v498_v59  ;;  %v415_v0 = vpop.f32.mrf.mxu1 }
  0xb0   : > { %v416_v1 = vadd.f32 %v955_v24, %v415_v0  ;;  %v549_v2 = vmul.f32 %v456_v61, %v326_v43  ;;  %v608_v4 = vpop.f32.mrf.mxu0 }
  0xb1   : > { %v557_v3 = vmul.f32 %v499_v62, %v318_v46  ;;  %v609_v7 = vadd.f32 %v965_v28, %v608_v4  ;;  %v383_v4 = vadd.f32 %v950_v23, %v943_v20 }
  0xb2   : > { %v526_v6 = vmul.f32 %v416_v1, %v319_v63 }
  0xb3   : > { %v565_v8 = vadd.f32 %v557_v3, %v549_v2  ;;  %625 = vst.msk [vmem:[%s978_s30 + $0x10] sm:$0xff] %vm345_vm0, %v609_v7  ;;  %v331_v7 = vld [vmem:[%s1142_s4 + $0x30] sm:$0xff] }
  0xb4   : > { %v534_v9 = vadd.f32 %v526_v6, %v518_v5 }
  0xb5   : > { %573 = vst.msk [vmem:[%s1015_s22 + $0x8] sm:$0xff] %vm345_vm0, %v565_v8  ;;  %v458_v11 = vpop.f32.mrf.mxu2 }
  0xb6   : > { %542 = vst.msk [vmem:[%s985_s10 + $0x10] sm:$0xff] %vm345_vm0, %v534_v9  ;;  %v501_v12 = vpop.f32.mrf.mxu3  ;;  %v459_v14 = vadd.f32 %v990_v37, %v458_v11 }
  0xb7   : > { %v502_v15 = vadd.f32 %v995_v38, %v501_v12  ;;  %v417_v17 = vpop.f32.mrf.mxu1 }
  0xb8   : > { %v418_v18 = vadd.f32 %v955_v24, %v417_v17  ;;  %v550_v21 = vmul.f32 %v459_v14, %v327_v60  ;;  %v610_v25 = vpop.f32.mrf.mxu0 }
  0xb9   : > { %v558_v22 = vmul.f32 %v502_v15, %v319_v63  ;;  %v611_v31 = vadd.f32 %v965_v28, %v610_v25  ;;  %v521_v63 = vmul.f32 %v380_v52, %v330_v55  ;;  %v522_v15 = vmul.f32 %v383_v4, %v331_v7 }
  0xba   : > { %v527_v30 = vmul.f32 %v418_v18, %v320_v16 }
  0xbb   : > { %v566_v32 = vadd.f32 %v558_v22, %v550_v21  ;;  %626 = vst.msk [vmem:[%s978_s30 + $0x18] sm:$0xff] %vm345_vm0, %v611_v31  ;;  %v385_v22 = vadd.f32 %v950_v23, %v960_v27 }
  0xbc   : > { %v535_v33 = vadd.f32 %v527_v30, %v519_v29  ;;  %v332_v30 = vld [vmem:[%s1142_s4 + $0x38] sm:$0xff] }
  0xbd   : > { %574 = vst.msk [vmem:[%s1015_s22 + $0x10] sm:$0xff] %vm345_vm0, %v566_v32  ;;  %v460_v35 = vpop.f32.mrf.mxu2 }
  0xbe   : > { %543 = vst.msk [vmem:[%s985_s10 + $0x18] sm:$0xff] %vm345_vm0, %v535_v33  ;;  %v503_v36 = vpop.f32.mrf.mxu3  ;;  %v461_v40 = vadd.f32 %v990_v37, %v460_v35  ;;  %v324_v33 = vld [vmem:[%s1141_s3 + $0x38] sm:$0xff] }
  0xbf   : > { %v504_v41 = vadd.f32 %v995_v38, %v503_v36  ;;  %v420_v19 = vpop.f32.mrf.mxu1 }
  0xc0   : > { %v421_v43 = vadd.f32 %v955_v24, %v420_v19  ;;  %v551_v44 = vmul.f32 %v461_v40, %v328_v13  ;;  %v613_v46 = vpop.f32.mrf.mxu0 }
  0xc1   : > { %v559_v45 = vmul.f32 %v504_v41, %v320_v16  ;;  %v614_v49 = vadd.f32 %v965_v28, %v613_v46 }
  0xc2   : > { %v528_v48 = vmul.f32 %v421_v43, %v321_v42 }
  0xc3   : > { %v567_v50 = vadd.f32 %v559_v45, %v551_v44  ;;  %627 = vst.msk [vmem:[%s978_s30 + $0x20] sm:$0xff] %vm345_vm0, %v614_v49 }
  0xc4   : > { %v536_v51 = vadd.f32 %v528_v48, %v520_v47 }
  0xc5   : > { %575 = vst.msk [vmem:[%s1015_s22 + $0x18] sm:$0xff] %vm345_vm0, %v567_v50  ;;  %v463_v53 = vpop.f32.mrf.mxu2 }
  0xc6   : > { %544 = vst.msk [vmem:[%s985_s10 + $0x20] sm:$0xff] %vm345_vm0, %v536_v51  ;;  %v506_v54 = vpop.f32.mrf.mxu3  ;;  %v464_v56 = vadd.f32 %v990_v37, %v463_v53 }
  0xc7   : > { %v507_v57 = vadd.f32 %v995_v38, %v506_v54  ;;  %v422_v26 = vpop.f32.mrf.mxu1 }
  0xc8   : > { %v423_v59 = vadd.f32 %v955_v24, %v422_v26  ;;  %v552_v60 = vmul.f32 %v464_v56, %v329_v39  ;;  %v615_v62 = vpop.f32.mrf.mxu0  ;;  %v523_v39 = vmul.f32 %v385_v22, %v332_v30 }
  0xc9   : > { %v560_v61 = vmul.f32 %v507_v57, %v321_v42  ;;  %v616_v1 = vadd.f32 %v965_v28, %v615_v62 }
  0xca   : > { %v529_v0 = vmul.f32 %v423_v59, %v322_v58 }
  0xcb   : > { %v568_v2 = vadd.f32 %v560_v61, %v552_v60  ;;  %628 = vst.msk [vmem:[%s978_s30 + $0x28] sm:$0xff] %vm345_vm0, %v616_v1 }
  0xcc   : > { %v537_v3 = vadd.f32 %v529_v0, %v521_v63 }
  0xcd   : > { %576 = vst.msk [vmem:[%s1015_s22 + $0x20] sm:$0xff] %vm345_vm0, %v568_v2  ;;  %v465_v5 = vpop.f32.mrf.mxu2 }
  0xce   : > { %545 = vst.msk [vmem:[%s985_s10 + $0x28] sm:$0xff] %vm345_vm0, %v537_v3  ;;  %v508_v6 = vpop.f32.mrf.mxu3  ;;  %v466_v8 = vadd.f32 %v990_v37, %v465_v5 }
  0xcf   : > { %v509_v9 = vadd.f32 %v995_v38, %v508_v6  ;;  %v425_v20 = vpop.f32.mrf.mxu1 }
  0xd0   : > { %v426_v11 = vadd.f32 %v955_v24, %v425_v20  ;;  %v553_v12 = vmul.f32 %v466_v8, %v330_v55  ;;  %v618_v14 = vpop.f32.mrf.mxu0 }
  0xd1   : > { %v561_v13 = vmul.f32 %v509_v9, %v322_v58  ;;  %v619_v17 = vadd.f32 %v965_v28, %v618_v14 }
  0xd2   : > { %v530_v16 = vmul.f32 %v426_v11, %v323_v10 }
  0xd3   : > { %v569_v18 = vadd.f32 %v561_v13, %v553_v12  ;;  %629 = vst.msk [vmem:[%s978_s30 + $0x30] sm:$0xff] %vm345_vm0, %v619_v17 }
  0xd4   : > { %v538_v21 = vadd.f32 %v530_v16, %v522_v15 }
  0xd5   : > { %577 = vst.msk [vmem:[%s1015_s22 + $0x28] sm:$0xff] %vm345_vm0, %v569_v18  ;;  %v468_v25 = vpop.f32.mrf.mxu2 }
  0xd6   : > { %546 = vst.msk [vmem:[%s985_s10 + $0x30] sm:$0xff] %vm345_vm0, %v538_v21  ;;  %v511_v29 = vpop.f32.mrf.mxu3  ;;  %v469_v31 = vadd.f32 %v990_v37, %v468_v25 }
  0xd7   : > { %v512_v32 = vadd.f32 %v995_v38, %v511_v29  ;;  %v427_v23 = vpop.f32.mrf.mxu1 }
  0xd8   : > { %v428_v27 = vadd.f32 %v955_v24, %v427_v23  ;;  %v554_v34 = vmul.f32 %v469_v31, %v331_v7  ;;  %v620_v36 = vpop.f32.mrf.mxu0 }
  0xd9   : > { %v562_v35 = vmul.f32 %v512_v32, %v323_v10  ;;  %v621_v41 = vadd.f32 %v965_v28, %v620_v36 }
  0xda   : > { %v531_v40 = vmul.f32 %v428_v27, %v324_v33 }
  0xdb   : > { %v570_v42 = vadd.f32 %v562_v35, %v554_v34  ;;  %630 = vst.msk [vmem:[%s978_s30 + $0x38] sm:$0xff] %vm345_vm0, %v621_v41 }
  0xdc   : > { %v539_v19 = vadd.f32 %v531_v40, %v523_v39 }
  0xdd   : > { %578 = vst.msk [vmem:[%s1015_s22 + $0x30] sm:$0xff] %vm345_vm0, %v570_v42  ;;  %v470_v43 = vpop.f32.mrf.mxu2 }
  0xde   : > { %547 = vst.msk [vmem:[%s985_s10 + $0x38] sm:$0xff] %vm345_vm0, %v539_v19  ;;  %v513_v44 = vpop.f32.mrf.mxu3  ;;  %v471_v24 = vadd.f32 %v990_v37, %v470_v43 }
  0xdf   : > { %v514_v45 = vadd.f32 %v995_v38, %v513_v44 }
  0xe0   : > { %v555_v46 = vmul.f32 %v471_v24, %v332_v30 }
  0xe1   : > { %v563_v47 = vmul.f32 %v514_v45, %v324_v33 }
  0xe3   : > { %v571_v48 = vadd.f32 %v563_v47, %v555_v46 }
  0xe5   : > { %579 = vst.msk [vmem:[%s1015_s22 + $0x38] sm:$0xff] %vm345_vm0, %v571_v48 }
  0xe6 PF: > { %s18_s24 = sadd.s32 1, %s850_s24  }
  0xe7   : > { %p15_p4 = scmp.ge.s32.totalorder %s18_s24, 4  }
  0xe9   :  { %17 = sbr.rel (!%p15_p4) target bundleno = 1 (0x1), region = 102 }

// kernel: bottleneck_vrc_forward.6
= control target key start
LH: loop header
LB: loop body
LE: loop exit
PB: predicated region body
PF: predicated region fallthrough
CT: control target
= control target key end

     0   :  { %s2429_s15 = smov 0   ;;  %s3200_s0 = inlined_call_operand.vmem [shape: f32[2,32,8,4], index: 0, kind: input, shape index: {}]   ;;  %s3201_s1 = inlined_call_operand.vmem [shape: f32[2,32,8,4], index: 1, kind: input, shape index: {}]   ;;  %s3202_s2 = inlined_call_operand.vmem [shape: f32[2,32,8,4], index: 2, kind: input, shape index: {}]   ;;  %s3203_s3 = inlined_call_operand.vmem [shape: f32[32,8,8], index: 3, kind: input, shape index: {}]   ;;  %s3204_s4 = inlined_call_operand.vmem [shape: f32[2,32,8,4], index: 4, kind: output, shape index: {}]  }
   0x1 LB: > { %s2177_s16 = sadd.s32 4294967295, %s2402_s15   ;;  %p2181_p0 = scmp.ge.s32.totalorder %s2402_s15, 1  ;;  %s2402_s15 = sphi %s2429_s15, %s14_s15  }
   0x2   : > { %p182_p1 = scmp.lt.s32.totalorder %s2402_s15, 3 }
   0x4   : > { %p183_p2 = pnand %p2181_p0, %p182_p1 }
   0x5   : > { %p218_p3 = scmp.lt.s32.totalorder (!%p183_p2), %s2177_s16, 1 }
   0x6   : > { %186 = sbr.rel (%p183_p2) target bundleno = 754 (0x2f2), region = 36 }
   0xb   : > { %s3206_s16 = smov (!%p218_p3, %s2177_s16), 1  ;;  %vm399_vm0 = vcmask 31744   ;;  %vm1008_vm1 = vcmask 64512   ;;  %vm1460_vm2 = vcmask 1043456  }
   0xc   : > { %s2437_s17 = sshll.u32 %s3206_s16, 8 }
   0xd   : > { %s2443_s20 = scalar_lea.vmem %s3201_s1, %s2437_s17  ;;  %s2449_s23 = scalar_lea.vmem %s3200_s0, %s2437_s17 }
   0xe   : > { %v303_v0 = vld [vmem:[%s2443_s20] sm:$0xff]  ;;  %v304_v1 = vld [vmem:[%s2443_s20 + $0x8] sm:$0xff]  ;;  %v305_v2 = vld [vmem:[%s2443_s20 + $0x10] sm:$0xff]  ;;  %s2943_s18 = scalar_lea.vmem %s3202_s2, %s2437_s17 }
   0xf   : > { %v335_v3 = vpack.c.bf16 %v303_v0, %v303_v0  ;;  %v336_v4 = vpack.c.bf16 %v304_v1, %v304_v1  ;;  %v337_v5 = vpack.c.bf16 %v305_v2, %v305_v2  ;;  %v306_v6 = vld [vmem:[%s2443_s20 + $0x18] sm:$0xff]  ;;  %v239_v7 = vld [vmem:[%s2449_s23] sm:$0xff]  ;;  %v240_v9 = vld [vmem:[%s2449_s23 + $0x8] sm:$0xff] }
  0x10   : > { %v338_v8 = vpack.c.bf16 %v306_v6, %v306_v6  ;;  %v241_v10 = vld [vmem:[%s2449_s23 + $0x10] sm:$0xff]  ;;  %v307_v11 = vld [vmem:[%s2443_s20 + $0x20] sm:$0xff]  ;;  %v310_v16 = vld [vmem:[%s2443_s20 + $0x38] sm:$0xff]  ;;  %v271_v22 = vpack.c.bf16 %v239_v7, %v239_v7  ;;  %v272_v27 = vpack.c.bf16 %v240_v9, %v240_v9 }
  0x11   : > { %v404_v12 = vsel %vm399_vm0, %v335_v3, 0  ;;  %v423_v13 = vsel %vm399_vm0, %v336_v4, 0  ;;  %v442_v14 = vsel %vm399_vm0, %v337_v5, 0  ;;  %v309_v15 = vld [vmem:[%s2443_s20 + $0x30] sm:$0xff]  ;;  %v308_v17 = vld [vmem:[%s2443_s20 + $0x28] sm:$0xff]  ;;  %v242_v19 = vld [vmem:[%s2449_s23 + $0x18] sm:$0xff]  ;;  %v339_v20 = vpack.c.bf16 %v307_v11, %v307_v11 }
  0x12   : > { %413 = vmatpush.bf16.xpose.msra.mxu0 %v404_v12  ;;  %432 = vmatpush.bf16.xpose.msra.mxu1 %v423_v13  ;;  %v461_v18 = vsel %vm399_vm0, %v338_v8, 0  ;;  %v341_v21 = vpack.c.bf16 %v309_v15, %v309_v15  ;;  %v342_v23 = vpack.c.bf16 %v310_v16, %v310_v16  ;;  %v340_v24 = vpack.c.bf16 %v308_v17, %v308_v17  ;;  %v311_v25 = vld [vmem:[%s2443_s20 + $0x40] sm:$0xff]  ;;  %v313_v26 = vld [vmem:[%s2443_s20 + $0x50] sm:$0xff]  ;;  %v314_v31 = vld [vmem:[%s2443_s20 + $0x58] sm:$0xff] }
  0x13   : > { %451 = vmatpush.bf16.xpose.msra.mxu2 %v442_v14  ;;  %470 = vmatpush.bf16.xpose.msra.mxu3 %v461_v18  ;;  %v273_v28 = vpack.c.bf16 %v241_v10, %v241_v10  ;;  %v480_v29 = vsel %vm399_vm0, %v339_v20, 0  ;;  %v312_v32 = vld [vmem:[%s2443_s20 + $0x48] sm:$0xff]  ;;  %v274_v33 = vpack.c.bf16 %v242_v19, %v242_v19  ;;  %v343_v36 = vpack.c.bf16 %v311_v25, %v311_v25  ;;  %v243_v44 = vld [vmem:[%s2449_s23 + $0x20] sm:$0xff]  ;;  %v317_v45 = vld [vmem:[%s2443_s20 + $0x70] sm:$0xff] }
  0x14   : > { %v518_v30 = vsel %vm399_vm0, %v341_v21, 0  ;;  %v537_v34 = vsel %vm399_vm0, %v342_v23, 0  ;;  %v499_v35 = vsel %vm399_vm0, %v340_v24, 0  ;;  %v345_v37 = vpack.c.bf16 %v313_v26, %v313_v26  ;;  %v315_v46 = vld [vmem:[%s2443_s20 + $0x60] sm:$0xff]  ;;  %v244_v47 = vld [vmem:[%s2449_s23 + $0x28] sm:$0xff]  ;;  %v318_v49 = vld [vmem:[%s2443_s20 + $0x78] sm:$0xff] }
  0x15   : > { %v346_v38 = vpack.c.bf16 %v314_v31, %v314_v31  ;;  %v344_v39 = vpack.c.bf16 %v312_v32, %v312_v32  ;;  %v556_v40 = vsel %vm399_vm0, %v343_v36, 0  ;;  %v316_v48 = vld [vmem:[%s2443_s20 + $0x68] sm:$0xff]  ;;  %v245_v50 = vld [vmem:[%s2449_s23 + $0x30] sm:$0xff]  ;;  %v246_v51 = vld [vmem:[%s2449_s23 + $0x38] sm:$0xff]  ;;  %v349_v52 = vpack.c.bf16 %v317_v45, %v317_v45 }
  0x16   : > { %v594_v41 = vsel %vm399_vm0, %v345_v37, 0  ;;  %v347_v53 = vpack.c.bf16 %v315_v46, %v315_v46  ;;  %v275_v54 = vpack.c.bf16 %v243_v44, %v243_v44  ;;  %v276_v55 = vpack.c.bf16 %v244_v47, %v244_v47  ;;  %v247_v0 = vld [vmem:[%s2449_s23 + $0x40] sm:$0xff]  ;;  %v321_v1 = vld [vmem:[%s2443_s20 + $0x90] sm:$0xff]  ;;  %v248_v3 = vld [vmem:[%s2449_s23 + $0x48] sm:$0xff] }
  0x17   : > { %v613_v42 = vsel %vm399_vm0, %v346_v38, 0  ;;  %v575_v43 = vsel %vm399_vm0, %v344_v39, 0  ;;  %v348_v56 = vpack.c.bf16 %v316_v48, %v316_v48  ;;  %v350_v57 = vpack.c.bf16 %v318_v49, %v318_v49  ;;  %v319_v2 = vld [vmem:[%s2443_s20 + $0x80] sm:$0xff]  ;;  %v320_v4 = vld [vmem:[%s2443_s20 + $0x88] sm:$0xff]  ;;  %v322_v5 = vld [vmem:[%s2443_s20 + $0x98] sm:$0xff] }
  0x18   : > { %v277_v58 = vpack.c.bf16 %v245_v50, %v245_v50  ;;  %v278_v59 = vpack.c.bf16 %v246_v51, %v246_v51  ;;  %v670_v60 = vsel %vm399_vm0, %v349_v52, 0  ;;  %v632_v61 = vsel %vm399_vm0, %v347_v53, 0  ;;  %v249_v6 = vld [vmem:[%s2449_s23 + $0x50] sm:$0xff]  ;;  %v250_v7 = vld [vmem:[%s2449_s23 + $0x58] sm:$0xff]  ;;  %v252_v23 = vld [vmem:[%s2449_s23 + $0x68] sm:$0xff] }
  0x19   : > { %2190 = vmatmul.msk.bf16.vlgmr.msra.gmra.mxu0 %vm399_vm0, %v271_v22  ;;  %2191 = vmatmul.msk.bf16.vlgmr.msra.gmra.mxu1 %vm399_vm0, %v272_v27  ;;  %v651_v62 = vsel %vm399_vm0, %v348_v56, 0  ;;  %v689_v63 = vsel %vm399_vm0, %v350_v57, 0  ;;  %v353_v8 = vpack.c.bf16 %v321_v1, %v321_v1  ;;  %v351_v9 = vpack.c.bf16 %v319_v2, %v319_v2  ;;  %v325_v20 = vld [vmem:[%s2443_s20 + $0xb0] sm:$0xff]  ;;  %v326_v21 = vld [vmem:[%s2443_s20 + $0xb8] sm:$0xff]  ;;  %v251_v22 = vld [vmem:[%s2449_s23 + $0x60] sm:$0xff] }
  0x1a   : > { %489 = vmatpush.bf16.xpose.msrb.mxu0 %v480_v29  ;;  %508 = vmatpush.bf16.xpose.msrb.mxu1 %v499_v35  ;;  %v279_v10 = vpack.c.bf16 %v247_v0, %v247_v0  ;;  %v280_v11 = vpack.c.bf16 %v248_v3, %v248_v3  ;;  %v352_v12 = vpack.c.bf16 %v320_v4, %v320_v4  ;;  %v253_v24 = vld [vmem:[%s2449_s23 + $0x70] sm:$0xff]  ;;  %v254_v25 = vld [vmem:[%s2449_s23 + $0x78] sm:$0xff]  ;;  %v256_v35 = vld [vmem:[%s2449_s23 + $0x88] sm:$0xff] }
  0x1b   : > { %527 = vmatpush.bf16.xpose.msrb.mxu2 %v518_v30  ;;  %546 = vmatpush.bf16.xpose.msrb.mxu3 %v537_v34  ;;  %v354_v13 = vpack.c.bf16 %v322_v5, %v322_v5  ;;  %v281_v14 = vpack.c.bf16 %v249_v6, %v249_v6  ;;  %v282_v15 = vpack.c.bf16 %v250_v7, %v250_v7  ;;  %v746_v16 = vsel %vm399_vm0, %v353_v8, 0  ;;  %v255_v34 = vld [vmem:[%s2449_s23 + $0x80] sm:$0xff]  ;;  %v257_v36 = vld [vmem:[%s2449_s23 + $0x90] sm:$0xff]  ;;  %v258_v37 = vld [vmem:[%s2449_s23 + $0x98] sm:$0xff] }
  0x1c   : > { %2192 = vmatmul.msk.bf16.vlgmr.msra.gmra.mxu2 %vm399_vm0, %v273_v28  ;;  %2193 = vmatmul.msk.bf16.vlgmr.msra.gmra.mxu3 %vm399_vm0, %v274_v33  ;;  %v708_v17 = vsel %vm399_vm0, %v351_v9, 0  ;;  %v727_v18 = vsel %vm399_vm0, %v352_v12, 0  ;;  %v357_v26 = vpack.c.bf16 %v325_v20, %v325_v20  ;;  %v358_v27 = vpack.c.bf16 %v326_v21, %v326_v21  ;;  %v324_v46 = vld [vmem:[%s2443_s20 + $0xa8] sm:$0xff]  ;;  %v329_v48 = vld [vmem:[%s2443_s20 + $0xd0] sm:$0xff]  ;;  %v323_v52 = vld [vmem:[%s2443_s20 + $0xa0] sm:$0xff] }
  0x1d   : > { %v765_v19 = vsel %vm399_vm0, %v354_v13, 0  ;;  %v283_v28 = vpack.c.bf16 %v251_v22, %v251_v22  ;;  %v284_v29 = vpack.c.bf16 %v252_v23, %v252_v23  ;;  %v285_v30 = vpack.c.bf16 %v253_v24, %v253_v24  ;;  %v260_v53 = vld [vmem:[%s2449_s23 + $0xa8] sm:$0xff]  ;;  %v265_v56 = vld [vmem:[%s2449_s23 + $0xd0] sm:$0xff]  ;;  %v330_v57 = vld [vmem:[%s2443_s20 + $0xd8] sm:$0xff] }
  0x1e   : > { %v286_v31 = vpack.c.bf16 %v254_v25, %v254_v25  ;;  %v822_v32 = vsel %vm399_vm0, %v357_v26, 0  ;;  %v841_v33 = vsel %vm399_vm0, %v358_v27, 0  ;;  %v287_v38 = vpack.c.bf16 %v255_v34, %v255_v34  ;;  %v259_v2 = vld [vmem:[%s2449_s23 + $0xa0] sm:$0xff]  ;;  %v368_v3 = vld [vmem:[%s3203_s3 + $0x8] sm:$0xff]  ;;  %v266_v6 = vld [vmem:[%s2449_s23 + $0xd8] sm:$0xff] }
  0x1f   : > { %v288_v39 = vpack.c.bf16 %v256_v35, %v256_v35  ;;  %v356_v47 = vpack.c.bf16 %v324_v46, %v324_v46  ;;  %v361_v50 = vpack.c.bf16 %v329_v48, %v329_v48  ;;  %v291_v4 = vpack.c.bf16 %v259_v2, %v259_v2  ;;  %v369_v9 = vld [vmem:[%s3203_s3 + $0x10] sm:$0xff]  ;;  %v370_v21 = vld [vmem:[%s3203_s3 + $0x18] sm:$0xff]  ;;  %v372_v25 = vld [vmem:[%s3203_s3 + $0x28] sm:$0xff] }
  0x20   : > { %v298_v7 = vpack.c.bf16 %v266_v6, %v266_v6  ;;  %v376_v2 = vld [vmem:[%s3203_s3 + $0x48] sm:$0xff] }
  0x21   : > { %v803_v49 = vsel %vm399_vm0, %v356_v47, 0  ;;  %v898_v51 = vsel %vm399_vm0, %v361_v50, 0 }
  0x22   : > { %565 = vmatpush.bf16.xpose.msra.mxu0 %v556_v40  ;;  %584 = vmatpush.bf16.xpose.msra.mxu1 %v575_v43  ;;  %v289_v40 = vpack.c.bf16 %v257_v36, %v257_v36  ;;  %v262_v43 = vld [vmem:[%s2449_s23 + $0xb8] sm:$0xff]  ;;  %v371_v36 = vld [vmem:[%s3203_s3 + $0x20] sm:$0xff] }
  0x23   : > { %603 = vmatpush.bf16.xpose.msra.mxu2 %v594_v41  ;;  %622 = vmatpush.bf16.xpose.msra.mxu3 %v613_v42  ;;  %v290_v41 = vpack.c.bf16 %v258_v37, %v258_v37  ;;  %v261_v42 = vld [vmem:[%s2449_s23 + $0xb0] sm:$0xff]  ;;  %v294_v45 = vpack.c.bf16 %v262_v43, %v262_v43 }
  0x24   : > { %v293_v44 = vpack.c.bf16 %v261_v42, %v261_v42  ;;  %v373_v42 = vld [vmem:[%s3203_s3 + $0x30] sm:$0xff] }
  0x29   : > { %2194 = vmatmul.msk.bf16.vlgmr.msrb.gmra.mxu0 %vm399_vm0, %v275_v54  ;;  %2195 = vmatmul.msk.bf16.vlgmr.msrb.gmra.mxu1 %vm399_vm0, %v276_v55  ;;  %v355_v54 = vpack.c.bf16 %v323_v52, %v323_v52  ;;  %v292_v55 = vpack.c.bf16 %v260_v53, %v260_v53  ;;  %v374_v53 = vld [vmem:[%s3203_s3 + $0x38] sm:$0xff] }
  0x2a   : > { %641 = vmatpush.bf16.xpose.msrb.mxu0 %v632_v61  ;;  %660 = vmatpush.bf16.xpose.msrb.mxu1 %v651_v62  ;;  %v367_v61 = vld [vmem:[%s3203_s3] sm:$0xff] }
  0x2c   : > { %2196 = vmatmul.msk.bf16.vlgmr.msrb.gmra.mxu2 %vm399_vm0, %v277_v58  ;;  %2197 = vmatmul.msk.bf16.vlgmr.msrb.gmra.mxu3 %vm399_vm0, %v278_v59  ;;  %v784_v58 = vsel %vm399_vm0, %v355_v54, 0  ;;  %v297_v59 = vpack.c.bf16 %v265_v56, %v265_v56  ;;  %v269_v54 = vld [vmem:[%s2449_s23 + $0xf0] sm:$0xff] }
  0x2d   : > { %679 = vmatpush.bf16.xpose.msrb.mxu2 %v670_v60  ;;  %698 = vmatpush.bf16.xpose.msrb.mxu3 %v689_v63  ;;  %v362_v60 = vpack.c.bf16 %v330_v57, %v330_v57  ;;  %v301_v56 = vpack.c.bf16 %v269_v54, %v269_v54  ;;  %v384_v54 = vld [vmem:[%s3203_s3 + $0x88] sm:$0xff] }
  0x2f   : > { %v917_v62 = vsel %vm399_vm0, %v362_v60, 0 }
  0x39   : > { %2198 = vmatmul.msk.bf16.vlgmr.msra.gmra.mxu0 %vm399_vm0, %v279_v10  ;;  %2199 = vmatmul.msk.bf16.vlgmr.msra.gmra.mxu1 %vm399_vm0, %v280_v11 }
  0x3a   : > { %717 = vmatpush.bf16.xpose.msra.mxu0 %v708_v17  ;;  %736 = vmatpush.bf16.xpose.msra.mxu1 %v727_v18  ;;  %v328_v17 = vld [vmem:[%s2443_s20 + $0xc8] sm:$0xff] }
  0x3b   : > { %v360_v20 = vpack.c.bf16 %v328_v17, %v328_v17 }
  0x3c   : > { %2200 = vmatmul.msk.bf16.vlgmr.msra.gmra.mxu2 %vm399_vm0, %v281_v14  ;;  %2201 = vmatmul.msk.bf16.vlgmr.msra.gmra.mxu3 %vm399_vm0, %v282_v15 }
  0x3d   : > { %755 = vmatpush.bf16.xpose.msra.mxu2 %v746_v16  ;;  %774 = vmatpush.bf16.xpose.msra.mxu3 %v765_v19  ;;  %v327_v16 = vld [vmem:[%s2443_s20 + $0xc0] sm:$0xff]  ;;  %v879_v23 = vsel %vm399_vm0, %v360_v20, 0 }
  0x3e   : > { %v359_v19 = vpack.c.bf16 %v327_v16, %v327_v16 }
  0x40   : > { %v860_v22 = vsel %vm399_vm0, %v359_v19, 0 }
  0x49   : > { %2202 = vmatmul.msk.bf16.vlgmr.msrb.gmra.mxu0 %vm399_vm0, %v283_v28  ;;  %2203 = vmatmul.msk.bf16.vlgmr.msrb.gmra.mxu1 %vm399_vm0, %v284_v29 }
  0x4a   : > { %812 = vmatpush.bf16.xpose.msrb.mxu1 %v803_v49  ;;  %793 = vmatpush.bf16.xpose.msrb.mxu0 %v784_v58 }
  0x4c   : > { %2204 = vmatmul.msk.bf16.vlgmr.msrb.gmra.mxu2 %vm399_vm0, %v285_v30  ;;  %2205 = vmatmul.msk.bf16.vlgmr.msrb.gmra.mxu3 %vm399_vm0, %v286_v31  ;;  %v263_v31 = vld [vmem:[%s2449_s23 + $0xc0] sm:$0xff] }
  0x4d   : > { %831 = vmatpush.bf16.xpose.msrb.mxu2 %v822_v32  ;;  %850 = vmatpush.bf16.xpose.msrb.mxu3 %v841_v33  ;;  %v264_v32 = vld [vmem:[%s2449_s23 + $0xc8] sm:$0xff]  ;;  %v295_v34 = vpack.c.bf16 %v263_v31, %v263_v31 }
  0x4e   : > { %v296_v35 = vpack.c.bf16 %v264_v32, %v264_v32 }
  0x59   : > { %2206 = vmatmul.msk.bf16.vlgmr.msra.gmra.mxu0 %vm399_vm0, %v287_v38  ;;  %2207 = vmatmul.msk.bf16.vlgmr.msra.gmra.mxu1 %vm399_vm0, %v288_v39  ;;  %v333_v38 = vld [vmem:[%s2443_s20 + $0xf0] sm:$0xff]  ;;  %v334_v39 = vld [vmem:[%s2443_s20 + $0xf8] sm:$0xff] }
  0x5a   : > { %869 = vmatpush.bf16.xpose.msra.mxu0 %v860_v22  ;;  %888 = vmatpush.bf16.xpose.msra.mxu1 %v879_v23  ;;  %v268_v22 = vld [vmem:[%s2449_s23 + $0xe8] sm:$0xff] }
  0x5c   : > { %2208 = vmatmul.msk.bf16.vlgmr.msra.gmra.mxu2 %vm399_vm0, %v289_v40  ;;  %2209 = vmatmul.msk.bf16.vlgmr.msra.gmra.mxu3 %vm399_vm0, %v290_v41  ;;  %v365_v40 = vpack.c.bf16 %v333_v38, %v333_v38  ;;  %v366_v41 = vpack.c.bf16 %v334_v39, %v334_v39 }
  0x5d   : > { %907 = vmatpush.bf16.xpose.msra.mxu2 %v898_v51  ;;  %926 = vmatpush.bf16.xpose.msra.mxu3 %v917_v62 }
  0x69   : > { %2211 = vmatmul.msk.bf16.vlgmr.msrb.gmra.mxu1 %vm399_vm0, %v292_v55  ;;  %2210 = vmatmul.msk.bf16.vlgmr.msrb.gmra.mxu0 %vm399_vm0, %v291_v4  ;;  %v270_v55 = vld [vmem:[%s2449_s23 + $0xf8] sm:$0xff]  ;;  %v332_v4 = vld [vmem:[%s2443_s20 + $0xe8] sm:$0xff] }
  0x6a   : > { %v302_v57 = vpack.c.bf16 %v270_v55, %v270_v55 }
  0x6c   : > { %2212 = vmatmul.msk.bf16.vlgmr.msrb.gmra.mxu2 %vm399_vm0, %v293_v44  ;;  %2213 = vmatmul.msk.bf16.vlgmr.msrb.gmra.mxu3 %vm399_vm0, %v294_v45  ;;  %v974_v44 = vsel %vm399_vm0, %v365_v40, 0  ;;  %v993_v45 = vsel %vm399_vm0, %v366_v41, 0  ;;  %v381_v40 = vld [vmem:[%s3203_s3 + $0x70] sm:$0xff]  ;;  %v382_v41 = vld [vmem:[%s3203_s3 + $0x78] sm:$0xff] }
  0x6d   : > { %983 = vmatpush.bf16.xpose.msrb.mxu2 %v974_v44  ;;  %1002 = vmatpush.bf16.xpose.msrb.mxu3 %v993_v45 }
  0x79   : > { %2214 = vmatmul.msk.bf16.vlgmr.msra.gmra.mxu0 %vm399_vm0, %v295_v34  ;;  %2215 = vmatmul.msk.bf16.vlgmr.msra.gmra.mxu1 %vm399_vm0, %v296_v35 }
  0x7c   : > { %2216 = vmatmul.msk.bf16.vlgmr.msra.gmra.mxu2 %vm399_vm0, %v297_v59  ;;  %2217 = vmatmul.msk.bf16.vlgmr.msra.gmra.mxu3 %vm399_vm0, %v298_v7  ;;  %v375_v59 = vld [vmem:[%s3203_s3 + $0x40] sm:$0xff]  ;;  %v364_v7 = vpack.c.bf16 %v332_v4, %v332_v4 }
  0x8c   : > { %2220 = vmatmul.msk.bf16.vlgmr.msrb.gmra.mxu2 %vm399_vm0, %v301_v56  ;;  %2221 = vmatmul.msk.bf16.vlgmr.msrb.gmra.mxu3 %vm399_vm0, %v302_v57 }
  0x96   : > { %v415_v63 = vpop.f32.mrf.mxu0  ;;  %v434_v0 = vpop.f32.mrf.mxu1 }
  0x97   : > { %v2554_v1 = vadd.f32 %v415_v63, %v367_v61  ;;  %v2564_v8 = vadd.f32 %v434_v0, %v368_v3  ;;  %v331_v3 = vld [vmem:[%s2443_s20 + $0xe0] sm:$0xff]  ;;  %s3092_s20 = scalar_lea.vmem %s3204_s4, %s2437_s17 }
  0x98   : > { %v363_v6 = vpack.c.bf16 %v331_v3, %v331_v3  ;;  %v386_v3 = vld [vmem:[%s3203_s3 + $0x98] sm:$0xff] }
  0x99   : > { %v1009_v5 = vsel %vm1008_vm1, %v2554_v1, -inf  ;;  %v1012_v15 = vsel %vm1008_vm1, %v2564_v8, -inf }
  0x9a   : > { %1010 = vmax.xlane.f32.xlu1 %v1009_v5 }
  0x9e   : > { %v417_v13 = vpop.f32.mrf.mxu0  ;;  %v436_v14 = vpop.f32.mrf.mxu1 }
  0x9f   : > { %v453_v10 = vpop.f32.mrf.mxu2  ;;  %v472_v11 = vpop.f32.mrf.mxu3  ;;  %v955_v13 = vsel %vm399_vm0, %v364_v7, 0  ;;  %v378_v14 = vld [vmem:[%s3203_s3 + $0x58] sm:$0xff] }
  0xa0   : > { %v2570_v12 = vadd.f32 %v453_v10, %v369_v9  ;;  %v2583_v24 = vadd.f32 %v472_v11, %v370_v21  ;;  %v936_v11 = vsel %vm399_vm0, %v363_v6, 0  ;;  %964 = vmatpush.bf16.xpose.msrb.mxu1 %v955_v13  ;;  %v267_v21 = vld [vmem:[%s2449_s23 + $0xe0] sm:$0xff] }
  0xa1   : > { %945 = vmatpush.bf16.xpose.msrb.mxu0 %v936_v11 }
  0xa2   : > { %v1015_v18 = vsel %vm1008_vm1, %v2570_v12, -inf  ;;  %1013 = vmax.xlane.f32.xlu1 %v1012_v15  ;;  %v1018_v33 = vsel %vm1008_vm1, %v2583_v24, -inf }
  0xa3   : > { %1016 = vmax.xlane.f32.xlu0 %v1015_v18 }
  0xa6   : > { %v491_v28 = vpop.f32.mrf.mxu0  ;;  %v510_v29 = vpop.f32.mrf.mxu1 }
  0xa7   : > { %v455_v26 = vpop.f32.mrf.mxu2  ;;  %v474_v27 = vpop.f32.mrf.mxu3  ;;  %v2588_v30 = vadd.f32 %v510_v29, %v372_v25  ;;  %v2606_v43 = vadd.f32 %v491_v28, %v371_v36  ;;  %v299_v25 = vpack.c.bf16 %v267_v21, %v267_v21  ;;  %v379_v29 = vld [vmem:[%s3203_s3 + $0x60] sm:$0xff]  ;;  %v380_v36 = vld [vmem:[%s3203_s3 + $0x68] sm:$0xff] }
  0xa8   : > { %v300_v26 = vpack.c.bf16 %v268_v22, %v268_v22  ;;  %v377_v27 = vld [vmem:[%s3203_s3 + $0x50] sm:$0xff] }
  0xa9   : > { %v1024_v37 = vsel %vm1008_vm1, %v2588_v30, -inf  ;;  %v1021_v52 = vsel %vm1008_vm1, %v2606_v43, -inf  ;;  %2218 = vmatmul.msk.bf16.vlgmr.msrb.gmra.mxu0 %vm399_vm0, %v299_v25 }
  0xaa   : > { %1025 = vmax.xlane.f32.xlu1 %v1024_v37  ;;  %2219 = vmatmul.msk.bf16.vlgmr.msrb.gmra.mxu1 %vm399_vm0, %v300_v26 }
  0xab   : > { %1019 = vmax.xlane.f32.xlu0 %v1018_v33 }
  0xae   : > { %v493_v49 = vpop.f32.mrf.mxu0  ;;  %v512_v50 = vpop.f32.mrf.mxu1 }
  0xaf   : > { %v529_v46 = vpop.f32.mrf.mxu2  ;;  %v548_v47 = vpop.f32.mrf.mxu3 }
  0xb0   : > { %v2610_v48 = vadd.f32 %v529_v46, %v373_v42  ;;  %v2621_v58 = vadd.f32 %v548_v47, %v374_v53  ;;  %v383_v53 = vld [vmem:[%s3203_s3 + $0x80] sm:$0xff] }
  0xb2   : > { %v1027_v51 = vsel %vm1008_vm1, %v2610_v48, -inf  ;;  %v1030_v5 = vsel %vm1008_vm1, %v2621_v58, -inf }
  0xb3   : > { %1028 = vmax.xlane.f32.xlu2 %v1027_v51  ;;  %1022 = vmax.xlane.f32.xlu0 %v1021_v52 }
  0xb6   : > { %v567_v62 = vpop.f32.mrf.mxu0  ;;  %v586_v63 = vpop.f32.mrf.mxu1 }
  0xb7   : > { %v531_v60 = vpop.f32.mrf.mxu2  ;;  %v550_v61 = vpop.f32.mrf.mxu3  ;;  %v2628_v0 = vadd.f32 %v567_v62, %v375_v59  ;;  %v2639_v10 = vadd.f32 %v586_v63, %v376_v2  ;;  %v385_v2 = vld [vmem:[%s3203_s3 + $0x90] sm:$0xff] }
  0xb9   : > { %v1033_v9 = vsel %vm1008_vm1, %v2628_v0, -inf  ;;  %v1036_v20 = vsel %vm1008_vm1, %v2639_v10, -inf }
  0xba   : > { %1034 = vmax.xlane.f32.xlu1 %v1033_v9 }
  0xbb   : > { %1031 = vmax.xlane.f32.xlu2 %v1030_v5 }
  0xbe   : > { %v569_v18 = vpop.f32.mrf.mxu0  ;;  %v588_v19 = vpop.f32.mrf.mxu1 }
  0xbf   : > { %v605_v15 = vpop.f32.mrf.mxu2  ;;  %v624_v16 = vpop.f32.mrf.mxu3  ;;  %v389_v18 = vld [vmem:[%s3203_s3 + $0xb0] sm:$0xff]  ;;  %v390_v19 = vld [vmem:[%s3203_s3 + $0xb8] sm:$0xff] }
  0xc0   : > { %v2646_v17 = vadd.f32 %v624_v16, %v378_v14  ;;  %v2659_v28 = vadd.f32 %v605_v15, %v377_v27 }
  0xc2   : > { %v1042_v23 = vsel %vm1008_vm1, %v2646_v17, -inf  ;;  %v1039_v37 = vsel %vm1008_vm1, %v2659_v28, -inf }
  0xc3   : > { %1037 = vmax.xlane.f32.xlu2 %v1036_v20  ;;  %1043 = vmax.xlane.f32.xlu0 %v1042_v23 }
  0xc6   : > { %v643_v33 = vpop.f32.mrf.mxu0  ;;  %v662_v34 = vpop.f32.mrf.mxu1 }
  0xc7   : > { %v607_v31 = vpop.f32.mrf.mxu2  ;;  %v626_v32 = vpop.f32.mrf.mxu3  ;;  %v2664_v35 = vadd.f32 %v643_v33, %v379_v29  ;;  %v2673_v39 = vadd.f32 %v662_v34, %v380_v36 }
  0xc9   : > { %v1045_v38 = vsel %vm1008_vm1, %v2664_v35, -inf  ;;  %v1048_v50 = vsel %vm1008_vm1, %v2673_v39, -inf }
  0xca   : > { %1046 = vmax.xlane.f32.xlu1 %v1045_v38 }
  0xcb   : > { %1040 = vmax.xlane.f32.xlu2 %v1039_v37 }
  0xce   : > { %v645_v47 = vpop.f32.mrf.mxu0  ;;  %v664_v49 = vpop.f32.mrf.mxu1 }
  0xcf   : > { %v681_v42 = vpop.f32.mrf.mxu2  ;;  %v700_v44 = vpop.f32.mrf.mxu3 }
  0xd0   : > { %v2681_v45 = vadd.f32 %v681_v42, %v381_v40  ;;  %v2683_v46 = vadd.f32 %v700_v44, %v382_v41 }
  0xd2   : > { %v1051_v51 = vsel %vm1008_vm1, %v2681_v45, -inf  ;;  %v1054_v52 = vsel %vm1008_vm1, %v2683_v46, -inf }
  0xd3   : > { %1049 = vmax.xlane.f32.xlu2 %v1048_v50  ;;  %1052 = vmax.xlane.f32.xlu0 %v1051_v51 }
  0xd4   : > { %1055 = vmax.xlane.f32.xlu1 %v1054_v52 }
  0xd6   : > { %v719_v57 = vpop.f32.mrf.mxu0  ;;  %v738_v59 = vpop.f32.mrf.mxu1 }
  0xd7   : > { %v683_v55 = vpop.f32.mrf.mxu2  ;;  %v702_v56 = vpop.f32.mrf.mxu3  ;;  %v2697_v60 = vadd.f32 %v719_v57, %v383_v53  ;;  %v2699_v61 = vadd.f32 %v738_v59, %v384_v54 }
  0xd9   : > { %v1057_v62 = vsel %vm1008_vm1, %v2697_v60, -inf  ;;  %v1060_v63 = vsel %vm1008_vm1, %v2699_v61, -inf }
  0xdb   : > { %1058 = vmax.xlane.f32.xlu0 %v1057_v62 }
  0xdc   : > { %1061 = vmax.xlane.f32.xlu1 %v1060_v63 }
  0xde   : > { %v721_v9 = vpop.f32.mrf.mxu0  ;;  %v740_v11 = vpop.f32.mrf.mxu1 }
  0xdf   : > { %v757_v4 = vpop.f32.mrf.mxu2  ;;  %v776_v5 = vpop.f32.mrf.mxu3 }
  0xe0   : > { %v2711_v6 = vadd.f32 %v757_v4, %v385_v2  ;;  %v2713_v7 = vadd.f32 %v776_v5, %v386_v3 }
  0xe2   : > { %v1063_v13 = vsel %vm1008_vm1, %v2711_v6, -inf  ;;  %v1066_v14 = vsel %vm1008_vm1, %v2713_v7, -inf }
  0xe3   : > { %1064 = vmax.xlane.f32.xlu2 %v1063_v13  ;;  %1067 = vmax.xlane.f32.xlu0 %v1066_v14 }
  0xe6   : > { %v2734_v34 = vpop.f32.mrf.mxu1  ;;  %v2740_v47 = vpop.f32.mrf.mxu0 }
  0xe7   : > { %v759_v15 = vpop.f32.mrf.mxu2  ;;  %v778_v16 = vpop.f32.mrf.mxu3 }
  0xee   : > { %v816_v49 = vpop.f32.mrf.mxu1  ;;  %v797_v57 = vpop.f32.mrf.mxu0 }
  0xef   : > { %v833_v20 = vpop.f32.mrf.mxu2  ;;  %v852_v21 = vpop.f32.mrf.mxu3 }
  0xf0   : > { %v2725_v22 = vadd.f32 %v833_v20, %v389_v18  ;;  %v2727_v23 = vadd.f32 %v852_v21, %v390_v19 }
  0xf2   : > { %v1078_v25 = vsel %vm1008_vm1, %v2727_v23, -inf  ;;  %v1075_v26 = vsel %vm1008_vm1, %v2725_v22, -inf }
  0xf3   : > { %1079 = vmax.xlane.f32.xlu2 %v1078_v25  ;;  %1076 = vmax.xlane.f32.xlu1 %v1075_v26  ;;  %v388_v26 = vld [vmem:[%s3203_s3 + $0xa8] sm:$0xff] }
  0xf6   : > { %v2764_v14 = vpop.f32.mrf.mxu0  ;;  %v2766_v15 = vpop.f32.mrf.mxu1 }
  0xf7   : > { %v835_v27 = vpop.f32.mrf.mxu2  ;;  %v854_v29 = vpop.f32.mrf.mxu3 }
  0xff   : > { %v2744_v50 = vpop.f32.mrf.mxu2  ;;  %v2754_v59 = vpop.f32.mrf.mxu3 }
 0x107   : > { %v930_v16 = vpop.f32.mrf.mxu3 }
 0x10d   : > { %v1011_v31 = vpop.xlane.xlu1 %1010 }
 0x10e   : > { %v1105_v32 = vsub.f32 %v2554_v1, %v1011_v31 }
 0x110   : > { %v1137_v33 = vmul.f32 1.442695, %v1105_v32 }
 0x112   : > { %2268 = vpow2.f32 %v1137_v33  ;;  %v892_v33 = vpop.f32.mrf.mxu1 }
 0x115   : > { %v1014_v38 = vpop.xlane.xlu1 %1013 }
 0x116   : > { %v1017_v36 = vpop.xlane.xlu0 %1016  ;;  %v1106_v40 = vsub.f32 %v2564_v8, %v1014_v38 }
 0x117   : > { %v1107_v37 = vsub.f32 %v2570_v12, %v1017_v36  ;;  %v2786_v36 = vadd.f32 %v2734_v34, %v388_v26 }
 0x118   : > { %v2738_v42 = vpop.eup %2268  ;;  %v1139_v44 = vmul.f32 1.442695, %v1106_v40 }
 0x119   : > { %v1141_v41 = vmul.f32 1.442695, %v1107_v37  ;;  %v1201_v1 = vsel %vm1008_vm1, %v2738_v42, 0.0 }
 0x11a   : > { %1202 = vadd.xlane.f32.xlu0 %v1201_v1  ;;  %v393_v1 = vld [vmem:[%s3203_s3 + $0xd0] sm:$0xff] }
 0x11b   : > { %2270 = vpow2.f32 %v1141_v41  ;;  %v1072_v41 = vsel %vm1008_vm1, %v2786_v36, -inf }
 0x11c   : > { %2272 = vpow2.f32 %v1139_v44 }
 0x11d   : > { %v1026_v52 = vpop.xlane.xlu1 %1025 }
 0x11e   : > { %v1020_v51 = vpop.xlane.xlu0 %1019  ;;  %v1110_v54 = vsub.f32 %v2588_v30, %v1026_v52 }
 0x11f   : > { %v1108_v12 = vsub.f32 %v2583_v24, %v1020_v51  ;;  %v911_v24 = vpop.f32.mrf.mxu2 }
 0x120   : > { %v1147_v63 = vmul.f32 1.442695, %v1110_v54 }
 0x121   : > { %v2747_v8 = vpop.eup %2270  ;;  %v1143_v53 = vmul.f32 1.442695, %v1108_v12  ;;  %v387_v12 = vld [vmem:[%s3203_s3 + $0xa0] sm:$0xff] }
 0x122   : > { %v2750_v55 = vpop.eup %2272  ;;  %v1207_v56 = vsel %vm1008_vm1, %v2747_v8, 0.0 }
 0x123   : > { %2274 = vpow2.f32 %v1143_v53  ;;  %1208 = vadd.xlane.f32.xlu2 %v1207_v56  ;;  %v1204_v62 = vsel %vm1008_vm1, %v2750_v55, 0.0  ;;  %v2806_v53 = vpop.f32.mrf.mxu3  ;;  %v2811_v56 = vadd.f32 %v2744_v50, %v393_v1 }
 0x124   : > { %1205 = vadd.xlane.f32.xlu1 %v1204_v62  ;;  %2276 = vpow2.f32 %v1147_v63 }
 0x126   : > { %v1029_v2 = vpop.xlane.xlu2 %1028  ;;  %v1023_v3 = vpop.xlane.xlu0 %1022 }
 0x127   : > { %v1111_v30 = vsub.f32 %v2610_v48, %v1029_v2  ;;  %v1109_v4 = vsub.f32 %v2606_v43, %v1023_v3  ;;  %v2804_v52 = vpop.f32.mrf.mxu2  ;;  %v1087_v2 = vsel %vm1008_vm1, %v2811_v56, -inf }
 0x129   : > { %v2760_v5 = vpop.eup %2274  ;;  %v1149_v9 = vmul.f32 1.442695, %v1111_v30  ;;  %v1145_v11 = vmul.f32 1.442695, %v1109_v4 }
 0x12a   : > { %v1210_v13 = vsel %vm1008_vm1, %v2760_v5, 0.0  ;;  %v2768_v48 = vpop.eup %2276 }
 0x12b   : > { %2278 = vpow2.f32 %v1149_v9  ;;  %1211 = vadd.xlane.f32.xlu0 %v1210_v13  ;;  %v1216_v32 = vsel %vm1008_vm1, %v2768_v48, 0.0  ;;  %v2824_v9 = vpop.f32.mrf.mxu1  ;;  %v1006_v13 = vpop.f32.mrf.mxu3 }
 0x12c   : > { %2280 = vpow2.f32 %v1145_v11 }
 0x12d   : > { %v1035_v19 = vpop.xlane.xlu1 %1034 }
 0x12e   : > { %v1032_v18 = vpop.xlane.xlu2 %1031  ;;  %v1113_v20 = vsub.f32 %v2628_v0, %v1035_v19 }
 0x12f   : > { %v1112_v43 = vsub.f32 %v2621_v58, %v1032_v18  ;;  %v873_v58 = vpop.f32.mrf.mxu0  ;;  %v987_v11 = vpop.f32.mrf.mxu2 }
 0x130   : > { %v1153_v29 = vmul.f32 1.442695, %v1113_v20 }
 0x131   : > { %v2772_v21 = vpop.eup %2278  ;;  %v1151_v25 = vmul.f32 1.442695, %v1112_v43 }
 0x132   : > { %v2777_v27 = vpop.eup %2280  ;;  %v1219_v31 = vsel %vm1008_vm1, %v2772_v21, 0.0 }
 0x133   : > { %2282 = vpow2.f32 %v1151_v25  ;;  %v1213_v0 = vsel %vm1008_vm1, %v2777_v27, 0.0  ;;  %1220 = vadd.xlane.f32.xlu1 %v1219_v31  ;;  %1217 = vadd.xlane.f32.xlu0 %v1216_v32  ;;  %v968_v33 = vpop.f32.mrf.mxu1 }
 0x134   : > { %2284 = vpow2.f32 %v1153_v29  ;;  %1214 = vadd.xlane.f32.xlu2 %v1213_v0  ;;  %v391_v0 = vld [vmem:[%s3203_s3 + $0xc0] sm:$0xff] }
 0x136   : > { %v1038_v37 = vpop.xlane.xlu2 %1037  ;;  %v1044_v38 = vpop.xlane.xlu0 %1043 }
 0x137   : > { %v1116_v40 = vsub.f32 %v2646_v17, %v1044_v38  ;;  %v1114_v34 = vsub.f32 %v2639_v10, %v1038_v37  ;;  %v2814_v10 = vadd.f32 %v2740_v47, %v387_v12  ;;  %v2822_v4 = vpop.f32.mrf.mxu0 }
 0x139   : > { %v2791_v44 = vpop.eup %2282  ;;  %v1159_v49 = vmul.f32 1.442695, %v1116_v40  ;;  %v1155_v57 = vmul.f32 1.442695, %v1114_v34  ;;  %v1069_v50 = vsel %vm1008_vm1, %v2814_v10, -inf }
 0x13a   : > { %v2796_v51 = vpop.eup %2284  ;;  %v1222_v17 = vsel %vm1008_vm1, %v2791_v44, 0.0 }
 0x13b   : > { %1073 = vmax.xlane.f32.xlu0 %v1072_v41  ;;  %v1225_v54 = vsel %vm1008_vm1, %v2796_v51, 0.0  ;;  %2286 = vpow2.f32 %v1159_v49 }
 0x13c   : > { %1223 = vadd.xlane.f32.xlu2 %v1222_v17  ;;  %1226 = vadd.xlane.f32.xlu1 %v1225_v54  ;;  %2288 = vpow2.f32 %v1155_v57 }
 0x13d   : > { %v1047_v63 = vpop.xlane.xlu1 %1046 }
 0x13e   : > { %v1041_v62 = vpop.xlane.xlu2 %1040  ;;  %v1117_v30 = vsub.f32 %v2664_v35, %v1047_v63 }
 0x13f   : > { %v1115_v24 = vsub.f32 %v2659_v28, %v1041_v62  ;;  %v394_v28 = vld [vmem:[%s3203_s3 + $0xd8] sm:$0xff]  ;;  %v949_v58 = vpop.f32.mrf.mxu0 }
 0x140   : > { %v1161_v16 = vmul.f32 1.442695, %v1117_v30  ;;  %v2834_v18 = vadd.f32 %v2754_v59, %v394_v28 }
 0x141   : > { %v1157_v3 = vmul.f32 1.442695, %v1115_v24  ;;  %v2826_v47 = vpop.eup %2286 }
 0x142   : > { %v1234_v35 = vsel %vm1008_vm1, %v2826_v47, 0.0  ;;  %v2836_v25 = vpop.eup %2288  ;;  %v1090_v32 = vsel %vm1008_vm1, %v2834_v18, -inf }
 0x143   : > { %2290 = vpow2.f32 %v1157_v3  ;;  %1088 = vmax.xlane.f32.xlu0 %v1087_v2  ;;  %v398_v3 = vld [vmem:[%s3203_s3 + $0xf8] sm:$0xff] }
 0x144   : > { %1070 = vmax.xlane.f32.xlu2 %v1069_v50  ;;  %1235 = vadd.xlane.f32.xlu1 %v1234_v35  ;;  %2292 = vpow2.f32 %v1161_v16  ;;  %v397_v50 = vld [vmem:[%s3203_s3 + $0xf0] sm:$0xff]  ;;  %v2890_v13 = vadd.f32 %v2806_v53, %v398_v3 }
 0x146   : > { %v1050_v43 = vpop.xlane.xlu2 %1049  ;;  %v1053_v19 = vpop.xlane.xlu0 %1052 }
 0x147   : > { %v1056_v20 = vpop.xlane.xlu1 %1055  ;;  %v1118_v26 = vsub.f32 %v2673_v39, %v1050_v43  ;;  %v1119_v59 = vsub.f32 %v2681_v45, %v1053_v19  ;;  %v392_v39 = vld [vmem:[%s3203_s3 + $0xc8] sm:$0xff]  ;;  %v2856_v45 = vadd.f32 %v2764_v14, %v391_v0  ;;  %v1102_v43 = vsel %vm1008_vm1, %v2890_v13, -inf }
 0x148   : > { %v1120_v31 = vsub.f32 %v2683_v46, %v1056_v20  ;;  %v1228_v46 = vsel %vm1008_vm1, %v2836_v25, 0.0  ;;  %v2859_v41 = vadd.f32 %v2766_v15, %v392_v39 }
 0x149   : > { %v2839_v29 = vpop.eup %2290  ;;  %v1163_v38 = vmul.f32 1.442695, %v1118_v26  ;;  %v1165_v49 = vmul.f32 1.442695, %v1119_v59  ;;  %v1081_v17 = vsel %vm1008_vm1, %v2856_v45, -inf  ;;  %v395_v26 = vld [vmem:[%s3203_s3 + $0xe0] sm:$0xff] }
 0x14a   : > { %v1231_v37 = vsel %vm1008_vm1, %v2839_v29, 0.0  ;;  %v1167_v40 = vmul.f32 1.442695, %v1120_v31  ;;  %v2861_v1 = vpop.eup %2292  ;;  %v1084_v12 = vsel %vm1008_vm1, %v2859_v41, -inf }
 0x14b   : > { %1232 = vadd.xlane.f32.xlu0 %v1231_v37  ;;  %2294 = vpow2.f32 %v1163_v38  ;;  %v1237_v14 = vsel %vm1008_vm1, %v2861_v1, 0.0 }
 0x14c   : > { %1229 = vadd.xlane.f32.xlu2 %v1228_v46  ;;  %1091 = vmax.xlane.f32.xlu1 %v1090_v32  ;;  %2296 = vpow2.f32 %v1167_v40 }
 0x14d   : > { %2298 = vpow2.f32 %v1165_v49 }
 0x14e   : > { %v1059_v34 = vpop.xlane.xlu0 %1058 }
 0x14f   : > { %v1062_v35 = vpop.xlane.xlu1 %1061  ;;  %v1121_v31 = vsub.f32 %v2697_v60, %v1059_v34 }
 0x150   : > { %v1122_v20 = vsub.f32 %v2699_v61, %v1062_v35  ;;  %v2912_v61 = vadd.f32 %v2822_v4, %v395_v26  ;;  %v1397_v26 = vld [vmem:[%s2943_s18 + $0x20] sm:$0xff] }
 0x151   : > { %v2869_v15 = vpop.eup %2294  ;;  %v1169_v59 = vmul.f32 1.442695, %v1121_v31  ;;  %v1429_v31 = vpack.c.bf16 %v1397_v26, %v1397_v26 }
 0x152   : > { %v2871_v57 = vpop.eup %2296  ;;  %v1240_v11 = vsel %vm1008_vm1, %v2869_v15, 0.0  ;;  %v1171_v58 = vmul.f32 1.442695, %v1122_v20  ;;  %v1093_v46 = vsel %vm1008_vm1, %v2912_v61, -inf }
 0x153   : > { %1238 = vadd.xlane.f32.xlu0 %v1237_v14  ;;  %v2874_v63 = vpop.eup %2298  ;;  %v1246_v28 = vsel %vm1008_vm1, %v2871_v57, 0.0 }
 0x154   : > { %1085 = vmax.xlane.f32.xlu2 %v1084_v12  ;;  %1082 = vmax.xlane.f32.xlu1 %v1081_v17 }
 0x156   : > { %v1065_v54 = vpop.xlane.xlu2 %1064  ;;  %v1068_v24 = vpop.xlane.xlu0 %1067 }
 0x157   : > { %v1123_v62 = vsub.f32 %v2711_v6, %v1065_v54  ;;  %v1124_v30 = vsub.f32 %v2713_v7, %v1068_v24  ;;  %v1243_v6 = vsel %vm1008_vm1, %v2874_v63, 0.0  ;;  %v2893_v7 = vadd.f32 %v2804_v52, %v397_v50  ;;  %v396_v52 = vld [vmem:[%s3203_s3 + $0xe8] sm:$0xff]  ;;  %v1393_v54 = vld [vmem:[%s2943_s18] sm:$0xff] }
 0x158   : > { %v2915_v33 = vadd.f32 %v2824_v9, %v396_v52 }
 0x159   : > { %v1173_v2 = vmul.f32 1.442695, %v1123_v62  ;;  %v1175_v16 = vmul.f32 1.442695, %v1124_v30  ;;  %v1099_v53 = vsel %vm1008_vm1, %v2893_v7, -inf  ;;  %v1425_v62 = vpack.c.bf16 %v1393_v54, %v1393_v54  ;;  %v1395_v30 = vld [vmem:[%s2943_s18 + $0x10] sm:$0xff] }
 0x15a   : > { %v1096_v4 = vsel %vm1008_vm1, %v2915_v33, -inf  ;;  %v1427_v50 = vpack.c.bf16 %v1395_v30, %v1395_v30  ;;  %v1401_v54 = vld [vmem:[%s2943_s18 + $0x40] sm:$0xff] }
 0x15b   : > { %2300 = vpow2.f32 %v1173_v2  ;;  %1247 = vadd.xlane.f32.xlu0 %v1246_v28  ;;  %v1462_v2 = vsel %vm1460_vm2, %v1425_v62, 0  ;;  %v1394_v28 = vld [vmem:[%s2943_s18 + $0x8] sm:$0xff]  ;;  %v1433_v30 = vpack.c.bf16 %v1401_v54, %v1401_v54 }
 0x15c   : > { %1244 = vadd.xlane.f32.xlu2 %v1243_v6  ;;  %1241 = vadd.xlane.f32.xlu1 %v1240_v11  ;;  %2302 = vpow2.f32 %v1175_v16  ;;  %v1500_v6 = vsel %vm1460_vm2, %v1427_v50, 0  ;;  %v1426_v11 = vpack.c.bf16 %v1394_v28, %v1394_v28  ;;  %v1396_v16 = vld [vmem:[%s2943_s18 + $0x18] sm:$0xff] }
 0x15d   : > { %2304 = vpow2.f32 %v1171_v58  ;;  %1471 = vmatpush.bf16.msra.mxu0 %v1462_v2  ;;  %1509 = vmatpush.bf16.msra.mxu2 %v1500_v6  ;;  %v1398_v58 = vld [vmem:[%s2943_s18 + $0x28] sm:$0xff]  ;;  %v1614_v28 = vsel %vm1460_vm2, %v1433_v30, 0 }
 0x15e   : > { %2306 = vpow2.f32 %v1169_v59  ;;  %v1481_v35 = vsel %vm1460_vm2, %v1426_v11, 0  ;;  %v1538_v59 = vsel %vm1460_vm2, %v1429_v31, 0 }
 0x15f   : > { %1490 = vmatpush.bf16.msra.mxu1 %v1481_v35  ;;  %v1402_v35 = vld [vmem:[%s2943_s18 + $0x48] sm:$0xff] }
 0x161   : > { %v2897_v19 = vpop.eup %2300  ;;  %1547 = vmatpush.bf16.msrb.mxu0 %v1538_v59 }
 0x162   : > { %v1255_v32 = vsel %vm1008_vm1, %v2897_v19, 0.0  ;;  %v2918_v37 = vpop.eup %2302 }
 0x163   : > { %1103 = vmax.xlane.f32.xlu0 %v1102_v43  ;;  %v1258_v40 = vsel %vm1008_vm1, %v2918_v37, 0.0  ;;  %v2927_v49 = vpop.eup %2304  ;;  %v1428_v43 = vpack.c.bf16 %v1396_v16, %v1396_v16  ;;  %v1403_v16 = vld [vmem:[%s2943_s18 + $0x50] sm:$0xff] }
 0x164   : > { %1100 = vmax.xlane.f32.xlu2 %v1099_v53  ;;  %1256 = vadd.xlane.f32.xlu1 %v1255_v32  ;;  %v2929_v34 = vpop.eup %2306  ;;  %v1252_v17 = vsel %vm1008_vm1, %v2927_v49, 0.0  ;;  %v1399_v53 = vld [vmem:[%s2943_s18 + $0x30] sm:$0xff] }
 0x165   : > { %v1519_v20 = vsel %vm1460_vm2, %v1428_v43, 0  ;;  %v1431_v52 = vpack.c.bf16 %v1399_v53, %v1399_v53  ;;  %v1404_v43 = vld [vmem:[%s2943_s18 + $0x58] sm:$0xff]  ;;  %v1434_v53 = vpack.c.bf16 %v1402_v35, %v1402_v35 }
 0x166   : > { %v1077_v60 = vpop.xlane.xlu1 %1076  ;;  %v1080_v0 = vpop.xlane.xlu2 %1079  ;;  %1528 = vmatpush.bf16.msra.mxu3 %v1519_v20  ;;  %v1436_v31 = vpack.c.bf16 %v1404_v43, %v1404_v43 }
 0x167   : > { %v1127_v39 = vsub.f32 %v2725_v22, %v1077_v60  ;;  %v1128_v9 = vsub.f32 %v2727_v23, %v1080_v0  ;;  %v1249_v23 = vsel %vm1008_vm1, %v2929_v34, 0.0  ;;  %v1576_v60 = vsel %vm1460_vm2, %v1431_v52, 0 }
 0x168   : > { %v1430_v0 = vpack.c.bf16 %v1398_v58, %v1398_v58  ;;  %1585 = vmatpush.bf16.msrb.mxu2 %v1576_v60  ;;  %v1633_v58 = vsel %vm1460_vm2, %v1434_v53, 0  ;;  %v1671_v60 = vsel %vm1460_vm2, %v1436_v31, 0 }
 0x169   : > { %v1181_v38 = vmul.f32 1.442695, %v1127_v39  ;;  %v1183_v22 = vmul.f32 1.442695, %v1128_v9 }
 0x16a   : > { %v1557_v39 = vsel %vm1460_vm2, %v1430_v0, 0  ;;  %v1405_v0 = vld [vmem:[%s2943_s18 + $0x60] sm:$0xff] }
 0x16b   : > { %1094 = vmax.xlane.f32.xlu0 %v1093_v46  ;;  %2308 = vpow2.f32 %v1181_v38  ;;  %1566 = vmatpush.bf16.msrb.mxu1 %v1557_v39  ;;  %v1400_v46 = vld [vmem:[%s2943_s18 + $0x38] sm:$0xff] }
 0x16c   : > { %1259 = vadd.xlane.f32.xlu2 %v1258_v40  ;;  %1097 = vmax.xlane.f32.xlu1 %v1096_v4  ;;  %2310 = vpow2.f32 %v1183_v22  ;;  %v1432_v9 = vpack.c.bf16 %v1400_v46, %v1400_v46 }
 0x171   : > { %v2931_v12 = vpop.eup %2308 }
 0x172   : > { %v1267_v14 = vsel %vm1008_vm1, %v2931_v12, 0.0  ;;  %v2946_v24 = vpop.eup %2310 }
 0x173   : > { %1253 = vadd.xlane.f32.xlu0 %v1252_v17  ;;  %v1270_v3 = vsel %vm1008_vm1, %v2946_v24, 0.0  ;;  %v1595_v17 = vsel %vm1460_vm2, %v1432_v9, 0 }
 0x174   : > { %1250 = vadd.xlane.f32.xlu2 %v1249_v23  ;;  %1268 = vadd.xlane.f32.xlu1 %v1267_v14 }
 0x175   : > { %1604 = vmatpush.bf16.msrb.mxu3 %v1595_v17 }
 0x17c   : > { %1271 = vadd.xlane.f32.xlu2 %v1270_v3 }
 0x18d   : > { %v1203_v32 = vpop.xlane.xlu0 %1202 }
 0x18e   : > { %2312 = vrcp.f32 %v1203_v32 }
 0x194   : > { %v2313_v38 = vpop.eup %2312 }
 0x195   : > { %v1329_v40 = vmul.f32 %v2313_v38, %v2738_v42 }
 0x196   : > { %v1209_v4 = vpop.xlane.xlu2 %1208 }
 0x197   : > { %2314 = vrcp.f32 %v1209_v4  ;;  %v1206_v22 = vpop.xlane.xlu1 %1205  ;;  %v1361_v23 = vpack.c.bf16 %v1329_v40, %v1329_v40  ;;  %v1437_v4 = vpack.c.bf16 %v1405_v0, %v1405_v0 }
 0x198   : > { %2316 = vrcp.f32 %v1206_v22 }
 0x199   : > { %2222 = vmatmul.msk.bf16.vlgmr.msra.gmra.mxu0 %vm1008_vm1, %v1361_v23 }
 0x19a   : > { %1623 = vmatpush.bf16.msra.mxu0 %v1614_v28 }
 0x19d   : > { %v2315_v14 = vpop.eup %2314 }
 0x19e   : > { %v2317_v62 = vpop.eup %2316  ;;  %v1331_v2 = vmul.f32 %v2315_v14, %v2747_v8  ;;  %v1212_v3 = vpop.xlane.xlu0 %1211 }
 0x19f   : > { %v1330_v42 = vmul.f32 %v2317_v62, %v2750_v55  ;;  %2318 = vrcp.f32 %v1212_v3  ;;  %v1435_v55 = vpack.c.bf16 %v1403_v16, %v1403_v16  ;;  %v1690_v3 = vsel %vm1460_vm2, %v1437_v4, 0  ;;  %v1406_v16 = vld [vmem:[%s2943_s18 + $0x68] sm:$0xff] }
 0x1a0   : > { %v1363_v50 = vpack.c.bf16 %v1331_v2, %v1331_v2  ;;  %v1438_v31 = vpack.c.bf16 %v1406_v16, %v1406_v16 }
 0x1a1   : > { %v1362_v6 = vpack.c.bf16 %v1330_v42, %v1330_v42  ;;  %v1652_v59 = vsel %vm1460_vm2, %v1435_v55, 0 }
 0x1a2   : > { %2224 = vmatmul.msk.bf16.vlgmr.msra.gmra.mxu2 %vm1008_vm1, %v1363_v50 }
 0x1a3   : > { %2223 = vmatmul.msk.bf16.vlgmr.msra.gmra.mxu1 %vm1008_vm1, %v1362_v6  ;;  %1661 = vmatpush.bf16.msra.mxu2 %v1652_v59 }
 0x1a4   : > { %1642 = vmatpush.bf16.msra.mxu1 %v1633_v58 }
 0x1a5   : > { %v2319_v11 = vpop.eup %2318 }
 0x1a6   : > { %v1332_v8 = vmul.f32 %v2319_v11, %v2760_v5  ;;  %v1218_v20 = vpop.xlane.xlu0 %1217  ;;  %v1221_v26 = vpop.xlane.xlu1 %1220 }
 0x1a7   : > { %v1215_v52 = vpop.xlane.xlu2 %1214  ;;  %2320 = vrcp.f32 %v1218_v20 }
 0x1a8   : > { %v1364_v32 = vpack.c.bf16 %v1332_v8, %v1332_v8  ;;  %2322 = vrcp.f32 %v1215_v52 }
 0x1a9   : > { %2324 = vrcp.f32 %v1221_v26 }
 0x1aa   : > { %2225 = vmatmul.msk.bf16.vlgmr.msra.gmra.mxu3 %vm1008_vm1, %v1364_v32 }
 0x1ab   : > { %1680 = vmatpush.bf16.msra.mxu3 %v1671_v60 }
 0x1ad   : > { %v2321_v5 = vpop.eup %2320 }
 0x1ae   : > { %v2323_v39 = vpop.eup %2322  ;;  %v1334_v46 = vmul.f32 %v2321_v5, %v2768_v48  ;;  %v1074_v38 = vpop.xlane.xlu0 %1073 }
 0x1af   : > { %v2325_v9 = vpop.eup %2324  ;;  %v1333_v40 = vmul.f32 %v2323_v39, %v2777_v27  ;;  %v1224_v22 = vpop.xlane.xlu2 %1223  ;;  %v1126_v17 = vsub.f32 %v2786_v36, %v1074_v38  ;;  %v1407_v27 = vld [vmem:[%s2943_s18 + $0x70] sm:$0xff]  ;;  %v1408_v36 = vld [vmem:[%s2943_s18 + $0x78] sm:$0xff] }
 0x1b0   : > { %v1227_v23 = vpop.xlane.xlu1 %1226  ;;  %v1335_v14 = vmul.f32 %v2325_v9, %v2772_v21  ;;  %2326 = vrcp.f32 %v1224_v22  ;;  %v1366_v62 = vpack.c.bf16 %v1334_v46, %v1334_v46  ;;  %v1439_v42 = vpack.c.bf16 %v1407_v27, %v1407_v27  ;;  %v1411_v22 = vld [vmem:[%s2943_s18 + $0x90] sm:$0xff] }
 0x1b1   : > { %v1365_v54 = vpack.c.bf16 %v1333_v40, %v1333_v40  ;;  %v1179_v2 = vmul.f32 1.442695, %v1126_v17  ;;  %v1440_v50 = vpack.c.bf16 %v1408_v36, %v1408_v36  ;;  %v1412_v17 = vld [vmem:[%s2943_s18 + $0x98] sm:$0xff] }
 0x1b2   : > { %v1367_v48 = vpack.c.bf16 %v1335_v14, %v1335_v14  ;;  %v1728_v8 = vsel %vm1460_vm2, %v1439_v42, 0 }
 0x1b3   : > { %2328 = vpow2.f32 %v1179_v2  ;;  %2226 = vmatmul.msk.bf16.vlgmr.msrb.gmra.mxu0 %vm1008_vm1, %v1365_v54  ;;  %2227 = vmatmul.msk.bf16.vlgmr.msrb.gmra.mxu1 %vm1008_vm1, %v1366_v62  ;;  %v1747_v55 = vsel %vm1460_vm2, %v1440_v50, 0  ;;  %v1443_v62 = vpack.c.bf16 %v1411_v22, %v1411_v22  ;;  %v1444_v2 = vpack.c.bf16 %v1412_v17, %v1412_v17 }
 0x1b4   : > { %2330 = vrcp.f32 %v1227_v23  ;;  %2228 = vmatmul.msk.bf16.vlgmr.msrb.gmra.mxu2 %vm1008_vm1, %v1367_v48  ;;  %1699 = vmatpush.bf16.msrb.mxu0 %v1690_v3 }
 0x1b5   : > { %1737 = vmatpush.bf16.msrb.mxu2 %v1728_v8  ;;  %v1804_v50 = vsel %vm1460_vm2, %v1443_v62, 0 }
 0x1b6   : > { %v2327_v21 = vpop.eup %2326  ;;  %v1089_v30 = vpop.xlane.xlu0 %1088 }
 0x1b7   : > { %v1336_v28 = vmul.f32 %v2327_v21, %v2791_v44  ;;  %v1071_v6 = vpop.xlane.xlu2 %1070  ;;  %v1131_v11 = vsub.f32 %v2811_v56, %v1089_v30  ;;  %v1709_v56 = vsel %vm1460_vm2, %v1438_v31, 0 }
 0x1b8   : > { %v1236_v35 = vpop.xlane.xlu1 %1235  ;;  %v1125_v43 = vsub.f32 %v2814_v10, %v1071_v6  ;;  %1718 = vmatpush.bf16.msrb.mxu1 %v1709_v56 }
 0x1b9   : > { %v2997_v20 = vpop.eup %2328  ;;  %v1368_v26 = vpack.c.bf16 %v1336_v28, %v1336_v28  ;;  %v1189_v53 = vmul.f32 1.442695, %v1131_v11  ;;  %2332 = vrcp.f32 %v1236_v35  ;;  %v1409_v11 = vld [vmem:[%s2943_s18 + $0x80] sm:$0xff]  ;;  %v1410_v35 = vld [vmem:[%s2943_s18 + $0x88] sm:$0xff] }
 0x1ba   : > { %v2331_v52 = vpop.eup %2330  ;;  %v1177_v32 = vmul.f32 1.442695, %v1125_v43  ;;  %v1264_v44 = vsel %vm1008_vm1, %v2997_v20, 0.0  ;;  %v1441_v8 = vpack.c.bf16 %v1409_v11, %v1409_v11 }
 0x1bb   : > { %2334 = vpow2.f32 %v1189_v53  ;;  %2229 = vmatmul.msk.bf16.vlgmr.msrb.gmra.mxu3 %vm1008_vm1, %v1368_v26  ;;  %1265 = vadd.xlane.f32.xlu1 %v1264_v44  ;;  %v1337_v10 = vmul.f32 %v2331_v52, %v2796_v51  ;;  %v1442_v26 = vpack.c.bf16 %v1410_v35, %v1410_v35 }
 0x1bc   : > { %2336 = vpow2.f32 %v1177_v32  ;;  %1756 = vmatpush.bf16.msrb.mxu3 %v1747_v55  ;;  %v1766_v52 = vsel %vm1460_vm2, %v1441_v8, 0 }
 0x1bd   : > { %v1369_v46 = vpack.c.bf16 %v1337_v10, %v1337_v10  ;;  %v1785_v32 = vsel %vm1460_vm2, %v1442_v26, 0 }
 0x1be   : > { %v1233_v58 = vpop.xlane.xlu0 %1232 }
 0x1bf   : > { %v1230_v59 = vpop.xlane.xlu2 %1229  ;;  %2338 = vrcp.f32 %v1233_v58  ;;  %v2333_v5 = vpop.eup %2332 }
 0x1c0   : > { %v1092_v60 = vpop.xlane.xlu1 %1091  ;;  %2340 = vrcp.f32 %v1230_v59  ;;  %v1415_v59 = vld [vmem:[%s2943_s18 + $0xb0] sm:$0xff] }
 0x1c1   : > { %v1132_v0 = vsub.f32 %v2834_v18, %v1092_v60  ;;  %v3006_v39 = vpop.eup %2334  ;;  %v1340_v18 = vmul.f32 %v2333_v5, %v2826_v47  ;;  %v1416_v60 = vld [vmem:[%s2943_s18 + $0xb8] sm:$0xff] }
 0x1c2   : > { %v3008_v38 = vpop.eup %2336  ;;  %v1279_v9 = vsel %vm1008_vm1, %v3006_v39, 0.0 }
 0x1c3   : > { %v1191_v4 = vmul.f32 1.442695, %v1132_v0  ;;  %2230 = vmatmul.msk.bf16.vlgmr.msra.gmra.mxu0 %vm1008_vm1, %v1369_v46  ;;  %1280 = vadd.xlane.f32.xlu2 %v1279_v9  ;;  %v1261_v51 = vsel %vm1008_vm1, %v3008_v38, 0.0  ;;  %v1372_v42 = vpack.c.bf16 %v1340_v18, %v1340_v18  ;;  %v1448_v9 = vpack.c.bf16 %v1416_v60, %v1416_v60 }
 0x1c4   : > { %1262 = vadd.xlane.f32.xlu0 %v1261_v51  ;;  %1775 = vmatpush.bf16.msra.mxu0 %v1766_v52 }
 0x1c5   : > { %2342 = vpow2.f32 %v1191_v4  ;;  %v2339_v40 = vpop.eup %2338  ;;  %v1447_v4 = vpack.c.bf16 %v1415_v59, %v1415_v59 }
 0x1c6   : > { %v2341_v23 = vpop.eup %2340  ;;  %v1339_v14 = vmul.f32 %v2339_v40, %v2839_v29  ;;  %v1239_v54 = vpop.xlane.xlu0 %1238 }
 0x1c7   : > { %v1338_v3 = vmul.f32 %v2341_v23, %v2836_v25  ;;  %v1086_v48 = vpop.xlane.xlu2 %1085  ;;  %2344 = vrcp.f32 %v1239_v54  ;;  %v1823_v25 = vsel %vm1460_vm2, %v1444_v2, 0 }
 0x1c8   : > { %v1083_v27 = vpop.xlane.xlu1 %1082  ;;  %v1371_v36 = vpack.c.bf16 %v1339_v14, %v1339_v14  ;;  %v1130_v21 = vsub.f32 %v2859_v41, %v1086_v48 }
 0x1c9   : > { %v1129_v30 = vsub.f32 %v2856_v45, %v1083_v27  ;;  %v1370_v47 = vpack.c.bf16 %v1338_v3, %v1338_v3  ;;  %v1880_v3 = vsel %vm1460_vm2, %v1447_v4, 0  ;;  %v1899_v27 = vsel %vm1460_vm2, %v1448_v9, 0  ;;  %v1419_v4 = vld [vmem:[%s2943_s18 + $0xd0] sm:$0xff] }
 0x1ca   : > { %v1187_v28 = vmul.f32 1.442695, %v1130_v21  ;;  %2232 = vmatmul.msk.bf16.vlgmr.msra.gmra.mxu2 %vm1008_vm1, %v1371_v36 }
 0x1cb   : > { %v3023_v29 = vpop.eup %2342  ;;  %v1185_v6 = vmul.f32 1.442695, %v1129_v30  ;;  %2231 = vmatmul.msk.bf16.vlgmr.msra.gmra.mxu1 %vm1008_vm1, %v1370_v47  ;;  %2233 = vmatmul.msk.bf16.vlgmr.msra.gmra.mxu3 %vm1008_vm1, %v1372_v42 }
 0x1cc   : > { %v1282_v45 = vsel %vm1008_vm1, %v3023_v29, 0.0  ;;  %2346 = vpow2.f32 %v1187_v28  ;;  %1813 = vmatpush.bf16.msra.mxu2 %v1804_v50  ;;  %1832 = vmatpush.bf16.msra.mxu3 %v1823_v25 }
 0x1cd   : > { %1283 = vadd.xlane.f32.xlu0 %v1282_v45  ;;  %v2345_v41 = vpop.eup %2344  ;;  %2348 = vpow2.f32 %v1185_v6  ;;  %1794 = vmatpush.bf16.msra.mxu1 %v1785_v32 }
 0x1ce   : > { %v1341_v16 = vmul.f32 %v2345_v41, %v2861_v1  ;;  %v1248_v43 = vpop.xlane.xlu0 %1247 }
 0x1cf   : > { %v1245_v53 = vpop.xlane.xlu2 %1244  ;;  %2350 = vrcp.f32 %v1248_v43 }
 0x1d0   : > { %v1242_v55 = vpop.xlane.xlu1 %1241  ;;  %v1373_v31 = vpack.c.bf16 %v1341_v16, %v1341_v16  ;;  %2352 = vrcp.f32 %v1245_v53 }
 0x1d1   : > { %2354 = vrcp.f32 %v1242_v55 }
 0x1d2   : > { %v3036_v44 = vpop.eup %2346 }
 0x1d3   : > { %v3038_v1 = vpop.eup %2348  ;;  %2234 = vmatmul.msk.bf16.vlgmr.msrb.gmra.mxu0 %vm1008_vm1, %v1373_v31  ;;  %v1276_v56 = vsel %vm1008_vm1, %v3036_v44, 0.0 }
 0x1d4   : > { %1277 = vadd.xlane.f32.xlu2 %v1276_v56  ;;  %v1273_v10 = vsel %vm1008_vm1, %v3038_v1, 0.0 }
 0x1d5   : > { %v2351_v58 = vpop.eup %2350  ;;  %1274 = vadd.xlane.f32.xlu1 %v1273_v10 }
 0x1d6   : > { %v2353_v5 = vpop.eup %2352  ;;  %v1344_v0 = vmul.f32 %v2351_v58, %v2871_v57  ;;  %v1104_v46 = vpop.xlane.xlu0 %1103 }
 0x1d7   : > { %v2355_v51 = vpop.eup %2354  ;;  %v1343_v40 = vmul.f32 %v2353_v5, %v2874_v63  ;;  %v1101_v18 = vpop.xlane.xlu2 %1100  ;;  %v1136_v22 = vsub.f32 %v2890_v13, %v1104_v46 }
 0x1d8   : > { %v1257_v17 = vpop.xlane.xlu1 %1256  ;;  %v1376_v23 = vpack.c.bf16 %v1344_v0, %v1344_v0  ;;  %v1342_v14 = vmul.f32 %v2355_v51, %v2869_v15  ;;  %v1135_v54 = vsub.f32 %v2893_v7, %v1101_v18  ;;  %v1451_v51 = vpack.c.bf16 %v1419_v4, %v1419_v4 }
 0x1d9   : > { %v1375_v62 = vpack.c.bf16 %v1343_v40, %v1343_v40  ;;  %v1199_v2 = vmul.f32 1.442695, %v1136_v22  ;;  %2356 = vrcp.f32 %v1257_v17 }
 0x1da   : > { %v1374_v57 = vpack.c.bf16 %v1342_v14, %v1342_v14  ;;  %v1197_v48 = vmul.f32 1.442695, %v1135_v54  ;;  %v1956_v17 = vsel %vm1460_vm2, %v1451_v51, 0  ;;  %v1420_v14 = vld [vmem:[%s2943_s18 + $0xd8] sm:$0xff] }
 0x1db   : > { %2358 = vpow2.f32 %v1199_v2  ;;  %2236 = vmatmul.msk.bf16.vlgmr.msrb.gmra.mxu2 %vm1008_vm1, %v1375_v62  ;;  %2237 = vmatmul.msk.bf16.vlgmr.msrb.gmra.mxu3 %vm1008_vm1, %v1376_v23  ;;  %v1452_v62 = vpack.c.bf16 %v1420_v14, %v1420_v14 }
 0x1dc   : > { %2360 = vpow2.f32 %v1197_v48  ;;  %2235 = vmatmul.msk.bf16.vlgmr.msrb.gmra.mxu1 %vm1008_vm1, %v1374_v57  ;;  %1889 = vmatpush.bf16.msrb.mxu2 %v1880_v3  ;;  %v1418_v48 = vld [vmem:[%s2943_s18 + $0xc8] sm:$0xff] }
 0x1dd   : > { %1908 = vmatpush.bf16.msrb.mxu3 %v1899_v27  ;;  %v1975_v2 = vsel %vm1460_vm2, %v1452_v62, 0 }
 0x1de   : > { %v1095_v15 = vpop.xlane.xlu0 %1094 }
 0x1df   : > { %v1260_v63 = vpop.xlane.xlu2 %1259  ;;  %v1133_v13 = vsub.f32 %v2912_v61, %v1095_v15  ;;  %v2357_v36 = vpop.eup %2356  ;;  %v1450_v15 = vpack.c.bf16 %v1418_v48, %v1418_v48 }
 0x1e0   : > { %v1098_v7 = vpop.xlane.xlu1 %1097  ;;  %2362 = vrcp.f32 %v1260_v63  ;;  %v1347_v61 = vmul.f32 %v2357_v36, %v2897_v19  ;;  %v1417_v63 = vld [vmem:[%s2943_s18 + $0xc0] sm:$0xff] }
 0x1e1   : > { %v1134_v21 = vsub.f32 %v2915_v33, %v1098_v7  ;;  %v3059_v30 = vpop.eup %2358  ;;  %v1193_v42 = vmul.f32 1.442695, %v1133_v13  ;;  %v1449_v36 = vpack.c.bf16 %v1417_v63, %v1417_v63 }
 0x1e2   : > { %v3061_v47 = vpop.eup %2360  ;;  %v1294_v28 = vsel %vm1008_vm1, %v3059_v30, 0.0  ;;  %v1379_v35 = vpack.c.bf16 %v1347_v61, %v1347_v61 }
 0x1e3   : > { %v1195_v50 = vmul.f32 1.442695, %v1134_v21  ;;  %2364 = vpow2.f32 %v1193_v42  ;;  %v1291_v6 = vsel %vm1008_vm1, %v3061_v47, 0.0  ;;  %1295 = vadd.xlane.f32.xlu1 %v1294_v28  ;;  %v1937_v21 = vsel %vm1460_vm2, %v1450_v15, 0 }
 0x1e4   : > { %1292 = vadd.xlane.f32.xlu0 %v1291_v6  ;;  %v1918_v42 = vsel %vm1460_vm2, %v1449_v36, 0 }
 0x1e5   : > { %2366 = vpow2.f32 %v1195_v50 }
 0x1e6   : > { %v2363_v25 = vpop.eup %2362  ;;  %v1254_v33 = vpop.xlane.xlu0 %1253 }
 0x1e7   : > { %v1348_v45 = vmul.f32 %v2363_v25, %v2918_v37  ;;  %v1251_v41 = vpop.xlane.xlu2 %1250  ;;  %2368 = vrcp.f32 %v1254_v33  ;;  %v1424_v25 = vld [vmem:[%s2943_s18 + $0xf8] sm:$0xff] }
 0x1e8   : > { %2370 = vrcp.f32 %v1251_v41  ;;  %v1269_v43 = vpop.xlane.xlu1 %1268  ;;  %v1456_v41 = vpack.c.bf16 %v1424_v25, %v1424_v25 }
 0x1e9   : > { %v3069_v11 = vpop.eup %2364  ;;  %v1380_v16 = vpack.c.bf16 %v1348_v45, %v1348_v45  ;;  %2372 = vrcp.f32 %v1269_v43 }
 0x1ea   : > { %v1285_v26 = vsel %vm1008_vm1, %v3069_v11, 0.0 }
 0x1eb   : > { %v3071_v8 = vpop.eup %2366  ;;  %2240 = vmatmul.msk.bf16.vlgmr.msra.gmra.mxu2 %vm1008_vm1, %v1379_v35  ;;  %2241 = vmatmul.msk.bf16.vlgmr.msra.gmra.mxu3 %vm1008_vm1, %v1380_v16 }
 0x1ec   : > { %v1288_v19 = vsel %vm1008_vm1, %v3071_v8, 0.0  ;;  %1286 = vadd.xlane.f32.xlu2 %v1285_v26  ;;  %1965 = vmatpush.bf16.msra.mxu2 %v1956_v17  ;;  %v2051_v26 = vsel %vm1460_vm2, %v1456_v41, 0 }
 0x1ed   : > { %1289 = vadd.xlane.f32.xlu0 %v1288_v19  ;;  %v2369_v37 = vpop.eup %2368  ;;  %1984 = vmatpush.bf16.msra.mxu3 %v1975_v2  ;;  %v1423_v19 = vld [vmem:[%s2943_s18 + $0xf0] sm:$0xff] }
 0x1ee   : > { %v2371_v53 = vpop.eup %2370  ;;  %v1346_v55 = vmul.f32 %v2369_v37, %v2927_v49 }
 0x1ef   : > { %v1345_v31 = vmul.f32 %v2371_v53, %v2929_v34  ;;  %v1272_v52 = vpop.xlane.xlu2 %1271  ;;  %v2373_v10 = vpop.eup %2372  ;;  %v1414_v34 = vld [vmem:[%s2943_s18 + $0xa8] sm:$0xff] }
 0x1f0   : > { %v1378_v32 = vpack.c.bf16 %v1346_v55, %v1346_v55  ;;  %2374 = vrcp.f32 %v1272_v52  ;;  %v1351_v58 = vmul.f32 %v2373_v10, %v2931_v12  ;;  %v1446_v0 = vpack.c.bf16 %v1414_v34, %v1414_v34 }
 0x1f1   : > { %v1377_v56 = vpack.c.bf16 %v1345_v31, %v1345_v31  ;;  %v1455_v31 = vpack.c.bf16 %v1423_v19, %v1423_v19 }
 0x1f2   : > { %2239 = vmatmul.msk.bf16.vlgmr.msra.gmra.mxu1 %vm1008_vm1, %v1378_v32  ;;  %v1383_v60 = vpack.c.bf16 %v1351_v58, %v1351_v58  ;;  %v1861_v12 = vsel %vm1460_vm2, %v1446_v0, 0 }
 0x1f3   : > { %2238 = vmatmul.msk.bf16.vlgmr.msra.gmra.mxu0 %vm1008_vm1, %v1377_v56  ;;  %1870 = vmatpush.bf16.msrb.mxu1 %v1861_v12 }
 0x1f6   : > { %v2375_v59 = vpop.eup %2374 }
 0x1f7   : > { %v1352_v49 = vmul.f32 %v2375_v59, %v2946_v24  ;;  %v1413_v24 = vld [vmem:[%s2943_s18 + $0xa0] sm:$0xff]  ;;  %1946 = vmatpush.bf16.msra.mxu1 %v1937_v21  ;;  %v2032_v59 = vsel %vm1460_vm2, %v1455_v31, 0 }
 0x1f8   : > { %v1445_v9 = vpack.c.bf16 %v1413_v24, %v1413_v24 }
 0x1f9   : > { %v1384_v5 = vpack.c.bf16 %v1352_v49, %v1352_v49 }
 0x1fa   : > { %v1842_v22 = vsel %vm1460_vm2, %v1445_v9, 0 }
 0x1fb   : > { %2244 = vmatmul.msk.bf16.vlgmr.msrb.gmra.mxu2 %vm1008_vm1, %v1383_v60  ;;  %2245 = vmatmul.msk.bf16.vlgmr.msrb.gmra.mxu3 %vm1008_vm1, %v1384_v5  ;;  %v1421_v60 = vld [vmem:[%s2943_s18 + $0xe0] sm:$0xff]  ;;  %v1422_v5 = vld [vmem:[%s2943_s18 + $0xe8] sm:$0xff] }
 0x1fc   : > { %1851 = vmatpush.bf16.msrb.mxu0 %v1842_v22  ;;  %2060 = vmatpush.bf16.msrb.mxu3 %v2051_v26 }
 0x1fd   : > { %2041 = vmatpush.bf16.msrb.mxu2 %v2032_v59 }
 0x200   : > { %1927 = vmatpush.bf16.msra.mxu0 %v1918_v42 }
 0x216   : > { %v1473_v46 = vpop.f32.mrf.mxu0 }
 0x217   : > { %2066 = vst.msk [vmem:[%s3092_s20] sm:$0xff] %vm399_vm0, %v1473_v46 }
 0x21e   : > { %v1475_v40 = vpop.f32.mrf.mxu0 }
 0x220   : > { %v1492_v18 = vpop.f32.mrf.mxu1 }
 0x221   : > { %2067 = vst.msk [vmem:[%s3092_s20 + $0x8] sm:$0xff] %vm399_vm0, %v1492_v18 }
 0x225   : > { %v1511_v23 = vpop.f32.mrf.mxu2 }
 0x226   : > { %2068 = vst.msk [vmem:[%s3092_s20 + $0x10] sm:$0xff] %vm399_vm0, %v1511_v23 }
 0x228   : > { %v1494_v54 = vpop.f32.mrf.mxu1 }
 0x22d   : > { %v1513_v3 = vpop.f32.mrf.mxu2  ;;  %v1530_v57 = vpop.f32.mrf.mxu3 }
 0x22e   : > { %2069 = vst.msk [vmem:[%s3092_s20 + $0x18] sm:$0xff] %vm399_vm0, %v1530_v57  ;;  %v1266_v27 = vpop.xlane.xlu1 %1265 }
 0x22f   : > { %2376 = vrcp.f32 %v1266_v27 }
 0x230   : > { %v1549_v13 = vpop.f32.mrf.mxu0  ;;  %v1568_v7 = vpop.f32.mrf.mxu1 }
 0x231   : > { %2070 = vst.msk [vmem:[%s3092_s20 + $0x20] sm:$0xff] %vm399_vm0, %v1549_v13 }
 0x232   : > { %2071 = vst.msk [vmem:[%s3092_s20 + $0x28] sm:$0xff] %vm399_vm0, %v1568_v7 }
 0x235   : > { %v2377_v50 = vpop.eup %2376  ;;  %v1532_v28 = vpop.f32.mrf.mxu3 }
 0x236   : > { %v1350_v6 = vmul.f32 %v2377_v50, %v2997_v20  ;;  %v1281_v61 = vpop.xlane.xlu2 %1280 }
 0x237   : > { %v1587_v33 = vpop.f32.mrf.mxu2  ;;  %2378 = vrcp.f32 %v1281_v61  ;;  %v1263_v45 = vpop.xlane.xlu0 %1262 }
 0x238   : > { %v1382_v35 = vpack.c.bf16 %v1350_v6, %v1350_v6  ;;  %2072 = vst.msk [vmem:[%s3092_s20 + $0x30] sm:$0xff] %vm399_vm0, %v1587_v33  ;;  %2380 = vrcp.f32 %v1263_v45  ;;  %v1551_v16 = vpop.f32.mrf.mxu0  ;;  %v1570_v43 = vpop.f32.mrf.mxu1 }
 0x23a   : > { %2243 = vmatmul.msk.bf16.vlgmr.msrb.gmra.mxu1 %vm1008_vm1, %v1382_v35 }
 0x23d   : > { %v2379_v20 = vpop.eup %2378 }
 0x23e   : > { %v2381_v37 = vpop.eup %2380  ;;  %v1355_v53 = vmul.f32 %v2379_v20, %v3006_v39  ;;  %v1606_v55 = vpop.f32.mrf.mxu3  ;;  %v1453_v39 = vpack.c.bf16 %v1421_v60, %v1421_v60 }
 0x23f   : > { %v1349_v52 = vmul.f32 %v2381_v37, %v3008_v38  ;;  %v1589_v32 = vpop.f32.mrf.mxu2  ;;  %2073 = vst.msk [vmem:[%s3092_s20 + $0x38] sm:$0xff] %vm399_vm0, %v1606_v55  ;;  %v1454_v38 = vpack.c.bf16 %v1422_v5, %v1422_v5 }
 0x240   : > { %v1284_v56 = vpop.xlane.xlu0 %1283  ;;  %v1387_v10 = vpack.c.bf16 %v1355_v53, %v1355_v53  ;;  %v1625_v58 = vpop.f32.mrf.mxu0  ;;  %v1994_v34 = vsel %vm1460_vm2, %v1453_v39, 0 }
 0x241   : > { %2382 = vrcp.f32 %v1284_v56  ;;  %v1381_v49 = vpack.c.bf16 %v1349_v52, %v1349_v52  ;;  %2074 = vst.msk [vmem:[%s3092_s20 + $0x40] sm:$0xff] %vm399_vm0, %v1625_v58  ;;  %v2013_v0 = vsel %vm1460_vm2, %v1454_v38, 0 }
 0x242   : > { %2248 = vmatmul.msk.bf16.vlgmr.msra.gmra.mxu2 %vm1008_vm1, %v1387_v10  ;;  %2022 = vmatpush.bf16.msrb.mxu1 %v2013_v0 }
 0x243   : > { %2242 = vmatmul.msk.bf16.vlgmr.msrb.gmra.mxu0 %vm1008_vm1, %v1381_v49 }
 0x244   : > { %2003 = vmatpush.bf16.msrb.mxu0 %v1994_v34 }
 0x246   : > { %v1608_v12 = vpop.f32.mrf.mxu3 }
 0x247   : > { %v2383_v46 = vpop.eup %2382  ;;  %v1278_v4 = vpop.xlane.xlu2 %1277 }
 0x248   : > { %v1356_v24 = vmul.f32 %v2383_v46, %v3023_v29  ;;  %2384 = vrcp.f32 %v1278_v4  ;;  %v1627_v9 = vpop.f32.mrf.mxu0  ;;  %v1644_v51 = vpop.f32.mrf.mxu1 }
 0x249   : > { %2075 = vst.msk [vmem:[%s3092_s20 + $0x48] sm:$0xff] %vm399_vm0, %v1644_v51  ;;  %v1275_v18 = vpop.xlane.xlu1 %1274 }
 0x24a   : > { %v1388_v40 = vpack.c.bf16 %v1356_v24, %v1356_v24  ;;  %2386 = vrcp.f32 %v1275_v18 }
 0x24c   : > { %2249 = vmatmul.msk.bf16.vlgmr.msra.gmra.mxu3 %vm1008_vm1, %v1388_v40 }
 0x24d   : > { %v1663_v22 = vpop.f32.mrf.mxu2 }
 0x24e   : > { %v2385_v17 = vpop.eup %2384  ;;  %2076 = vst.msk [vmem:[%s3092_s20 + $0x50] sm:$0xff] %vm399_vm0, %v1663_v22  ;;  %v1682_v23 = vpop.f32.mrf.mxu3 }
 0x24f   : > { %v1354_v14 = vmul.f32 %v2385_v17, %v3036_v44  ;;  %2077 = vst.msk [vmem:[%s3092_s20 + $0x58] sm:$0xff] %vm399_vm0, %v1682_v23 }
 0x250   : > { %v2387_v29 = vpop.eup %2386  ;;  %v1646_v54 = vpop.f32.mrf.mxu1 }
 0x251   : > { %v1701_v62 = vpop.f32.mrf.mxu0  ;;  %v1386_v2 = vpack.c.bf16 %v1354_v14, %v1354_v14  ;;  %v1353_v3 = vmul.f32 %v2387_v29, %v3038_v1 }
 0x252   : > { %2078 = vst.msk [vmem:[%s3092_s20 + $0x60] sm:$0xff] %vm399_vm0, %v1701_v62 }
 0x253   : > { %v1385_v57 = vpack.c.bf16 %v1353_v3, %v1353_v3  ;;  %2247 = vmatmul.msk.bf16.vlgmr.msra.gmra.mxu1 %vm1008_vm1, %v1386_v2 }
 0x255   : > { %2246 = vmatmul.msk.bf16.vlgmr.msra.gmra.mxu0 %vm1008_vm1, %v1385_v57  ;;  %v1665_v48 = vpop.f32.mrf.mxu2 }
 0x256   : > { %v1684_v27 = vpop.f32.mrf.mxu3  ;;  %v1296_v44 = vpop.xlane.xlu1 %1295 }
 0x257   : > { %v1293_v15 = vpop.xlane.xlu0 %1292  ;;  %2388 = vrcp.f32 %v1296_v44 }
 0x258   : > { %2390 = vrcp.f32 %v1293_v15 }
 0x259   : > { %v1703_v63 = vpop.f32.mrf.mxu0  ;;  %v1720_v13 = vpop.f32.mrf.mxu1 }
 0x25a   : > { %2079 = vst.msk [vmem:[%s3092_s20 + $0x68] sm:$0xff] %vm399_vm0, %v1720_v13 }
 0x25d   : > { %v2389_v1 = vpop.eup %2388 }
 0x25e   : > { %v2391_v7 = vpop.eup %2390  ;;  %v1360_v36 = vmul.f32 %v2389_v1, %v3059_v30  ;;  %v1739_v21 = vpop.f32.mrf.mxu2 }
 0x25f   : > { %v1758_v42 = vpop.f32.mrf.mxu3  ;;  %v1359_v50 = vmul.f32 %v2391_v7, %v3061_v47  ;;  %2080 = vst.msk [vmem:[%s3092_s20 + $0x70] sm:$0xff] %vm399_vm0, %v1739_v21  ;;  %v1287_v28 = vpop.xlane.xlu2 %1286 }
 0x260   : > { %v1290_v6 = vpop.xlane.xlu0 %1289  ;;  %v1392_v61 = vpack.c.bf16 %v1360_v36, %v1360_v36  ;;  %2081 = vst.msk [vmem:[%s3092_s20 + $0x78] sm:$0xff] %vm399_vm0, %v1758_v42  ;;  %2392 = vrcp.f32 %v1287_v28 }
 0x261   : > { %v1391_v25 = vpack.c.bf16 %v1359_v50, %v1359_v50  ;;  %2394 = vrcp.f32 %v1290_v6  ;;  %v1722_v33 = vpop.f32.mrf.mxu1 }
 0x262   : > { %2253 = vmatmul.msk.bf16.vlgmr.msrb.gmra.mxu3 %vm1008_vm1, %v1392_v61 }
 0x263   : > { %2252 = vmatmul.msk.bf16.vlgmr.msrb.gmra.mxu2 %vm1008_vm1, %v1391_v25 }
 0x266   : > { %v2393_v30 = vpop.eup %2392  ;;  %v1741_v47 = vpop.f32.mrf.mxu2 }
 0x267   : > { %v1760_v45 = vpop.f32.mrf.mxu3  ;;  %v2395_v41 = vpop.eup %2394  ;;  %v1357_v35 = vmul.f32 %v2393_v30, %v3069_v11 }
 0x268   : > { %v1358_v16 = vmul.f32 %v2395_v41, %v3071_v8 }
 0x269   : > { %v1389_v43 = vpack.c.bf16 %v1357_v35, %v1357_v35 }
 0x26a   : > { %v1390_v26 = vpack.c.bf16 %v1358_v16, %v1358_v16 }
 0x26b   : > { %2250 = vmatmul.msk.bf16.vlgmr.msrb.gmra.mxu0 %vm1008_vm1, %v1389_v43 }
 0x26c   : > { %2251 = vmatmul.msk.bf16.vlgmr.msrb.gmra.mxu1 %vm1008_vm1, %v1390_v26 }
 0x26e   : > { %v1815_v20 = vpop.f32.mrf.mxu2 }
 0x26f   : > { %v1834_v19 = vpop.f32.mrf.mxu3  ;;  %2084 = vst.msk [vmem:[%s3092_s20 + $0x90] sm:$0xff] %vm399_vm0, %v1815_v20  ;;  %v1796_v37 = vpop.f32.mrf.mxu1 }
 0x270   : > { %2085 = vst.msk [vmem:[%s3092_s20 + $0x98] sm:$0xff] %vm399_vm0, %v1834_v19  ;;  %v1777_v53 = vpop.f32.mrf.mxu0 }
 0x271   : > { %2082 = vst.msk [vmem:[%s3092_s20 + $0x80] sm:$0xff] %vm399_vm0, %v1777_v53 }
 0x272   : > { %2083 = vst.msk [vmem:[%s3092_s20 + $0x88] sm:$0xff] %vm399_vm0, %v1796_v37 }
 0x276   : > { %v1817_v11 = vpop.f32.mrf.mxu2 }
 0x277   : > { %v1836_v8 = vpop.f32.mrf.mxu3  ;;  %v1798_v55 = vpop.f32.mrf.mxu1 }
 0x278   : > { %v1779_v31 = vpop.f32.mrf.mxu0 }
 0x27e   : > { %v1891_v52 = vpop.f32.mrf.mxu2 }
 0x27f   : > { %v1910_v32 = vpop.f32.mrf.mxu3  ;;  %2088 = vst.msk [vmem:[%s3092_s20 + $0xb0] sm:$0xff] %vm399_vm0, %v1891_v52 }
 0x280   : > { %2089 = vst.msk [vmem:[%s3092_s20 + $0xb8] sm:$0xff] %vm399_vm0, %v1910_v32 }
 0x286   : > { %v1893_v56 = vpop.f32.mrf.mxu2 }
 0x287   : > { %v1912_v10 = vpop.f32.mrf.mxu3 }
 0x2b7   : > { %v1872_v58 = vpop.f32.mrf.mxu1 }
 0x2b8   : > { %2087 = vst.msk [vmem:[%s3092_s20 + $0xa8] sm:$0xff] %vm399_vm0, %v1872_v58 }
 0x2bf   : > { %v1874_v59 = vpop.f32.mrf.mxu1 }
 0x2c0   : > { %v1853_v49 = vpop.f32.mrf.mxu0 }
 0x2c1   : > { %2086 = vst.msk [vmem:[%s3092_s20 + $0xa0] sm:$0xff] %vm399_vm0, %v1853_v49 }
 0x2c5   : > { %v1967_v60 = vpop.f32.mrf.mxu2 }
 0x2c6   : > { %2092 = vst.msk [vmem:[%s3092_s20 + $0xd0] sm:$0xff] %vm399_vm0, %v1967_v60 }
 0x2c8   : > { %v1855_v5 = vpop.f32.mrf.mxu0 }
 0x2cd   : > { %v1969_v39 = vpop.f32.mrf.mxu2 }
 0x2cf   : > { %v1986_v38 = vpop.f32.mrf.mxu3 }
 0x2d0   : > { %2093 = vst.msk [vmem:[%s3092_s20 + $0xd8] sm:$0xff] %vm399_vm0, %v1986_v38  ;;  %v1948_v34 = vpop.f32.mrf.mxu1 }
 0x2d1   : > { %2091 = vst.msk [vmem:[%s3092_s20 + $0xc8] sm:$0xff] %vm399_vm0, %v1948_v34 }
 0x2d2   : > { %v1929_v0 = vpop.f32.mrf.mxu0 }
 0x2d3   : > { %2090 = vst.msk [vmem:[%s3092_s20 + $0xc0] sm:$0xff] %vm399_vm0, %v1929_v0 }
 0x2d7   : > { %v1988_v46 = vpop.f32.mrf.mxu3 }
 0x2d8   : > { %v1950_v12 = vpop.f32.mrf.mxu1 }
 0x2da   : > { %v1931_v24 = vpop.f32.mrf.mxu0 }
 0x2e5   : > { %v2062_v4 = vpop.f32.mrf.mxu3 }
 0x2e6   : > { %v2043_v9 = vpop.f32.mrf.mxu2  ;;  %2097 = vst.msk [vmem:[%s3092_s20 + $0xf8] sm:$0xff] %vm399_vm0, %v2062_v4 }
 0x2e7   : > { %2096 = vst.msk [vmem:[%s3092_s20 + $0xf0] sm:$0xff] %vm399_vm0, %v2043_v9 }
 0x2e8   : > { %v2005_v51 = vpop.f32.mrf.mxu0 }
 0x2e9   : > { %2094 = vst.msk [vmem:[%s3092_s20 + $0xe0] sm:$0xff] %vm399_vm0, %v2005_v51  ;;  %v2024_v40 = vpop.f32.mrf.mxu1 }
 0x2ea   : > { %2095 = vst.msk [vmem:[%s3092_s20 + $0xe8] sm:$0xff] %vm399_vm0, %v2024_v40 }
 0x2ed   : > { %v2064_v18 = vpop.f32.mrf.mxu3 }
 0x2ee   : > { %v2045_v22 = vpop.f32.mrf.mxu2 }
 0x2f0   : > { %v2007_v17 = vpop.f32.mrf.mxu0 }
 0x2f1   : > { %v2026_v23 = vpop.f32.mrf.mxu1 }
 0x2f2 PF: > { %s14_s15 = sadd.s32 1, %s2402_s15  }
 0x2f3   : > { %p11_p4 = scmp.ge.s32.totalorder %s14_s15, 4  }
 0x2f5   :  { %13 = sbr.rel (!%p11_p4) target bundleno = 1 (0x1), region = 72 }

// kernel: bottleneck_vrc_forward.4
= control target key start
LH: loop header
LB: loop body
LE: loop exit
PB: predicated region body
PF: predicated region fallthrough
CT: control target
= control target key end

     0   :  { %s3990_s24 = smov 0   ;;  %s4822_s0 = inlined_call_operand.vmem [shape: f32[2,10,10,16], index: 0, kind: input, shape index: {}]   ;;  %s4823_s1 = inlined_call_operand.vmem [shape: bf16[3,3,16,8], index: 1, kind: input, shape index: {}]   ;;  %s4824_s2 = inlined_call_operand.vmem [shape: f32[1,1,8], index: 2, kind: input, shape index: {}]   ;;  %s4825_s3 = inlined_call_operand.vmem [shape: f32[1,1,8], index: 3, kind: input, shape index: {}]   ;;  %s4826_s4 = inlined_call_operand.vmem [shape: bf16[3,3,8,16], index: 4, kind: input, shape index: {}]   ;;  %s4827_s5 = inlined_call_operand.vmem [shape: f32[1,1,16], index: 5, kind: input, shape index: {}]   ;;  %s4828_s6 = inlined_call_operand.vmem [shape: f32[1,1,16], index: 6, kind: input, shape index: {}]   ;;  %s4829_s7 = inlined_call_operand.vmem [shape: f32[2,8,8,16], index: 7, kind: output, shape index: {}]  }
   0x1 LB: > { %s3575_s25 = sadd.s32 4294967295, %s3947_s24   ;;  %p3579_p0 = scmp.ge.s32.totalorder %s3947_s24, 1  ;;  %s3947_s24 = sphi %s3990_s24, %s17_s24  }
   0x2   : > { %p237_p1 = scmp.lt.s32.totalorder %s3947_s24, 3 }
   0x4   : > { %p238_p2 = pnand %p3579_p0, %p237_p1 }
   0x5   : > { %p269_p3 = scmp.lt.s32.totalorder (!%p238_p2), %s3575_s25, 1 }
   0x6   : > { %241 = sbr.rel (%p238_p2) target bundleno = 896 (0x380), region = 48 }
   0xb   : > { %v3855_v0 = vld [vmem:[%s4823_s1 + $0x8] sm:$0xff]  ;;  %s4841_s25 = smov (!%p269_p3, %s3575_s25), 1  ;;  %vm323_vm0 = vcmask 130048   ;;  %v3854_v8 = vld [vmem:[%s4823_s1] sm:$0xff]  ;;  %v3856_v26 = vld [vmem:[%s4823_s1 + $0x10] sm:$0xff]  ;;  %vm1899_vm1 = vcmask 64512  }
   0xc   : > { %334 = vmatpush.bf16.msra.mxu0 %v3855_v0  ;;  %350 = vmatpush.bf16.msra.mxu1 %v3855_v0  ;;  %s3863_s28 = smul.u32 160, %s4841_s25  ;;  %v3857_v43 = vld [vmem:[%s4823_s1 + $0x18] sm:$0xff]  ;;  %v3858_v52 = vld [vmem:[%s4823_s1 + $0x20] sm:$0xff]  ;;  %v3859_v57 = vld [vmem:[%s4823_s1 + $0x28] sm:$0xff]  ;;  %vm1901_vm2 = vcmask 58368   ;;  %vm1968_vm3 = vcmask 1043456  }
   0xd   : > { %366 = vmatpush.bf16.msra.mxu2 %v3855_v0  ;;  %382 = vmatpush.bf16.msra.mxu3 %v3855_v0  ;;  %s3853_s9 = sshll.u32 %s4841_s25, 6 }
   0xe   : > { %s4007_s8 = scalar_lea.vmem %s4822_s0, %s3863_s28  ;;  %s4737_s11 = scalar_lea.vmem %s4829_s7, %s3853_s9 }
   0xf   : > { %v298_v1 = vld [vmem:[%s4007_s8 + $0x1] sm:$0xff]  ;;  %v299_v2 = vld [vmem:[%s4007_s8 + $0x11] sm:$0xff] }
  0x10   : > { %414 = vmatpush.bf16.msrb.mxu1 %v3855_v0  ;;  %398 = vmatpush.bf16.msrb.mxu0 %v3855_v0  ;;  %v300_v3 = vld [vmem:[%s4007_s8 + $0x21] sm:$0xff]  ;;  %v306_v4 = vpack.c.bf16 %v298_v1, %v298_v1  ;;  %v4012_v5 = vpack.c.bf16 %v299_v2, %v299_v2  ;;  %v301_v7 = vld [vmem:[%s4007_s8 + $0x31] sm:$0xff] }
  0x11   : > { %430 = vmatpush.bf16.msrb.mxu2 %v3855_v0  ;;  %446 = vmatpush.bf16.msrb.mxu3 %v3855_v0  ;;  %v4014_v6 = vpack.c.bf16 %v300_v3, %v300_v3  ;;  %v4020_v9 = vpack.c.bf16 %v301_v7, %v301_v7  ;;  %v302_v10 = vld [vmem:[%s4007_s8 + $0x41] sm:$0xff]  ;;  %v303_v11 = vld [vmem:[%s4007_s8 + $0x51] sm:$0xff] }
  0x12   : > { %3589 = vmatmul.msk.bf16.vlgmr.msra.gmra.mxu0 %vm323_vm0, %v306_v4  ;;  %3590 = vmatmul.msk.bf16.vlgmr.msra.gmra.mxu1 %vm323_vm0, %v4012_v5  ;;  %v304_v12 = vld [vmem:[%s4007_s8 + $0x61] sm:$0xff]  ;;  %v305_v13 = vld [vmem:[%s4007_s8 + $0x71] sm:$0xff]  ;;  %v4033_v14 = vpack.c.bf16 %v302_v10, %v302_v10  ;;  %v4035_v15 = vpack.c.bf16 %v303_v11, %v303_v11 }
  0x13   : > { %3591 = vmatmul.msk.bf16.vlgmr.msra.gmra.mxu2 %vm323_vm0, %v4014_v6  ;;  %3592 = vmatmul.msk.bf16.vlgmr.msra.gmra.mxu3 %vm323_vm0, %v4020_v9  ;;  %v4037_v16 = vpack.c.bf16 %v304_v12, %v304_v12  ;;  %v4039_v17 = vpack.c.bf16 %v305_v13, %v305_v13  ;;  %v280_v18 = vld [vmem:[%s4007_s8] sm:$0xff]  ;;  %v281_v19 = vld [vmem:[%s4007_s8 + $0x10] sm:$0xff] }
  0x14   : > { %484 = vmatpush.bf16.msra.mxu1 %v3854_v8  ;;  %468 = vmatpush.bf16.msra.mxu0 %v3854_v8  ;;  %v282_v20 = vld [vmem:[%s4007_s8 + $0x20] sm:$0xff]  ;;  %v283_v21 = vld [vmem:[%s4007_s8 + $0x30] sm:$0xff]  ;;  %v288_v22 = vpack.c.bf16 %v280_v18, %v280_v18  ;;  %v289_v23 = vpack.c.bf16 %v281_v19, %v281_v19 }
  0x15   : > { %500 = vmatpush.bf16.msra.mxu2 %v3854_v8  ;;  %516 = vmatpush.bf16.msra.mxu3 %v3854_v8  ;;  %v4053_v24 = vpack.c.bf16 %v282_v20, %v282_v20  ;;  %v4055_v25 = vpack.c.bf16 %v283_v21, %v283_v21  ;;  %v284_v27 = vld [vmem:[%s4007_s8 + $0x40] sm:$0xff]  ;;  %v285_v28 = vld [vmem:[%s4007_s8 + $0x50] sm:$0xff] }
  0x16   : > { %v286_v29 = vld [vmem:[%s4007_s8 + $0x60] sm:$0xff]  ;;  %v287_v30 = vld [vmem:[%s4007_s8 + $0x70] sm:$0xff]  ;;  %v4070_v31 = vpack.c.bf16 %v284_v27, %v284_v27  ;;  %v4072_v32 = vpack.c.bf16 %v285_v28, %v285_v28 }
  0x17   : > { %v4074_v33 = vpack.c.bf16 %v286_v29, %v286_v29  ;;  %v4076_v34 = vpack.c.bf16 %v287_v30, %v287_v30  ;;  %v586_v35 = vld [vmem:[%s4007_s8 + $0x2] sm:$0xff]  ;;  %v587_v36 = vld [vmem:[%s4007_s8 + $0x12] sm:$0xff] }
  0x18   : > { %v588_v37 = vld [vmem:[%s4007_s8 + $0x22] sm:$0xff]  ;;  %v589_v38 = vld [vmem:[%s4007_s8 + $0x32] sm:$0xff]  ;;  %v594_v39 = vpack.c.bf16 %v586_v35, %v586_v35  ;;  %v4090_v40 = vpack.c.bf16 %v587_v36, %v587_v36 }
  0x19   : > { %v4092_v41 = vpack.c.bf16 %v588_v37, %v588_v37  ;;  %v4094_v42 = vpack.c.bf16 %v589_v38, %v589_v38  ;;  %v590_v44 = vld [vmem:[%s4007_s8 + $0x42] sm:$0xff]  ;;  %v591_v45 = vld [vmem:[%s4007_s8 + $0x52] sm:$0xff] }
  0x1a   : > { %v592_v46 = vld [vmem:[%s4007_s8 + $0x62] sm:$0xff]  ;;  %v593_v47 = vld [vmem:[%s4007_s8 + $0x72] sm:$0xff]  ;;  %v4110_v48 = vpack.c.bf16 %v590_v44, %v590_v44  ;;  %v4112_v49 = vpack.c.bf16 %v591_v45, %v591_v45 }
  0x1b   : > { %v4114_v50 = vpack.c.bf16 %v592_v46, %v592_v46  ;;  %v4116_v51 = vpack.c.bf16 %v593_v47, %v593_v47  ;;  %v3630_v53 = vld [vmem:[%s4007_s8 + $0x80] sm:$0xff]  ;;  %v3860_v20 = vld [vmem:[%s4823_s1 + $0x30] sm:$0xff] }
  0x1c   : > { %v4137_v54 = vpack.c.bf16 %v3630_v53, %v3630_v53  ;;  %v3652_v62 = vld [vmem:[%s4007_s8 + $0x81] sm:$0xff] }
  0x1d   : > { %v4159_v3 = vpack.c.bf16 %v3652_v62, %v3652_v62  ;;  %v3674_v29 = vld [vmem:[%s4007_s8 + $0x82] sm:$0xff] }
  0x1e   : > { %v4181_v38 = vpack.c.bf16 %v3674_v29, %v3674_v29 }
  0x22   : > { %3593 = vmatmul.msk.bf16.vlgmr.msrb.gmra.mxu0 %vm323_vm0, %v4033_v14  ;;  %3594 = vmatmul.msk.bf16.vlgmr.msrb.gmra.mxu1 %vm323_vm0, %v4035_v15 }
  0x23   : > { %3595 = vmatmul.msk.bf16.vlgmr.msrb.gmra.mxu2 %vm323_vm0, %v4037_v16  ;;  %3596 = vmatmul.msk.bf16.vlgmr.msrb.gmra.mxu3 %vm323_vm0, %v4039_v17 }
  0x24   : > { %564 = vmatpush.bf16.msrb.mxu2 %v3854_v8  ;;  %548 = vmatpush.bf16.msrb.mxu1 %v3854_v8 }
  0x25   : > { %532 = vmatpush.bf16.msrb.mxu0 %v3854_v8  ;;  %580 = vmatpush.bf16.msrb.mxu3 %v3854_v8 }
  0x32   : > { %3601 = vmatmul.msk.bf16.vlgmr.msra.gmra.mxu0 %vm323_vm0, %v288_v22  ;;  %3602 = vmatmul.msk.bf16.vlgmr.msra.gmra.mxu1 %vm323_vm0, %v289_v23 }
  0x33   : > { %3603 = vmatmul.msk.bf16.vlgmr.msra.gmra.mxu2 %vm323_vm0, %v4053_v24  ;;  %3604 = vmatmul.msk.bf16.vlgmr.msra.gmra.mxu3 %vm323_vm0, %v4055_v25 }
  0x34   : > { %653 = vmatpush.bf16.msra.mxu2 %v3856_v26  ;;  %637 = vmatpush.bf16.msra.mxu1 %v3856_v26 }
  0x35   : > { %621 = vmatpush.bf16.msra.mxu0 %v3856_v26  ;;  %669 = vmatpush.bf16.msra.mxu3 %v3856_v26 }
  0x42   : > { %3605 = vmatmul.msk.bf16.vlgmr.msrb.gmra.mxu0 %vm323_vm0, %v4070_v31  ;;  %3606 = vmatmul.msk.bf16.vlgmr.msrb.gmra.mxu1 %vm323_vm0, %v4072_v32 }
  0x43   : > { %3607 = vmatmul.msk.bf16.vlgmr.msrb.gmra.mxu2 %vm323_vm0, %v4074_v33  ;;  %3608 = vmatmul.msk.bf16.vlgmr.msrb.gmra.mxu3 %vm323_vm0, %v4076_v34 }
  0x44   : > { %717 = vmatpush.bf16.msrb.mxu2 %v3856_v26  ;;  %701 = vmatpush.bf16.msrb.mxu1 %v3856_v26 }
  0x45   : > { %685 = vmatpush.bf16.msrb.mxu0 %v3856_v26  ;;  %733 = vmatpush.bf16.msrb.mxu3 %v3856_v26 }
  0x52   : > { %3615 = vmatmul.msk.bf16.vlgmr.msra.gmra.mxu0 %vm323_vm0, %v594_v39  ;;  %3616 = vmatmul.msk.bf16.vlgmr.msra.gmra.mxu1 %vm323_vm0, %v4090_v40 }
  0x53   : > { %3617 = vmatmul.msk.bf16.vlgmr.msra.gmra.mxu2 %vm323_vm0, %v4092_v41  ;;  %3618 = vmatmul.msk.bf16.vlgmr.msra.gmra.mxu3 %vm323_vm0, %v4094_v42 }
  0x54   : > { %815 = vmatpush.bf16.msra.mxu2 %v3857_v43  ;;  %799 = vmatpush.bf16.msra.mxu1 %v3857_v43 }
  0x55   : > { %783 = vmatpush.bf16.msra.mxu0 %v3857_v43  ;;  %831 = vmatpush.bf16.msra.mxu3 %v3857_v43 }
  0x62   : > { %3619 = vmatmul.msk.bf16.vlgmr.msrb.gmra.mxu0 %vm323_vm0, %v4110_v48  ;;  %3620 = vmatmul.msk.bf16.vlgmr.msrb.gmra.mxu1 %vm323_vm0, %v4112_v49 }
  0x63   : > { %3621 = vmatmul.msk.bf16.vlgmr.msrb.gmra.mxu2 %vm323_vm0, %v4114_v50  ;;  %3622 = vmatmul.msk.bf16.vlgmr.msrb.gmra.mxu3 %vm323_vm0, %v4116_v51 }
  0x64   : > { %879 = vmatpush.bf16.msrb.mxu2 %v3857_v43  ;;  %863 = vmatpush.bf16.msrb.mxu1 %v3857_v43 }
  0x65   : > { %847 = vmatpush.bf16.msrb.mxu0 %v3857_v43  ;;  %895 = vmatpush.bf16.msrb.mxu3 %v3857_v43 }
  0x72   : > { %3637 = vmatmul.msk.bf16.vlgmr.msra.gmra.mxu0 %vm323_vm0, %v289_v23  ;;  %3638 = vmatmul.msk.bf16.vlgmr.msra.gmra.mxu1 %vm323_vm0, %v4053_v24 }
  0x73   : > { %3639 = vmatmul.msk.bf16.vlgmr.msra.gmra.mxu2 %vm323_vm0, %v4055_v25  ;;  %3640 = vmatmul.msk.bf16.vlgmr.msra.gmra.mxu3 %vm323_vm0, %v4070_v31 }
  0x74   : > { %976 = vmatpush.bf16.msra.mxu2 %v3858_v52  ;;  %960 = vmatpush.bf16.msra.mxu1 %v3858_v52 }
  0x75   : > { %944 = vmatpush.bf16.msra.mxu0 %v3858_v52  ;;  %992 = vmatpush.bf16.msra.mxu3 %v3858_v52 }
  0x82   : > { %3641 = vmatmul.msk.bf16.vlgmr.msrb.gmra.mxu0 %vm323_vm0, %v4072_v32  ;;  %3642 = vmatmul.msk.bf16.vlgmr.msrb.gmra.mxu1 %vm323_vm0, %v4074_v33 }
  0x83   : > { %3643 = vmatmul.msk.bf16.vlgmr.msrb.gmra.mxu2 %vm323_vm0, %v4076_v34  ;;  %3644 = vmatmul.msk.bf16.vlgmr.msrb.gmra.mxu3 %vm323_vm0, %v4137_v54 }
  0x84   : > { %1040 = vmatpush.bf16.msrb.mxu2 %v3858_v52  ;;  %1024 = vmatpush.bf16.msrb.mxu1 %v3858_v52 }
  0x85   : > { %1008 = vmatpush.bf16.msrb.mxu0 %v3858_v52  ;;  %1056 = vmatpush.bf16.msrb.mxu3 %v3858_v52 }
  0x8f   : > { %v336_v55 = vpop.f32.mrf.mxu0  ;;  %v352_v56 = vpop.f32.mrf.mxu1 }
  0x92   : > { %3659 = vmatmul.msk.bf16.vlgmr.msra.gmra.mxu0 %vm323_vm0, %v4012_v5  ;;  %3660 = vmatmul.msk.bf16.vlgmr.msra.gmra.mxu1 %vm323_vm0, %v4014_v6 }
  0x93   : > { %3661 = vmatmul.msk.bf16.vlgmr.msra.gmra.mxu2 %vm323_vm0, %v4020_v9  ;;  %3662 = vmatmul.msk.bf16.vlgmr.msra.gmra.mxu3 %vm323_vm0, %v4033_v14 }
  0x94   : > { %1137 = vmatpush.bf16.msra.mxu2 %v3859_v57  ;;  %1121 = vmatpush.bf16.msra.mxu1 %v3859_v57 }
  0x95   : > { %1105 = vmatpush.bf16.msra.mxu0 %v3859_v57  ;;  %1153 = vmatpush.bf16.msra.mxu3 %v3859_v57 }
  0x96   : > { %v368_v58 = vpop.f32.mrf.mxu2  ;;  %v384_v59 = vpop.f32.mrf.mxu3 }
  0x97   : > { %v338_v60 = vpop.f32.mrf.mxu0  ;;  %v354_v61 = vpop.f32.mrf.mxu1 }
  0x98   : > { %v3861_v60 = vld [vmem:[%s4823_s1 + $0x38] sm:$0xff] }
  0x9e   : > { %v370_v63 = vpop.f32.mrf.mxu2  ;;  %v386_v0 = vpop.f32.mrf.mxu3 }
  0x9f   : > { %v400_v1 = vpop.f32.mrf.mxu0  ;;  %v416_v2 = vpop.f32.mrf.mxu1 }
  0xa2   : > { %3663 = vmatmul.msk.bf16.vlgmr.msrb.gmra.mxu0 %vm323_vm0, %v4035_v15  ;;  %3664 = vmatmul.msk.bf16.vlgmr.msrb.gmra.mxu1 %vm323_vm0, %v4037_v16 }
  0xa3   : > { %3665 = vmatmul.msk.bf16.vlgmr.msrb.gmra.mxu2 %vm323_vm0, %v4039_v17  ;;  %3666 = vmatmul.msk.bf16.vlgmr.msrb.gmra.mxu3 %vm323_vm0, %v4159_v3 }
  0xa4   : > { %1201 = vmatpush.bf16.msrb.mxu2 %v3859_v57  ;;  %1185 = vmatpush.bf16.msrb.mxu1 %v3859_v57 }
  0xa5   : > { %1169 = vmatpush.bf16.msrb.mxu0 %v3859_v57  ;;  %1217 = vmatpush.bf16.msrb.mxu3 %v3859_v57 }
  0xa6   : > { %v432_v4 = vpop.f32.mrf.mxu2  ;;  %v448_v5 = vpop.f32.mrf.mxu3 }
  0xa7   : > { %v402_v7 = vpop.f32.mrf.mxu0  ;;  %v418_v8 = vpop.f32.mrf.mxu1 }
  0xae   : > { %v434_v10 = vpop.f32.mrf.mxu2  ;;  %v450_v11 = vpop.f32.mrf.mxu3 }
  0xaf   : > { %v470_v12 = vpop.f32.mrf.mxu0  ;;  %v486_v13 = vpop.f32.mrf.mxu1 }
  0xb0   : > { %v471_v18 = vadd.f32 %v470_v12, %v336_v55  ;;  %v487_v19 = vadd.f32 %v486_v13, %v352_v56 }
  0xb2   : > { %3681 = vmatmul.msk.bf16.vlgmr.msra.gmra.mxu0 %vm323_vm0, %v4090_v40  ;;  %3682 = vmatmul.msk.bf16.vlgmr.msra.gmra.mxu1 %vm323_vm0, %v4092_v41 }
  0xb3   : > { %3683 = vmatmul.msk.bf16.vlgmr.msra.gmra.mxu2 %vm323_vm0, %v4094_v42  ;;  %3684 = vmatmul.msk.bf16.vlgmr.msra.gmra.mxu3 %vm323_vm0, %v4110_v48 }
  0xb4   : > { %1299 = vmatpush.bf16.msra.mxu2 %v3860_v20  ;;  %1283 = vmatpush.bf16.msra.mxu1 %v3860_v20 }
  0xb5   : > { %1267 = vmatpush.bf16.msra.mxu0 %v3860_v20  ;;  %1315 = vmatpush.bf16.msra.mxu3 %v3860_v20 }
  0xb6   : > { %v502_v21 = vpop.f32.mrf.mxu2  ;;  %v518_v22 = vpop.f32.mrf.mxu3 }
  0xb7   : > { %v503_v23 = vadd.f32 %v502_v21, %v368_v58  ;;  %v519_v26 = vadd.f32 %v518_v22, %v384_v59  ;;  %v472_v27 = vpop.f32.mrf.mxu0  ;;  %v488_v28 = vpop.f32.mrf.mxu1 }
  0xbe   : > { %v504_v30 = vpop.f32.mrf.mxu2  ;;  %v520_v35 = vpop.f32.mrf.mxu3 }
  0xbf   : > { %v534_v36 = vpop.f32.mrf.mxu0  ;;  %v550_v37 = vpop.f32.mrf.mxu1 }
  0xc0   : > { %v535_v39 = vadd.f32 %v534_v36, %v400_v1  ;;  %v551_v40 = vadd.f32 %v550_v37, %v416_v2 }
  0xc2   : > { %3685 = vmatmul.msk.bf16.vlgmr.msrb.gmra.mxu0 %vm323_vm0, %v4112_v49  ;;  %3686 = vmatmul.msk.bf16.vlgmr.msrb.gmra.mxu1 %vm323_vm0, %v4114_v50 }
  0xc3   : > { %3687 = vmatmul.msk.bf16.vlgmr.msrb.gmra.mxu2 %vm323_vm0, %v4116_v51  ;;  %3688 = vmatmul.msk.bf16.vlgmr.msrb.gmra.mxu3 %vm323_vm0, %v4181_v38 }
  0xc4   : > { %1363 = vmatpush.bf16.msrb.mxu2 %v3860_v20  ;;  %1347 = vmatpush.bf16.msrb.mxu1 %v3860_v20 }
  0xc5   : > { %1331 = vmatpush.bf16.msrb.mxu0 %v3860_v20  ;;  %1379 = vmatpush.bf16.msrb.mxu3 %v3860_v20 }
  0xc6   : > { %v566_v43 = vpop.f32.mrf.mxu2  ;;  %v582_v44 = vpop.f32.mrf.mxu3 }
  0xc7   : > { %v567_v45 = vadd.f32 %v566_v43, %v432_v4  ;;  %v583_v46 = vadd.f32 %v582_v44, %v448_v5  ;;  %v536_v47 = vpop.f32.mrf.mxu0  ;;  %v552_v52 = vpop.f32.mrf.mxu1 }
  0xce   : > { %v568_v53 = vpop.f32.mrf.mxu2  ;;  %v584_v55 = vpop.f32.mrf.mxu3 }
  0xcf   : > { %v623_v56 = vpop.f32.mrf.mxu0  ;;  %v639_v57 = vpop.f32.mrf.mxu1 }
  0xd0   : > { %v739_v58 = vadd.f32 %v623_v56, %v471_v18  ;;  %v740_v59 = vadd.f32 %v639_v57, %v487_v19 }
  0xd2   : > { %3703 = vmatmul.msk.bf16.vlgmr.msra.gmra.mxu0 %vm323_vm0, %v4053_v24  ;;  %3704 = vmatmul.msk.bf16.vlgmr.msra.gmra.mxu1 %vm323_vm0, %v4055_v25  ;;  %v3696_v24 = vld [vmem:[%s4007_s8 + $0x90] sm:$0xff] }
  0xd3   : > { %3705 = vmatmul.msk.bf16.vlgmr.msra.gmra.mxu2 %vm323_vm0, %v4070_v31  ;;  %3706 = vmatmul.msk.bf16.vlgmr.msra.gmra.mxu3 %vm323_vm0, %v4072_v32  ;;  %v1247_v8 = vpack.c.bf16 %v3696_v24, %v3696_v24 }
  0xd4   : > { %1460 = vmatpush.bf16.msra.mxu2 %v3861_v60  ;;  %1444 = vmatpush.bf16.msra.mxu1 %v3861_v60 }
  0xd5   : > { %1428 = vmatpush.bf16.msra.mxu0 %v3861_v60  ;;  %1476 = vmatpush.bf16.msra.mxu3 %v3861_v60 }
  0xd6   : > { %v655_v61 = vpop.f32.mrf.mxu2  ;;  %v671_v62 = vpop.f32.mrf.mxu3 }
  0xd7   : > { %v741_v63 = vadd.f32 %v655_v61, %v503_v23  ;;  %v742_v0 = vadd.f32 %v671_v62, %v519_v26  ;;  %v625_v1 = vpop.f32.mrf.mxu0  ;;  %v641_v2 = vpop.f32.mrf.mxu1 }
  0xde   : > { %v657_v4 = vpop.f32.mrf.mxu2  ;;  %v673_v5 = vpop.f32.mrf.mxu3 }
  0xdf   : > { %v687_v25 = vpop.f32.mrf.mxu0  ;;  %v703_v7 = vpop.f32.mrf.mxu1 }
  0xe0   : > { %v743_v31 = vadd.f32 %v687_v25, %v535_v39  ;;  %v744_v10 = vadd.f32 %v703_v7, %v551_v40 }
  0xe2   : > { %3707 = vmatmul.msk.bf16.vlgmr.msrb.gmra.mxu0 %vm323_vm0, %v4074_v33  ;;  %3708 = vmatmul.msk.bf16.vlgmr.msrb.gmra.mxu1 %vm323_vm0, %v4076_v34 }
  0xe3   : > { %3709 = vmatmul.msk.bf16.vlgmr.msrb.gmra.mxu2 %vm323_vm0, %v4137_v54  ;;  %3710 = vmatmul.msk.bf16.vlgmr.msrb.gmra.mxu3 %vm323_vm0, %v1247_v8  ;;  %v3862_v54 = vld [vmem:[%s4823_s1 + $0x40] sm:$0xff] }
  0xe4   : > { %1524 = vmatpush.bf16.msrb.mxu2 %v3861_v60  ;;  %1508 = vmatpush.bf16.msrb.mxu1 %v3861_v60 }
  0xe5   : > { %1492 = vmatpush.bf16.msrb.mxu0 %v3861_v60  ;;  %1540 = vmatpush.bf16.msrb.mxu3 %v3861_v60 }
  0xe6   : > { %v719_v32 = vpop.f32.mrf.mxu2  ;;  %v735_v11 = vpop.f32.mrf.mxu3 }
  0xe7   : > { %v745_v12 = vadd.f32 %v719_v32, %v567_v45  ;;  %v746_v13 = vadd.f32 %v735_v11, %v583_v46  ;;  %v689_v18 = vpop.f32.mrf.mxu0  ;;  %v705_v19 = vpop.f32.mrf.mxu1 }
  0xee   : > { %v721_v20 = vpop.f32.mrf.mxu2  ;;  %v737_v33 = vpop.f32.mrf.mxu3 }
  0xef   : > { %v785_v21 = vpop.f32.mrf.mxu0  ;;  %v801_v22 = vpop.f32.mrf.mxu1 }
  0xf0   : > { %v901_v34 = vadd.f32 %v785_v21, %v739_v58  ;;  %v902_v23 = vadd.f32 %v801_v22, %v740_v59 }
  0xf2   : > { %3725 = vmatmul.msk.bf16.vlgmr.msra.gmra.mxu0 %vm323_vm0, %v4014_v6  ;;  %3726 = vmatmul.msk.bf16.vlgmr.msra.gmra.mxu1 %vm323_vm0, %v4020_v9  ;;  %v3718_v6 = vld [vmem:[%s4007_s8 + $0x91] sm:$0xff] }
  0xf3   : > { %3727 = vmatmul.msk.bf16.vlgmr.msra.gmra.mxu2 %vm323_vm0, %v4033_v14  ;;  %3728 = vmatmul.msk.bf16.vlgmr.msra.gmra.mxu3 %vm323_vm0, %v4035_v15  ;;  %v1408_v40 = vpack.c.bf16 %v3718_v6, %v3718_v6 }
  0xf4   : > { %1621 = vmatpush.bf16.msra.mxu2 %v3862_v54  ;;  %1605 = vmatpush.bf16.msra.mxu1 %v3862_v54 }
  0xf5   : > { %1589 = vmatpush.bf16.msra.mxu0 %v3862_v54  ;;  %1637 = vmatpush.bf16.msra.mxu3 %v3862_v54 }
  0xf6   : > { %v817_v26 = vpop.f32.mrf.mxu2  ;;  %v833_v27 = vpop.f32.mrf.mxu3 }
  0xf7   : > { %v903_v28 = vadd.f32 %v817_v26, %v741_v63  ;;  %v904_v29 = vadd.f32 %v833_v27, %v742_v0  ;;  %v787_v30 = vpop.f32.mrf.mxu0  ;;  %v803_v35 = vpop.f32.mrf.mxu1  ;;  %v3740_v63 = vld [vmem:[%s4007_s8 + $0x92] sm:$0xff] }
  0xf8   : > { %v1569_v24 = vpack.c.bf16 %v3740_v63, %v3740_v63 }
  0xfe   : > { %v819_v36 = vpop.f32.mrf.mxu2  ;;  %v835_v37 = vpop.f32.mrf.mxu3 }
  0xff   : > { %v849_v9 = vpop.f32.mrf.mxu0  ;;  %v865_v39 = vpop.f32.mrf.mxu1 }
 0x100   : > { %v905_v14 = vadd.f32 %v849_v9, %v743_v31  ;;  %v906_v43 = vadd.f32 %v865_v39, %v744_v10 }
 0x102   : > { %3729 = vmatmul.msk.bf16.vlgmr.msrb.gmra.mxu0 %vm323_vm0, %v4037_v16  ;;  %3730 = vmatmul.msk.bf16.vlgmr.msrb.gmra.mxu1 %vm323_vm0, %v4039_v17 }
 0x103   : > { %3731 = vmatmul.msk.bf16.vlgmr.msrb.gmra.mxu2 %vm323_vm0, %v4159_v3  ;;  %3732 = vmatmul.msk.bf16.vlgmr.msrb.gmra.mxu3 %vm323_vm0, %v1408_v40 }
 0x104   : > { %1685 = vmatpush.bf16.msrb.mxu2 %v3862_v54  ;;  %1669 = vmatpush.bf16.msrb.mxu1 %v3862_v54 }
 0x105   : > { %1653 = vmatpush.bf16.msrb.mxu0 %v3862_v54  ;;  %1701 = vmatpush.bf16.msrb.mxu3 %v3862_v54 }
 0x106   : > { %v881_v15 = vpop.f32.mrf.mxu2  ;;  %v897_v44 = vpop.f32.mrf.mxu3 }
 0x107   : > { %v907_v45 = vadd.f32 %v881_v15, %v745_v12  ;;  %v908_v46 = vadd.f32 %v897_v44, %v746_v13  ;;  %v851_v47 = vpop.f32.mrf.mxu0  ;;  %v867_v52 = vpop.f32.mrf.mxu1 }
 0x10e   : > { %v883_v53 = vpop.f32.mrf.mxu2  ;;  %v899_v16 = vpop.f32.mrf.mxu3 }
 0x10f   : > { %v946_v55 = vpop.f32.mrf.mxu0  ;;  %v962_v17 = vpop.f32.mrf.mxu1 }
 0x110   : > { %v1062_v56 = vadd.f32 %v946_v55, %v901_v34  ;;  %v1063_v57 = vadd.f32 %v962_v17, %v902_v23 }
 0x112   : > { %3747 = vmatmul.msk.bf16.vlgmr.msra.gmra.mxu0 %vm323_vm0, %v4092_v41  ;;  %3748 = vmatmul.msk.bf16.vlgmr.msra.gmra.mxu1 %vm323_vm0, %v4094_v42 }
 0x113   : > { %3749 = vmatmul.msk.bf16.vlgmr.msra.gmra.mxu2 %vm323_vm0, %v4110_v48  ;;  %3750 = vmatmul.msk.bf16.vlgmr.msra.gmra.mxu3 %vm323_vm0, %v4112_v49 }
 0x116   : > { %v978_v3 = vpop.f32.mrf.mxu2  ;;  %v994_v58 = vpop.f32.mrf.mxu3 }
 0x117   : > { %v1064_v59 = vadd.f32 %v978_v3, %v903_v28  ;;  %v1065_v60 = vadd.f32 %v994_v58, %v904_v29  ;;  %v948_v61 = vpop.f32.mrf.mxu0  ;;  %v964_v62 = vpop.f32.mrf.mxu1 }
 0x11e   : > { %v980_v0 = vpop.f32.mrf.mxu2  ;;  %v996_v1 = vpop.f32.mrf.mxu3 }
 0x11f   : > { %v1010_v2 = vpop.f32.mrf.mxu0  ;;  %v1026_v41 = vpop.f32.mrf.mxu1 }
 0x120   : > { %v1066_v4 = vadd.f32 %v1010_v2, %v905_v14  ;;  %v1067_v42 = vadd.f32 %v1026_v41, %v906_v43 }
 0x122   : > { %3751 = vmatmul.msk.bf16.vlgmr.msrb.gmra.mxu0 %vm323_vm0, %v4114_v50  ;;  %3752 = vmatmul.msk.bf16.vlgmr.msrb.gmra.mxu1 %vm323_vm0, %v4116_v51 }
 0x123   : > { %3753 = vmatmul.msk.bf16.vlgmr.msrb.gmra.mxu2 %vm323_vm0, %v4181_v38  ;;  %3754 = vmatmul.msk.bf16.vlgmr.msrb.gmra.mxu3 %vm323_vm0, %v1569_v24 }
 0x126   : > { %v1042_v48 = vpop.f32.mrf.mxu2  ;;  %v1058_v49 = vpop.f32.mrf.mxu3 }
 0x127   : > { %v1068_v5 = vadd.f32 %v1042_v48, %v907_v45  ;;  %v1069_v25 = vadd.f32 %v1058_v49, %v908_v46  ;;  %v1012_v7 = vpop.f32.mrf.mxu0  ;;  %v1028_v8 = vpop.f32.mrf.mxu1 }
 0x12e   : > { %v1044_v31 = vpop.f32.mrf.mxu2  ;;  %v1060_v10 = vpop.f32.mrf.mxu3 }
 0x12f   : > { %v1107_v32 = vpop.f32.mrf.mxu0  ;;  %v1123_v11 = vpop.f32.mrf.mxu1 }
 0x130   : > { %v1223_v12 = vadd.f32 %v1107_v32, %v1062_v56  ;;  %v1224_v50 = vadd.f32 %v1123_v11, %v1063_v57  ;;  %v4271_v11 = vld [vmem:[%s4824_s2] ss:$0 sm:$0xff] }
 0x136   : > { %v1139_v13 = vpop.f32.mrf.mxu2  ;;  %v1155_v18 = vpop.f32.mrf.mxu3 }
 0x137   : > { %v4245_v51 = vadd.f32 %v1139_v13, %v1064_v59  ;;  %v4247_v19 = vadd.f32 %v1155_v18, %v1065_v60  ;;  %v1109_v38 = vpop.f32.mrf.mxu0  ;;  %v1125_v20 = vpop.f32.mrf.mxu1  ;;  %v4278_v18 = vld [vmem:[%s4825_s3] ss:$0 sm:$0xff] }
 0x13e   : > { %v1141_v33 = vpop.f32.mrf.mxu2  ;;  %v1157_v21 = vpop.f32.mrf.mxu3 }
 0x13f   : > { %v1171_v22 = vpop.f32.mrf.mxu0  ;;  %v1187_v34 = vpop.f32.mrf.mxu1 }
 0x140   : > { %v1227_v23 = vadd.f32 %v1171_v22, %v1066_v4  ;;  %v1228_v54 = vadd.f32 %v1187_v34, %v1067_v42 }
 0x146   : > { %v1203_v26 = vpop.f32.mrf.mxu2  ;;  %v1219_v27 = vpop.f32.mrf.mxu3 }
 0x147   : > { %v1229_v28 = vadd.f32 %v1203_v26, %v1068_v5  ;;  %v1230_v29 = vadd.f32 %v1219_v27, %v1069_v25  ;;  %v1173_v30 = vpop.f32.mrf.mxu0  ;;  %v1189_v35 = vpop.f32.mrf.mxu1  ;;  %v3949_v5 = vmov 0.0  }
 0x148   : > { %1903 = vst.msk [vmem:[#allocation2 + $0x10] sm:$0xff] %vm1899_vm1, %v3949_v5 }
 0x149   : > { %1904 = vst.msk [vmem:[#allocation2 + $0x18] sm:$0x3] %vm1901_vm2, %v3949_v5 }
 0x14a   : > { %1900 = vst.msk [vmem:[#allocation2] sm:$0xff] %vm1899_vm1, %v3949_v5 }
 0x14b   : > { %1902 = vst.msk [vmem:[#allocation2 + $0x8] sm:$0x3] %vm1901_vm2, %v3949_v5 }
 0x14c   : > { %1905 = vst.msk [vmem:[#allocation2 + $0x20] sm:$0xff] %vm1899_vm1, %v3949_v5 }
 0x14d   : > { %1906 = vst.msk [vmem:[#allocation2 + $0x28] sm:$0x3] %vm1901_vm2, %v3949_v5 }
 0x14e   : > { %v1205_v6 = vpop.f32.mrf.mxu2  ;;  %v1221_v36 = vpop.f32.mrf.mxu3  ;;  %1907 = vst.msk [vmem:[#allocation2 + $0x30] sm:$0xff] %vm1899_vm1, %v3949_v5 }
 0x14f   : > { %v1269_v37 = vpop.f32.mrf.mxu0  ;;  %v1285_v9 = vpop.f32.mrf.mxu1  ;;  %1908 = vst.msk [vmem:[#allocation2 + $0x38] sm:$0x3] %vm1901_vm2, %v3949_v5 }
 0x150   : > { %v1385_v25 = vadd.f32 %v1269_v37, %v1223_v12  ;;  %v1386_v7 = vadd.f32 %v1285_v9, %v1224_v50  ;;  %1909 = vst.msk [vmem:[#allocation2 + $0x40] sm:$0xff] %vm1899_vm1, %v3949_v5 }
 0x151   : > { %1910 = vst.msk [vmem:[#allocation2 + $0x48] sm:$0x3] %vm1901_vm2, %v3949_v5 }
 0x152   : > { %1911 = vst.msk [vmem:[#allocation2 + $0x50] sm:$0xff] %vm1899_vm1, %v3949_v5 }
 0x153   : > { %1912 = vst.msk [vmem:[#allocation2 + $0x58] sm:$0x3] %vm1901_vm2, %v3949_v5 }
 0x154   : > { %1913 = vst.msk [vmem:[#allocation2 + $0x60] sm:$0xff] %vm1899_vm1, %v3949_v5 }
 0x155   : > { %1914 = vst.msk [vmem:[#allocation2 + $0x68] sm:$0x3] %vm1901_vm2, %v3949_v5 }
 0x156   : > { %v1301_v39 = vpop.f32.mrf.mxu2  ;;  %v1317_v40 = vpop.f32.mrf.mxu3  ;;  %1915 = vst.msk [vmem:[#allocation2 + $0x70] sm:$0xff] %vm1899_vm1, %v3949_v5 }
 0x157   : > { %v1271_v14 = vpop.f32.mrf.mxu0  ;;  %v1287_v43 = vpop.f32.mrf.mxu1  ;;  %v1387_v21 = vadd.f32 %v1301_v39, %v4245_v51  ;;  %v1388_v22 = vadd.f32 %v1317_v40, %v4247_v19  ;;  %1916 = vst.msk [vmem:[#allocation2 + $0x78] sm:$0x3] %vm1901_vm2, %v3949_v5  ;;  %v3763_v40 = vld [vmem:[%s4826_s4 + $0x4] sm:$0xf] }
 0x158   : > { %1917 = vst.msk [vmem:[#allocation2 + $0x80] sm:$0xff] %vm1899_vm1, %v3949_v5 }
 0x159   : > { %1918 = vst.msk [vmem:[#allocation2 + $0x88] sm:$0x3] %vm1901_vm2, %v3949_v5 }
 0x15a   : > { %1919 = vst.msk [vmem:[#allocation2 + $0x90] sm:$0xff] %vm1899_vm1, %v3949_v5 }
 0x15b   : > { %1920 = vst.msk [vmem:[#allocation2 + $0x98] sm:$0x3] %vm1901_vm2, %v3949_v5 }
 0x15e   : > { %v1303_v15 = vpop.f32.mrf.mxu2  ;;  %v1319_v44 = vpop.f32.mrf.mxu3 }
 0x15f   : > { %v1333_v45 = vpop.f32.mrf.mxu0  ;;  %v1349_v46 = vpop.f32.mrf.mxu1  ;;  %v1970_v15 = vsel %vm1968_vm3, %v3763_v40, 0 }
 0x160   : > { %v4249_v47 = vadd.f32 %v1333_v45, %v1227_v23  ;;  %v4251_v52 = vadd.f32 %v1349_v46, %v1228_v54  ;;  %1979 = vmatpush.bf16.msra.mxu0 %v1970_v15  ;;  %2011 = vmatpush.bf16.msra.mxu2 %v1970_v15 }
 0x161   : > { %2027 = vmatpush.bf16.msra.mxu3 %v1970_v15  ;;  %1995 = vmatpush.bf16.msra.mxu1 %v1970_v15 }
 0x164   : > { %2043 = vmatpush.bf16.msrb.mxu0 %v1970_v15  ;;  %2075 = vmatpush.bf16.msrb.mxu2 %v1970_v15 }
 0x165   : > { %2091 = vmatpush.bf16.msrb.mxu3 %v1970_v15  ;;  %2059 = vmatpush.bf16.msrb.mxu1 %v1970_v15 }
 0x166   : > { %v1365_v53 = vpop.f32.mrf.mxu2  ;;  %v1381_v16 = vpop.f32.mrf.mxu3 }
 0x167   : > { %v4253_v55 = vadd.f32 %v1365_v53, %v1229_v28  ;;  %v4255_v17 = vadd.f32 %v1381_v16, %v1230_v29  ;;  %v1335_v56 = vpop.f32.mrf.mxu0  ;;  %v1351_v57 = vpop.f32.mrf.mxu1 }
 0x168   : > { %v1947_v56 = vld [vmem:[#allocation2 + $0x1] sm:$0xff] }
 0x16e   : > { %v1367_v3 = vpop.f32.mrf.mxu2  ;;  %v1383_v58 = vpop.f32.mrf.mxu3 }
 0x16f   : > { %v1430_v59 = vpop.f32.mrf.mxu0  ;;  %v1446_v60 = vpop.f32.mrf.mxu1 }
 0x170   : > { %v1546_v8 = vadd.f32 %v1430_v59, %v1385_v25  ;;  %v1547_v31 = vadd.f32 %v1446_v60, %v1386_v7  ;;  %v1955_v60 = vpack.c.bf16 %v1947_v56, %v1947_v56 }
 0x172   : > { %3764 = vmatmul.msk.bf16.vlgmr.msra.gmra.mxu0 %vm1899_vm1, %v1955_v60 }
 0x176   : > { %v1462_v61 = vpop.f32.mrf.mxu2  ;;  %v1478_v62 = vpop.f32.mrf.mxu3 }
 0x177   : > { %v1432_v63 = vpop.f32.mrf.mxu0  ;;  %v1448_v0 = vpop.f32.mrf.mxu1  ;;  %v1548_v54 = vadd.f32 %v1462_v61, %v1387_v21  ;;  %v1549_v26 = vadd.f32 %v1478_v62, %v1388_v22 }
 0x17e   : > { %v1464_v1 = vpop.f32.mrf.mxu2  ;;  %v1480_v2 = vpop.f32.mrf.mxu3 }
 0x17f   : > { %v4257_v41 = vpop.f32.mrf.mxu0  ;;  %v4259_v24 = vpop.f32.mrf.mxu1 }
 0x180   : > { %v1550_v45 = vadd.f32 %v4257_v41, %v4249_v47  ;;  %v1551_v46 = vadd.f32 %v4259_v24, %v4251_v52 }
 0x186   : > { %v4261_v4 = vpop.f32.mrf.mxu2  ;;  %v4263_v42 = vpop.f32.mrf.mxu3 }
 0x187   : > { %v1496_v48 = vpop.f32.mrf.mxu0  ;;  %v1512_v49 = vpop.f32.mrf.mxu1  ;;  %v1552_v24 = vadd.f32 %v4261_v4, %v4253_v55 }
 0x18e   : > { %v1528_v10 = vpop.f32.mrf.mxu2  ;;  %v1544_v32 = vpop.f32.mrf.mxu3 }
 0x18f   : > { %v1591_v13 = vpop.f32.mrf.mxu0  ;;  %v1607_v12 = vpop.f32.mrf.mxu1 }
 0x190   : > { %v1707_v50 = vadd.f32 %v1591_v13, %v1546_v8  ;;  %v1708_v38 = vadd.f32 %v1607_v12, %v1547_v31 }
 0x192   : > { %v1719_v20 = vmul.f32 %v4271_v11, %v1707_v50  ;;  %v1720_v33 = vmul.f32 %v4271_v11, %v1708_v38  ;;  %v1553_v50 = vadd.f32 %v4263_v42, %v4255_v17 }
 0x194   : > { %v4289_v34 = vadd.f32 %v4278_v18, %v1719_v20  ;;  %v4293_v23 = vadd.f32 %v4278_v18, %v1720_v33 }
 0x196   : > { %v3755_v27 = vmul.f32 -1.442695, %v4289_v34  ;;  %v3756_v51 = vmul.f32 -1.442695, %v4293_v23  ;;  %v1623_v19 = vpop.f32.mrf.mxu2  ;;  %v1639_v28 = vpop.f32.mrf.mxu3 }
 0x197   : > { %v1709_v29 = vadd.f32 %v1623_v19, %v1548_v54  ;;  %v1710_v30 = vadd.f32 %v1639_v28, %v1549_v26  ;;  %v1593_v35 = vpop.f32.mrf.mxu0  ;;  %v1609_v6 = vpop.f32.mrf.mxu1 }
 0x198   : > { %3877 = vpow2.f32 %v3755_v27 }
 0x199   : > { %3879 = vpow2.f32 %v3756_v51  ;;  %v1721_v36 = vmul.f32 %v4271_v11, %v1709_v29  ;;  %v1722_v37 = vmul.f32 %v4271_v11, %v1710_v30 }
 0x19b   : > { %v4307_v9 = vadd.f32 %v4278_v18, %v1721_v36  ;;  %v4310_v39 = vadd.f32 %v4278_v18, %v1722_v37 }
 0x19d   : > { %v3757_v14 = vmul.f32 -1.442695, %v4307_v9  ;;  %v3758_v43 = vmul.f32 -1.442695, %v4310_v39 }
 0x19e   : > { %v3878_v44 = vpop.eup %3877  ;;  %v1625_v53 = vpop.f32.mrf.mxu2 }
 0x19f   : > { %v1641_v16 = vpop.f32.mrf.mxu3  ;;  %v3880_v57 = vpop.eup %3879  ;;  %v4325_v3 = vadd.f32 1.0, %v3878_v44  ;;  %3881 = vpow2.f32 %v3757_v14 }
 0x1a0   : > { %v1655_v58 = vpop.f32.mrf.mxu0  ;;  %v1671_v59 = vpop.f32.mrf.mxu1  ;;  %v4327_v47 = vadd.f32 1.0, %v3880_v57  ;;  %3883 = vpow2.f32 %v3758_v43 }
 0x1a1   : > { %v1711_v52 = vadd.f32 %v1655_v58, %v1550_v45  ;;  %v1712_v61 = vadd.f32 %v1671_v59, %v1551_v46  ;;  %3885 = vrcp.f32 %v4325_v3  ;;  %v1780_v7 = vand.u32 2147483647, %v4325_v3 }
 0x1a2   : > { %3887 = vrcp.f32 %v4327_v47  ;;  %v1782_v8 = vand.u32 2147483648, %v4325_v3  ;;  %vm1776_vm4 = vweird.f32 %v4325_v3  ;;  %v1795_v21 = vand.u32 2147483647, %v4327_v47 }
 0x1a3   : > { %v1723_v62 = vmul.f32 %v4271_v11, %v1711_v52  ;;  %v1724_v63 = vmul.f32 %v4271_v11, %v1712_v61  ;;  %v1797_v22 = vand.u32 2147483648, %v4327_v47  ;;  %vm4359_vm5 = vcmp.eq.f32.partialorder %v1780_v7, 8.507059e+37 }
 0x1a4   : > { %v1783_v26 = vor.u32 1.1754944e-38, %v1782_v8  ;;  %vm1791_vm6 = vweird.f32 %v4327_v47  ;;  %vm4365_vm9 = vcmp.eq.f32.partialorder %v1795_v21, 8.507059e+37 }
 0x1a5   : > { %v3882_v0 = vpop.eup %3881  ;;  %v4335_v1 = vadd.f32 %v4278_v18, %v1723_v62  ;;  %v4338_v2 = vadd.f32 %v4278_v18, %v1724_v63  ;;  %v1798_v35 = vor.u32 1.1754944e-38, %v1797_v22 }
 0x1a6   : > { %v3884_v41 = vpop.eup %3883  ;;  %v4342_v48 = vadd.f32 1.0, %v3882_v0  ;;  %v1687_v49 = vpop.f32.mrf.mxu2 }
 0x1a7   : > { %v1703_v5 = vpop.f32.mrf.mxu3  ;;  %v3886_v25 = vpop.eup %3885  ;;  %v4346_v31 = vadd.f32 1.0, %v3884_v41  ;;  %v3759_v55 = vmul.f32 -1.442695, %v4335_v1  ;;  %v1713_v4 = vadd.f32 %v1687_v49, %v1552_v24  ;;  %v3760_v20 = vmul.f32 -1.442695, %v4338_v2 }
 0x1a8   : > { %v1673_v10 = vpop.f32.mrf.mxu1  ;;  %v1657_v32 = vpop.f32.mrf.mxu0  ;;  %v1772_v12 = vmul.f32 %v3886_v25, %v4325_v3  ;;  %3889 = vrcp.f32 %v4342_v48  ;;  %vm1777_vm7 = vweird.f32 %v3886_v25  ;;  %v1714_v19 = vadd.f32 %v1703_v5, %v1553_v50 }
 0x1a9   : > { %v3888_v13 = vpop.eup %3887  ;;  %3891 = vrcp.f32 %v4346_v31  ;;  %v1725_v42 = vmul.f32 %v4271_v11, %v1713_v4  ;;  %vm1778_vm10 = vmor %vm1776_vm4, %vm1777_vm7  ;;  %vm1806_vm11 = vweird.f32 %v4342_v48  ;;  %v1810_v43 = vand.u32 2147483647, %v4342_v48 }
 0x1aa   : > { %v1787_v38 = vmul.f32 %v3888_v13, %v4327_v47  ;;  %v1773_v33 = vsub.f32 1.0, %v1772_v12  ;;  %3893 = vpow2.f32 %v3759_v55  ;;  %vm1792_vm8 = vweird.f32 %v3888_v13 }
 0x1ab   : > { %3895 = vpow2.f32 %v3760_v20  ;;  %v4370_v6 = vadd.f32 %v4278_v18, %v1725_v42  ;;  %vm1793_vm12 = vmor %vm1791_vm6, %vm1792_vm8  ;;  %v1812_v45 = vand.u32 2147483648, %v4342_v48  ;;  %v1726_v53 = vmul.f32 %v4271_v11, %v1714_v19 }
 0x1ac   : > { %v1788_v27 = vsub.f32 1.0, %v1787_v38  ;;  %v1774_v17 = vmul.f32 %v3886_v25, %v1773_v33  ;;  %v1825_v63 = vand.u32 2147483647, %v4346_v31  ;;  %v1827_v0 = vand.u32 2147483648, %v4346_v31 }
 0x1ad   : > { %v3761_v46 = vmul.f32 -1.442695, %v4370_v6  ;;  %vm1811_vm2 = vcmp.eq.f32.partialorder %v1810_v43, 8.507059e+37  ;;  %vm1821_vm4 = vweird.f32 %v4346_v31 }
 0x1ae   : > { %v1789_v51 = vmul.f32 %v3888_v13, %v1788_v27  ;;  %v3890_v28 = vpop.eup %3889  ;;  %v1775_v29 = vadd.f32 %v3886_v25, %v1774_v17  ;;  %v1689_v36 = vpop.f32.mrf.mxu2  ;;  %v1828_v10 = vor.u32 1.1754944e-38, %v1827_v0  ;;  %vm1826_vm6 = vcmp.eq.f32.partialorder %v1825_v63, 8.507059e+37 }
 0x1af   : > { %v1705_v37 = vpop.f32.mrf.mxu3  ;;  %v1802_v14 = vmul.f32 %v3890_v28, %v4342_v48  ;;  %v3892_v15 = vpop.eup %3891  ;;  %vm1807_vm13 = vweird.f32 %v3890_v28  ;;  %3897 = vpow2.f32 %v3761_v46 }
 0x1b0   : > { %v1790_v40 = vadd.f32 %v3888_v13, %v1789_v51  ;;  %v1779_v44 = vsel %vm1778_vm10, %v3886_v25, %v1775_v29  ;;  %v1817_v3 = vmul.f32 %v3892_v15, %v4346_v31  ;;  %v3894_v58 = vpop.eup %3893  ;;  %vm1822_vm14 = vweird.f32 %v3892_v15  ;;  %vm1808_vm15 = vmor %vm1806_vm11, %vm1807_vm13 }
 0x1b1   : > { %v1784_v16 = vsel %vm4359_vm5, %v1783_v26, %v1779_v44  ;;  %v1803_v57 = vsub.f32 1.0, %v1802_v14  ;;  %v3896_v47 = vpop.eup %3895  ;;  %v4390_v62 = vadd.f32 1.0, %v3894_v58  ;;  %vm1823_vm5 = vmor %vm1821_vm4, %vm1822_vm14 }
 0x1b2   : > { %v1794_v56 = vsel %vm1793_vm12, %v3888_v13, %v1790_v40  ;;  %v1891_v59 = vmul.f32 %v1784_v16, %v4289_v34  ;;  %v1818_v11 = vsub.f32 1.0, %v1817_v3  ;;  %v4395_v41 = vadd.f32 1.0, %v3896_v47 }
 0x1b3   : > { %v1799_v60 = vsel %vm4365_vm9, %v1798_v35, %v1794_v56  ;;  %v1804_v61 = vmul.f32 %v3890_v28, %v1803_v57  ;;  %v4398_v34 = vadd.f32 %v4278_v18, %v1726_v53  ;;  %3899 = vrcp.f32 %v4390_v62  ;;  %v1946_v18 = vld [vmem:[%s4826_s4] sm:$0xf] }
 0x1b4   : > { %v1892_v52 = vmul.f32 %v1799_v60, %v4293_v23  ;;  %1922 = vst.msk [vmem:[#allocation2 + $0x11] sm:$0xff] %vm1899_vm1, %v1891_v59  ;;  %v1819_v49 = vmul.f32 %v3892_v15, %v1818_v11  ;;  %v1813_v23 = vor.u32 1.1754944e-38, %v1812_v45  ;;  %3901 = vrcp.f32 %v4395_v41 }
 0x1b5   : > { %v1805_v24 = vadd.f32 %v3890_v28, %v1804_v61  ;;  %v3898_v7 = vpop.eup %3897  ;;  %v3762_v32 = vmul.f32 -1.442695, %v4398_v34  ;;  %v4415_v31 = vsel %vm1968_vm3, %v1946_v18, 0  ;;  %v1842_v27 = vand.u32 2147483648, %v4390_v62 }
 0x1b6   : > { %1923 = vst.msk [vmem:[#allocation2 + $0x21] sm:$0xff] %vm1899_vm1, %v1892_v52  ;;  %v1820_v25 = vadd.f32 %v3892_v15, %v1819_v49  ;;  %v4412_v55 = vadd.f32 1.0, %v3898_v7  ;;  %2110 = vmatpush.bf16.msra.mxu0 %v4415_v31  ;;  %v1855_v19 = vand.u32 2147483647, %v4395_v41  ;;  %vm1836_vm9 = vweird.f32 %v4390_v62 }
 0x1b7   : > { %v1809_v5 = vsel %vm1808_vm15, %v3890_v28, %v1805_v24  ;;  %3903 = vpow2.f32 %v3762_v32  ;;  %v1857_v28 = vand.u32 2147483648, %v4395_v41  ;;  %vm1851_vm10 = vweird.f32 %v4395_v41  ;;  %v1930_v32 = vld [vmem:[#allocation2] sm:$0xff] }
 0x1b8   : > { %v1814_v8 = vsel %vm1811_vm2, %v1813_v23, %v1809_v5  ;;  %v1824_v13 = vsel %vm1823_vm5, %v3892_v15, %v1820_v25  ;;  %3905 = vrcp.f32 %v4412_v55  ;;  %v1843_v40 = vor.u32 1.1754944e-38, %v1842_v27 }
 0x1b9   : > { %v1893_v48 = vmul.f32 %v1814_v8, %v4307_v9  ;;  %v1829_v12 = vsel %vm1826_vm6, %v1828_v10, %v1824_v13  ;;  %v3900_v4 = vpop.eup %3899  ;;  %vm1856_vm14 = vcmp.eq.f32.partialorder %v1855_v19, 8.507059e+37  ;;  %v1858_v44 = vor.u32 1.1754944e-38, %v1857_v28  ;;  %v2228_v19 = vld [vmem:[#allocation2 + $0x2] sm:$0xff] }
 0x1ba   : > { %v1894_v50 = vmul.f32 %v1829_v12, %v4310_v39  ;;  %v3902_v20 = vpop.eup %3901  ;;  %v1832_v9 = vmul.f32 %v3900_v4, %v4390_v62  ;;  %v1840_v39 = vand.u32 2147483647, %v4390_v62  ;;  %vm1837_vm7 = vweird.f32 %v3900_v4  ;;  %v3780_v12 = vld [vmem:[%s4826_s4 + $0x8] sm:$0xf] }
 0x1bb   : > { %1924 = vst.msk [vmem:[#allocation2 + $0x31] sm:$0xff] %vm1899_vm1, %v1893_v48  ;;  %v1948_v38 = vld [vmem:[#allocation2 + $0x11] sm:$0xff]  ;;  %v1847_v21 = vmul.f32 %v3902_v20, %v4395_v41  ;;  %vm1852_vm8 = vweird.f32 %v3902_v20  ;;  %vm1838_vm11 = vmor %vm1836_vm9, %vm1837_vm7  ;;  %v1870_v58 = vand.u32 2147483647, %v4412_v55  ;;  %v1872_v59 = vand.u32 2147483648, %v4412_v55 }
 0x1bc   : > { %1925 = vst.msk [vmem:[#allocation2 + $0x41] sm:$0xff] %vm1899_vm1, %v1894_v50  ;;  %v1833_v22 = vsub.f32 1.0, %v1832_v9  ;;  %v4424_v54 = vpack.c.bf16 %v1948_v38, %v1948_v38  ;;  %vm1841_vm12 = vcmp.eq.f32.partialorder %v1840_v39, 8.507059e+37  ;;  %vm1853_vm13 = vmor %vm1851_vm10, %vm1852_vm8  ;;  %vm1866_vm2 = vweird.f32 %v4412_v55 }
 0x1bd   : > { %v1949_v33 = vld [vmem:[#allocation2 + $0x21] sm:$0xff]  ;;  %v1848_v17 = vsub.f32 1.0, %v1847_v21  ;;  %v3904_v42 = vpop.eup %3903  ;;  %vm1871_vm5 = vcmp.eq.f32.partialorder %v1870_v58, 8.507059e+37  ;;  %v2250_v38 = vsel %vm1968_vm3, %v3780_v12, 0 }
 0x1be   : > { %v4426_v26 = vpack.c.bf16 %v1949_v33, %v1949_v33  ;;  %v1834_v51 = vmul.f32 %v3900_v4, %v1833_v22  ;;  %3765 = vmatmul.msk.bf16.vlgmr.msra.gmra.mxu1 %vm1899_vm1, %v4424_v54  ;;  %v4436_v30 = vadd.f32 1.0, %v3904_v42  ;;  %v3906_v35 = vpop.eup %3905 }
 0x1bf   : > { %v1849_v29 = vmul.f32 %v3902_v20, %v1848_v17  ;;  %2126 = vmatpush.bf16.msra.mxu1 %v4415_v31  ;;  %v1862_v43 = vmul.f32 %v3906_v35, %v4412_v55  ;;  %vm1867_vm15 = vweird.f32 %v3906_v35  ;;  %v1938_v55 = vpack.c.bf16 %v1930_v32, %v1930_v32 }
 0x1c0   : > { %3766 = vmatmul.msk.bf16.vlgmr.msra.gmra.mxu2 %vm1899_vm1, %v4426_v26  ;;  %v1835_v36 = vadd.f32 %v3900_v4, %v1834_v51  ;;  %3907 = vrcp.f32 %v4436_v30  ;;  %vm1868_vm4 = vmor %vm1866_vm2, %vm1867_vm15  ;;  %v1887_v24 = vand.u32 2147483648, %v4436_v30  ;;  %v1885_v23 = vand.u32 2147483647, %v4436_v30 }
 0x1c1   : > { %2142 = vmatpush.bf16.msra.mxu2 %v4415_v31  ;;  %v1850_v14 = vadd.f32 %v3902_v20, %v1849_v29  ;;  %v1863_v16 = vsub.f32 1.0, %v1862_v43  ;;  %vm1881_vm7 = vweird.f32 %v4436_v30  ;;  %v3789_v29 = vld [vmem:[%s4826_s4 + $0xc] sm:$0xf] }
 0x1c2   : > { %v1950_v37 = vld [vmem:[#allocation2 + $0x31] sm:$0xff]  ;;  %v1839_v15 = vsel %vm1838_vm11, %v3900_v4, %v1835_v36  ;;  %v1888_v8 = vor.u32 1.1754944e-38, %v1887_v24  ;;  %vm1886_vm9 = vcmp.eq.f32.partialorder %v1885_v23, 8.507059e+37  ;;  %v2407_v36 = vsel %vm1968_vm3, %v3789_v29, 0 }
 0x1c3   : > { %v1951_v45 = vld [vmem:[#allocation2 + $0x41] sm:$0xff]  ;;  %v1844_v46 = vsel %vm1841_vm12, %v1843_v40, %v1839_v15  ;;  %v1854_v53 = vsel %vm1853_vm13, %v3902_v20, %v1850_v14  ;;  %v4446_v56 = vpack.c.bf16 %v1950_v37, %v1950_v37  ;;  %v1864_v47 = vmul.f32 %v3906_v35, %v1863_v16  ;;  %v1933_v21 = vld [vmem:[#allocation2 + $0x30] sm:$0xff] }
 0x1c4   : > { %v1895_v57 = vmul.f32 %v1844_v46, %v4335_v1  ;;  %v1859_v3 = vsel %vm1856_vm14, %v1858_v44, %v1854_v53  ;;  %v4454_v52 = vpack.c.bf16 %v1951_v45, %v1951_v45  ;;  %v1932_v20 = vld [vmem:[#allocation2 + $0x20] sm:$0xff]  ;;  %v4496_v39 = vpack.c.bf16 %v1933_v21, %v1933_v21  ;;  %v2229_v37 = vld [vmem:[#allocation2 + $0x12] sm:$0xff] }
 0x1c5   : > { %v1896_v60 = vmul.f32 %v1859_v3, %v4338_v2  ;;  %3767 = vmatmul.msk.bf16.vlgmr.msra.gmra.mxu3 %vm1899_vm1, %v4446_v56  ;;  %v1865_v1 = vadd.f32 %v3906_v35, %v1864_v47  ;;  %v1873_v2 = vor.u32 1.1754944e-38, %v1872_v59  ;;  %v4491_v33 = vpack.c.bf16 %v1932_v20, %v1932_v20  ;;  %v1934_v22 = vld [vmem:[#allocation2 + $0x40] sm:$0xff]  ;;  %v2231_v15 = vld [vmem:[#allocation2 + $0x32] sm:$0xff] }
 0x1c6   : > { %1926 = vst.msk [vmem:[#allocation2 + $0x51] sm:$0xff] %vm1899_vm1, %v1895_v57  ;;  %2158 = vmatpush.bf16.msra.mxu3 %v4415_v31  ;;  %v3908_v61 = vpop.eup %3907  ;;  %3768 = vmatmul.msk.bf16.vlgmr.msrb.gmra.mxu0 %vm1899_vm1, %v4454_v52  ;;  %v4498_v27 = vpack.c.bf16 %v1934_v22, %v1934_v22  ;;  %v2230_v40 = vld [vmem:[#allocation2 + $0x22] sm:$0xff]  ;;  %v4521_v14 = vpack.c.bf16 %v2229_v37, %v2229_v37  ;;  %v3798_v59 = vld [vmem:[%s4826_s4 + $0x10] sm:$0xf] }
 0x1c7   : > { %1927 = vst.msk [vmem:[#allocation2 + $0x61] sm:$0xff] %vm1899_vm1, %v1896_v60  ;;  %v1877_v11 = vmul.f32 %v3908_v61, %v4436_v30  ;;  %2174 = vmatpush.bf16.msrb.mxu0 %v4415_v31  ;;  %v1869_v62 = vsel %vm1868_vm4, %v3906_v35, %v1865_v1  ;;  %vm1882_vm6 = vweird.f32 %v3908_v61  ;;  %v2236_v30 = vpack.c.bf16 %v2228_v19, %v2228_v19  ;;  %v2232_v44 = vld [vmem:[#allocation2 + $0x42] sm:$0xff] }
 0x1c8   : > { %v1874_v63 = vsel %vm1871_vm5, %v1873_v2, %v1869_v62  ;;  %vm1883_vm8 = vmor %vm1881_vm7, %vm1882_vm6  ;;  %v4523_v43 = vpack.c.bf16 %v2230_v40, %v2230_v40  ;;  %v4529_v45 = vpack.c.bf16 %v2231_v15, %v2231_v15  ;;  %v4531_v46 = vpack.c.bf16 %v2232_v44, %v2232_v44  ;;  %v3807_v62 = vld [vmem:[%s4826_s4 + $0x14] sm:$0xf] }
 0x1c9   : > { %v1878_v0 = vsub.f32 1.0, %v1877_v11  ;;  %v1897_v41 = vmul.f32 %v1874_v63, %v4370_v6  ;;  %v2564_v47 = vsel %vm1968_vm3, %v3798_v59, 0  ;;  %v2721_v63 = vsel %vm1968_vm3, %v3807_v62, 0 }
 0x1cb   : > { %v1879_v49 = vmul.f32 %v3908_v61, %v1878_v0  ;;  %1928 = vst.msk [vmem:[#allocation2 + $0x71] sm:$0xff] %vm1899_vm1, %v1897_v41 }
 0x1cd   : > { %v1952_v5 = vld [vmem:[#allocation2 + $0x51] sm:$0xff]  ;;  %v1880_v25 = vadd.f32 %v3908_v61, %v1879_v49 }
 0x1ce   : > { %v4469_v18 = vpack.c.bf16 %v1952_v5, %v1952_v5  ;;  %v1953_v7 = vld [vmem:[#allocation2 + $0x61] sm:$0xff]  ;;  %v2233_v53 = vld [vmem:[#allocation2 + $0x52] sm:$0xff] }
 0x1cf   : > { %v4471_v10 = vpack.c.bf16 %v1953_v7, %v1953_v7  ;;  %v1884_v6 = vsel %vm1883_vm8, %v3908_v61, %v1880_v25  ;;  %v1936_v17 = vld [vmem:[#allocation2 + $0x60] sm:$0xff]  ;;  %v4537_v57 = vpack.c.bf16 %v2233_v53, %v2233_v53 }
 0x1d0   : > { %3769 = vmatmul.msk.bf16.vlgmr.msrb.gmra.mxu1 %vm1899_vm1, %v4469_v18  ;;  %v1889_v48 = vsel %vm1886_vm9, %v1888_v8, %v1884_v6  ;;  %v4506_v51 = vpack.c.bf16 %v1936_v17, %v1936_v17  ;;  %v2234_v16 = vld [vmem:[#allocation2 + $0x62] sm:$0xff] }
 0x1d1   : > { %3770 = vmatmul.msk.bf16.vlgmr.msrb.gmra.mxu2 %vm1899_vm1, %v4471_v10  ;;  %2190 = vmatpush.bf16.msrb.mxu1 %v4415_v31  ;;  %v1898_v13 = vmul.f32 %v1889_v48, %v4398_v34  ;;  %v1931_v34 = vld [vmem:[#allocation2 + $0x10] sm:$0xff]  ;;  %v4539_v3 = vpack.c.bf16 %v2234_v16, %v2234_v16 }
 0x1d2   : > { %2206 = vmatpush.bf16.msrb.mxu2 %v4415_v31  ;;  %v1954_v4 = vld [vmem:[#allocation2 + $0x71] sm:$0xff]  ;;  %v1939_v9 = vpack.c.bf16 %v1931_v34, %v1931_v34 }
 0x1d3   : > { %1929 = vst.msk [vmem:[#allocation2 + $0x81] sm:$0xff] %vm1899_vm1, %v1898_v13  ;;  %v4484_v50 = vpack.c.bf16 %v1954_v4, %v1954_v4  ;;  %v1937_v28 = vld [vmem:[#allocation2 + $0x70] sm:$0xff] }
 0x1d4   : > { %v4515_v35 = vpack.c.bf16 %v1937_v28, %v1937_v28  ;;  %v2235_v58 = vld [vmem:[#allocation2 + $0x72] sm:$0xff] }
 0x1d5   : > { %3771 = vmatmul.msk.bf16.vlgmr.msrb.gmra.mxu3 %vm1899_vm1, %v4484_v50  ;;  %v4548_v60 = vpack.c.bf16 %v2235_v58, %v2235_v58 }
 0x1d6   : > { %3772 = vmatmul.msk.bf16.vlgmr.msra.gmra.mxu0 %vm1899_vm1, %v1938_v55  ;;  %2222 = vmatpush.bf16.msrb.mxu3 %v4415_v31  ;;  %v1935_v31 = vld [vmem:[#allocation2 + $0x50] sm:$0xff]  ;;  %v3816_v55 = vld [vmem:[%s4826_s4 + $0x18] sm:$0xf] }
 0x1d7   : > { %2259 = vmatpush.bf16.msra.mxu0 %v2250_v38  ;;  %v4504_v42 = vpack.c.bf16 %v1935_v31, %v1935_v31  ;;  %v2879_v4 = vsel %vm1968_vm3, %v3816_v55, 0  ;;  %v2864_v55 = vld [vmem:[#allocation2 + $0x90] sm:$0xff] }
 0x1da   : > { %v2392_v2 = vld [vmem:[#allocation2 + $0x80] sm:$0xff] }
 0x1db   : > { %v4566_v11 = vpack.c.bf16 %v2392_v2, %v2392_v2  ;;  %v2549_v8 = vld [vmem:[#allocation2 + $0x81] sm:$0xff]  ;;  %v3825_v2 = vld [vmem:[%s4826_s4 + $0x1c] sm:$0xf] }
 0x1dc   : > { %v4588_v12 = vpack.c.bf16 %v2549_v8, %v2549_v8  ;;  %v2706_v53 = vld [vmem:[#allocation2 + $0x82] sm:$0xff]  ;;  %v3036_v62 = vsel %vm1968_vm3, %v3825_v2, 0 }
 0x1e0   : > { %3773 = vmatmul.msk.bf16.vlgmr.msra.gmra.mxu1 %vm1899_vm1, %v1939_v9 }
 0x1e1   : > { %3774 = vmatmul.msk.bf16.vlgmr.msra.gmra.mxu2 %vm1899_vm1, %v4491_v33  ;;  %2275 = vmatpush.bf16.msra.mxu1 %v2250_v38 }
 0x1e2   : > { %2291 = vmatpush.bf16.msra.mxu2 %v2250_v38 }
 0x1e5   : > { %3775 = vmatmul.msk.bf16.vlgmr.msra.gmra.mxu3 %vm1899_vm1, %v4496_v39 }
 0x1e6   : > { %3776 = vmatmul.msk.bf16.vlgmr.msrb.gmra.mxu0 %vm1899_vm1, %v4498_v27  ;;  %2307 = vmatpush.bf16.msra.mxu3 %v2250_v38 }
 0x1e7   : > { %2323 = vmatpush.bf16.msrb.mxu0 %v2250_v38 }
 0x1ef   : > { %v1981_v61 = vpop.f32.mrf.mxu0 }
 0x1f0   : > { %3777 = vmatmul.msk.bf16.vlgmr.msrb.gmra.mxu1 %vm1899_vm1, %v4504_v42 }
 0x1f1   : > { %3778 = vmatmul.msk.bf16.vlgmr.msrb.gmra.mxu2 %vm1899_vm1, %v4506_v51  ;;  %2339 = vmatpush.bf16.msrb.mxu1 %v2250_v38 }
 0x1f2   : > { %2355 = vmatpush.bf16.msrb.mxu2 %v2250_v38 }
 0x1f5   : > { %3779 = vmatmul.msk.bf16.vlgmr.msrb.gmra.mxu3 %vm1899_vm1, %v4515_v35 }
 0x1f6   : > { %3781 = vmatmul.msk.bf16.vlgmr.msra.gmra.mxu0 %vm1899_vm1, %v2236_v30  ;;  %2371 = vmatpush.bf16.msrb.mxu3 %v2250_v38 }
 0x1f7   : > { %2416 = vmatpush.bf16.msra.mxu0 %v2407_v36  ;;  %v1983_v1 = vpop.f32.mrf.mxu0 }
 0x1f8   : > { %v4610_v1 = vpack.c.bf16 %v2706_v53, %v2706_v53 }
 0x200   : > { %3782 = vmatmul.msk.bf16.vlgmr.msra.gmra.mxu1 %vm1899_vm1, %v4521_v14 }
 0x201   : > { %3783 = vmatmul.msk.bf16.vlgmr.msra.gmra.mxu2 %vm1899_vm1, %v4523_v43  ;;  %2432 = vmatpush.bf16.msra.mxu1 %v2407_v36 }
 0x202   : > { %2448 = vmatpush.bf16.msra.mxu2 %v2407_v36 }
 0x205   : > { %3784 = vmatmul.msk.bf16.vlgmr.msra.gmra.mxu3 %vm1899_vm1, %v4529_v45 }
 0x206   : > { %3785 = vmatmul.msk.bf16.vlgmr.msrb.gmra.mxu0 %vm1899_vm1, %v4531_v46  ;;  %2464 = vmatpush.bf16.msra.mxu3 %v2407_v36 }
 0x207   : > { %2480 = vmatpush.bf16.msrb.mxu0 %v2407_v36 }
 0x210   : > { %3786 = vmatmul.msk.bf16.vlgmr.msrb.gmra.mxu1 %vm1899_vm1, %v4537_v57 }
 0x211   : > { %3787 = vmatmul.msk.bf16.vlgmr.msrb.gmra.mxu2 %vm1899_vm1, %v4539_v3  ;;  %2496 = vmatpush.bf16.msrb.mxu1 %v2407_v36 }
 0x212   : > { %2512 = vmatpush.bf16.msrb.mxu2 %v2407_v36 }
 0x215   : > { %3788 = vmatmul.msk.bf16.vlgmr.msrb.gmra.mxu3 %vm1899_vm1, %v4548_v60 }
 0x216   : > { %3790 = vmatmul.msk.bf16.vlgmr.msra.gmra.mxu0 %vm1899_vm1, %v1939_v9  ;;  %2528 = vmatpush.bf16.msrb.mxu3 %v2407_v36 }
 0x217   : > { %2573 = vmatpush.bf16.msra.mxu0 %v2564_v47 }
 0x220   : > { %3791 = vmatmul.msk.bf16.vlgmr.msra.gmra.mxu1 %vm1899_vm1, %v4491_v33 }
 0x221   : > { %3792 = vmatmul.msk.bf16.vlgmr.msra.gmra.mxu2 %vm1899_vm1, %v4496_v39  ;;  %2589 = vmatpush.bf16.msra.mxu1 %v2564_v47 }
 0x222   : > { %2605 = vmatpush.bf16.msra.mxu2 %v2564_v47 }
 0x225   : > { %3793 = vmatmul.msk.bf16.vlgmr.msra.gmra.mxu3 %vm1899_vm1, %v4498_v27 }
 0x226   : > { %3794 = vmatmul.msk.bf16.vlgmr.msrb.gmra.mxu0 %vm1899_vm1, %v4504_v42  ;;  %2621 = vmatpush.bf16.msra.mxu3 %v2564_v47 }
 0x227   : > { %2637 = vmatpush.bf16.msrb.mxu0 %v2564_v47 }
 0x230   : > { %3795 = vmatmul.msk.bf16.vlgmr.msrb.gmra.mxu1 %vm1899_vm1, %v4506_v51 }
 0x231   : > { %3796 = vmatmul.msk.bf16.vlgmr.msrb.gmra.mxu2 %vm1899_vm1, %v4515_v35  ;;  %2653 = vmatpush.bf16.msrb.mxu1 %v2564_v47 }
 0x232   : > { %2669 = vmatpush.bf16.msrb.mxu2 %v2564_v47 }
 0x235   : > { %3797 = vmatmul.msk.bf16.vlgmr.msrb.gmra.mxu3 %vm1899_vm1, %v4566_v11 }
 0x236   : > { %3799 = vmatmul.msk.bf16.vlgmr.msra.gmra.mxu0 %vm1899_vm1, %v4424_v54  ;;  %2685 = vmatpush.bf16.msrb.mxu3 %v2564_v47 }
 0x237   : > { %2730 = vmatpush.bf16.msra.mxu0 %v2721_v63 }
 0x23b   : > { %v1997_v0 = vpop.f32.mrf.mxu1 }
 0x240   : > { %3800 = vmatmul.msk.bf16.vlgmr.msra.gmra.mxu1 %vm1899_vm1, %v4426_v26 }
 0x241   : > { %3801 = vmatmul.msk.bf16.vlgmr.msra.gmra.mxu2 %vm1899_vm1, %v4446_v56  ;;  %2746 = vmatpush.bf16.msra.mxu1 %v2721_v63 }
 0x242   : > { %2762 = vmatpush.bf16.msra.mxu2 %v2721_v63 }
 0x243   : > { %v2013_v41 = vpop.f32.mrf.mxu2  ;;  %v1999_v24 = vpop.f32.mrf.mxu1 }
 0x244   : > { %v2045_v49 = vpop.f32.mrf.mxu0 }
 0x245   : > { %3802 = vmatmul.msk.bf16.vlgmr.msra.gmra.mxu3 %vm1899_vm1, %v4454_v52 }
 0x246   : > { %3803 = vmatmul.msk.bf16.vlgmr.msrb.gmra.mxu0 %vm1899_vm1, %v4469_v18  ;;  %2778 = vmatpush.bf16.msra.mxu3 %v2721_v63 }
 0x247   : > { %2794 = vmatpush.bf16.msrb.mxu0 %v2721_v63 }
 0x248   : > { %v2029_v54 = vpop.f32.mrf.mxu3 }
 0x24b   : > { %v2015_v23 = vpop.f32.mrf.mxu2 }
 0x24c   : > { %v2047_v5 = vpop.f32.mrf.mxu0 }
 0x24d   : > { %v2061_v25 = vpop.f32.mrf.mxu1 }
 0x250   : > { %3804 = vmatmul.msk.bf16.vlgmr.msrb.gmra.mxu1 %vm1899_vm1, %v4471_v10  ;;  %v2031_v7 = vpop.f32.mrf.mxu3 }
 0x251   : > { %3805 = vmatmul.msk.bf16.vlgmr.msrb.gmra.mxu2 %vm1899_vm1, %v4484_v50  ;;  %2810 = vmatpush.bf16.msrb.mxu1 %v2721_v63 }
 0x252   : > { %2826 = vmatpush.bf16.msrb.mxu2 %v2721_v63 }
 0x254   : > { %v2077_v6 = vpop.f32.mrf.mxu2  ;;  %v2112_v32 = vpop.f32.mrf.mxu0 }
 0x255   : > { %v2113_v48 = vadd.f32 %v2112_v32, %v1981_v61  ;;  %v2063_v13 = vpop.f32.mrf.mxu1  ;;  %3806 = vmatmul.msk.bf16.vlgmr.msrb.gmra.mxu3 %vm1899_vm1, %v4588_v12 }
 0x256   : > { %3808 = vmatmul.msk.bf16.vlgmr.msra.gmra.mxu0 %vm1899_vm1, %v4521_v14  ;;  %2842 = vmatpush.bf16.msrb.mxu3 %v2721_v63 }
 0x257   : > { %2888 = vmatpush.bf16.msra.mxu0 %v2879_v4 }
 0x258   : > { %v2093_v38 = vpop.f32.mrf.mxu3 }
 0x25c   : > { %v2079_v34 = vpop.f32.mrf.mxu2  ;;  %v2114_v20 = vpop.f32.mrf.mxu0 }
 0x25d   : > { %v2128_v9 = vpop.f32.mrf.mxu1 }
 0x25e   : > { %v2129_v21 = vadd.f32 %v2128_v9, %v1997_v0 }
 0x260   : > { %3809 = vmatmul.msk.bf16.vlgmr.msra.gmra.mxu1 %vm1899_vm1, %v4523_v43  ;;  %v2095_v22 = vpop.f32.mrf.mxu3 }
 0x261   : > { %3810 = vmatmul.msk.bf16.vlgmr.msra.gmra.mxu2 %vm1899_vm1, %v4529_v45  ;;  %2904 = vmatpush.bf16.msra.mxu1 %v2879_v4 }
 0x262   : > { %2920 = vmatpush.bf16.msra.mxu2 %v2879_v4 }
 0x264   : > { %v2144_v31 = vpop.f32.mrf.mxu2  ;;  %v2176_v17 = vpop.f32.mrf.mxu0 }
 0x265   : > { %v2145_v19 = vadd.f32 %v2144_v31, %v2013_v41  ;;  %v2177_v28 = vadd.f32 %v2176_v17, %v2045_v49  ;;  %v2130_v29 = vpop.f32.mrf.mxu1  ;;  %3811 = vmatmul.msk.bf16.vlgmr.msra.gmra.mxu3 %vm1899_vm1, %v4531_v46 }
 0x266   : > { %3812 = vmatmul.msk.bf16.vlgmr.msrb.gmra.mxu0 %vm1899_vm1, %v4537_v57  ;;  %2936 = vmatpush.bf16.msra.mxu3 %v2879_v4 }
 0x267   : > { %2952 = vmatpush.bf16.msrb.mxu0 %v2879_v4 }
 0x268   : > { %v2160_v30 = vpop.f32.mrf.mxu3 }
 0x269   : > { %v2161_v36 = vadd.f32 %v2160_v30, %v2029_v54 }
 0x26c   : > { %v2146_v37 = vpop.f32.mrf.mxu2  ;;  %v2178_v40 = vpop.f32.mrf.mxu0 }
 0x26d   : > { %v2192_v14 = vpop.f32.mrf.mxu1 }
 0x26e   : > { %v2193_v15 = vadd.f32 %v2192_v14, %v2061_v25 }
 0x270   : > { %3813 = vmatmul.msk.bf16.vlgmr.msrb.gmra.mxu1 %vm1899_vm1, %v4539_v3  ;;  %v2162_v44 = vpop.f32.mrf.mxu3 }
 0x271   : > { %3814 = vmatmul.msk.bf16.vlgmr.msrb.gmra.mxu2 %vm1899_vm1, %v4548_v60  ;;  %2968 = vmatpush.bf16.msrb.mxu1 %v2879_v4 }
 0x272   : > { %2984 = vmatpush.bf16.msrb.mxu2 %v2879_v4 }
 0x274   : > { %v2208_v16 = vpop.f32.mrf.mxu2  ;;  %v2261_v58 = vpop.f32.mrf.mxu0 }
 0x275   : > { %v2209_v59 = vadd.f32 %v2208_v16, %v2077_v6  ;;  %v2377_v47 = vadd.f32 %v2261_v58, %v2113_v48  ;;  %v2194_v61 = vpop.f32.mrf.mxu1  ;;  %3815 = vmatmul.msk.bf16.vlgmr.msrb.gmra.mxu3 %vm1899_vm1, %v4610_v1  ;;  %v3021_v16 = vld [vmem:[#allocation2 + $0x91] sm:$0xff] }
 0x276   : > { %3817 = vmatmul.msk.bf16.vlgmr.msra.gmra.mxu0 %vm1899_vm1, %v4491_v33  ;;  %3000 = vmatpush.bf16.msrb.mxu3 %v2879_v4  ;;  %v2872_v4 = vpack.c.bf16 %v2864_v55, %v2864_v55  ;;  %v3029_v58 = vpack.c.bf16 %v3021_v16, %v3021_v16 }
 0x277   : > { %3045 = vmatpush.bf16.msra.mxu0 %v3036_v62 }
 0x278   : > { %v2224_v63 = vpop.f32.mrf.mxu3 }
 0x279   : > { %v2225_v0 = vadd.f32 %v2224_v63, %v2093_v38 }
 0x27c   : > { %v2210_v41 = vpop.f32.mrf.mxu2  ;;  %v2263_v24 = vpop.f32.mrf.mxu0 }
 0x27d   : > { %v2277_v49 = vpop.f32.mrf.mxu1 }
 0x27e   : > { %v2378_v54 = vadd.f32 %v2277_v49, %v2129_v21  ;;  %v3834_v21 = vld [vmem:[%s4826_s4 + $0x20] sm:$0xf] }
 0x27f   : > { %v3193_v22 = vsel %vm1968_vm3, %v3834_v21, 0 }
 0x280   : > { %3818 = vmatmul.msk.bf16.vlgmr.msra.gmra.mxu1 %vm1899_vm1, %v4496_v39  ;;  %v2226_v23 = vpop.f32.mrf.mxu3 }
 0x281   : > { %3819 = vmatmul.msk.bf16.vlgmr.msra.gmra.mxu2 %vm1899_vm1, %v4498_v27  ;;  %3061 = vmatpush.bf16.msra.mxu1 %v3036_v62 }
 0x282   : > { %3077 = vmatpush.bf16.msra.mxu2 %v3036_v62 }
 0x284   : > { %v2293_v5 = vpop.f32.mrf.mxu2  ;;  %v2325_v25 = vpop.f32.mrf.mxu0 }
 0x285   : > { %v2379_v33 = vadd.f32 %v2293_v5, %v2145_v19  ;;  %v2381_v7 = vadd.f32 %v2325_v25, %v2177_v28  ;;  %v2279_v8 = vpop.f32.mrf.mxu1  ;;  %3820 = vmatmul.msk.bf16.vlgmr.msra.gmra.mxu3 %vm1899_vm1, %v4504_v42 }
 0x286   : > { %3821 = vmatmul.msk.bf16.vlgmr.msrb.gmra.mxu0 %vm1899_vm1, %v4506_v51  ;;  %3093 = vmatpush.bf16.msra.mxu3 %v3036_v62 }
 0x287   : > { %3109 = vmatpush.bf16.msrb.mxu0 %v3036_v62 }
 0x288   : > { %v2309_v39 = vpop.f32.mrf.mxu3 }
 0x289   : > { %v2380_v6 = vadd.f32 %v2309_v39, %v2161_v36 }
 0x28c   : > { %v2295_v32 = vpop.f32.mrf.mxu2  ;;  %v2327_v27 = vpop.f32.mrf.mxu0 }
 0x28d   : > { %v2341_v48 = vpop.f32.mrf.mxu1 }
 0x28e   : > { %v2382_v13 = vadd.f32 %v2341_v48, %v2193_v15 }
 0x290   : > { %3822 = vmatmul.msk.bf16.vlgmr.msrb.gmra.mxu1 %vm1899_vm1, %v4515_v35  ;;  %v2311_v42 = vpop.f32.mrf.mxu3 }
 0x291   : > { %3823 = vmatmul.msk.bf16.vlgmr.msrb.gmra.mxu2 %vm1899_vm1, %v4566_v11  ;;  %3125 = vmatpush.bf16.msrb.mxu1 %v3036_v62 }
 0x292   : > { %3141 = vmatpush.bf16.msrb.mxu2 %v3036_v62 }
 0x294   : > { %v2357_v51 = vpop.f32.mrf.mxu2  ;;  %v2418_v38 = vpop.f32.mrf.mxu0 }
 0x295   : > { %v2383_v34 = vadd.f32 %v2357_v51, %v2209_v59  ;;  %v2534_v20 = vadd.f32 %v2418_v38, %v2377_v47  ;;  %v2343_v9 = vpop.f32.mrf.mxu1  ;;  %3824 = vmatmul.msk.bf16.vlgmr.msrb.gmra.mxu3 %vm1899_vm1, %v2872_v4 }
 0x296   : > { %3826 = vmatmul.msk.bf16.vlgmr.msra.gmra.mxu0 %vm1899_vm1, %v4426_v26  ;;  %3157 = vmatpush.bf16.msrb.mxu3 %v3036_v62 }
 0x297   : > { %3202 = vmatpush.bf16.msra.mxu0 %v3193_v22 }
 0x298   : > { %v2373_v35 = vpop.f32.mrf.mxu3 }
 0x299   : > { %v2384_v11 = vadd.f32 %v2373_v35, %v2225_v0 }
 0x29c   : > { %v2359_v31 = vpop.f32.mrf.mxu2  ;;  %v2420_v17 = vpop.f32.mrf.mxu0 }
 0x29d   : > { %v2434_v19 = vpop.f32.mrf.mxu1 }
 0x29e   : > { %v2535_v28 = vadd.f32 %v2434_v19, %v2378_v54 }
 0x2a0   : > { %3827 = vmatmul.msk.bf16.vlgmr.msra.gmra.mxu1 %vm1899_vm1, %v4446_v56  ;;  %v2375_v29 = vpop.f32.mrf.mxu3 }
 0x2a1   : > { %3828 = vmatmul.msk.bf16.vlgmr.msra.gmra.mxu2 %vm1899_vm1, %v4454_v52  ;;  %3218 = vmatpush.bf16.msra.mxu1 %v3193_v22 }
 0x2a2   : > { %3234 = vmatpush.bf16.msra.mxu2 %v3193_v22 }
 0x2a4   : > { %v2450_v30 = vpop.f32.mrf.mxu2  ;;  %v2482_v36 = vpop.f32.mrf.mxu0 }
 0x2a5   : > { %v2536_v26 = vadd.f32 %v2450_v30, %v2379_v33  ;;  %v2538_v37 = vadd.f32 %v2482_v36, %v2381_v7  ;;  %v2436_v40 = vpop.f32.mrf.mxu1  ;;  %3829 = vmatmul.msk.bf16.vlgmr.msra.gmra.mxu3 %vm1899_vm1, %v4469_v18 }
 0x2a6   : > { %3830 = vmatmul.msk.bf16.vlgmr.msrb.gmra.mxu0 %vm1899_vm1, %v4471_v10  ;;  %3250 = vmatpush.bf16.msra.mxu3 %v3193_v22 }
 0x2a7   : > { %3266 = vmatpush.bf16.msrb.mxu0 %v3193_v22 }
 0x2a8   : > { %v2466_v56 = vpop.f32.mrf.mxu3 }
 0x2a9   : > { %v2537_v14 = vadd.f32 %v2466_v56, %v2380_v6 }
 0x2ac   : > { %v2452_v15 = vpop.f32.mrf.mxu2  ;;  %v2484_v52 = vpop.f32.mrf.mxu0 }
 0x2ad   : > { %v2498_v44 = vpop.f32.mrf.mxu1 }
 0x2ae   : > { %v2539_v53 = vadd.f32 %v2498_v44, %v2382_v13 }
 0x2b0   : > { %3831 = vmatmul.msk.bf16.vlgmr.msrb.gmra.mxu1 %vm1899_vm1, %v4484_v50  ;;  %v2468_v18 = vpop.f32.mrf.mxu3 }
 0x2b1   : > { %3832 = vmatmul.msk.bf16.vlgmr.msrb.gmra.mxu2 %vm1899_vm1, %v4588_v12  ;;  %3282 = vmatpush.bf16.msrb.mxu1 %v3193_v22 }
 0x2b2   : > { %3298 = vmatpush.bf16.msrb.mxu2 %v3193_v22 }
 0x2b4   : > { %v2514_v10 = vpop.f32.mrf.mxu2  ;;  %v2575_v59 = vpop.f32.mrf.mxu0 }
 0x2b5   : > { %v2540_v47 = vadd.f32 %v2514_v10, %v2383_v34  ;;  %v2691_v61 = vadd.f32 %v2575_v59, %v2534_v20  ;;  %v2500_v2 = vpop.f32.mrf.mxu1  ;;  %3833 = vmatmul.msk.bf16.vlgmr.msrb.gmra.mxu3 %vm1899_vm1, %v3029_v58 }
 0x2b6   : > { %3835 = vmatmul.msk.bf16.vlgmr.msra.gmra.mxu0 %vm1899_vm1, %v4523_v43  ;;  %3314 = vmatpush.bf16.msrb.mxu3 %v3193_v22 }
 0x2b8   : > { %v2530_v50 = vpop.f32.mrf.mxu3 }
 0x2b9   : > { %v2541_v62 = vadd.f32 %v2530_v50, %v2384_v11 }
 0x2bc   : > { %v2516_v63 = vpop.f32.mrf.mxu2  ;;  %v2577_v0 = vpop.f32.mrf.mxu0 }
 0x2bd   : > { %v2591_v12 = vpop.f32.mrf.mxu1 }
 0x2be   : > { %v2692_v41 = vadd.f32 %v2591_v12, %v2535_v28 }
 0x2c0   : > { %3836 = vmatmul.msk.bf16.vlgmr.msra.gmra.mxu1 %vm1899_vm1, %v4529_v45  ;;  %v2532_v24 = vpop.f32.mrf.mxu3 }
 0x2c1   : > { %3837 = vmatmul.msk.bf16.vlgmr.msra.gmra.mxu2 %vm1899_vm1, %v4531_v46  ;;  %v3178_v46 = vld [vmem:[#allocation2 + $0x92] sm:$0xff] }
 0x2c2   : > { %v3186_v32 = vpack.c.bf16 %v3178_v46, %v3178_v46 }
 0x2c4   : > { %v2607_v49 = vpop.f32.mrf.mxu2  ;;  %v2639_v54 = vpop.f32.mrf.mxu0 }
 0x2c5   : > { %v2693_v23 = vadd.f32 %v2607_v49, %v2536_v26  ;;  %v2695_v5 = vadd.f32 %v2639_v54, %v2538_v37  ;;  %v2593_v25 = vpop.f32.mrf.mxu1  ;;  %3838 = vmatmul.msk.bf16.vlgmr.msra.gmra.mxu3 %vm1899_vm1, %v4537_v57 }
 0x2c6   : > { %3839 = vmatmul.msk.bf16.vlgmr.msrb.gmra.mxu0 %vm1899_vm1, %v4539_v3 }
 0x2c8   : > { %v2623_v43 = vpop.f32.mrf.mxu3 }
 0x2c9   : > { %v2694_v33 = vadd.f32 %v2623_v43, %v2537_v14 }
 0x2cc   : > { %v2609_v7 = vpop.f32.mrf.mxu2  ;;  %v2641_v8 = vpop.f32.mrf.mxu0 }
 0x2cd   : > { %v2655_v45 = vpop.f32.mrf.mxu1 }
 0x2ce   : > { %v2696_v39 = vadd.f32 %v2655_v45, %v2539_v53 }
 0x2d0   : > { %3840 = vmatmul.msk.bf16.vlgmr.msrb.gmra.mxu1 %vm1899_vm1, %v4548_v60  ;;  %v2625_v6 = vpop.f32.mrf.mxu3 }
 0x2d1   : > { %3841 = vmatmul.msk.bf16.vlgmr.msrb.gmra.mxu2 %vm1899_vm1, %v4610_v1  ;;  %v4682_v6 = vld [vmem:[%s4827_s5] ss:$0 sm:$0xff] }
 0x2d4   : > { %v2671_v27 = vpop.f32.mrf.mxu2  ;;  %v2732_v57 = vpop.f32.mrf.mxu0 }
 0x2d5   : > { %v2697_v48 = vadd.f32 %v2671_v27, %v2540_v47  ;;  %v2848_v13 = vadd.f32 %v2732_v57, %v2691_v61  ;;  %v2657_v3 = vpop.f32.mrf.mxu1  ;;  %3842 = vmatmul.msk.bf16.vlgmr.msrb.gmra.mxu3 %vm1899_vm1, %v3186_v32 }
 0x2d8   : > { %v2687_v55 = vpop.f32.mrf.mxu3 }
 0x2d9   : > { %v2698_v42 = vadd.f32 %v2687_v55, %v2541_v62 }
 0x2dc   : > { %v2673_v4 = vpop.f32.mrf.mxu2  ;;  %v2734_v51 = vpop.f32.mrf.mxu0 }
 0x2dd   : > { %v2748_v38 = vpop.f32.mrf.mxu1 }
 0x2de   : > { %v2849_v34 = vadd.f32 %v2748_v38, %v2692_v41 }
 0x2e0   : > { %v2689_v60 = vpop.f32.mrf.mxu3 }
 0x2e4   : > { %v2764_v20 = vpop.f32.mrf.mxu2  ;;  %v2796_v9 = vpop.f32.mrf.mxu0 }
 0x2e5   : > { %v4667_v21 = vadd.f32 %v2764_v20, %v2693_v23  ;;  %v4669_v1 = vadd.f32 %v2796_v9, %v2695_v5  ;;  %v2750_v22 = vpop.f32.mrf.mxu1 }
 0x2e8   : > { %v2780_v35 = vpop.f32.mrf.mxu3 }
 0x2e9   : > { %v4671_v11 = vadd.f32 %v2780_v35, %v2694_v33 }
 0x2ec   : > { %v2766_v31 = vpop.f32.mrf.mxu2  ;;  %v2798_v17 = vpop.f32.mrf.mxu0 }
 0x2ed   : > { %v2812_v19 = vpop.f32.mrf.mxu1 }
 0x2ee   : > { %v4673_v28 = vadd.f32 %v2812_v19, %v2696_v39 }
 0x2f0   : > { %v2782_v29 = vpop.f32.mrf.mxu3 }
 0x2f4   : > { %v2828_v30 = vpop.f32.mrf.mxu2  ;;  %v2890_v36 = vpop.f32.mrf.mxu0 }
 0x2f5   : > { %v2854_v26 = vadd.f32 %v2828_v30, %v2697_v48  ;;  %v2814_v37 = vpop.f32.mrf.mxu1  ;;  %v3006_v45 = vadd.f32 %v2890_v36, %v2848_v13  ;;  %v4689_v48 = vld [vmem:[%s4828_s6] ss:$0 sm:$0xff] }
 0x2f8   : > { %v2844_v40 = vpop.f32.mrf.mxu3 }
 0x2f9   : > { %v2855_v56 = vadd.f32 %v2844_v40, %v2698_v42 }
 0x2fc   : > { %v2830_v14 = vpop.f32.mrf.mxu2  ;;  %v2892_v15 = vpop.f32.mrf.mxu0 }
 0x2fd   : > { %v2906_v52 = vpop.f32.mrf.mxu1 }
 0x2fe   : > { %v3007_v42 = vadd.f32 %v2906_v52, %v2849_v34 }
 0x300   : > { %v2846_v44 = vpop.f32.mrf.mxu3 }
 0x304   : > { %v2922_v53 = vpop.f32.mrf.mxu2  ;;  %v2954_v16 = vpop.f32.mrf.mxu0 }
 0x305   : > { %v2908_v18 = vpop.f32.mrf.mxu1  ;;  %v3008_v31 = vadd.f32 %v2922_v53, %v4667_v21  ;;  %v3010_v17 = vadd.f32 %v2954_v16, %v4669_v1 }
 0x308   : > { %v2938_v58 = vpop.f32.mrf.mxu3 }
 0x309   : > { %v3009_v21 = vadd.f32 %v2938_v58, %v4671_v11 }
 0x30c   : > { %v2924_v10 = vpop.f32.mrf.mxu2  ;;  %v2956_v59 = vpop.f32.mrf.mxu0 }
 0x30d   : > { %v2970_v47 = vpop.f32.mrf.mxu1 }
 0x30e   : > { %v3011_v10 = vadd.f32 %v2970_v47, %v4673_v28 }
 0x310   : > { %v2940_v61 = vpop.f32.mrf.mxu3 }
 0x314   : > { %v2986_v2 = vpop.f32.mrf.mxu2  ;;  %v3047_v50 = vpop.f32.mrf.mxu0 }
 0x315   : > { %v4675_v62 = vadd.f32 %v2986_v2, %v2854_v26  ;;  %v2972_v63 = vpop.f32.mrf.mxu1  ;;  %v3163_v46 = vadd.f32 %v3047_v50, %v3006_v45 }
 0x318   : > { %v3002_v0 = vpop.f32.mrf.mxu3 }
 0x319   : > { %v4677_v12 = vadd.f32 %v3002_v0, %v2855_v56 }
 0x31c   : > { %v2988_v41 = vpop.f32.mrf.mxu2  ;;  %v3049_v24 = vpop.f32.mrf.mxu0 }
 0x31d   : > { %v3063_v49 = vpop.f32.mrf.mxu1 }
 0x31e   : > { %v3164_v38 = vadd.f32 %v3063_v49, %v3007_v42 }
 0x320   : > { %v3004_v54 = vpop.f32.mrf.mxu3 }
 0x324   : > { %v3079_v23 = vpop.f32.mrf.mxu2  ;;  %v3111_v5 = vpop.f32.mrf.mxu0 }
 0x325   : > { %v3065_v25 = vpop.f32.mrf.mxu1  ;;  %v3165_v30 = vadd.f32 %v3079_v23, %v3008_v31  ;;  %v3167_v36 = vadd.f32 %v3111_v5, %v3010_v17 }
 0x328   : > { %v3095_v43 = vpop.f32.mrf.mxu3 }
 0x329   : > { %v3166_v53 = vadd.f32 %v3095_v43, %v3009_v21 }
 0x32c   : > { %v3081_v33 = vpop.f32.mrf.mxu2  ;;  %v3113_v7 = vpop.f32.mrf.mxu0 }
 0x32d   : > { %v3127_v8 = vpop.f32.mrf.mxu1 }
 0x32e   : > { %v3168_v50 = vadd.f32 %v3127_v8, %v3011_v10 }
 0x330   : > { %v3097_v39 = vpop.f32.mrf.mxu3 }
 0x334   : > { %v4684_v32 = vpop.f32.mrf.mxu2  ;;  %v3204_v27 = vpop.f32.mrf.mxu0 }
 0x335   : > { %v3320_v57 = vadd.f32 %v3204_v27, %v3163_v46  ;;  %v3129_v3 = vpop.f32.mrf.mxu1 }
 0x336   : > { %v3169_v3 = vadd.f32 %v4684_v32, %v4675_v62 }
 0x337   : > { %v3332_v55 = vmul.f32 %v4682_v6, %v3320_v57 }
 0x338   : > { %v4695_v4 = vpop.f32.mrf.mxu3 }
 0x339   : > { %v4693_v13 = vadd.f32 %v4689_v48, %v3332_v55 }
 0x33b   : > { %v3843_v51 = vmul.f32 -1.442695, %v4693_v13 }
 0x33c   : > { %v3145_v60 = vpop.f32.mrf.mxu2  ;;  %v3206_v20 = vpop.f32.mrf.mxu0 }
 0x33d   : > { %3909 = vpow2.f32 %v3843_v51  ;;  %v3220_v9 = vpop.f32.mrf.mxu1 }
 0x33e   : > { %v3321_v22 = vadd.f32 %v3220_v9, %v3164_v38 }
 0x340   : > { %v3333_v35 = vmul.f32 %v4682_v6, %v3321_v22  ;;  %v3161_v34 = vpop.f32.mrf.mxu3 }
 0x342   : > { %v4702_v19 = vadd.f32 %v4689_v48, %v3333_v35 }
 0x343   : > { %v3910_v29 = vpop.eup %3909 }
 0x344   : > { %v3376_v26 = vadd.f32 1.0, %v3910_v29  ;;  %v3844_v37 = vmul.f32 -1.442695, %v4702_v19  ;;  %v3236_v40 = vpop.f32.mrf.mxu2  ;;  %v3268_v56 = vpop.f32.mrf.mxu0  ;;  %v3170_v29 = vadd.f32 %v4695_v4, %v4677_v12 }
 0x345   : > { %v3322_v14 = vadd.f32 %v3236_v40, %v3165_v30  ;;  %v3324_v15 = vadd.f32 %v3268_v56, %v3167_v36  ;;  %v3222_v52 = vpop.f32.mrf.mxu1 }
 0x346   : > { %3911 = vrcp.f32 %v3376_v26  ;;  %v3393_v25 = vand.u32 2147483647, %v3376_v26  ;;  %v3395_v43 = vand.u32 2147483648, %v3376_v26  ;;  %vm3389_vm3 = vweird.f32 %v3376_v26 }
 0x347   : > { %3913 = vpow2.f32 %v3844_v37  ;;  %v3334_v1 = vmul.f32 %v4682_v6, %v3322_v14  ;;  %v3336_v44 = vmul.f32 %v4682_v6, %v3324_v15 }
 0x348   : > { %v3252_v59 = vpop.f32.mrf.mxu3  ;;  %v3396_v55 = vor.u32 1.1754944e-38, %v3395_v43  ;;  %vm3394_vm11 = vcmp.eq.f32.partialorder %v3393_v25, 8.507059e+37 }
 0x349   : > { %v4709_v16 = vadd.f32 %v4689_v48, %v3334_v1  ;;  %v4712_v18 = vadd.f32 %v4689_v48, %v3336_v44  ;;  %v3323_v11 = vadd.f32 %v3252_v59, %v3166_v53 }
 0x34b   : > { %v3845_v61 = vmul.f32 -1.442695, %v4709_v16  ;;  %v3847_v2 = vmul.f32 -1.442695, %v4712_v18  ;;  %v3335_v49 = vmul.f32 %v4682_v6, %v3323_v11 }
 0x34c   : > { %v3912_v58 = vpop.eup %3911  ;;  %v3238_v63 = vpop.f32.mrf.mxu2 }
 0x34d   : > { %v3270_v0 = vpop.f32.mrf.mxu0  ;;  %v3914_v41 = vpop.eup %3913  ;;  %v3385_v24 = vmul.f32 %v3912_v58, %v3376_v26  ;;  %3915 = vpow2.f32 %v3845_v61  ;;  %v4719_v5 = vadd.f32 %v4689_v48, %v3335_v49  ;;  %vm3390_vm1 = vweird.f32 %v3912_v58 }
 0x34e   : > { %v3284_v54 = vpop.f32.mrf.mxu1  ;;  %v3377_v23 = vadd.f32 1.0, %v3914_v41  ;;  %3917 = vpow2.f32 %v3847_v2  ;;  %vm3391_vm10 = vmor %vm3389_vm3, %vm3390_vm1 }
 0x34f   : > { %v3325_v28 = vadd.f32 %v3284_v54, %v3168_v50  ;;  %v3386_v47 = vsub.f32 1.0, %v3385_v24  ;;  %v3846_v7 = vmul.f32 -1.442695, %v4719_v5 }
 0x350   : > { %3919 = vrcp.f32 %v3377_v23  ;;  %v3254_v45 = vpop.f32.mrf.mxu3  ;;  %v3408_v17 = vand.u32 2147483647, %v3377_v23  ;;  %v3410_v36 = vand.u32 2147483648, %v3377_v23  ;;  %vm3404_vm13 = vweird.f32 %v3377_v23 }
 0x351   : > { %v3387_v33 = vmul.f32 %v3912_v58, %v3386_v47  ;;  %v3337_v8 = vmul.f32 %v4682_v6, %v3325_v28  ;;  %3921 = vpow2.f32 %v3846_v7 }
 0x352   : > { %vm4749_vm14 = vcmp.eq.f32.partialorder %v3408_v17, 8.507059e+37  ;;  %v3411_v52 = vor.u32 1.1754944e-38, %v3410_v36 }
 0x353   : > { %v3916_v39 = vpop.eup %3915  ;;  %v3388_v46 = vadd.f32 %v3912_v58, %v3387_v33  ;;  %v4725_v27 = vadd.f32 %v4689_v48, %v3337_v8 }
 0x354   : > { %v3918_v57 = vpop.eup %3917  ;;  %v4729_v42 = vadd.f32 1.0, %v3916_v39  ;;  %v3300_v51 = vpop.f32.mrf.mxu2 }
 0x355   : > { %v3392_v38 = vsel %vm3391_vm10, %v3912_v58, %v3388_v46  ;;  %v4731_v60 = vadd.f32 1.0, %v3918_v57  ;;  %v3848_v20 = vmul.f32 -1.442695, %v4725_v27  ;;  %v3326_v32 = vadd.f32 %v3300_v51, %v3169_v3 }
 0x356   : > { %v3286_v9 = vpop.f32.mrf.mxu1  ;;  %v3920_v22 = vpop.eup %3919  ;;  %v3397_v62 = vsel %vm3394_vm11, %v3396_v55, %v3392_v38  ;;  %3923 = vrcp.f32 %v4729_v42  ;;  %v3423_v53 = vand.u32 2147483647, %v4729_v42  ;;  %v3425_v10 = vand.u32 2147483648, %v4729_v42 }
 0x357   : > { %v3504_v35 = vmul.f32 %v3397_v62, %v4693_v13  ;;  %v3400_v31 = vmul.f32 %v3920_v22, %v3377_v23  ;;  %3925 = vrcp.f32 %v4731_v60  ;;  %v3922_v34 = vpop.eup %3921  ;;  %v3338_v37 = vmul.f32 %v4682_v6, %v3326_v32 }
 0x358   : > { %3927 = vpow2.f32 %v3848_v20  ;;  %v4746_v26 = vadd.f32 1.0, %v3922_v34  ;;  %v3316_v40 = vpop.f32.mrf.mxu3  ;;  %vm3405_vm12 = vweird.f32 %v3920_v22  ;;  %v3453_v59 = vand.u32 2147483647, %v4731_v60 }
 0x359   : > { %3512 = vst.msk [vmem:[%s4737_s11] sm:$0xff] %vm323_vm0, %v3504_v35  ;;  %v3401_v30 = vsub.f32 1.0, %v3400_v31  ;;  %v3327_v13 = vadd.f32 %v3316_v40, %v3170_v29  ;;  %v4756_v1 = vadd.f32 %v4689_v48, %v3338_v37  ;;  %vm3406_vm15 = vmor %vm3404_vm13, %vm3405_vm12  ;;  %v3455_v63 = vand.u32 2147483648, %v4731_v60 }
 0x35a   : > { %3929 = vrcp.f32 %v4746_v26  ;;  %vm3419_vm4 = vweird.f32 %v4729_v42  ;;  %vm4774_vm5 = vcmp.eq.f32.partialorder %v3423_v53, 8.507059e+37  ;;  %vm3449_vm6 = vweird.f32 %v4731_v60 }
 0x35b   : > { %v3402_v56 = vmul.f32 %v3920_v22, %v3401_v30  ;;  %v3339_v61 = vmul.f32 %v4682_v6, %v3327_v13  ;;  %v3849_v24 = vmul.f32 -1.442695, %v4756_v1  ;;  %v3426_v33 = vor.u32 1.1754944e-38, %v3425_v10 }
 0x35c   : > { %v3924_v14 = vpop.eup %3923  ;;  %v3302_v12 = vpop.f32.mrf.mxu2  ;;  %vm4783_vm9 = vcmp.eq.f32.partialorder %v3453_v59, 8.507059e+37  ;;  %v3456_v46 = vor.u32 1.1754944e-38, %v3455_v63  ;;  %v3438_v55 = vand.u32 2147483647, %v4746_v26  ;;  %vm3434_vm10 = vweird.f32 %v4746_v26 }
 0x35d   : > { %v3403_v4 = vadd.f32 %v3920_v22, %v3402_v56  ;;  %v3415_v21 = vmul.f32 %v3924_v14, %v4729_v42  ;;  %v3926_v44 = vpop.eup %3925  ;;  %v4770_v49 = vadd.f32 %v4689_v48, %v3339_v61  ;;  %vm3420_vm2 = vweird.f32 %v3924_v14 }
 0x35e   : > { %v3928_v2 = vpop.eup %3927  ;;  %v3445_v50 = vmul.f32 %v3926_v44, %v4731_v60  ;;  %vm3450_vm7 = vweird.f32 %v3926_v44  ;;  %vm3421_vm8 = vmor %vm3419_vm4, %vm3420_vm2  ;;  %v3440_v42 = vand.u32 2147483648, %v4746_v26  ;;  %vm3439_vm12 = vcmp.eq.f32.partialorder %v3438_v55, 8.507059e+37 }
 0x35f   : > { %v3407_v11 = vsel %vm3406_vm15, %v3920_v22, %v3403_v4  ;;  %v3416_v58 = vsub.f32 1.0, %v3415_v21  ;;  %v4766_v41 = vadd.f32 1.0, %v3928_v2  ;;  %v3850_v8 = vmul.f32 -1.442695, %v4770_v49  ;;  %vm3451_vm1 = vmor %vm3449_vm6, %vm3450_vm7 }
 0x360   : > { %v3412_v0 = vsel %vm4749_vm14, %v3411_v52, %v3407_v11  ;;  %v3446_v23 = vsub.f32 1.0, %v3445_v50  ;;  %v3930_v28 = vpop.eup %3929  ;;  %v3318_v25 = vpop.f32.mrf.mxu3 }
 0x361   : > { %v3505_v6 = vmul.f32 %v3412_v0, %v4702_v19  ;;  %v3417_v54 = vmul.f32 %v3924_v14, %v3416_v58  ;;  %3931 = vrcp.f32 %v4766_v41  ;;  %v3430_v19 = vmul.f32 %v3930_v28, %v4746_v26 }
 0x362   : > { %v3447_v43 = vmul.f32 %v3926_v44, %v3446_v23  ;;  %3933 = vpow2.f32 %v3849_v24  ;;  %vm3435_vm3 = vweird.f32 %v3930_v28  ;;  %v3468_v36 = vand.u32 2147483647, %v4766_v41 }
 0x363   : > { %3513 = vst.msk [vmem:[%s4737_s11 + $0x8] sm:$0xff] %vm323_vm0, %v3505_v6  ;;  %v3418_v48 = vadd.f32 %v3924_v14, %v3417_v54  ;;  %v3431_v57 = vsub.f32 1.0, %v3430_v19  ;;  %3935 = vpow2.f32 %v3850_v8  ;;  %vm3436_vm11 = vmor %vm3434_vm10, %vm3435_vm3  ;;  %vm3464_vm14 = vweird.f32 %v4766_v41 }
 0x364   : > { %v3448_v39 = vadd.f32 %v3926_v44, %v3447_v43  ;;  %vm3469_vm2 = vcmp.eq.f32.partialorder %v3468_v36, 8.507059e+37 }
 0x365   : > { %v3422_v45 = vsel %vm3421_vm8, %v3924_v14, %v3418_v48  ;;  %v3432_v20 = vmul.f32 %v3930_v28, %v3431_v57 }
 0x366   : > { %v3427_v3 = vsel %vm4774_vm5, %v3426_v33, %v3422_v45  ;;  %v3452_v38 = vsel %vm3451_vm1, %v3926_v44, %v3448_v39 }
 0x367   : > { %v3506_v51 = vmul.f32 %v3427_v3, %v4709_v16  ;;  %v3932_v9 = vpop.eup %3931  ;;  %v3457_v22 = vsel %vm4783_vm9, %v3456_v46, %v3452_v38  ;;  %v3433_v62 = vadd.f32 %v3930_v28, %v3432_v20  ;;  %v3441_v16 = vor.u32 1.1754944e-38, %v3440_v42 }
 0x368   : > { %v3508_v60 = vmul.f32 %v3457_v22, %v4712_v18  ;;  %v3460_v32 = vmul.f32 %v3932_v9, %v4766_v41  ;;  %v3934_v35 = vpop.eup %3933  ;;  %v3470_v18 = vand.u32 2147483648, %v4766_v41  ;;  %vm3465_vm13 = vweird.f32 %v3932_v9 }
 0x369   : > { %3514 = vst.msk [vmem:[%s4737_s11 + $0x10] sm:$0xff] %vm323_vm0, %v3506_v51  ;;  %v3437_v31 = vsel %vm3436_vm11, %v3930_v28, %v3433_v62  ;;  %v3382_v34 = vadd.f32 1.0, %v3934_v35  ;;  %v3936_v29 = vpop.eup %3935  ;;  %vm3466_vm15 = vmor %vm3464_vm14, %vm3465_vm13 }
 0x36a   : > { %3516 = vst.msk [vmem:[%s4737_s11 + $0x20] sm:$0xff] %vm323_vm0, %v3508_v60  ;;  %v3461_v17 = vsub.f32 1.0, %v3460_v32  ;;  %v3442_v30 = vsel %vm3439_vm12, %v3441_v16, %v3437_v31  ;;  %v3383_v40 = vadd.f32 1.0, %v3936_v29  ;;  %v3471_v13 = vor.u32 1.1754944e-38, %v3470_v18 }
 0x36b   : > { %v3507_v26 = vmul.f32 %v3442_v30, %v4719_v5  ;;  %3937 = vrcp.f32 %v3382_v34  ;;  %v3485_v44 = vand.u32 2147483648, %v3382_v34  ;;  %v3483_v59 = vand.u32 2147483647, %v3382_v34 }
 0x36c   : > { %v3462_v37 = vmul.f32 %v3932_v9, %v3461_v17  ;;  %3939 = vrcp.f32 %v3383_v40  ;;  %vm3479_vm5 = vweird.f32 %v3382_v34  ;;  %v3500_v11 = vand.u32 2147483648, %v3383_v40 }
 0x36d   : > { %3515 = vst.msk [vmem:[%s4737_s11 + $0x18] sm:$0xff] %vm323_vm0, %v3507_v26  ;;  %v3486_v58 = vor.u32 1.1754944e-38, %v3485_v44  ;;  %vm3484_vm8 = vcmp.eq.f32.partialorder %v3483_v59, 8.507059e+37  ;;  %vm3494_vm9 = vweird.f32 %v3383_v40 }
 0x36e   : > { %v3463_v56 = vadd.f32 %v3932_v9, %v3462_v37  ;;  %v3501_v6 = vor.u32 1.1754944e-38, %v3500_v11 }
 0x370   : > { %v3467_v14 = vsel %vm3466_vm15, %v3932_v9, %v3463_v56 }
 0x371   : > { %v3472_v15 = vsel %vm3469_vm2, %v3471_v13, %v3467_v14  ;;  %v3938_v12 = vpop.eup %3937 }
 0x372   : > { %v3509_v4 = vmul.f32 %v3472_v15, %v4725_v27  ;;  %v3475_v5 = vmul.f32 %v3938_v12, %v3382_v34  ;;  %v3940_v52 = vpop.eup %3939  ;;  %vm3480_vm4 = vweird.f32 %v3938_v12  ;;  %v3498_v27 = vand.u32 2147483647, %v3383_v40 }
 0x373   : > { %v3490_v53 = vmul.f32 %v3940_v52, %v3383_v40  ;;  %vm3481_vm6 = vmor %vm3479_vm5, %vm3480_vm4  ;;  %vm3495_vm7 = vweird.f32 %v3940_v52 }
 0x374   : > { %3517 = vst.msk [vmem:[%s4737_s11 + $0x28] sm:$0xff] %vm323_vm0, %v3509_v4  ;;  %v3476_v21 = vsub.f32 1.0, %v3475_v5  ;;  %vm3496_vm1 = vmor %vm3494_vm9, %vm3495_vm7  ;;  %vm3499_vm3 = vcmp.eq.f32.partialorder %v3498_v27, 8.507059e+37 }
 0x375   : > { %v3491_v61 = vsub.f32 1.0, %v3490_v53 }
 0x376   : > { %v3477_v10 = vmul.f32 %v3938_v12, %v3476_v21 }
 0x377   : > { %v3492_v50 = vmul.f32 %v3940_v52, %v3491_v61 }
 0x378   : > { %v3478_v2 = vadd.f32 %v3938_v12, %v3477_v10 }
 0x379   : > { %v3493_v41 = vadd.f32 %v3940_v52, %v3492_v50 }
 0x37a   : > { %v3482_v63 = vsel %vm3481_vm6, %v3938_v12, %v3478_v2 }
 0x37b   : > { %v3487_v0 = vsel %vm3484_vm8, %v3486_v58, %v3482_v63  ;;  %v3497_v54 = vsel %vm3496_vm1, %v3940_v52, %v3493_v41 }
 0x37c   : > { %v3510_v24 = vmul.f32 %v3487_v0, %v4756_v1  ;;  %v3502_v23 = vsel %vm3499_vm3, %v3501_v6, %v3497_v54 }
 0x37d   : > { %v3511_v28 = vmul.f32 %v3502_v23, %v4770_v49 }
 0x37e   : > { %3518 = vst.msk [vmem:[%s4737_s11 + $0x30] sm:$0xff] %vm323_vm0, %v3510_v24 }
 0x37f   : > { %3519 = vst.msk [vmem:[%s4737_s11 + $0x38] sm:$0xff] %vm323_vm0, %v3511_v28 }
 0x380 PF: > { %s17_s24 = sadd.s32 1, %s3947_s24  }
 0x381   : > { %p14_p4 = scmp.ge.s32.totalorder %s17_s24, 4  }
 0x383   :  { %16 = sbr.rel (!%p14_p4) target bundleno = 1 (0x1), region = 98 }

// kernel: bottleneck_vrc_forward.7
= control target key start
LH: loop header
LB: loop body
LE: loop exit
PB: predicated region body
PF: predicated region fallthrough
CT: control target
= control target key end

     0   :  { %s4308_s13 = smov 0   ;;  %s6056_s0 = inlined_call_operand.vmem [shape: f32[2,32,8,4], index: 0, kind: input, shape index: {}]   ;;  %s6057_s1 = inlined_call_operand.vmem [shape: f32[2,32,8,4], index: 1, kind: input, shape index: {}]   ;;  %s6058_s2 = inlined_call_operand.vmem [shape: f32[2,32,8,4], index: 2, kind: input, shape index: {}]   ;;  %s6059_s3 = inlined_call_operand.vmem [shape: f32[32,8,8], index: 3, kind: input, shape index: {}]   ;;  %s6060_s4 = inlined_call_operand.vmem [shape: f32[2,8,8,16], index: 4, kind: input, shape index: {}]   ;;  %s6061_s5 = inlined_call_operand.vmem [shape: f32[5,5,1,1,16], index: 5, kind: input, shape index: {}]   ;;  %s6062_s6 = inlined_call_operand.vmem [shape: f32[1,1,16], index: 6, kind: input, shape index: {}]   ;;  %s6063_s7 = inlined_call_operand.vmem [shape: bf16[16,16], index: 7, kind: input, shape index: {}]   ;;  %s6064_s8 = inlined_call_operand.vmem [shape: f32[1,1,16], index: 8, kind: input, shape index: {}]   ;;  %s6065_s9 = inlined_call_operand.vmem [shape: f32[2,8,8,16], index: 9, kind: input, shape index: {}]   ;;  %s6066_s10 = inlined_call_operand.vmem [shape: f32[2,8,8,16], index: 10, kind: output, shape index: {}]  }
   0x1 LB: > { %s3927_s14 = sadd.s32 4294967295, %s4250_s13   ;;  %p3931_p0 = scmp.ge.s32.totalorder %s4250_s13, 1  ;;  %s4250_s13 = sphi %s4308_s13, %s20_s13  }
   0x2   : > { %p352_p1 = scmp.lt.s32.totalorder %s4250_s13, 3 }
   0x4   : > { %p353_p2 = pnand %p3931_p0, %p352_p1 }
   0x6   : > { %356 = sbr.rel (%p353_p2) target bundleno = 958 (0x3be), region = 60 }
   0xb   : > { %p410_p3 = scmp.lt.s32.totalorder %s3927_s14, 1  ;;  %vm601_vm0 = vcmask 31744   ;;  %vm1210_vm1 = vcmask 64512   ;;  %vm1662_vm2 = vcmask 1043456   ;;  %vm3068_vm3 = vcmask 1041408  }
   0xc   : > { %vm2268_vm4 = vcmask 130048   ;;  %vm2270_vm5 = vcmask 125952  }
   0xd   : > { %s6251_s14 = smov (!%p410_p3, %s3927_s14), 1 }
   0xe   : > { %s4319_s15 = sshll.u32 %s6251_s14, 8  ;;  %s5110_s26 = sshll.u32 %s6251_s14, 6 }
   0xf   : > { %s4325_s18 = scalar_lea.vmem %s6057_s1, %s4319_s15  ;;  %s4331_s21 = scalar_lea.vmem %s6056_s0, %s4319_s15 }
  0x10   : > { %v505_v0 = vld [vmem:[%s4325_s18] sm:$0xff]  ;;  %v506_v1 = vld [vmem:[%s4325_s18 + $0x8] sm:$0xff]  ;;  %v507_v2 = vld [vmem:[%s4325_s18 + $0x10] sm:$0xff]  ;;  %s5122_s29 = scalar_lea.vmem %s6060_s4, %s5110_s26  ;;  %s6017_s12 = scalar_lea.vmem %s6065_s9, %s5110_s26 }
  0x11   : > { %v537_v3 = vpack.c.bf16 %v505_v0, %v505_v0  ;;  %v538_v4 = vpack.c.bf16 %v506_v1, %v506_v1  ;;  %v539_v5 = vpack.c.bf16 %v507_v2, %v507_v2  ;;  %v508_v6 = vld [vmem:[%s4325_s18 + $0x18] sm:$0xff]  ;;  %v441_v7 = vld [vmem:[%s4331_s21] sm:$0xff]  ;;  %v442_v9 = vld [vmem:[%s4331_s21 + $0x8] sm:$0xff]  ;;  %s6025_s17 = scalar_lea.vmem %s6066_s10, %s5110_s26 }
  0x12   : > { %v540_v8 = vpack.c.bf16 %v508_v6, %v508_v6  ;;  %v443_v10 = vld [vmem:[%s4331_s21 + $0x10] sm:$0xff]  ;;  %v509_v15 = vld [vmem:[%s4325_s18 + $0x20] sm:$0xff]  ;;  %v510_v16 = vld [vmem:[%s4325_s18 + $0x28] sm:$0xff]  ;;  %v473_v22 = vpack.c.bf16 %v441_v7, %v441_v7  ;;  %v474_v27 = vpack.c.bf16 %v442_v9, %v442_v9 }
  0x13   : > { %v511_v11 = vld [vmem:[%s4325_s18 + $0x30] sm:$0xff]  ;;  %v606_v12 = vsel %vm601_vm0, %v537_v3, 0  ;;  %v625_v13 = vsel %vm601_vm0, %v538_v4, 0  ;;  %v644_v14 = vsel %vm601_vm0, %v539_v5, 0  ;;  %v512_v17 = vld [vmem:[%s4325_s18 + $0x38] sm:$0xff]  ;;  %v541_v21 = vpack.c.bf16 %v509_v15, %v509_v15  ;;  %v513_v25 = vld [vmem:[%s4325_s18 + $0x40] sm:$0xff] }
  0x14   : > { %615 = vmatpush.bf16.xpose.msra.mxu0 %v606_v12  ;;  %634 = vmatpush.bf16.xpose.msra.mxu1 %v625_v13  ;;  %v663_v18 = vsel %vm601_vm0, %v540_v8, 0  ;;  %v444_v19 = vld [vmem:[%s4331_s21 + $0x18] sm:$0xff]  ;;  %v543_v20 = vpack.c.bf16 %v511_v11, %v511_v11  ;;  %v542_v23 = vpack.c.bf16 %v510_v16, %v510_v16  ;;  %v544_v24 = vpack.c.bf16 %v512_v17, %v512_v17  ;;  %v514_v26 = vld [vmem:[%s4325_s18 + $0x48] sm:$0xff]  ;;  %v515_v31 = vld [vmem:[%s4325_s18 + $0x50] sm:$0xff] }
  0x15   : > { %653 = vmatpush.bf16.xpose.msra.mxu2 %v644_v14  ;;  %672 = vmatpush.bf16.xpose.msra.mxu3 %v663_v18  ;;  %v475_v28 = vpack.c.bf16 %v443_v10, %v443_v10  ;;  %v682_v30 = vsel %vm601_vm0, %v541_v21, 0  ;;  %v516_v32 = vld [vmem:[%s4325_s18 + $0x58] sm:$0xff]  ;;  %v476_v33 = vpack.c.bf16 %v444_v19, %v444_v19  ;;  %v545_v36 = vpack.c.bf16 %v513_v25, %v513_v25  ;;  %v445_v44 = vld [vmem:[%s4331_s21 + $0x20] sm:$0xff]  ;;  %v519_v46 = vld [vmem:[%s4325_s18 + $0x70] sm:$0xff] }
  0x16   : > { %v720_v29 = vsel %vm601_vm0, %v543_v20, 0  ;;  %v701_v34 = vsel %vm601_vm0, %v542_v23, 0  ;;  %v739_v35 = vsel %vm601_vm0, %v544_v24, 0  ;;  %v546_v37 = vpack.c.bf16 %v514_v26, %v514_v26  ;;  %v517_v45 = vld [vmem:[%s4325_s18 + $0x60] sm:$0xff]  ;;  %v446_v47 = vld [vmem:[%s4331_s21 + $0x28] sm:$0xff]  ;;  %v520_v48 = vld [vmem:[%s4325_s18 + $0x78] sm:$0xff] }
  0x17   : > { %v547_v38 = vpack.c.bf16 %v515_v31, %v515_v31  ;;  %v548_v39 = vpack.c.bf16 %v516_v32, %v516_v32  ;;  %v758_v40 = vsel %vm601_vm0, %v545_v36, 0  ;;  %v518_v49 = vld [vmem:[%s4325_s18 + $0x68] sm:$0xff]  ;;  %v447_v50 = vld [vmem:[%s4331_s21 + $0x30] sm:$0xff]  ;;  %v448_v51 = vld [vmem:[%s4331_s21 + $0x38] sm:$0xff]  ;;  %v549_v52 = vpack.c.bf16 %v517_v45, %v517_v45 }
  0x18   : > { %v777_v41 = vsel %vm601_vm0, %v546_v37, 0  ;;  %v551_v53 = vpack.c.bf16 %v519_v46, %v519_v46  ;;  %v477_v54 = vpack.c.bf16 %v445_v44, %v445_v44  ;;  %v478_v55 = vpack.c.bf16 %v446_v47, %v446_v47  ;;  %v523_v0 = vld [vmem:[%s4325_s18 + $0x90] sm:$0xff]  ;;  %v524_v1 = vld [vmem:[%s4325_s18 + $0x98] sm:$0xff]  ;;  %v449_v2 = vld [vmem:[%s4331_s21 + $0x40] sm:$0xff] }
  0x19   : > { %v796_v42 = vsel %vm601_vm0, %v547_v38, 0  ;;  %v815_v43 = vsel %vm601_vm0, %v548_v39, 0  ;;  %v552_v56 = vpack.c.bf16 %v520_v48, %v520_v48  ;;  %v550_v57 = vpack.c.bf16 %v518_v49, %v518_v49  ;;  %v450_v3 = vld [vmem:[%s4331_s21 + $0x48] sm:$0xff]  ;;  %v451_v4 = vld [vmem:[%s4331_s21 + $0x50] sm:$0xff]  ;;  %v452_v5 = vld [vmem:[%s4331_s21 + $0x58] sm:$0xff] }
  0x1a   : > { %v479_v58 = vpack.c.bf16 %v447_v50, %v447_v50  ;;  %v480_v59 = vpack.c.bf16 %v448_v51, %v448_v51  ;;  %v834_v60 = vsel %vm601_vm0, %v549_v52, 0  ;;  %v872_v61 = vsel %vm601_vm0, %v551_v53, 0  ;;  %v522_v14 = vld [vmem:[%s4325_s18 + $0x88] sm:$0xff]  ;;  %v453_v17 = vld [vmem:[%s4331_s21 + $0x60] sm:$0xff]  ;;  %v455_v19 = vld [vmem:[%s4331_s21 + $0x70] sm:$0xff] }
  0x1b   : > { %3944 = vmatmul.msk.bf16.vlgmr.msra.gmra.mxu0 %vm601_vm0, %v473_v22  ;;  %3945 = vmatmul.msk.bf16.vlgmr.msra.gmra.mxu1 %vm601_vm0, %v474_v27  ;;  %v891_v62 = vsel %vm601_vm0, %v552_v56, 0  ;;  %v853_v63 = vsel %vm601_vm0, %v550_v57, 0  ;;  %v555_v6 = vpack.c.bf16 %v523_v0, %v523_v0  ;;  %v556_v7 = vpack.c.bf16 %v524_v1, %v524_v1  ;;  %v454_v18 = vld [vmem:[%s4331_s21 + $0x68] sm:$0xff]  ;;  %v456_v20 = vld [vmem:[%s4331_s21 + $0x78] sm:$0xff]  ;;  %v459_v26 = vld [vmem:[%s4331_s21 + $0x90] sm:$0xff] }
  0x1c   : > { %691 = vmatpush.bf16.xpose.msrb.mxu0 %v682_v30  ;;  %710 = vmatpush.bf16.xpose.msrb.mxu1 %v701_v34  ;;  %v481_v8 = vpack.c.bf16 %v449_v2, %v449_v2  ;;  %v482_v9 = vpack.c.bf16 %v450_v3, %v450_v3  ;;  %v483_v10 = vpack.c.bf16 %v451_v4, %v451_v4  ;;  %v458_v25 = vld [vmem:[%s4331_s21 + $0x88] sm:$0xff]  ;;  %v460_v27 = vld [vmem:[%s4331_s21 + $0x98] sm:$0xff]  ;;  %v527_v31 = vld [vmem:[%s4325_s18 + $0xb0] sm:$0xff] }
  0x1d   : > { %729 = vmatpush.bf16.xpose.msrb.mxu2 %v720_v29  ;;  %748 = vmatpush.bf16.xpose.msrb.mxu3 %v739_v35  ;;  %v484_v11 = vpack.c.bf16 %v452_v5, %v452_v5  ;;  %v948_v12 = vsel %vm601_vm0, %v555_v6, 0  ;;  %v967_v13 = vsel %vm601_vm0, %v556_v7, 0  ;;  %v554_v15 = vpack.c.bf16 %v522_v14, %v522_v14  ;;  %v521_v34 = vld [vmem:[%s4325_s18 + $0x80] sm:$0xff]  ;;  %v463_v36 = vld [vmem:[%s4331_s21 + $0xb0] sm:$0xff]  ;;  %v528_v37 = vld [vmem:[%s4325_s18 + $0xb8] sm:$0xff] }
  0x1e   : > { %3946 = vmatmul.msk.bf16.vlgmr.msra.gmra.mxu2 %vm601_vm0, %v475_v28  ;;  %3947 = vmatmul.msk.bf16.vlgmr.msra.gmra.mxu3 %vm601_vm0, %v476_v33  ;;  %v485_v21 = vpack.c.bf16 %v453_v17, %v453_v17  ;;  %v486_v22 = vpack.c.bf16 %v454_v18, %v454_v18  ;;  %v487_v23 = vpack.c.bf16 %v455_v19, %v455_v19  ;;  %v464_v44 = vld [vmem:[%s4331_s21 + $0xb8] sm:$0xff]  ;;  %v531_v45 = vld [vmem:[%s4325_s18 + $0xd0] sm:$0xff]  ;;  %v526_v49 = vld [vmem:[%s4325_s18 + $0xa8] sm:$0xff] }
  0x1f   : > { %v929_v16 = vsel %vm601_vm0, %v554_v15, 0  ;;  %v488_v24 = vpack.c.bf16 %v456_v20, %v456_v20  ;;  %v490_v28 = vpack.c.bf16 %v458_v25, %v458_v25  ;;  %v491_v29 = vpack.c.bf16 %v459_v26, %v459_v26  ;;  %v467_v51 = vld [vmem:[%s4331_s21 + $0xd0] sm:$0xff]  ;;  %v532_v0 = vld [vmem:[%s4325_s18 + $0xd8] sm:$0xff]  ;;  %v574_v19 = vld [vmem:[%s6059_s3 + $0x28] sm:$0xff] }
  0x20   : > { %v492_v30 = vpack.c.bf16 %v460_v27, %v460_v27  ;;  %v559_v32 = vpack.c.bf16 %v527_v31, %v527_v31  ;;  %v553_v35 = vpack.c.bf16 %v521_v34, %v521_v34  ;;  %v495_v39 = vpack.c.bf16 %v463_v36, %v463_v36  ;;  %v571_v4 = vld [vmem:[%s6059_s3 + $0x10] sm:$0xff]  ;;  %v529_v27 = vld [vmem:[%s4325_s18 + $0xc0] sm:$0xff]  ;;  %v536_v34 = vld [vmem:[%s4325_s18 + $0xf8] sm:$0xff] }
  0x21   : > { %v496_v46 = vpack.c.bf16 %v464_v44, %v464_v44  ;;  %v563_v47 = vpack.c.bf16 %v531_v45, %v531_v45  ;;  %v558_v50 = vpack.c.bf16 %v526_v49, %v526_v49  ;;  %v499_v53 = vpack.c.bf16 %v467_v51, %v467_v51  ;;  %v465_v49 = vld [vmem:[%s4331_s21 + $0xc0] sm:$0xff] }
  0x22   : > { %v1024_v33 = vsel %vm601_vm0, %v559_v32, 0  ;;  %v910_v38 = vsel %vm601_vm0, %v553_v35, 0  ;;  %v564_v2 = vpack.c.bf16 %v532_v0, %v532_v0 }
  0x23   : > { %v1100_v48 = vsel %vm601_vm0, %v563_v47, 0  ;;  %v1005_v52 = vsel %vm601_vm0, %v558_v50, 0  ;;  %v466_v50 = vld [vmem:[%s4331_s21 + $0xc8] sm:$0xff] }
  0x24   : > { %767 = vmatpush.bf16.xpose.msra.mxu0 %v758_v40  ;;  %786 = vmatpush.bf16.xpose.msra.mxu1 %v777_v41  ;;  %v560_v40 = vpack.c.bf16 %v528_v37, %v528_v37  ;;  %v1119_v5 = vsel %vm601_vm0, %v564_v2, 0 }
  0x25   : > { %805 = vmatpush.bf16.xpose.msra.mxu2 %v796_v42  ;;  %824 = vmatpush.bf16.xpose.msra.mxu3 %v815_v43  ;;  %v457_v42 = vld [vmem:[%s4331_s21 + $0x80] sm:$0xff] }
  0x26   : > { %v1043_v41 = vsel %vm601_vm0, %v560_v40, 0  ;;  %v489_v43 = vpack.c.bf16 %v457_v42, %v457_v42 }
  0x2b   : > { %3948 = vmatmul.msk.bf16.vlgmr.msrb.gmra.mxu0 %vm601_vm0, %v477_v54  ;;  %3949 = vmatmul.msk.bf16.vlgmr.msrb.gmra.mxu1 %vm601_vm0, %v478_v55  ;;  %v569_v54 = vld [vmem:[%s6059_s3] sm:$0xff] }
  0x2c   : > { %843 = vmatpush.bf16.xpose.msrb.mxu0 %v834_v60  ;;  %862 = vmatpush.bf16.xpose.msrb.mxu1 %v853_v63  ;;  %v570_v60 = vld [vmem:[%s6059_s3 + $0x8] sm:$0xff] }
  0x2e   : > { %3950 = vmatmul.msk.bf16.vlgmr.msrb.gmra.mxu2 %vm601_vm0, %v479_v58  ;;  %3951 = vmatmul.msk.bf16.vlgmr.msrb.gmra.mxu3 %vm601_vm0, %v480_v59  ;;  %v525_v58 = vld [vmem:[%s4325_s18 + $0xa0] sm:$0xff]  ;;  %v462_v59 = vld [vmem:[%s4331_s21 + $0xa8] sm:$0xff] }
  0x2f   : > { %881 = vmatpush.bf16.xpose.msrb.mxu2 %v872_v61  ;;  %900 = vmatpush.bf16.xpose.msrb.mxu3 %v891_v62  ;;  %v557_v61 = vpack.c.bf16 %v525_v58, %v525_v58  ;;  %v494_v62 = vpack.c.bf16 %v462_v59, %v462_v59 }
  0x31   : > { %v986_v1 = vsel %vm601_vm0, %v557_v61, 0 }
  0x3b   : > { %3952 = vmatmul.msk.bf16.vlgmr.msra.gmra.mxu0 %vm601_vm0, %v481_v8  ;;  %3953 = vmatmul.msk.bf16.vlgmr.msra.gmra.mxu1 %vm601_vm0, %v482_v9 }
  0x3c   : > { %938 = vmatpush.bf16.xpose.msra.mxu1 %v929_v16  ;;  %919 = vmatpush.bf16.xpose.msra.mxu0 %v910_v38  ;;  %v468_v16 = vld [vmem:[%s4331_s21 + $0xd8] sm:$0xff]  ;;  %v568_v38 = vpack.c.bf16 %v536_v34, %v536_v34  ;;  %v582_v34 = vld [vmem:[%s6059_s3 + $0x68] sm:$0xff] }
  0x3d   : > { %v500_v18 = vpack.c.bf16 %v468_v16, %v468_v16  ;;  %v533_v16 = vld [vmem:[%s4325_s18 + $0xe0] sm:$0xff] }
  0x3e   : > { %3954 = vmatmul.msk.bf16.vlgmr.msra.gmra.mxu2 %vm601_vm0, %v483_v10  ;;  %3955 = vmatmul.msk.bf16.vlgmr.msra.gmra.mxu3 %vm601_vm0, %v484_v11  ;;  %v572_v11 = vld [vmem:[%s6059_s3 + $0x18] sm:$0xff] }
  0x3f   : > { %957 = vmatpush.bf16.xpose.msra.mxu2 %v948_v12  ;;  %976 = vmatpush.bf16.xpose.msra.mxu3 %v967_v13  ;;  %v461_v13 = vld [vmem:[%s4331_s21 + $0xa0] sm:$0xff] }
  0x40   : > { %v493_v15 = vpack.c.bf16 %v461_v13, %v461_v13 }
  0x4b   : > { %3956 = vmatmul.msk.bf16.vlgmr.msrb.gmra.mxu0 %vm601_vm0, %v485_v21  ;;  %3957 = vmatmul.msk.bf16.vlgmr.msrb.gmra.mxu1 %vm601_vm0, %v486_v22  ;;  %v573_v22 = vld [vmem:[%s6059_s3 + $0x20] sm:$0xff] }
  0x4c   : > { %1014 = vmatpush.bf16.xpose.msrb.mxu1 %v1005_v52  ;;  %995 = vmatpush.bf16.xpose.msrb.mxu0 %v986_v1  ;;  %v497_v52 = vpack.c.bf16 %v465_v49, %v465_v49 }
  0x4e   : > { %3958 = vmatmul.msk.bf16.vlgmr.msrb.gmra.mxu2 %vm601_vm0, %v487_v23  ;;  %3959 = vmatmul.msk.bf16.vlgmr.msrb.gmra.mxu3 %vm601_vm0, %v488_v24 }
  0x4f   : > { %1033 = vmatpush.bf16.xpose.msrb.mxu2 %v1024_v33  ;;  %1052 = vmatpush.bf16.xpose.msrb.mxu3 %v1043_v41  ;;  %v535_v33 = vld [vmem:[%s4325_s18 + $0xf0] sm:$0xff]  ;;  %v1195_v41 = vsel %vm601_vm0, %v568_v38, 0 }
  0x50   : > { %v567_v37 = vpack.c.bf16 %v535_v33, %v535_v33 }
  0x52   : > { %v1176_v40 = vsel %vm601_vm0, %v567_v37, 0 }
  0x5b   : > { %3961 = vmatmul.msk.bf16.vlgmr.msra.gmra.mxu1 %vm601_vm0, %v490_v28  ;;  %3960 = vmatmul.msk.bf16.vlgmr.msra.gmra.mxu0 %vm601_vm0, %v489_v43  ;;  %v530_v28 = vld [vmem:[%s4325_s18 + $0xc8] sm:$0xff] }
  0x5e   : > { %3962 = vmatmul.msk.bf16.vlgmr.msra.gmra.mxu2 %vm601_vm0, %v491_v29  ;;  %3963 = vmatmul.msk.bf16.vlgmr.msra.gmra.mxu3 %vm601_vm0, %v492_v30  ;;  %v561_v29 = vpack.c.bf16 %v529_v27, %v529_v27  ;;  %v562_v30 = vpack.c.bf16 %v530_v28, %v530_v28 }
  0x5f   : > { %1109 = vmatpush.bf16.xpose.msra.mxu2 %v1100_v48  ;;  %1128 = vmatpush.bf16.xpose.msra.mxu3 %v1119_v5  ;;  %v576_v48 = vld [vmem:[%s6059_s3 + $0x38] sm:$0xff] }
  0x60   : > { %v1062_v35 = vsel %vm601_vm0, %v561_v29, 0  ;;  %v1081_v36 = vsel %vm601_vm0, %v562_v30, 0 }
  0x61   : > { %1071 = vmatpush.bf16.xpose.msra.mxu0 %v1062_v35  ;;  %1090 = vmatpush.bf16.xpose.msra.mxu1 %v1081_v36  ;;  %v469_v35 = vld [vmem:[%s4331_s21 + $0xe0] sm:$0xff]  ;;  %v470_v36 = vld [vmem:[%s4331_s21 + $0xe8] sm:$0xff] }
  0x62   : > { %v501_v37 = vpack.c.bf16 %v469_v35, %v469_v35  ;;  %v502_v38 = vpack.c.bf16 %v470_v36, %v470_v36 }
  0x6b   : > { %3965 = vmatmul.msk.bf16.vlgmr.msrb.gmra.mxu1 %vm601_vm0, %v494_v62  ;;  %3964 = vmatmul.msk.bf16.vlgmr.msrb.gmra.mxu0 %vm601_vm0, %v493_v15  ;;  %v579_v15 = vld [vmem:[%s6059_s3 + $0x50] sm:$0xff] }
  0x6e   : > { %3966 = vmatmul.msk.bf16.vlgmr.msrb.gmra.mxu2 %vm601_vm0, %v495_v39  ;;  %3967 = vmatmul.msk.bf16.vlgmr.msrb.gmra.mxu3 %vm601_vm0, %v496_v46  ;;  %v575_v39 = vld [vmem:[%s6059_s3 + $0x30] sm:$0xff] }
  0x6f   : > { %1185 = vmatpush.bf16.xpose.msrb.mxu2 %v1176_v40  ;;  %1204 = vmatpush.bf16.xpose.msrb.mxu3 %v1195_v41  ;;  %v583_v41 = vld [vmem:[%s6059_s3 + $0x70] sm:$0xff] }
  0x7b   : > { %3968 = vmatmul.msk.bf16.vlgmr.msra.gmra.mxu0 %vm601_vm0, %v497_v52 }
  0x7e   : > { %3970 = vmatmul.msk.bf16.vlgmr.msra.gmra.mxu2 %vm601_vm0, %v499_v53  ;;  %3971 = vmatmul.msk.bf16.vlgmr.msra.gmra.mxu3 %vm601_vm0, %v500_v18  ;;  %v498_v53 = vpack.c.bf16 %v466_v50, %v466_v50  ;;  %v534_v18 = vld [vmem:[%s4325_s18 + $0xe8] sm:$0xff] }
  0x80   : > { %3969 = vmatmul.msk.bf16.vlgmr.msra.gmra.mxu1 %vm601_vm0, %v498_v53 }
  0x98   : > { %v617_v55 = vpop.f32.mrf.mxu0  ;;  %v636_v56 = vpop.f32.mrf.mxu1 }
  0x99   : > { %v4430_v57 = vadd.f32 %v617_v55, %v569_v54  ;;  %v4442_v3 = vadd.f32 %v636_v56, %v570_v60  ;;  %v471_v54 = vld [vmem:[%s4331_s21 + $0xf0] sm:$0xff]  ;;  %v472_v55 = vld [vmem:[%s4331_s21 + $0xf8] sm:$0xff]  ;;  %v577_v60 = vld [vmem:[%s6059_s3 + $0x40] sm:$0xff]  ;;  %s4813_s21 = scalar_lea.vmem %s6058_s2, %s4319_s15 }
  0x9a   : > { %v503_v58 = vpack.c.bf16 %v471_v54, %v471_v54  ;;  %v504_v59 = vpack.c.bf16 %v472_v55, %v472_v55 }
  0x9b   : > { %v1211_v63 = vsel %vm1210_vm1, %v4430_v57, -inf  ;;  %v1214_v12 = vsel %vm1210_vm1, %v4442_v3, -inf }
  0x9c   : > { %1212 = vmax.xlane.f32.xlu1 %v1211_v63  ;;  %3974 = vmatmul.msk.bf16.vlgmr.msrb.gmra.mxu2 %vm601_vm0, %v503_v58  ;;  %v587_v58 = vld [vmem:[%s6059_s3 + $0x90] sm:$0xff] }
  0x9d   : > { %3975 = vmatmul.msk.bf16.vlgmr.msrb.gmra.mxu3 %vm601_vm0, %v504_v59  ;;  %v588_v59 = vld [vmem:[%s6059_s3 + $0x98] sm:$0xff] }
  0xa0   : > { %v619_v9 = vpop.f32.mrf.mxu0  ;;  %v638_v10 = vpop.f32.mrf.mxu1 }
  0xa1   : > { %v655_v6 = vpop.f32.mrf.mxu2  ;;  %v674_v7 = vpop.f32.mrf.mxu3 }
  0xa2   : > { %v4448_v8 = vadd.f32 %v655_v6, %v571_v4  ;;  %v4459_v17 = vadd.f32 %v674_v7, %v572_v11  ;;  %v578_v4 = vld [vmem:[%s6059_s3 + $0x48] sm:$0xff]  ;;  %v580_v7 = vld [vmem:[%s6059_s3 + $0x58] sm:$0xff] }
  0xa4   : > { %v1217_v14 = vsel %vm1210_vm1, %v4448_v8, -inf  ;;  %1215 = vmax.xlane.f32.xlu1 %v1214_v12  ;;  %v1220_v25 = vsel %vm1210_vm1, %v4459_v17, -inf }
  0xa5   : > { %1218 = vmax.xlane.f32.xlu0 %v1217_v14 }
  0xa8   : > { %v693_v23 = vpop.f32.mrf.mxu0  ;;  %v712_v24 = vpop.f32.mrf.mxu1 }
  0xa9   : > { %v657_v20 = vpop.f32.mrf.mxu2  ;;  %v676_v21 = vpop.f32.mrf.mxu3  ;;  %v4471_v26 = vadd.f32 %v712_v24, %v574_v19  ;;  %v4475_v31 = vadd.f32 %v693_v23, %v573_v22 }
  0xaa   : > { %v565_v20 = vpack.c.bf16 %v533_v16, %v533_v16  ;;  %v566_v21 = vpack.c.bf16 %v534_v18, %v534_v18 }
  0xab   : > { %v1226_v32 = vsel %vm1210_vm1, %v4471_v26, -inf  ;;  %v1223_v47 = vsel %vm1210_vm1, %v4475_v31, -inf }
  0xac   : > { %1227 = vmax.xlane.f32.xlu1 %v1226_v32  ;;  %v1138_v23 = vsel %vm601_vm0, %v565_v20, 0  ;;  %v1157_v24 = vsel %vm601_vm0, %v566_v21, 0 }
  0xad   : > { %1221 = vmax.xlane.f32.xlu0 %v1220_v25  ;;  %1147 = vmatpush.bf16.xpose.msrb.mxu0 %v1138_v23  ;;  %v581_v25 = vld [vmem:[%s6059_s3 + $0x60] sm:$0xff] }
  0xae   : > { %1166 = vmatpush.bf16.xpose.msrb.mxu1 %v1157_v24 }
  0xb0   : > { %v695_v45 = vpop.f32.mrf.mxu0  ;;  %v714_v46 = vpop.f32.mrf.mxu1 }
  0xb1   : > { %v731_v42 = vpop.f32.mrf.mxu2  ;;  %v750_v43 = vpop.f32.mrf.mxu3 }
  0xb2   : > { %v4488_v44 = vadd.f32 %v731_v42, %v575_v39  ;;  %v4501_v56 = vadd.f32 %v750_v43, %v576_v48  ;;  %v584_v42 = vld [vmem:[%s6059_s3 + $0x78] sm:$0xff] }
  0xb4   : > { %v1229_v51 = vsel %vm1210_vm1, %v4488_v44, -inf  ;;  %v1232_v1 = vsel %vm1210_vm1, %v4501_v56, -inf  ;;  %3972 = vmatmul.msk.bf16.vlgmr.msrb.gmra.mxu0 %vm601_vm0, %v501_v37 }
  0xb5   : > { %1230 = vmax.xlane.f32.xlu2 %v1229_v51  ;;  %1224 = vmax.xlane.f32.xlu0 %v1223_v47 }
  0xb6   : > { %3973 = vmatmul.msk.bf16.vlgmr.msrb.gmra.mxu1 %vm601_vm0, %v502_v38 }
  0xb8   : > { %v769_v63 = vpop.f32.mrf.mxu0  ;;  %v788_v0 = vpop.f32.mrf.mxu1 }
  0xb9   : > { %v733_v61 = vpop.f32.mrf.mxu2  ;;  %v752_v62 = vpop.f32.mrf.mxu3  ;;  %v4512_v2 = vadd.f32 %v769_v63, %v577_v60  ;;  %v4519_v6 = vadd.f32 %v788_v0, %v578_v4 }
  0xbb   : > { %v1235_v5 = vsel %vm1210_vm1, %v4512_v2, -inf  ;;  %v1238_v14 = vsel %vm1210_vm1, %v4519_v6, -inf }
  0xbc   : > { %1236 = vmax.xlane.f32.xlu1 %v1235_v5 }
  0xbd   : > { %1233 = vmax.xlane.f32.xlu2 %v1232_v1  ;;  %v586_v1 = vld [vmem:[%s6059_s3 + $0x88] sm:$0xff] }
  0xc0   : > { %v771_v12 = vpop.f32.mrf.mxu0  ;;  %v790_v13 = vpop.f32.mrf.mxu1 }
  0xc1   : > { %v807_v9 = vpop.f32.mrf.mxu2  ;;  %v826_v10 = vpop.f32.mrf.mxu3 }
  0xc2   : > { %v4524_v11 = vadd.f32 %v826_v10, %v580_v7  ;;  %v4535_v22 = vadd.f32 %v807_v9, %v579_v15 }
  0xc4   : > { %v1244_v19 = vsel %vm1210_vm1, %v4524_v11, -inf  ;;  %v1241_v30 = vsel %vm1210_vm1, %v4535_v22, -inf }
  0xc5   : > { %1239 = vmax.xlane.f32.xlu2 %v1238_v14  ;;  %1245 = vmax.xlane.f32.xlu0 %v1244_v19 }
  0xc8   : > { %v845_v29 = vpop.f32.mrf.mxu0  ;;  %v864_v32 = vpop.f32.mrf.mxu1 }
  0xc9   : > { %v809_v27 = vpop.f32.mrf.mxu2  ;;  %v828_v28 = vpop.f32.mrf.mxu3  ;;  %v4544_v33 = vadd.f32 %v845_v29, %v581_v25  ;;  %v4553_v40 = vadd.f32 %v864_v32, %v582_v34 }
  0xcb   : > { %v1247_v39 = vsel %vm1210_vm1, %v4544_v33, -inf  ;;  %v1250_v49 = vsel %vm1210_vm1, %v4553_v40, -inf }
  0xcc   : > { %1248 = vmax.xlane.f32.xlu1 %v1247_v39 }
  0xcd   : > { %1242 = vmax.xlane.f32.xlu2 %v1241_v30 }
  0xd0   : > { %v847_v48 = vpop.f32.mrf.mxu0  ;;  %v866_v50 = vpop.f32.mrf.mxu1 }
  0xd1   : > { %v883_v43 = vpop.f32.mrf.mxu2  ;;  %v902_v45 = vpop.f32.mrf.mxu3 }
  0xd2   : > { %v4563_v46 = vadd.f32 %v883_v43, %v583_v41  ;;  %v4565_v47 = vadd.f32 %v902_v45, %v584_v42  ;;  %v591_v41 = vld [vmem:[%s6059_s3 + $0xb0] sm:$0xff] }
  0xd4   : > { %v1253_v51 = vsel %vm1210_vm1, %v4563_v46, -inf  ;;  %v1256_v52 = vsel %vm1210_vm1, %v4565_v47, -inf }
  0xd5   : > { %1251 = vmax.xlane.f32.xlu2 %v1250_v49  ;;  %1254 = vmax.xlane.f32.xlu0 %v1253_v51 }
  0xd6   : > { %1257 = vmax.xlane.f32.xlu1 %v1256_v52 }
  0xd8   : > { %v940_v55 = vpop.f32.mrf.mxu1  ;;  %v921_v13 = vpop.f32.mrf.mxu0 }
  0xd9   : > { %v885_v53 = vpop.f32.mrf.mxu2  ;;  %v904_v54 = vpop.f32.mrf.mxu3  ;;  %v4590_v7 = vadd.f32 %v940_v55, %v586_v1 }
  0xdb   : > { %v1262_v12 = vsel %vm1210_vm1, %v4590_v7, -inf }
  0xe0   : > { %v942_v0 = vpop.f32.mrf.mxu1  ;;  %v923_v19 = vpop.f32.mrf.mxu0 }
  0xe1   : > { %v959_v60 = vpop.f32.mrf.mxu2  ;;  %v978_v61 = vpop.f32.mrf.mxu3 }
  0xe2   : > { %v4579_v62 = vadd.f32 %v959_v60, %v587_v58  ;;  %v4581_v63 = vadd.f32 %v978_v61, %v588_v59  ;;  %v585_v60 = vld [vmem:[%s6059_s3 + $0x80] sm:$0xff] }
  0xe4   : > { %v1265_v4 = vsel %vm1210_vm1, %v4579_v62, -inf  ;;  %v1268_v5 = vsel %vm1210_vm1, %v4581_v63, -inf }
  0xe5   : > { %1266 = vmax.xlane.f32.xlu0 %v1265_v4  ;;  %1269 = vmax.xlane.f32.xlu1 %v1268_v5 }
  0xe8   : > { %v4601_v32 = vpop.f32.mrf.mxu1  ;;  %v4615_v42 = vpop.f32.mrf.mxu0 }
  0xe9   : > { %v961_v9 = vpop.f32.mrf.mxu2  ;;  %v980_v10 = vpop.f32.mrf.mxu3 }
  0xed   : > { %1263 = vmax.xlane.f32.xlu1 %v1262_v12 }
  0xf0   : > { %v1018_v43 = vpop.f32.mrf.mxu1  ;;  %v999_v61 = vpop.f32.mrf.mxu0 }
  0xf1   : > { %v1035_v14 = vpop.f32.mrf.mxu2  ;;  %v4595_v21 = vpop.f32.mrf.mxu3 }
  0xf2   : > { %v4622_v50 = vadd.f32 %v1035_v14, %v591_v41  ;;  %v589_v41 = vld [vmem:[%s6059_s3 + $0xa0] sm:$0xff] }
  0xf9   : > { %v1037_v20 = vpop.f32.mrf.mxu2  ;;  %v1056_v35 = vpop.f32.mrf.mxu3 }
  0xfd   : > { %v4644_v14 = vpop.f32.mrf.mxu1 }
 0x101   : > { %v4603_v34 = vpop.f32.mrf.mxu2  ;;  %v4633_v0 = vpop.f32.mrf.mxu3 }
 0x109   : > { %v1113_v49 = vpop.f32.mrf.mxu2 }
 0x10f   : > { %v1213_v15 = vpop.xlane.xlu1 %1212 }
 0x110   : > { %v1307_v16 = vsub.f32 %v4430_v57, %v1213_v15 }
 0x112   : > { %v1339_v18 = vmul.f32 1.442695, %v1307_v16  ;;  %v4651_v16 = vpop.f32.mrf.mxu0 }
 0x114   : > { %4116 = vpow2.f32 %v1339_v18  ;;  %v1132_v18 = vpop.f32.mrf.mxu3 }
 0x117   : > { %v1216_v25 = vpop.xlane.xlu1 %1215 }
 0x118   : > { %v1219_v23 = vpop.xlane.xlu0 %1218  ;;  %v1308_v27 = vsub.f32 %v4442_v3, %v1216_v25 }
 0x119   : > { %v1309_v24 = vsub.f32 %v4448_v8, %v1219_v23 }
 0x11a   : > { %v4599_v29 = vpop.eup %4116  ;;  %v1341_v30 = vmul.f32 1.442695, %v1308_v27 }
 0x11b   : > { %v1343_v28 = vmul.f32 1.442695, %v1309_v24  ;;  %v1403_v57 = vsel %vm1210_vm1, %v4599_v29, 0.0 }
 0x11c   : > { %1404 = vadd.xlane.f32.xlu2 %v1403_v57  ;;  %v1094_v57 = vpop.f32.mrf.mxu1 }
 0x11d   : > { %4118 = vpow2.f32 %v1343_v28 }
 0x11e   : > { %4120 = vpow2.f32 %v1341_v30 }
 0x11f   : > { %v1228_v37 = vpop.xlane.xlu1 %1227 }
 0x120   : > { %v1222_v36 = vpop.xlane.xlu0 %1221  ;;  %v1312_v45 = vsub.f32 %v4471_v26, %v1228_v37  ;;  %v1277_v26 = vsel %vm1210_vm1, %v4622_v50, -inf  ;;  %v4673_v37 = vpop.f32.mrf.mxu2 }
 0x121   : > { %v1310_v8 = vsub.f32 %v4459_v17, %v1222_v36  ;;  %v590_v36 = vld [vmem:[%s6059_s3 + $0xa8] sm:$0xff]  ;;  %v4680_v43 = vpop.f32.mrf.mxu3 }
 0x122   : > { %v1349_v53 = vmul.f32 1.442695, %v1312_v45  ;;  %v4685_v45 = vadd.f32 %v4601_v32, %v590_v36 }
 0x123   : > { %v4608_v3 = vpop.eup %4118  ;;  %v1345_v38 = vmul.f32 1.442695, %v1310_v8  ;;  %v1075_v8 = vpop.f32.mrf.mxu0 }
 0x124   : > { %v4610_v39 = vpop.eup %4120  ;;  %v1409_v48 = vsel %vm1210_vm1, %v4608_v3, 0.0  ;;  %v1274_v32 = vsel %vm1210_vm1, %v4685_v45, -inf }
 0x125   : > { %4122 = vpow2.f32 %v1345_v38  ;;  %v1406_v17 = vsel %vm1210_vm1, %v4610_v39, 0.0  ;;  %1410 = vadd.xlane.f32.xlu2 %v1409_v48 }
 0x126   : > { %1407 = vadd.xlane.f32.xlu0 %v1406_v17  ;;  %4124 = vpow2.f32 %v1349_v53 }
 0x128   : > { %v1231_v51 = vpop.xlane.xlu2 %1230  ;;  %v1225_v52 = vpop.xlane.xlu0 %1224 }
 0x129   : > { %v1311_v54 = vsub.f32 %v4475_v31, %v1225_v52  ;;  %v1313_v59 = vsub.f32 %v4488_v44, %v1231_v51  ;;  %v4637_v31 = vadd.f32 %v921_v13, %v585_v60  ;;  %v592_v13 = vld [vmem:[%s6059_s3 + $0xb8] sm:$0xff]  ;;  %v4691_v51 = vadd.f32 %v4615_v42, %v589_v41  ;;  %v1189_v42 = vpop.f32.mrf.mxu2 }
 0x12a   : > { %v4658_v20 = vadd.f32 %v4595_v21, %v592_v13  ;;  %v595_v21 = vld [vmem:[%s6059_s3 + $0xd0] sm:$0xff] }
 0x12b   : > { %v4625_v55 = vpop.eup %4122  ;;  %v1347_v58 = vmul.f32 1.442695, %v1311_v54  ;;  %v1351_v4 = vmul.f32 1.442695, %v1313_v59  ;;  %v1259_v12 = vsel %vm1210_vm1, %v4637_v31, -inf  ;;  %v4688_v48 = vadd.f32 %v4603_v34, %v595_v21 }
 0x12c   : > { %v1412_v1 = vsel %vm1210_vm1, %v4625_v55, 0.0  ;;  %v4640_v9 = vpop.eup %4124  ;;  %v1280_v30 = vsel %vm1210_vm1, %v4658_v20, -inf  ;;  %v1271_v59 = vsel %vm1210_vm1, %v4691_v51, -inf }
 0x12d   : > { %4126 = vpow2.f32 %v1347_v58  ;;  %1278 = vmax.xlane.f32.xlu2 %v1277_v26  ;;  %v1418_v19 = vsel %vm1210_vm1, %v4640_v9, 0.0  ;;  %v1289_v26 = vsel %vm1210_vm1, %v4688_v48, -inf }
 0x12e   : > { %1413 = vadd.xlane.f32.xlu0 %v1412_v1  ;;  %4128 = vpow2.f32 %v1351_v4 }
 0x12f   : > { %v1237_v24 = vpop.xlane.xlu1 %1236 }
 0x130   : > { %v1234_v5 = vpop.xlane.xlu2 %1233  ;;  %v1315_v54 = vsub.f32 %v4512_v2, %v1237_v24  ;;  %v1208_v2 = vpop.f32.mrf.mxu3 }
 0x131   : > { %v1314_v44 = vsub.f32 %v4501_v56, %v1234_v5 }
 0x132   : > { %v1355_v60 = vmul.f32 1.442695, %v1315_v54 }
 0x133   : > { %v1353_v10 = vmul.f32 1.442695, %v1314_v44  ;;  %v4646_v15 = vpop.eup %4126  ;;  %v4717_v18 = vpop.f32.mrf.mxu1 }
 0x134   : > { %v1415_v56 = vsel %vm1210_vm1, %v4646_v15, 0.0  ;;  %v4660_v27 = vpop.eup %4128 }
 0x135   : > { %4130 = vpow2.f32 %v1353_v10  ;;  %1416 = vadd.xlane.f32.xlu1 %v1415_v56  ;;  %1419 = vadd.xlane.f32.xlu2 %v1418_v19  ;;  %v1421_v38 = vsel %vm1210_vm1, %v4660_v27, 0.0  ;;  %v4712_v10 = vpop.f32.mrf.mxu0 }
 0x136   : > { %1260 = vmax.xlane.f32.xlu0 %v1259_v12 }
 0x138   : > { %v1240_v23 = vpop.xlane.xlu2 %1239  ;;  %v1246_v25 = vpop.xlane.xlu0 %1245 }
 0x139   : > { %v1318_v35 = vsub.f32 %v4524_v11, %v1246_v25  ;;  %v1316_v34 = vsub.f32 %v4519_v6, %v1240_v23  ;;  %v594_v23 = vld [vmem:[%s6059_s3 + $0xc8] sm:$0xff] }
 0x13a   : > { %v4728_v24 = vadd.f32 %v4644_v14, %v594_v23 }
 0x13b   : > { %v4662_v28 = vpop.eup %4130  ;;  %v1361_v17 = vmul.f32 1.442695, %v1318_v35  ;;  %v1357_v61 = vmul.f32 1.442695, %v1316_v34  ;;  %v593_v35 = vld [vmem:[%s6059_s3 + $0xc0] sm:$0xff]  ;;  %v1170_v21 = vpop.f32.mrf.mxu1 }
 0x13c   : > { %v1424_v11 = vsel %vm1210_vm1, %v4662_v28, 0.0  ;;  %v1286_v36 = vsel %vm1210_vm1, %v4728_v24, -inf  ;;  %v4745_v41 = vadd.f32 %v4651_v16, %v593_v35  ;;  %v599_v16 = vld [vmem:[%s6059_s3 + $0xf0] sm:$0xff] }
 0x13d   : > { %1422 = vadd.xlane.f32.xlu1 %v1421_v38  ;;  %1425 = vadd.xlane.f32.xlu2 %v1424_v11  ;;  %4132 = vpow2.f32 %v1361_v17  ;;  %v1151_v57 = vpop.f32.mrf.mxu0  ;;  %v4767_v42 = vadd.f32 %v4673_v37, %v599_v16 }
 0x13e   : > { %1281 = vmax.xlane.f32.xlu0 %v1280_v30 }
 0x13f   : > { %v1249_v53 = vpop.xlane.xlu1 %1248 }
 0x140   : > { %v1243_v49 = vpop.xlane.xlu2 %1242  ;;  %v1319_v8 = vsub.f32 %v4544_v33, %v1249_v53 }
 0x141   : > { %v1317_v52 = vsub.f32 %v4535_v22, %v1243_v49  ;;  %v596_v22 = vld [vmem:[%s6059_s3 + $0xd8] sm:$0xff] }
 0x142   : > { %v4706_v1 = vadd.f32 %v4633_v0, %v596_v22  ;;  %v1363_v17 = vmul.f32 1.442695, %v1319_v8 }
 0x143   : > { %v1359_v58 = vmul.f32 1.442695, %v1317_v52  ;;  %v4708_v4 = vpop.eup %4132 }
 0x144   : > { %v1292_v13 = vsel %vm1210_vm1, %v4706_v1, -inf  ;;  %v1436_v56 = vsel %vm1210_vm1, %v4708_v4, 0.0 }
 0x145   : > { %4134 = vpow2.f32 %v1359_v58  ;;  %1290 = vmax.xlane.f32.xlu1 %v1289_v26  ;;  %1272 = vmax.xlane.f32.xlu2 %v1271_v59  ;;  %v1283_v58 = vsel %vm1210_vm1, %v4745_v41, -inf }
 0x146   : > { %1275 = vmax.xlane.f32.xlu0 %v1274_v32  ;;  %4136 = vpow2.f32 %v1355_v60  ;;  %v600_v32 = vld [vmem:[%s6059_s3 + $0xf8] sm:$0xff] }
 0x147   : > { %4138 = vpow2.f32 %v1357_v61  ;;  %v4770_v22 = vadd.f32 %v4680_v43, %v600_v32 }
 0x148   : > { %v1255_v5 = vpop.xlane.xlu0 %1254  ;;  %v1252_v11 = vpop.xlane.xlu2 %1251 }
 0x149   : > { %v1258_v6 = vpop.xlane.xlu1 %1257  ;;  %v1321_v0 = vsub.f32 %v4563_v46, %v1255_v5  ;;  %v1320_v53 = vsub.f32 %v4553_v40, %v1252_v11  ;;  %v1596_v11 = vld [vmem:[%s4813_s21 + $0x8] sm:$0xff] }
 0x14a   : > { %v1322_v12 = vsub.f32 %v4565_v47, %v1258_v6  ;;  %v1301_v6 = vsel %vm1210_vm1, %v4767_v42, -inf }
 0x14b   : > { %v4710_v44 = vpop.eup %4134  ;;  %v1367_v46 = vmul.f32 1.442695, %v1321_v0 }
 0x14c   : > { %v1433_v19 = vsel %vm1210_vm1, %v4710_v44, 0.0  ;;  %v1369_v47 = vmul.f32 1.442695, %v1322_v12  ;;  %v4730_v25 = vpop.eup %4136 }
 0x14d   : > { %1437 = vadd.xlane.f32.xlu1 %v1436_v56  ;;  %1293 = vmax.xlane.f32.xlu2 %v1292_v13  ;;  %v4732_v30 = vpop.eup %4138  ;;  %v1427_v38 = vsel %vm1210_vm1, %v4730_v25, 0.0  ;;  %v597_v56 = vld [vmem:[%s6059_s3 + $0xe0] sm:$0xff] }
 0x14e   : > { %1434 = vadd.xlane.f32.xlu0 %v1433_v19  ;;  %4140 = vpow2.f32 %v1369_v47  ;;  %v1430_v14 = vsel %vm1210_vm1, %v4732_v30, 0.0  ;;  %v598_v19 = vld [vmem:[%s6059_s3 + $0xe8] sm:$0xff] }
 0x14f   : > { %4142 = vpow2.f32 %v1367_v46  ;;  %v4803_v57 = vadd.f32 %v4717_v18, %v598_v19 }
 0x150   : > { %4144 = vpow2.f32 %v1363_v17  ;;  %v1597_v17 = vld [vmem:[%s4813_s21 + $0x10] sm:$0xff] }
 0x154   : > { %v4747_v52 = vpop.eup %4140 }
 0x155   : > { %1431 = vadd.xlane.f32.xlu1 %v1430_v14  ;;  %1287 = vmax.xlane.f32.xlu2 %v1286_v36  ;;  %v4749_v33 = vpop.eup %4142  ;;  %v1448_v59 = vsel %vm1210_vm1, %v4747_v52, 0.0  ;;  %v1298_v36 = vsel %vm1210_vm1, %v4803_v57, -inf }
 0x156   : > { %1428 = vadd.xlane.f32.xlu0 %v1427_v38  ;;  %v1445_v40 = vsel %vm1210_vm1, %v4749_v33, 0.0  ;;  %v4772_v61 = vpop.eup %4144 }
 0x157   : > { %v1439_v37 = vsel %vm1210_vm1, %v4772_v61, 0.0 }
 0x158   : > { %v1267_v49 = vpop.xlane.xlu0 %1266  ;;  %v1270_v54 = vpop.xlane.xlu1 %1269 }
 0x159   : > { %v1325_v26 = vsub.f32 %v4579_v62, %v1267_v49  ;;  %v1326_v34 = vsub.f32 %v4581_v63, %v1270_v54  ;;  %v1365_v62 = vmul.f32 1.442695, %v1320_v53  ;;  %v1304_v63 = vsel %vm1210_vm1, %v4770_v22, -inf }
 0x15a   : > { %v1628_v49 = vpack.c.bf16 %v1596_v11, %v1596_v11  ;;  %v1629_v54 = vpack.c.bf16 %v1597_v17, %v1597_v17 }
 0x15b   : > { %v1375_v2 = vmul.f32 1.442695, %v1325_v26  ;;  %v1377_v60 = vmul.f32 1.442695, %v1326_v34  ;;  %4146 = vpow2.f32 %v1365_v62  ;;  %v1598_v26 = vld [vmem:[%s4813_s21 + $0x18] sm:$0xff]  ;;  %v1599_v34 = vld [vmem:[%s4813_s21 + $0x20] sm:$0xff] }
 0x15c   : > { %v1683_v53 = vsel %vm1662_vm2, %v1628_v49, 0  ;;  %v1630_v16 = vpack.c.bf16 %v1598_v26, %v1598_v26  ;;  %v1606_v26 = vld [vmem:[%s4813_s21 + $0x58] sm:$0xff] }
 0x15d   : > { %1284 = vmax.xlane.f32.xlu1 %v1283_v58  ;;  %1446 = vadd.xlane.f32.xlu2 %v1445_v40  ;;  %4148 = vpow2.f32 %v1375_v2  ;;  %v1702_v58 = vsel %vm1662_vm2, %v1629_v54, 0  ;;  %v1600_v40 = vld [vmem:[%s4813_s21 + $0x28] sm:$0xff] }
 0x15e   : > { %1449 = vadd.xlane.f32.xlu0 %v1448_v59  ;;  %4150 = vpow2.f32 %v1377_v60  ;;  %1692 = vmatpush.bf16.msra.mxu1 %v1683_v53  ;;  %v1721_v32 = vsel %vm1662_vm2, %v1630_v16, 0  ;;  %v1631_v59 = vpack.c.bf16 %v1599_v34, %v1599_v34  ;;  %v1632_v60 = vpack.c.bf16 %v1600_v40, %v1600_v40 }
 0x15f   : > { %1711 = vmatpush.bf16.msra.mxu2 %v1702_v58  ;;  %1730 = vmatpush.bf16.msra.mxu3 %v1721_v32  ;;  %v1605_v58 = vld [vmem:[%s4813_s21 + $0x50] sm:$0xff] }
 0x160   : > { %v1264_v5 = vpop.xlane.xlu1 %1263  ;;  %v1740_v2 = vsel %vm1662_vm2, %v1631_v59, 0  ;;  %v1637_v34 = vpack.c.bf16 %v1605_v58, %v1605_v58 }
 0x161   : > { %v4780_v43 = vpop.eup %4146  ;;  %v1324_v0 = vsub.f32 %v4590_v7, %v1264_v5  ;;  %v4800_v7 = vadd.f32 %v4712_v10, %v597_v56  ;;  %v1595_v10 = vld [vmem:[%s4813_s21] sm:$0xff] }
 0x162   : > { %v1442_v47 = vsel %vm1210_vm1, %v4780_v43, 0.0  ;;  %v1627_v18 = vpack.c.bf16 %v1595_v10, %v1595_v10 }
 0x163   : > { %v4782_v12 = vpop.eup %4148  ;;  %v1373_v35 = vmul.f32 1.442695, %v1324_v0  ;;  %v1295_v21 = vsel %vm1210_vm1, %v4800_v7, -inf  ;;  %v1602_v0 = vld [vmem:[%s4813_s21 + $0x38] sm:$0xff] }
 0x164   : > { %v4784_v13 = vpop.eup %4150  ;;  %v1457_v23 = vsel %vm1210_vm1, %v4782_v12, 0.0  ;;  %v1664_v14 = vsel %vm1662_vm2, %v1627_v18, 0 }
 0x165   : > { %1305 = vmax.xlane.f32.xlu1 %v1304_v63  ;;  %1440 = vadd.xlane.f32.xlu2 %v1439_v37  ;;  %v1460_v46 = vsel %vm1210_vm1, %v4784_v13, 0.0  ;;  %4152 = vpow2.f32 %v1373_v35  ;;  %v1759_v63 = vsel %vm1662_vm2, %v1632_v60, 0 }
 0x166   : > { %1302 = vmax.xlane.f32.xlu0 %v1301_v6  ;;  %1673 = vmatpush.bf16.msra.mxu0 %v1664_v14  ;;  %v1601_v6 = vld [vmem:[%s4813_s21 + $0x30] sm:$0xff] }
 0x167   : > { %1768 = vmatpush.bf16.msrb.mxu1 %v1759_v63  ;;  %v1633_v37 = vpack.c.bf16 %v1601_v6, %v1601_v6 }
 0x16a   : > { %1749 = vmatpush.bf16.msrb.mxu0 %v1740_v2 }
 0x16b   : > { %v4816_v8 = vpop.eup %4152 }
 0x16c   : > { %v1454_v38 = vsel %vm1210_vm1, %v4816_v8, 0.0 }
 0x16d   : > { %1458 = vadd.xlane.f32.xlu1 %v1457_v23  ;;  %1461 = vadd.xlane.f32.xlu2 %v1460_v46  ;;  %v1634_v46 = vpack.c.bf16 %v1602_v0, %v1602_v0 }
 0x16e   : > { %1443 = vadd.xlane.f32.xlu0 %v1442_v47  ;;  %v1778_v47 = vsel %vm1662_vm2, %v1633_v37, 0 }
 0x16f   : > { %1787 = vmatpush.bf16.msrb.mxu2 %v1778_v47 }
 0x175   : > { %1299 = vmax.xlane.f32.xlu1 %v1298_v36  ;;  %v1797_v36 = vsel %vm1662_vm2, %v1634_v46, 0 }
 0x176   : > { %1296 = vmax.xlane.f32.xlu0 %v1295_v21  ;;  %1806 = vmatpush.bf16.msrb.mxu3 %v1797_v36 }
 0x17e   : > { %1455 = vadd.xlane.f32.xlu0 %v1454_v38 }
 0x18f   : > { %v1405_v62 = vpop.xlane.xlu2 %1404 }
 0x190   : > { %4154 = vrcp.f32 %v1405_v62  ;;  %v1854_v62 = vsel %vm1662_vm2, %v1637_v34, 0 }
 0x196   : > { %v4155_v5 = vpop.eup %4154 }
 0x197   : > { %v1531_v56 = vmul.f32 %v4155_v5, %v4599_v29  ;;  %v1603_v5 = vld [vmem:[%s4813_s21 + $0x40] sm:$0xff] }
 0x198   : > { %v1411_v19 = vpop.xlane.xlu2 %1410  ;;  %v1635_v46 = vpack.c.bf16 %v1603_v5, %v1603_v5 }
 0x199   : > { %v1408_v23 = vpop.xlane.xlu0 %1407  ;;  %4156 = vrcp.f32 %v1411_v19  ;;  %v1563_v35 = vpack.c.bf16 %v1531_v56, %v1531_v56 }
 0x19a   : > { %4158 = vrcp.f32 %v1408_v23 }
 0x19b   : > { %3976 = vmatmul.msk.bf16.vlgmr.msra.gmra.mxu0 %vm1210_vm1, %v1563_v35 }
 0x19f   : > { %v4157_v21 = vpop.eup %4156 }
 0x1a0   : > { %v4159_v10 = vpop.eup %4158  ;;  %v1533_v29 = vmul.f32 %v4157_v21, %v4608_v3  ;;  %v1279_v18 = vpop.xlane.xlu2 %1278 }
 0x1a1   : > { %v1414_v14 = vpop.xlane.xlu0 %1413  ;;  %v1532_v38 = vmul.f32 %v4159_v10, %v4610_v39  ;;  %v1329_v11 = vsub.f32 %v4622_v50, %v1279_v18  ;;  %v1638_v39 = vpack.c.bf16 %v1606_v26, %v1606_v26 }
 0x1a2   : > { %4160 = vrcp.f32 %v1414_v14  ;;  %v1565_v17 = vpack.c.bf16 %v1533_v29, %v1533_v29  ;;  %v1816_v29 = vsel %vm1662_vm2, %v1635_v46, 0 }
 0x1a3   : > { %v1564_v49 = vpack.c.bf16 %v1532_v38, %v1532_v38  ;;  %v1383_v54 = vmul.f32 1.442695, %v1329_v11  ;;  %v1873_v2 = vsel %vm1662_vm2, %v1638_v39, 0  ;;  %1825 = vmatpush.bf16.msra.mxu0 %v1816_v29  ;;  %v1609_v38 = vld [vmem:[%s4813_s21 + $0x70] sm:$0xff]  ;;  %v1610_v11 = vld [vmem:[%s4813_s21 + $0x78] sm:$0xff] }
 0x1a4   : > { %3978 = vmatmul.msk.bf16.vlgmr.msra.gmra.mxu2 %vm1210_vm1, %v1565_v17  ;;  %v1641_v58 = vpack.c.bf16 %v1609_v38, %v1609_v38  ;;  %v1642_v26 = vpack.c.bf16 %v1610_v11, %v1610_v11 }
 0x1a5   : > { %4162 = vpow2.f32 %v1383_v54  ;;  %3977 = vmatmul.msk.bf16.vlgmr.msra.gmra.mxu1 %vm1210_vm1, %v1564_v49  ;;  %1863 = vmatpush.bf16.msra.mxu2 %v1854_v62 }
 0x1a8   : > { %v4161_v53 = vpop.eup %4160  ;;  %v1417_v16 = vpop.xlane.xlu1 %1416 }
 0x1a9   : > { %v1534_v3 = vmul.f32 %v4161_v53, %v4625_v55  ;;  %v1261_v32 = vpop.xlane.xlu0 %1260  ;;  %4164 = vrcp.f32 %v1417_v16  ;;  %v1420_v59 = vpop.xlane.xlu2 %1419 }
 0x1aa   : > { %v1323_v50 = vsub.f32 %v4637_v31, %v1261_v32  ;;  %4166 = vrcp.f32 %v1420_v59  ;;  %v1604_v31 = vld [vmem:[%s4813_s21 + $0x48] sm:$0xff]  ;;  %v1930_v59 = vsel %vm1662_vm2, %v1641_v58, 0 }
 0x1ab   : > { %v1566_v40 = vpack.c.bf16 %v1534_v3, %v1534_v3  ;;  %v4848_v60 = vpop.eup %4162  ;;  %v1636_v6 = vpack.c.bf16 %v1604_v31, %v1604_v31 }
 0x1ac   : > { %v1371_v63 = vmul.f32 1.442695, %v1323_v50  ;;  %v1469_v55 = vsel %vm1210_vm1, %v4848_v60, 0.0 }
 0x1ad   : > { %3979 = vmatmul.msk.bf16.vlgmr.msra.gmra.mxu3 %vm1210_vm1, %v1566_v40  ;;  %1470 = vadd.xlane.f32.xlu1 %v1469_v55  ;;  %v1835_v47 = vsel %vm1662_vm2, %v1636_v6, 0 }
 0x1ae   : > { %4168 = vpow2.f32 %v1371_v63  ;;  %1882 = vmatpush.bf16.msra.mxu3 %v1873_v2  ;;  %1844 = vmatpush.bf16.msra.mxu1 %v1835_v47  ;;  %v1949_v63 = vsel %vm1662_vm2, %v1642_v26, 0 }
 0x1af   : > { %v4165_v37 = vpop.eup %4164 }
 0x1b0   : > { %v4167_v0 = vpop.eup %4166  ;;  %v1535_v56 = vmul.f32 %v4165_v37, %v4646_v15  ;;  %v1423_v19 = vpop.xlane.xlu1 %1422 }
 0x1b1   : > { %v1282_v23 = vpop.xlane.xlu0 %1281  ;;  %v1536_v35 = vmul.f32 %v4167_v0, %v4640_v9  ;;  %4170 = vrcp.f32 %v1423_v19  ;;  %v1426_v21 = vpop.xlane.xlu2 %1425 }
 0x1b2   : > { %v1330_v36 = vsub.f32 %v4658_v20, %v1282_v23  ;;  %v1567_v10 = vpack.c.bf16 %v1535_v56, %v1535_v56  ;;  %4172 = vrcp.f32 %v1426_v21  ;;  %v1613_v21 = vld [vmem:[%s4813_s21 + $0x90] sm:$0xff] }
 0x1b3   : > { %v1568_v15 = vpack.c.bf16 %v1536_v35, %v1536_v35  ;;  %v1645_v38 = vpack.c.bf16 %v1613_v21, %v1613_v21 }
 0x1b4   : > { %v4860_v18 = vpop.eup %4168  ;;  %v1385_v14 = vmul.f32 1.442695, %v1330_v36  ;;  %3980 = vmatmul.msk.bf16.vlgmr.msrb.gmra.mxu0 %vm1210_vm1, %v1567_v10  ;;  %v1608_v36 = vld [vmem:[%s4813_s21 + $0x68] sm:$0xff]  ;;  %v1614_v10 = vld [vmem:[%s4813_s21 + $0x98] sm:$0xff] }
 0x1b5   : > { %v1451_v9 = vsel %vm1210_vm1, %v4860_v18, 0.0  ;;  %3981 = vmatmul.msk.bf16.vlgmr.msrb.gmra.mxu1 %vm1210_vm1, %v1568_v15  ;;  %v1646_v11 = vpack.c.bf16 %v1614_v10, %v1614_v10 }
 0x1b6   : > { %4174 = vpow2.f32 %v1385_v14  ;;  %1452 = vadd.xlane.f32.xlu2 %v1451_v9 }
 0x1b7   : > { %v4171_v20 = vpop.eup %4170 }
 0x1b8   : > { %v4173_v17 = vpop.eup %4172  ;;  %v1537_v49 = vmul.f32 %v4171_v20, %v4660_v27  ;;  %v1291_v54 = vpop.xlane.xlu1 %1290  ;;  %v1640_v20 = vpack.c.bf16 %v1608_v36, %v1608_v36 }
 0x1b9   : > { %v1276_v53 = vpop.xlane.xlu0 %1275  ;;  %v1538_v3 = vmul.f32 %v4173_v17, %v4662_v28  ;;  %v1333_v16 = vsub.f32 %v4688_v48, %v1291_v54  ;;  %v1273_v34 = vpop.xlane.xlu2 %1272 }
 0x1ba   : > { %v1328_v32 = vsub.f32 %v4685_v45, %v1276_v53  ;;  %v1569_v39 = vpack.c.bf16 %v1537_v49, %v1537_v49  ;;  %v1327_v50 = vsub.f32 %v4691_v51, %v1273_v34  ;;  %v1607_v45 = vld [vmem:[%s4813_s21 + $0x60] sm:$0xff]  ;;  %v1911_v53 = vsel %vm1662_vm2, %v1640_v20, 0 }
 0x1bb   : > { %v1570_v27 = vpack.c.bf16 %v1538_v3, %v1538_v3  ;;  %v1391_v62 = vmul.f32 1.442695, %v1333_v16  ;;  %v1639_v31 = vpack.c.bf16 %v1607_v45, %v1607_v45  ;;  %1920 = vmatpush.bf16.msrb.mxu1 %v1911_v53  ;;  %v2006_v3 = vsel %vm1662_vm2, %v1645_v38, 0 }
 0x1bc   : > { %v4874_v40 = vpop.eup %4174  ;;  %v1381_v2 = vmul.f32 1.442695, %v1328_v32  ;;  %v1379_v55 = vmul.f32 1.442695, %v1327_v50  ;;  %3982 = vmatmul.msk.bf16.vlgmr.msrb.gmra.mxu2 %vm1210_vm1, %v1569_v39 }
 0x1bd   : > { %v1472_v28 = vsel %vm1210_vm1, %v4874_v40, 0.0  ;;  %4176 = vpow2.f32 %v1391_v62  ;;  %3983 = vmatmul.msk.bf16.vlgmr.msrb.gmra.mxu3 %vm1210_vm1, %v1570_v27  ;;  %1939 = vmatpush.bf16.msrb.mxu2 %v1930_v59  ;;  %v1892_v5 = vsel %vm1662_vm2, %v1639_v31, 0 }
 0x1be   : > { %1473 = vadd.xlane.f32.xlu2 %v1472_v28  ;;  %4178 = vpow2.f32 %v1381_v2  ;;  %1958 = vmatpush.bf16.msrb.mxu3 %v1949_v63 }
 0x1bf   : > { %4180 = vpow2.f32 %v1379_v55  ;;  %1901 = vmatpush.bf16.msrb.mxu0 %v1892_v5 }
 0x1c0   : > { %v1438_v48 = vpop.xlane.xlu1 %1437 }
 0x1c1   : > { %v1435_v51 = vpop.xlane.xlu0 %1434  ;;  %4182 = vrcp.f32 %v1438_v48  ;;  %v1294_v6 = vpop.xlane.xlu2 %1293  ;;  %v1612_v48 = vld [vmem:[%s4813_s21 + $0x88] sm:$0xff] }
 0x1c2   : > { %4184 = vrcp.f32 %v1435_v51  ;;  %v1334_v37 = vsub.f32 %v4706_v1, %v1294_v6 }
 0x1c3   : > { %v4884_v0 = vpop.eup %4176 }
 0x1c4   : > { %v4886_v56 = vpop.eup %4178  ;;  %v1393_v19 = vmul.f32 1.442695, %v1334_v37  ;;  %v1481_v23 = vsel %vm1210_vm1, %v4884_v0, 0.0  ;;  %v1644_v37 = vpack.c.bf16 %v1612_v48, %v1612_v48 }
 0x1c5   : > { %v4890_v47 = vpop.eup %4180  ;;  %v1466_v46 = vsel %vm1210_vm1, %v4886_v56, 0.0 }
 0x1c6   : > { %1482 = vadd.xlane.f32.xlu2 %v1481_v23  ;;  %4186 = vpow2.f32 %v1393_v19  ;;  %1467 = vadd.xlane.f32.xlu1 %v1466_v46  ;;  %v1463_v1 = vsel %vm1210_vm1, %v4890_v47, 0.0 }
 0x1c7   : > { %v4183_v35 = vpop.eup %4182  ;;  %1464 = vadd.xlane.f32.xlu0 %v1463_v1 }
 0x1c8   : > { %v4185_v29 = vpop.eup %4184  ;;  %v1542_v15 = vmul.f32 %v4183_v35, %v4708_v4  ;;  %v1432_v14 = vpop.xlane.xlu1 %1431  ;;  %v2025_v4 = vsel %vm1662_vm2, %v1646_v11, 0  ;;  %v1987_v35 = vsel %vm1662_vm2, %v1644_v37, 0  ;;  %v1616_v37 = vld [vmem:[%s4813_s21 + $0xa8] sm:$0xff] }
 0x1c9   : > { %v1429_v9 = vpop.xlane.xlu0 %1428  ;;  %v1541_v17 = vmul.f32 %v4185_v29, %v4710_v44  ;;  %4188 = vrcp.f32 %v1432_v14  ;;  %v1288_v49 = vpop.xlane.xlu2 %1287 }
 0x1ca   : > { %v1332_v54 = vsub.f32 %v4728_v24, %v1288_v49  ;;  %4190 = vrcp.f32 %v1429_v9  ;;  %v1574_v58 = vpack.c.bf16 %v1542_v15, %v1542_v15 }
 0x1cb   : > { %v1573_v26 = vpack.c.bf16 %v1541_v17, %v1541_v17 }
 0x1cc   : > { %v4905_v16 = vpop.eup %4186  ;;  %v1389_v32 = vmul.f32 1.442695, %v1332_v54 }
 0x1cd   : > { %3986 = vmatmul.msk.bf16.vlgmr.msra.gmra.mxu2 %vm1210_vm1, %v1573_v26  ;;  %3987 = vmatmul.msk.bf16.vlgmr.msra.gmra.mxu3 %vm1210_vm1, %v1574_v58  ;;  %v1484_v44 = vsel %vm1210_vm1, %v4905_v16, 0.0 }
 0x1ce   : > { %4192 = vpow2.f32 %v1389_v32  ;;  %2015 = vmatpush.bf16.msra.mxu2 %v2006_v3  ;;  %2034 = vmatpush.bf16.msra.mxu3 %v2025_v4 }
 0x1cf   : > { %v4189_v24 = vpop.eup %4188  ;;  %1485 = vadd.xlane.f32.xlu0 %v1484_v44 }
 0x1d0   : > { %v4191_v34 = vpop.eup %4190  ;;  %v1540_v39 = vmul.f32 %v4189_v24, %v4732_v30  ;;  %v1285_v50 = vpop.xlane.xlu1 %1284 }
 0x1d1   : > { %v1450_v59 = vpop.xlane.xlu0 %1449  ;;  %v1539_v27 = vmul.f32 %v4191_v34, %v4730_v25  ;;  %v1331_v62 = vsub.f32 %v4745_v41, %v1285_v50  ;;  %v1447_v2 = vpop.xlane.xlu2 %1446 }
 0x1d2   : > { %4194 = vrcp.f32 %v1450_v59  ;;  %v1572_v63 = vpack.c.bf16 %v1540_v39, %v1540_v39 }
 0x1d3   : > { %4196 = vrcp.f32 %v1447_v2  ;;  %v1571_v55 = vpack.c.bf16 %v1539_v27, %v1539_v27  ;;  %v1387_v28 = vmul.f32 1.442695, %v1331_v62 }
 0x1d4   : > { %v4914_v45 = vpop.eup %4192  ;;  %3985 = vmatmul.msk.bf16.vlgmr.msra.gmra.mxu1 %vm1210_vm1, %v1572_v63  ;;  %v1617_v63 = vld [vmem:[%s4813_s21 + $0xb0] sm:$0xff] }
 0x1d5   : > { %4198 = vpow2.f32 %v1387_v28  ;;  %3984 = vmatmul.msk.bf16.vlgmr.msra.gmra.mxu0 %vm1210_vm1, %v1571_v55  ;;  %v1478_v30 = vsel %vm1210_vm1, %v4914_v45, 0.0  ;;  %1996 = vmatpush.bf16.msra.mxu1 %v1987_v35  ;;  %v1649_v55 = vpack.c.bf16 %v1617_v63, %v1617_v63 }
 0x1d6   : > { %1479 = vadd.xlane.f32.xlu2 %v1478_v30  ;;  %v1611_v30 = vld [vmem:[%s4813_s21 + $0x80] sm:$0xff] }
 0x1d7   : > { %v2082_v28 = vsel %vm1662_vm2, %v1649_v55, 0  ;;  %v1626_v55 = vld [vmem:[%s4813_s21 + $0xf8] sm:$0xff] }
 0x1d8   : > { %v4195_v25 = vpop.eup %4194  ;;  %v1306_v31 = vpop.xlane.xlu1 %1305 }
 0x1d9   : > { %v4197_v41 = vpop.eup %4196  ;;  %v1546_v51 = vmul.f32 %v4195_v25, %v4747_v52  ;;  %v1303_v6 = vpop.xlane.xlu0 %1302  ;;  %v1338_v19 = vsub.f32 %v4770_v22, %v1306_v31  ;;  %v1643_v25 = vpack.c.bf16 %v1611_v30, %v1611_v30 }
 0x1da   : > { %v1545_v5 = vmul.f32 %v4197_v41, %v4749_v33  ;;  %v1441_v23 = vpop.xlane.xlu2 %1440  ;;  %v1337_v46 = vsub.f32 %v4767_v42, %v1303_v6  ;;  %v1618_v41 = vld [vmem:[%s4813_s21 + $0xb8] sm:$0xff]  ;;  %v1615_v6 = vld [vmem:[%s4813_s21 + $0xa0] sm:$0xff] }
 0x1db   : > { %v1578_v1 = vpack.c.bf16 %v1546_v51, %v1546_v51  ;;  %4200 = vrcp.f32 %v1441_v23  ;;  %v4926_v36 = vpop.eup %4198  ;;  %v1401_v10 = vmul.f32 1.442695, %v1338_v19  ;;  %v1968_v48 = vsel %vm1662_vm2, %v1643_v25, 0 }
 0x1dc   : > { %v1577_v21 = vpack.c.bf16 %v1545_v5, %v1545_v5  ;;  %v1399_v29 = vmul.f32 1.442695, %v1337_v46  ;;  %v1475_v52 = vsel %vm1210_vm1, %v4926_v36, 0.0  ;;  %1977 = vmatpush.bf16.msra.mxu0 %v1968_v48  ;;  %v1650_v51 = vpack.c.bf16 %v1618_v41, %v1618_v41  ;;  %v1621_v5 = vld [vmem:[%s4813_s21 + $0xd0] sm:$0xff] }
 0x1dd   : > { %4202 = vpow2.f32 %v1401_v10  ;;  %1476 = vadd.xlane.f32.xlu1 %v1475_v52  ;;  %3991 = vmatmul.msk.bf16.vlgmr.msrb.gmra.mxu3 %vm1210_vm1, %v1578_v1  ;;  %v1647_v23 = vpack.c.bf16 %v1615_v6, %v1615_v6  ;;  %v1648_v46 = vpack.c.bf16 %v1616_v37, %v1616_v37  ;;  %v1653_v1 = vpack.c.bf16 %v1621_v5, %v1621_v5 }
 0x1de   : > { %3990 = vmatmul.msk.bf16.vlgmr.msrb.gmra.mxu2 %vm1210_vm1, %v1577_v21  ;;  %4204 = vpow2.f32 %v1399_v29 }
 0x1df   : > { %2091 = vmatpush.bf16.msrb.mxu2 %v2082_v28  ;;  %v2044_v10 = vsel %vm1662_vm2, %v1647_v23, 0  ;;  %v2063_v29 = vsel %vm1662_vm2, %v1648_v46, 0  ;;  %v2158_v52 = vsel %vm1662_vm2, %v1653_v1, 0  ;;  %v1658_v28 = vpack.c.bf16 %v1626_v55, %v1626_v55 }
 0x1e0   : > { %v1459_v42 = vpop.xlane.xlu1 %1458 }
 0x1e1   : > { %v4201_v33 = vpop.eup %4200  ;;  %v1444_v22 = vpop.xlane.xlu0 %1443  ;;  %4206 = vrcp.f32 %v1459_v42  ;;  %v2253_v6 = vsel %vm1662_vm2, %v1658_v28, 0 }
 0x1e2   : > { %v1543_v15 = vmul.f32 %v4201_v33, %v4772_v61  ;;  %v1462_v14 = vpop.xlane.xlu2 %1461  ;;  %4208 = vrcp.f32 %v1444_v22  ;;  %v1622_v22 = vld [vmem:[%s4813_s21 + $0xd8] sm:$0xff] }
 0x1e3   : > { %v4933_v9 = vpop.eup %4202  ;;  %4210 = vrcp.f32 %v1462_v14 }
 0x1e4   : > { %v1575_v20 = vpack.c.bf16 %v1543_v15, %v1543_v15  ;;  %v4935_v38 = vpop.eup %4204  ;;  %v1496_v11 = vsel %vm1210_vm1, %v4933_v9, 0.0 }
 0x1e5   : > { %1497 = vadd.xlane.f32.xlu1 %v1496_v11  ;;  %v1493_v17 = vsel %vm1210_vm1, %v4935_v38, 0.0 }
 0x1e6   : > { %3988 = vmatmul.msk.bf16.vlgmr.msrb.gmra.mxu0 %vm1210_vm1, %v1575_v20  ;;  %1494 = vadd.xlane.f32.xlu0 %v1493_v17  ;;  %v1654_v20 = vpack.c.bf16 %v1622_v22, %v1622_v22 }
 0x1e7   : > { %v4207_v61 = vpop.eup %4206  ;;  %2053 = vmatpush.bf16.msrb.mxu0 %v2044_v10  ;;  %v1623_v10 = vld [vmem:[%s4813_s21 + $0xe0] sm:$0xff] }
 0x1e8   : > { %v4209_v49 = vpop.eup %4208  ;;  %v1549_v54 = vmul.f32 %v4207_v61, %v4782_v12  ;;  %v1300_v53 = vpop.xlane.xlu1 %1299  ;;  %v2177_v61 = vsel %vm1662_vm2, %v1654_v20, 0 }
 0x1e9   : > { %v1297_v58 = vpop.xlane.xlu0 %1296  ;;  %v4211_v26 = vpop.eup %4210  ;;  %v1544_v3 = vmul.f32 %v4209_v49, %v4780_v43  ;;  %v1336_v4 = vsub.f32 %v4803_v57, %v1300_v53 }
 0x1ea   : > { %v1335_v32 = vsub.f32 %v4800_v7, %v1297_v58  ;;  %v1550_v44 = vmul.f32 %v4211_v26, %v4784_v13  ;;  %v1581_v24 = vpack.c.bf16 %v1549_v54, %v1549_v54  ;;  %v1620_v58 = vld [vmem:[%s4813_s21 + $0xc8] sm:$0xff] }
 0x1eb   : > { %v1576_v34 = vpack.c.bf16 %v1544_v3, %v1544_v3  ;;  %v1397_v39 = vmul.f32 1.442695, %v1336_v4 }
 0x1ec   : > { %v1395_v50 = vmul.f32 1.442695, %v1335_v32  ;;  %v1582_v59 = vpack.c.bf16 %v1550_v44, %v1550_v44 }
 0x1ed   : > { %4212 = vpow2.f32 %v1397_v39  ;;  %3989 = vmatmul.msk.bf16.vlgmr.msrb.gmra.mxu1 %vm1210_vm1, %v1576_v34  ;;  %v1619_v34 = vld [vmem:[%s4813_s21 + $0xc0] sm:$0xff] }
 0x1ee   : > { %3994 = vmatmul.msk.bf16.vlgmr.msra.gmra.mxu2 %vm1210_vm1, %v1581_v24  ;;  %4214 = vpow2.f32 %v1395_v50  ;;  %3995 = vmatmul.msk.bf16.vlgmr.msra.gmra.mxu3 %vm1210_vm1, %v1582_v59  ;;  %v1651_v39 = vpack.c.bf16 %v1619_v34, %v1619_v34 }
 0x1ef   : > { %2072 = vmatpush.bf16.msrb.mxu1 %v2063_v29  ;;  %2167 = vmatpush.bf16.msra.mxu2 %v2158_v52  ;;  %v1624_v29 = vld [vmem:[%s4813_s21 + $0xe8] sm:$0xff]  ;;  %v1655_v52 = vpack.c.bf16 %v1623_v10, %v1623_v10 }
 0x1f1   : > { %v1456_v43 = vpop.xlane.xlu0 %1455 }
 0x1f2   : > { %4216 = vrcp.f32 %v1456_v43 }
 0x1f3   : > { %v4950_v12 = vpop.eup %4212 }
 0x1f4   : > { %v4952_v13 = vpop.eup %4214  ;;  %v1490_v7 = vsel %vm1210_vm1, %v4950_v12, 0.0 }
 0x1f5   : > { %1491 = vadd.xlane.f32.xlu0 %v1490_v7  ;;  %v1487_v57 = vsel %vm1210_vm1, %v4952_v13, 0.0  ;;  %v2120_v7 = vsel %vm1662_vm2, %v1651_v39, 0 }
 0x1f6   : > { %1488 = vadd.xlane.f32.xlu2 %v1487_v57 }
 0x1f8   : > { %v4217_v27 = vpop.eup %4216 }
 0x1f9   : > { %v1548_v62 = vmul.f32 %v4217_v27, %v4816_v8  ;;  %v2101_v8 = vsel %vm1662_vm2, %v1650_v51, 0 }
 0x1fa   : > { %2110 = vmatpush.bf16.msrb.mxu3 %v2101_v8 }
 0x1fb   : > { %v1580_v2 = vpack.c.bf16 %v1548_v62, %v1548_v62 }
 0x1fd   : > { %3993 = vmatmul.msk.bf16.vlgmr.msra.gmra.mxu1 %vm1210_vm1, %v1580_v2 }
 0x1fe   : > { %2186 = vmatpush.bf16.msra.mxu3 %v2177_v61  ;;  %v3050_v61 = vld [vmem:[%s6063_s7] sm:$0xf] }
 0x218   : > { %v4965_v31 = vpop.f32.mrf.mxu0 }
 0x220   : > { %v1471_v19 = vpop.xlane.xlu1 %1470  ;;  %v1677_v35 = vpop.f32.mrf.mxu0 }
 0x221   : > { %4218 = vrcp.f32 %v1471_v19 }
 0x222   : > { %v4971_v21 = vpop.f32.mrf.mxu1 }
 0x227   : > { %v4219_v33 = vpop.eup %4218  ;;  %v4976_v42 = vpop.f32.mrf.mxu2 }
 0x228   : > { %v1553_v15 = vmul.f32 %v4219_v33, %v4848_v60  ;;  %v1652_v60 = vpack.c.bf16 %v1620_v58, %v1620_v58  ;;  %v1656_v33 = vpack.c.bf16 %v1624_v29, %v1624_v29 }
 0x229   : > { %v1453_v14 = vpop.xlane.xlu2 %1452 }
 0x22a   : > { %4220 = vrcp.f32 %v1453_v14  ;;  %v1585_v11 = vpack.c.bf16 %v1553_v15, %v1553_v15  ;;  %v1696_v17 = vpop.f32.mrf.mxu1  ;;  %v2139_v24 = vsel %vm1662_vm2, %v1652_v60, 0  ;;  %v2215_v22 = vsel %vm1662_vm2, %v1656_v33, 0 }
 0x22b   : > { %2148 = vmatpush.bf16.msra.mxu1 %v2139_v24 }
 0x22c   : > { %3998 = vmatmul.msk.bf16.vlgmr.msrb.gmra.mxu2 %vm1210_vm1, %v1585_v11 }
 0x22f   : > { %v1715_v54 = vpop.f32.mrf.mxu2 }
 0x230   : > { %v4221_v49 = vpop.eup %4220  ;;  %v4982_v53 = vpop.f32.mrf.mxu3 }
 0x231   : > { %v1547_v26 = vmul.f32 %v4221_v49, %v4860_v18  ;;  %v1474_v3 = vpop.xlane.xlu2 %1473  ;;  %v4986_v4 = vpop.f32.mrf.mxu0  ;;  %v3060_v29 = vpack.c.bf16 %v4982_v53, %v4982_v53 }
 0x232   : > { %4222 = vrcp.f32 %v1474_v3  ;;  %v4988_v44 = vpop.f32.mrf.mxu1 }
 0x233   : > { %v1579_v32 = vpack.c.bf16 %v1547_v26, %v1547_v26  ;;  %v5022_v26 = vsel %vm3068_vm3, %v3050_v61, 0 }
 0x235   : > { %3992 = vmatmul.msk.bf16.vlgmr.msra.gmra.mxu0 %vm1210_vm1, %v1579_v32 }
 0x236   : > { %2129 = vmatpush.bf16.msra.mxu0 %v2120_v7 }
 0x238   : > { %v4223_v50 = vpop.eup %4222  ;;  %v1734_v59 = vpop.f32.mrf.mxu3 }
 0x239   : > { %v1554_v18 = vmul.f32 %v4223_v50, %v4874_v40  ;;  %v1483_v43 = vpop.xlane.xlu2 %1482  ;;  %v1753_v57 = vpop.f32.mrf.mxu0  ;;  %v1625_v40 = vld [vmem:[%s4813_s21 + $0xf0] sm:$0xff] }
 0x23a   : > { %4224 = vrcp.f32 %v1483_v43  ;;  %v1468_v27 = vpop.xlane.xlu1 %1467  ;;  %v1465_v2 = vpop.xlane.xlu0 %1464  ;;  %v1657_v8 = vpack.c.bf16 %v1625_v40, %v1625_v40 }
 0x23b   : > { %v1586_v62 = vpack.c.bf16 %v1554_v18, %v1554_v18  ;;  %4226 = vrcp.f32 %v1468_v27  ;;  %v1772_v63 = vpop.f32.mrf.mxu1 }
 0x23c   : > { %4228 = vrcp.f32 %v1465_v2  ;;  %v2234_v1 = vsel %vm1662_vm2, %v1657_v8, 0 }
 0x23d   : > { %3999 = vmatmul.msk.bf16.vlgmr.msrb.gmra.mxu3 %vm1210_vm1, %v1586_v62  ;;  %2243 = vmatpush.bf16.msrb.mxu2 %v2234_v1 }
 0x23e   : > { %2262 = vmatpush.bf16.msrb.mxu3 %v2253_v6 }
 0x23f   : > { %v4997_v25 = vpop.f32.mrf.mxu2 }
 0x240   : > { %v4225_v30 = vpop.eup %4224  ;;  %v5001_v51 = vpop.f32.mrf.mxu3 }
 0x241   : > { %v4227_v48 = vpop.eup %4226  ;;  %v1557_v41 = vmul.f32 %v4225_v30, %v4884_v0 }
 0x242   : > { %v4229_v37 = vpop.eup %4228  ;;  %v1552_v5 = vmul.f32 %v4227_v48, %v4886_v56  ;;  %v1486_v46 = vpop.xlane.xlu0 %1485 }
 0x243   : > { %v1551_v19 = vmul.f32 %v4229_v37, %v4890_v47  ;;  %v1589_v23 = vpack.c.bf16 %v1557_v41, %v1557_v41  ;;  %4230 = vrcp.f32 %v1486_v46  ;;  %v2196_v47 = vsel %vm1662_vm2, %v1655_v52, 0 }
 0x244   : > { %v1584_v35 = vpack.c.bf16 %v1552_v5, %v1552_v5  ;;  %v5050_v41 = vunpack.c.l.b16 %v3050_v61 }
 0x245   : > { %v1583_v0 = vpack.c.bf16 %v1551_v19, %v1551_v19  ;;  %4002 = vmatmul.msk.bf16.vlgmr.msra.gmra.mxu2 %vm1210_vm1, %v1589_v23 }
 0x246   : > { %3997 = vmatmul.msk.bf16.vlgmr.msrb.gmra.mxu1 %vm1210_vm1, %v1584_v35  ;;  %3111 = vmatpush.bf16.msra.mxu2 %v5022_v26  ;;  %v3215_v5 = vpack.c.b16 %v5050_v41, %v5050_v41 }
 0x247   : > { %3996 = vmatmul.msk.bf16.vlgmr.msrb.gmra.mxu0 %vm1210_vm1, %v1583_v0  ;;  %v1791_v56 = vpop.f32.mrf.mxu2  ;;  %2224 = vmatpush.bf16.msrb.mxu1 %v2215_v22 }
 0x248   : > { %v1810_v15 = vpop.f32.mrf.mxu3  ;;  %2205 = vmatpush.bf16.msrb.mxu0 %v2196_v47  ;;  %v3216_v35 = vrot.slane %v3215_v5, 2  ;;  %v3059_v47 = vpack.c.bf16 %v4976_v42, %v4976_v42  ;;  %v3058_v42 = vpack.c.bf16 %v4971_v21, %v4971_v21  ;;  %v3051_v21 = vld [vmem:[%s6063_s7 + $0x4] sm:$0xf] }
 0x249   : > { %v4231_v14 = vpop.eup %4230  ;;  %v1480_v20 = vpop.xlane.xlu2 %1479  ;;  %v3064_v15 = vpack.c.bf16 %v5001_v51, %v5001_v51  ;;  %v3061_v51 = vpack.c.bf16 %v4986_v4, %v4986_v4  ;;  %v5101_v61 = vsel %vm3068_vm3, %v3051_v21, 0  ;;  %v4252_v4 = vmov 0.0  }
 0x24a   : > { %v1558_v11 = vmul.f32 %v4231_v14, %v4905_v16  ;;  %4232 = vrcp.f32 %v1480_v20  ;;  %v3057_v20 = vpack.c.bf16 %v4965_v31, %v4965_v31  ;;  %v3062_v31 = vpack.c.bf16 %v4988_v44, %v4988_v44  ;;  %2276 = vst.msk [vmem:[#allocation2 + $0x30] sm:$0xff] %vm2268_vm4, %v4252_v4 }
 0x24b   : > { %2277 = vst.msk [vmem:[#allocation2 + $0x38] sm:$0xf] %vm2270_vm5, %v4252_v4 }
 0x24c   : > { %v1590_v17 = vpack.c.bf16 %v1558_v11, %v1558_v11  ;;  %v3063_v11 = vpack.c.bf16 %v4997_v25, %v4997_v25  ;;  %2278 = vst.msk [vmem:[#allocation2 + $0x40] sm:$0xff] %vm2268_vm4, %v4252_v4 }
 0x24d   : > { %2279 = vst.msk [vmem:[#allocation2 + $0x48] sm:$0xf] %vm2270_vm5, %v4252_v4 }
 0x24e   : > { %4003 = vmatmul.msk.bf16.vlgmr.msra.gmra.mxu3 %vm1210_vm1, %v1590_v17  ;;  %2280 = vst.msk [vmem:[#allocation2 + $0x50] sm:$0xff] %vm2268_vm4, %v4252_v4 }
 0x24f   : > { %3127 = vmatpush.bf16.msra.mxu3 %v5022_v26  ;;  %2281 = vst.msk [vmem:[#allocation2 + $0x58] sm:$0xf] %vm2270_vm5, %v4252_v4 }
 0x250   : > { %v4233_v49 = vpop.eup %4232  ;;  %v1477_v54 = vpop.xlane.xlu1 %1476  ;;  %2282 = vst.msk [vmem:[#allocation2 + $0x60] sm:$0xff] %vm2268_vm4, %v4252_v4 }
 0x251   : > { %v5019_v58 = vpop.f32.mrf.mxu2  ;;  %v1556_v3 = vmul.f32 %v4233_v49, %v4914_v45  ;;  %4234 = vrcp.f32 %v1477_v54  ;;  %v5025_v16 = vpop.f32.mrf.mxu1  ;;  %2283 = vst.msk [vmem:[#allocation2 + $0x68] sm:$0xf] %vm2270_vm5, %v4252_v4  ;;  %v2295_v54 = vld [vmem:[%s5122_s29 + $0x8] sm:$0xff] }
 0x252   : > { %v5027_v60 = vpop.f32.mrf.mxu3  ;;  %v5031_v32 = vpop.f32.mrf.mxu0  ;;  %v3207_v17 = vpack.c.bf16 %v5019_v58, %v5019_v58  ;;  %v3206_v44 = vpack.c.bf16 %v5025_v16, %v5025_v16  ;;  %2284 = vst.msk [vmem:[#allocation2 + $0x70] sm:$0xff] %vm2268_vm4, %v4252_v4  ;;  %v5158_v16 = vunpack.c.l.b16 %v3051_v21 }
 0x253   : > { %v1588_v24 = vpack.c.bf16 %v1556_v3, %v1556_v3  ;;  %v3208_v25 = vpack.c.bf16 %v5027_v60, %v5027_v60  ;;  %v3205_v58 = vpack.c.bf16 %v5031_v32, %v5031_v32  ;;  %2285 = vst.msk [vmem:[#allocation2 + $0x78] sm:$0xf] %vm2270_vm5, %v4252_v4  ;;  %v5163_v60 = vld [vmem:[%s6061_s5] ss:$0 sm:$0xff]  ;;  %v5170_v32 = vld [vmem:[%s6061_s5 + $0x5] ss:$0 sm:$0xff] }
 0x254   : > { %2304 = vst.msk [vmem:[#allocation2 + $0x32] sm:$0xff] %vm2268_vm4, %v2295_v54 }
 0x255   : > { %2269 = vst.msk [vmem:[#allocation2] sm:$0xff] %vm2268_vm4, %v4252_v4 }
 0x256   : > { %4001 = vmatmul.msk.bf16.vlgmr.msra.gmra.mxu1 %vm1210_vm1, %v1588_v24  ;;  %6139 = vst [vmem:[#allocation3_spill] sm:$0xff] %v5163_v60  ;;  %v5175_v24 = vld [vmem:[%s6061_s5 + $0xa] ss:$0 sm:$0xff] }
 0x257   : > { %3095 = vmatpush.bf16.msra.mxu1 %v5022_v26  ;;  %v4235_v34 = vpop.eup %4234  ;;  %2271 = vst.msk [vmem:[#allocation2 + $0x8] sm:$0xf] %vm2270_vm5, %v4252_v4 }
 0x258   : > { %v1555_v39 = vmul.f32 %v4235_v34, %v4926_v36  ;;  %v1498_v45 = vpop.xlane.xlu1 %1497  ;;  %6140 = vst [vmem:[#allocation4_spill] sm:$0xff] %v5170_v32  ;;  %v2299_v34 = vld [vmem:[%s5122_s29 + $0x28] sm:$0xff] }
 0x259   : > { %v1867_v50 = vpop.f32.mrf.mxu2  ;;  %4236 = vrcp.f32 %v1498_v45  ;;  %v1848_v59 = vpop.f32.mrf.mxu1  ;;  %6141 = vst [vmem:[#allocation5_spill] sm:$0xff] %v5175_v24  ;;  %v5190_v45 = vld [vmem:[%s6061_s5 + $0x14] ss:$0 sm:$0xff] }
 0x25a   : > { %v1886_v18 = vpop.f32.mrf.mxu3  ;;  %v1587_v43 = vpack.c.bf16 %v1555_v39, %v1555_v39  ;;  %v1495_v7 = vpop.xlane.xlu0 %1494  ;;  %2272 = vst.msk [vmem:[#allocation2 + $0x10] sm:$0xff] %vm2268_vm4, %v4252_v4  ;;  %v5185_v39 = vld [vmem:[%s6061_s5 + $0xf] ss:$0 sm:$0xff]  ;;  %v3513_v50 = vpack.c.b16 %v5158_v16, %v5158_v16 }
 0x25b   : > { %v1829_v57 = vpop.f32.mrf.mxu0  ;;  %4238 = vrcp.f32 %v1495_v7  ;;  %2273 = vst.msk [vmem:[#allocation2 + $0x18] sm:$0xf] %vm2270_vm5, %v4252_v4  ;;  %v5197_v59 = vld [vmem:[#allocation2 + $0x30] sm:$0xff]  ;;  %v2297_v7 = vld [vmem:[%s5122_s29 + $0x18] sm:$0xff] }
 0x25c   : > { %4000 = vmatmul.msk.bf16.vlgmr.msra.gmra.mxu0 %vm1210_vm1, %v1587_v43  ;;  %6142 = vst [vmem:[#allocation6_spill] sm:$0xff] %v5185_v39  ;;  %v5199_v18 = vld [vmem:[#allocation2 + $0x31] sm:$0xff]  ;;  %v2298_v57 = vld [vmem:[%s5122_s29 + $0x20] sm:$0xff] }
 0x25d   : > { %3079 = vmatpush.bf16.msra.mxu0 %v5022_v26  ;;  %6143 = vst [vmem:[#allocation7_spill] sm:$0xff] %v5190_v45  ;;  %v5201_v43 = vld [vmem:[#allocation2 + $0x32] sm:$0xff] }
 0x25e   : > { %2274 = vst.msk [vmem:[#allocation2 + $0x20] sm:$0xff] %vm2268_vm4, %v4252_v4 }
 0x25f   : > { %v4237_v27 = vpop.eup %4236  ;;  %2308 = vst.msk [vmem:[#allocation2 + $0x72] sm:$0xff] %vm2268_vm4, %v2299_v34  ;;  %v2300_v34 = vld [vmem:[%s5122_s29 + $0x30] sm:$0xff] }
 0x260   : > { %v1562_v62 = vmul.f32 %v4237_v27, %v4933_v9  ;;  %6144 = vst [vmem:[#allocation8_spill] sm:$0xff] %v5201_v43  ;;  %v2326_v27 = vmul.f32 %v5163_v60, %v5197_v59 }
 0x261   : > { %v5039_v2 = vpop.f32.mrf.mxu2  ;;  %v4239_v63 = vpop.eup %4238  ;;  %2275 = vst.msk [vmem:[#allocation2 + $0x28] sm:$0xf] %vm2270_vm5, %v4252_v4 }
 0x262   : > { %v5041_v36 = vpop.f32.mrf.mxu3  ;;  %v1594_v55 = vpack.c.bf16 %v1562_v62, %v1562_v62  ;;  %v1561_v28 = vmul.f32 %v4239_v63, %v4935_v38  ;;  %v3211_v3 = vpack.c.bf16 %v5039_v2, %v5039_v2  ;;  %v2355_v62 = vmul.f32 %v5170_v32, %v5199_v18  ;;  %v5211_v63 = vld [vmem:[#allocation2 + $0x33] sm:$0xff]  ;;  %2306 = vst.msk [vmem:[#allocation2 + $0x52] sm:$0xff] %vm2268_vm4, %v2297_v7 }
 0x263   : > { %v5044_v30 = vpop.f32.mrf.mxu0  ;;  %v3212_v49 = vpack.c.bf16 %v5041_v36, %v5041_v36  ;;  %v2384_v2 = vmul.f32 %v5175_v24, %v5201_v43  ;;  %6145 = vst [vmem:[#allocation9_spill] sm:$0xff] %v5211_v63  ;;  %v5216_v36 = vld [vmem:[#allocation2 + $0x34] sm:$0xff] }
 0x264   : > { %v1593_v40 = vpack.c.bf16 %v1561_v28, %v1561_v28  ;;  %4007 = vmatmul.msk.bf16.vlgmr.msrb.gmra.mxu3 %vm1210_vm1, %v1594_v55  ;;  %6146 = vst [vmem:[#allocation10_spill] sm:$0xff] %v5216_v36  ;;  %v2363_v28 = vadd.f32 %v2355_v62, %v2326_v27  ;;  %v5327_v27 = vld [vmem:[%s6061_s5 + $0x2] ss:$0 sm:$0xff] }
 0x265   : > { %3191 = vmatpush.bf16.msrb.mxu3 %v5022_v26  ;;  %2307 = vst.msk [vmem:[#allocation2 + $0x62] sm:$0xff] %vm2268_vm4, %v2298_v57 }
 0x266   : > { %4006 = vmatmul.msk.bf16.vlgmr.msrb.gmra.mxu2 %vm1210_vm1, %v1593_v40  ;;  %v2413_v40 = vmul.f32 %v5185_v39, %v5211_v63  ;;  %2286 = vst.msk [vmem:[#allocation2 + $0x80] sm:$0xff] %vm2268_vm4, %v4252_v4 }
 0x267   : > { %3175 = vmatpush.bf16.msrb.mxu2 %v5022_v26  ;;  %2287 = vst.msk [vmem:[#allocation2 + $0x88] sm:$0xf] %vm2270_vm5, %v4252_v4 }
 0x268   : > { %v1492_v9 = vpop.xlane.xlu0 %1491  ;;  %2288 = vst.msk [vmem:[#allocation2 + $0x90] sm:$0xff] %vm2268_vm4, %v4252_v4 }
 0x269   : > { %v1943_v48 = vpop.f32.mrf.mxu2  ;;  %4240 = vrcp.f32 %v1492_v9  ;;  %v1489_v6 = vpop.xlane.xlu2 %1488  ;;  %v5226_v9 = vld [vmem:[%s6061_s5 + $0x1] ss:$0 sm:$0xff]  ;;  %2289 = vst.msk [vmem:[#allocation2 + $0x98] sm:$0xf] %vm2270_vm5, %v4252_v4 }
 0x26a   : > { %v1962_v8 = vpop.f32.mrf.mxu3  ;;  %4242 = vrcp.f32 %v1489_v6  ;;  %v5052_v37 = vpop.f32.mrf.mxu1  ;;  %6147 = vst [vmem:[#allocation11_spill] sm:$0xff] %v5226_v9  ;;  %v3514_v48 = vrot.slane %v3513_v50, 2  ;;  %v5233_v6 = vld [vmem:[%s6061_s5 + $0x6] ss:$0 sm:$0xff] }
 0x26b   : > { %v1905_v38 = vpop.f32.mrf.mxu0  ;;  %6148 = vst [vmem:[#allocation12_spill] sm:$0xff] %v5233_v6 }
 0x26c   : > { %v5237_v38 = vld [vmem:[#allocation2 + $0x10] sm:$0xff]  ;;  %2290 = vst.msk [vmem:[#allocation2 + $0xa0] sm:$0xff] %vm2268_vm4, %v4252_v4 }
 0x26d   : > { %2291 = vst.msk [vmem:[#allocation2 + $0xa8] sm:$0xf] %vm2270_vm5, %v4252_v4 }
 0x26e   : > { %2292 = vst.msk [vmem:[#allocation2 + $0xb0] sm:$0xff] %vm2268_vm4, %v4252_v4 }
 0x26f   : > { %v4241_v19 = vpop.eup %4240  ;;  %2293 = vst.msk [vmem:[#allocation2 + $0xb8] sm:$0xf] %vm2270_vm5, %v4252_v4 }
 0x270   : > { %v4243_v23 = vpop.eup %4242  ;;  %v1560_v46 = vmul.f32 %v4241_v19, %v4950_v12  ;;  %v3221_v12 = vsel %vm3068_vm3, %v3216_v35, 0  ;;  %v2392_v19 = vadd.f32 %v2384_v2, %v2363_v28  ;;  %v2324_v35 = vmul.f32 %v5163_v60, %v5237_v38  ;;  %2309 = vst.msk [vmem:[#allocation2 + $0x82] sm:$0xff] %vm2268_vm4, %v2300_v34  ;;  %v5332_v2 = vld [vmem:[#allocation2 + $0x50] sm:$0xff] }
 0x271   : > { %v5057_v1 = vpop.f32.mrf.mxu2  ;;  %v1559_v0 = vmul.f32 %v4243_v23, %v4952_v13  ;;  %v2442_v23 = vmul.f32 %v5190_v45, %v5216_v36  ;;  %6152 = vst [vmem:[#allocation16_spill] sm:$0xff] %v5332_v2  ;;  %v5334_v28 = vld [vmem:[#allocation2 + $0x14] sm:$0xff] }
 0x272   : > { %v5060_v10 = vpop.f32.mrf.mxu3  ;;  %v1592_v52 = vpack.c.bf16 %v1560_v46, %v1560_v46  ;;  %v1924_v33 = vpop.f32.mrf.mxu1  ;;  %6153 = vst [vmem:[#allocation17_spill] sm:$0xff] %v5334_v28 }
 0x273   : > { %v1591_v56 = vpack.c.bf16 %v1559_v0, %v1559_v0  ;;  %v5249_v0 = vld [vmem:[#allocation2 + $0x11] sm:$0xff] }
 0x274   : > { %4005 = vmatmul.msk.bf16.vlgmr.msrb.gmra.mxu1 %vm1210_vm1, %v1592_v52  ;;  %4035 = vmatmul.msk.bf16.vlgmr.msra.gmra.mxu3 %vm601_vm0, %v3060_v29  ;;  %v3210_v29 = vpack.c.bf16 %v5052_v37, %v5052_v37  ;;  %v3359_v52 = vpack.c.bf16 %v5060_v10, %v5060_v10  ;;  %v5257_v33 = vld [vmem:[#allocation2 + $0x12] sm:$0xff]  ;;  %v5266_v37 = vld [vmem:[%s6061_s5 + $0xb] ss:$0 sm:$0xff]  ;;  %v2353_v10 = vmul.f32 %v5170_v32, %v5249_v0 }
 0x275   : > { %4004 = vmatmul.msk.bf16.vlgmr.msrb.gmra.mxu0 %vm1210_vm1, %v1591_v56  ;;  %3159 = vmatpush.bf16.msrb.mxu1 %v5022_v26  ;;  %v3209_v56 = vpack.c.bf16 %v5044_v30, %v5044_v30  ;;  %6149 = vst [vmem:[#allocation13_spill] sm:$0xff] %v5266_v37  ;;  %v3358_v30 = vpack.c.bf16 %v5057_v1, %v5057_v1  ;;  %v2294_v1 = vld [vmem:[%s5122_s29] sm:$0xff] }
 0x276   : > { %4034 = vmatmul.msk.bf16.vlgmr.msra.gmra.mxu2 %vm601_vm0, %v3059_v47  ;;  %3143 = vmatpush.bf16.msrb.mxu0 %v5022_v26  ;;  %v2296_v26 = vld [vmem:[%s5122_s29 + $0x10] sm:$0xff]  ;;  %v2421_v47 = vadd.f32 %v2413_v40, %v2392_v19  ;;  %v2361_v21 = vadd.f32 %v2353_v10, %v2324_v35  ;;  %2303 = vst.msk [vmem:[#allocation2 + $0x22] sm:$0xff] %vm2268_vm4, %v2294_v1  ;;  %v2301_v1 = vld [vmem:[%s5122_s29 + $0x38] sm:$0xff] }
 0x277   : > { %3262 = vmatpush.bf16.msra.mxu2 %v3221_v12  ;;  %3278 = vmatpush.bf16.msra.mxu3 %v3221_v12  ;;  %2305 = vst.msk [vmem:[#allocation2 + $0x42] sm:$0xff] %vm2268_vm4, %v2296_v26  ;;  %v2368_v26 = vld [vmem:[#allocation2 + $0x2] sm:$0xff] }
 0x278   : > { %2310 = vst.msk [vmem:[#allocation2 + $0x92] sm:$0xff] %vm2268_vm4, %v2301_v1 }
 0x279   : > { %v2019_v13 = vpop.f32.mrf.mxu2 }
 0x27a   : > { %v2038_v53 = vpop.f32.mrf.mxu3  ;;  %v5073_v22 = vpop.f32.mrf.mxu1  ;;  %v2311_v13 = vld [vmem:[#allocation2] sm:$0xff] }
 0x27b   : > { %v2339_v53 = vld [vmem:[#allocation2 + $0x1] sm:$0xff]  ;;  %v3357_v19 = vpack.c.bf16 %v5073_v22, %v5073_v22 }
 0x27e   : > { %v5228_v8 = vld [vmem:[#allocation2 + $0x40] sm:$0xff] }
 0x27f   : > { %v5243_v46 = vld [vmem:[#allocation2 + $0x41] sm:$0xff] }
 0x282   : > { %v2000_v14 = vpop.f32.mrf.mxu1 }
 0x283   : > { %v5281_v14 = vld [vmem:[#allocation2 + $0x42] sm:$0xff] }
 0x284   : > { %4033 = vmatmul.msk.bf16.vlgmr.msra.gmra.mxu1 %vm601_vm0, %v3058_v42  ;;  %4039 = vmatmul.msk.bf16.vlgmr.msrb.gmra.mxu3 %vm601_vm0, %v3064_v15  ;;  %v5277_v42 = vsel %vm3068_vm3, %v3514_v48, 0  ;;  %v2501_v15 = vmul.f32 %v5233_v6, %v5243_v46  ;;  %v2381_v48 = vmul.f32 %v5175_v24, %v2368_v26 }
 0x285   : > { %4032 = vmatmul.msk.bf16.vlgmr.msra.gmra.mxu0 %vm601_vm0, %v3057_v20  ;;  %3246 = vmatpush.bf16.msra.mxu1 %v3221_v12  ;;  %v2450_v20 = vadd.f32 %v2442_v23, %v2421_v47  ;;  %v5341_v23 = vpack.c.b16 %v5158_v16, %v5050_v41  ;;  %v5358_v41 = vmul.f32 %v5226_v9, %v5197_v59 }
 0x286   : > { %4038 = vmatmul.msk.bf16.vlgmr.msrb.gmra.mxu2 %vm601_vm0, %v3063_v11  ;;  %3230 = vmatpush.bf16.msra.mxu0 %v3221_v12  ;;  %v5291_v11 = vld [vmem:[%s6061_s5 + $0x10] ss:$0 sm:$0xff]  ;;  %v5362_v16 = vmul.f32 %v5233_v6, %v5199_v18 }
 0x287   : > { %3326 = vmatpush.bf16.msrb.mxu2 %v3221_v12  ;;  %3342 = vmatpush.bf16.msrb.mxu3 %v3221_v12  ;;  %6150 = vst [vmem:[#allocation14_spill] sm:$0xff] %v5291_v11 }
 0x288   : > { %6154 = vst [vmem:[#allocation18_spill] sm:$0xff] %v5341_v23  ;;  %v5429_v23 = vld [vmem:[#allocation2 + $0x24] sm:$0xff] }
 0x289   : > { %6163 = vst [vmem:[#allocation27_spill] sm:$0xff] %v5429_v23 }
 0x294   : > { %4037 = vmatmul.msk.bf16.vlgmr.msrb.gmra.mxu1 %vm601_vm0, %v3062_v31  ;;  %4043 = vmatmul.msk.bf16.vlgmr.msra.gmra.mxu3 %vm601_vm0, %v3208_v25  ;;  %v2382_v31 = vmul.f32 %v5175_v24, %v5257_v33  ;;  %v5299_v25 = vld [vmem:[#allocation2 + $0x43] sm:$0xff] }
 0x295   : > { %4036 = vmatmul.msk.bf16.vlgmr.msrb.gmra.mxu0 %vm601_vm0, %v3061_v51  ;;  %3310 = vmatpush.bf16.msrb.mxu1 %v3221_v12  ;;  %v5303_v51 = vld [vmem:[#allocation2 + $0x13] sm:$0xff]  ;;  %v2559_v57 = vmul.f32 %v5291_v11, %v5299_v25 }
 0x296   : > { %4042 = vmatmul.msk.bf16.vlgmr.msra.gmra.mxu2 %vm601_vm0, %v3207_v17  ;;  %3294 = vmatpush.bf16.msrb.mxu0 %v3221_v12  ;;  %v2472_v12 = vmul.f32 %v5226_v9, %v5228_v8  ;;  %v2323_v17 = vmul.f32 %v5163_v60, %v2311_v13  ;;  %v2390_v62 = vadd.f32 %v2382_v31, %v2361_v21  ;;  %v5379_v21 = vld [vmem:[%s6061_s5 + $0x11] ss:$0 sm:$0xff] }
 0x297   : > { %3409 = vmatpush.bf16.msra.mxu2 %v5101_v61  ;;  %3425 = vmatpush.bf16.msra.mxu3 %v5101_v61  ;;  %v2411_v4 = vmul.f32 %v5185_v39, %v5303_v51  ;;  %v2617_v13 = vmul.f32 %v5327_v27, %v5332_v2  ;;  %v5381_v31 = vld [vmem:[#allocation2 + $0x70] sm:$0xff] }
 0x298   : > { %v2480_v54 = vadd.f32 %v2472_v12, %v2450_v20  ;;  %v5354_v12 = vld [vmem:[#allocation2 + $0x51] sm:$0xff]  ;;  %6158 = vst [vmem:[#allocation22_spill] sm:$0xff] %v5381_v31 }
 0x299   : > { %6155 = vst [vmem:[#allocation19_spill] sm:$0xff] %v5354_v12  ;;  %v5374_v20 = vld [vmem:[#allocation2 + $0x52] sm:$0xff] }
 0x29a   : > { %v2509_v7 = vadd.f32 %v2501_v15, %v2480_v54  ;;  %v2426_v15 = vld [vmem:[#allocation2 + $0x4] sm:$0xff]  ;;  %6157 = vst [vmem:[#allocation21_spill] sm:$0xff] %v5374_v20 }
 0x2a4   : > { %4041 = vmatmul.msk.bf16.vlgmr.msra.gmra.mxu1 %vm601_vm0, %v3206_v44  ;;  %4047 = vmatmul.msk.bf16.vlgmr.msrb.gmra.mxu3 %vm601_vm0, %v3212_v49  ;;  %v2352_v44 = vmul.f32 %v5170_v32, %v2339_v53  ;;  %v5369_v53 = vld [vmem:[%s6061_s5 + $0xc] ss:$0 sm:$0xff] }
 0x2a5   : > { %4040 = vmatmul.msk.bf16.vlgmr.msra.gmra.mxu0 %vm601_vm0, %v3205_v58  ;;  %3393 = vmatpush.bf16.msra.mxu1 %v5101_v61  ;;  %v5314_v58 = vld [vmem:[%s6061_s5 + $0x15] ss:$0 sm:$0xff]  ;;  %6156 = vst [vmem:[#allocation20_spill] sm:$0xff] %v5369_v53  ;;  %v2675_v47 = vmul.f32 %v5369_v53, %v5374_v20 }
 0x2a6   : > { %4046 = vmatmul.msk.bf16.vlgmr.msrb.gmra.mxu2 %vm601_vm0, %v3211_v3  ;;  %3377 = vmatpush.bf16.msra.mxu0 %v5101_v61  ;;  %v5318_v3 = vld [vmem:[#allocation2 + $0x44] sm:$0xff]  ;;  %v2360_v40 = vadd.f32 %v2352_v44, %v2323_v17  ;;  %v5385_v17 = vmul.f32 %v5266_v37, %v5201_v43  ;;  %v5389_v44 = vmul.f32 %v5291_v11, %v5211_v63 }
 0x2a7   : > { %3473 = vmatpush.bf16.msrb.mxu2 %v5101_v61  ;;  %3489 = vmatpush.bf16.msrb.mxu3 %v5101_v61  ;;  %6151 = vst [vmem:[#allocation15_spill] sm:$0xff] %v5318_v3  ;;  %v2330_v63 = vmul.f32 %v5163_v60, %v5381_v31 }
 0x2af   : > { %v5218_v55 = vpop.f32.mrf.mxu2 }
 0x2b2   : > { %v5239_v5 = vpop.f32.mrf.mxu0 }
 0x2b3   : > { %v3356_v22 = vpack.c.bf16 %v5239_v5, %v5239_v5  ;;  %v2419_v5 = vadd.f32 %v2411_v4, %v2390_v62  ;;  %v5403_v62 = vmul.f32 %v5314_v58, %v5216_v36  ;;  %v5407_v4 = vmul.f32 %v5226_v9, %v5237_v38  ;;  %v5423_v38 = vld [vmem:[%s6061_s5 + $0x16] ss:$0 sm:$0xff] }
 0x2b4   : > { %4045 = vmatmul.msk.bf16.vlgmr.msrb.gmra.mxu1 %vm601_vm0, %v3210_v29  ;;  %4051 = vmatmul.msk.bf16.vlgmr.msra.gmra.mxu3 %vm601_vm0, %v3359_v52  ;;  %v2588_v29 = vmul.f32 %v5314_v58, %v5318_v3  ;;  %v5348_v52 = vld [vmem:[%s6061_s5 + $0x7] ss:$0 sm:$0xff]  ;;  %6161 = vst [vmem:[#allocation25_spill] sm:$0xff] %v5423_v38 }
 0x2b5   : > { %4044 = vmatmul.msk.bf16.vlgmr.msrb.gmra.mxu0 %vm601_vm0, %v3209_v56  ;;  %3457 = vmatpush.bf16.msrb.mxu1 %v5101_v61  ;;  %v2397_v56 = vld [vmem:[#allocation2 + $0x3] sm:$0xff]  ;;  %v2646_v34 = vmul.f32 %v5348_v52, %v5354_v12  ;;  %6159 = vst [vmem:[#allocation23_spill] sm:$0xff] %v5403_v62 }
 0x2b6   : > { %4050 = vmatmul.msk.bf16.vlgmr.msra.gmra.mxu2 %vm601_vm0, %v3358_v30  ;;  %3441 = vmatpush.bf16.msrb.mxu0 %v5101_v61  ;;  %v2530_v61 = vmul.f32 %v5266_v37, %v5281_v14  ;;  %v2440_v30 = vmul.f32 %v5190_v45, %v5334_v28  ;;  %v2410_v54 = vmul.f32 %v5185_v39, %v2397_v56  ;;  %v5415_v56 = vld [vmem:[#allocation2 + $0x23] sm:$0xff] }
 0x2b7   : > { %v2095_v49 = vpop.f32.mrf.mxu2  ;;  %3560 = vmatpush.bf16.msra.mxu2 %v5277_v42  ;;  %3576 = vmatpush.bf16.msra.mxu3 %v5277_v42  ;;  %6160 = vst [vmem:[#allocation24_spill] sm:$0xff] %v5415_v56  ;;  %v2412_v20 = vmul.f32 %v5185_v39, %v5415_v56 }
 0x2b8   : > { %v2538_v35 = vadd.f32 %v2530_v61, %v2509_v7  ;;  %v2389_v49 = vadd.f32 %v2381_v48, %v2360_v40  ;;  %v5397_v7 = vld [vmem:[#allocation2 + $0x21] sm:$0xff]  ;;  %v5409_v48 = vld [vmem:[#allocation2 + $0x53] sm:$0xff]  ;;  %v2448_v28 = vadd.f32 %v2440_v30, %v2419_v5 }
 0x2b9   : > { %v2704_v30 = vmul.f32 %v5379_v21, %v5409_v48  ;;  %v2499_v3 = vmul.f32 %v5233_v6, %v5397_v7 }
 0x2ba   : > { %v1981_v50 = vpop.f32.mrf.mxu0  ;;  %v2567_v10 = vadd.f32 %v2559_v57, %v2538_v35  ;;  %v5399_v57 = vld [vmem:[#allocation2 + $0x22] sm:$0xff]  ;;  %v2418_v62 = vadd.f32 %v2410_v54, %v2389_v49  ;;  %v2441_v54 = vmul.f32 %v5190_v45, %v5429_v23 }
 0x2bb   : > { %v5395_v50 = vld [vmem:[#allocation2 + $0x20] sm:$0xff]  ;;  %v2383_v12 = vmul.f32 %v5175_v24, %v5399_v57 }
 0x2bc   : > { %v2596_v26 = vadd.f32 %v2588_v29, %v2567_v10  ;;  %v2325_v35 = vmul.f32 %v5163_v60, %v5395_v50  ;;  %v2354_v29 = vmul.f32 %v5170_v32, %v5397_v7  ;;  %v2439_v10 = vmul.f32 %v5190_v45, %v2426_v15  ;;  %v5433_v15 = vld [vmem:[#allocation2 + $0x54] sm:$0xff] }
 0x2bd   : > { %6165 = vst [vmem:[#allocation29_spill] sm:$0xff] %v5433_v15 }
 0x2be   : > { %v2625_v1 = vadd.f32 %v2617_v13, %v2596_v26  ;;  %v5438_v13 = vld [vmem:[%s6061_s5 + $0x3] ss:$0 sm:$0xff]  ;;  %v2362_v26 = vadd.f32 %v2354_v29, %v2325_v35  ;;  %v2733_v29 = vmul.f32 %v5423_v38, %v5433_v15  ;;  %v2674_v15 = vmul.f32 %v5369_v53, %v5281_v14 }
 0x2bf   : > { %6166 = vst [vmem:[#allocation30_spill] sm:$0xff] %v5438_v13 }
 0x2c0   : > { %v2112_v61 = vpop.f32.mrf.mxu3  ;;  %v2654_v5 = vadd.f32 %v2646_v34, %v2625_v1  ;;  %v2391_v49 = vadd.f32 %v2383_v12, %v2362_v26  ;;  %v5462_v1 = vld [vmem:[#allocation2 + $0x60] sm:$0xff]  ;;  %v6168_v12 = vpack.c.bf16 %v5218_v55, %v5218_v55  ;;  %v2447_v26 = vadd.f32 %v2439_v10, %v2418_v62  ;;  %v5480_v55 = vld [vmem:[#allocation2 + $0x72] sm:$0xff] }
 0x2c1   : > { %v3363_v40 = vpack.c.bf16 %v2112_v61, %v2112_v61  ;;  %v5425_v61 = vld [vmem:[#allocation2 + $0x71] sm:$0xff]  ;;  %6167 = vst [vmem:[#allocation31_spill] sm:$0xff] %v5462_v1  ;;  %v2498_v62 = vmul.f32 %v5233_v6, %v5249_v0  ;;  %v5507_v0 = vld [vmem:[%s6061_s5 + $0xd] ss:$0 sm:$0xff] }
 0x2c2   : > { %6162 = vst [vmem:[#allocation26_spill] sm:$0xff] %v5425_v61  ;;  %v2359_v34 = vmul.f32 %v5170_v32, %v5425_v61  ;;  %v2683_v35 = vadd.f32 %v2675_v47, %v2654_v5  ;;  %v5474_v47 = vld [vmem:[%s6061_s5 + $0x8] ss:$0 sm:$0xff]  ;;  %v5486_v61 = vmul.f32 %v5327_v27, %v5228_v8 }
 0x2c3   : > { %v5431_v36 = vpop.f32.mrf.mxu1  ;;  %6169 = vst [vmem:[#allocation32_spill] sm:$0xff] %v5480_v55 }
 0x2c4   : > { %6164 = vst [vmem:[#allocation28_spill] sm:$0xff] %v5431_v36  ;;  %v5444_v2 = vpop.f32.mrf.mxu0  ;;  %v2470_v36 = vmul.f32 %v5226_v9, %v5395_v50  ;;  %4049 = vmatmul.msk.bf16.vlgmr.msra.gmra.mxu1 %vm601_vm0, %v3357_v19  ;;  %4055 = vmatmul.msk.bf16.vlgmr.msrb.gmra.mxu3 %vm601_vm0, %v3363_v40  ;;  %v2763_v40 = vmul.f32 %v5438_v13, %v5462_v1 }
 0x2c5   : > { %4048 = vmatmul.msk.bf16.vlgmr.msra.gmra.mxu0 %vm601_vm0, %v3356_v22  ;;  %3544 = vmatpush.bf16.msra.mxu1 %v5277_v42  ;;  %v2420_v22 = vadd.f32 %v2412_v20, %v2391_v49  ;;  %v5490_v20 = vmul.f32 %v5348_v52, %v5243_v46  ;;  %v5496_v49 = vld [vmem:[#allocation2 + $0x73] sm:$0xff] }
 0x2c6   : > { %v2478_v19 = vadd.f32 %v2470_v36, %v2448_v28  ;;  %4054 = vmatmul.msk.bf16.vlgmr.msrb.gmra.mxu2 %vm601_vm0, %v6168_v12  ;;  %3528 = vmatpush.bf16.msra.mxu0 %v5277_v42  ;;  %v2712_v36 = vadd.f32 %v2704_v30, %v2683_v35  ;;  %v2528_v12 = vmul.f32 %v5266_v37, %v5399_v57  ;;  %v5494_v30 = vld [vmem:[#allocation2 + $0x61] sm:$0xff] }
 0x2c7   : > { %3624 = vmatpush.bf16.msrb.mxu2 %v5277_v42  ;;  %3640 = vmatpush.bf16.msrb.mxu3 %v5277_v42  ;;  %v2449_v45 = vadd.f32 %v2441_v54, %v2420_v22  ;;  %6170 = vst [vmem:[#allocation33_spill] sm:$0xff] %v5494_v30  ;;  %v2557_v54 = vmul.f32 %v5291_v11, %v5415_v56 }
 0x2c8   : > { %v2114_v5 = vpop.f32.mrf.mxu3  ;;  %v5476_v9 = vpop.f32.mrf.mxu2  ;;  %v2507_v28 = vadd.f32 %v2499_v3, %v2478_v19  ;;  %v2741_v10 = vadd.f32 %v2733_v29, %v2712_v36  ;;  %6171 = vst [vmem:[#allocation34_spill] sm:$0xff] %v5496_v49  ;;  %v2586_v35 = vmul.f32 %v5314_v58, %v5429_v23  ;;  %v2792_v22 = vmul.f32 %v5474_v47, %v5494_v30 }
 0x2c9   : > { %v2479_v29 = vadd.f32 %v5358_v41, %v2449_v45  ;;  %v2367_v5 = vadd.f32 %v2359_v34, %v2330_v63  ;;  %v2388_v36 = vmul.f32 %v5175_v24, %v5480_v55  ;;  %v2477_v23 = vadd.f32 %v5407_v4, %v2447_v26  ;;  %v5524_v41 = vld [vmem:[#allocation2 + $0x62] sm:$0xff] }
 0x2ca   : > { %v2536_v3 = vadd.f32 %v2528_v12, %v2507_v28  ;;  %v2771_v12 = vadd.f32 %v2763_v40, %v2741_v10  ;;  %v2527_v45 = vmul.f32 %v5266_v37, %v5257_v33  ;;  %v5522_v63 = vmul.f32 %v5185_v39, %v5496_v49  ;;  %6172 = vst [vmem:[#allocation35_spill] sm:$0xff] %v5524_v41  ;;  %v5539_v10 = vld [vmem:[%s6061_s5 + $0x12] ss:$0 sm:$0xff] }
 0x2cb   : > { %v2076_v19 = vpop.f32.mrf.mxu1  ;;  %v2508_v56 = vadd.f32 %v5362_v16, %v2479_v29  ;;  %v5528_v34 = vmul.f32 %v5379_v21, %v5299_v25  ;;  %v2644_v16 = vmul.f32 %v5348_v52, %v5199_v18  ;;  %v2556_v4 = vmul.f32 %v5291_v11, %v5303_v51 }
 0x2cc   : > { %v2057_v28 = vpop.f32.mrf.mxu0  ;;  %v2565_v6 = vadd.f32 %v2557_v54, %v2536_v3  ;;  %v2615_v19 = vmul.f32 %v5327_v27, %v5197_v59  ;;  %v2800_v26 = vadd.f32 %v2792_v22, %v2771_v12  ;;  %v2821_v33 = vmul.f32 %v5507_v0, %v5524_v41 }
 0x2cd   : > { %v2537_v3 = vadd.f32 %v5385_v17, %v2508_v56  ;;  %v2673_v51 = vmul.f32 %v5369_v53, %v5201_v43  ;;  %v2506_v22 = vadd.f32 %v2498_v62, %v2477_v23  ;;  %v5548_v29 = vadd.f32 %v2388_v36, %v2367_v5  ;;  %v5553_v28 = vld [vmem:[%s6061_s5 + $0x17] ss:$0 sm:$0xff]  ;;  %v6174_v17 = vld [vmem:[#allocation15_spill] sm:$0xff]  ;;  %v6177_v62 = vld [vmem:[#allocation28_spill] sm:$0xff] }
 0x2ce   : > { %v2594_v40 = vadd.f32 %v2586_v35, %v2565_v6  ;;  %v5544_v6 = vmul.f32 %v5163_v60, %v5462_v1  ;;  %v5558_v56 = vmul.f32 %v5423_v38, %v6174_v17  ;;  %v6175_v60 = vld [vmem:[#allocation16_spill] sm:$0xff]  ;;  %v5566_v23 = vmul.f32 %v5170_v32, %v5494_v30  ;;  %v6180_v32 = vld [vmem:[#allocation23_spill] sm:$0xff] }
 0x2cf   : > { %v2566_v12 = vadd.f32 %v5389_v44, %v2537_v3  ;;  %v3361_v5 = vpack.c.bf16 %v6177_v62, %v6177_v62  ;;  %v6179_v44 = vld [vmem:[#allocation9_spill] sm:$0xff]  ;;  %v2535_v39 = vadd.f32 %v2527_v45, %v2506_v22  ;;  %v2829_v11 = vadd.f32 %v2821_v33, %v2800_v26 }
 0x2d0   : > { %6173 = vst [vmem:[#allocation36_spill] sm:$0xff] %v5544_v6  ;;  %v2171_v54 = vpop.f32.mrf.mxu2  ;;  %v2623_v35 = vadd.f32 %v2615_v19, %v2594_v40  ;;  %v5562_v19 = vmul.f32 %v5438_v13, %v6175_v60  ;;  %v5570_v40 = vld [vmem:[#allocation2 + $0x63] sm:$0xff]  ;;  %v2702_v3 = vmul.f32 %v5379_v21, %v6179_v44  ;;  %v3360_v62 = vpack.c.bf16 %v5444_v2, %v5444_v2  ;;  %v6182_v44 = vld [vmem:[#allocation17_spill] sm:$0xff] }
 0x2d1   : > { %6176 = vst [vmem:[#allocation15_spill] sm:$0xff] %v5566_v23  ;;  %v2188_v36 = vpop.f32.mrf.mxu3  ;;  %v2850_v37 = vmul.f32 %v5539_v10, %v5570_v40  ;;  %v2595_v23 = vadd.f32 %v6180_v32, %v2566_v12  ;;  %v5581_v60 = vld [vmem:[#allocation2 + $0x64] sm:$0xff]  ;;  %v2585_v45 = vmul.f32 %v5314_v58, %v6182_v44  ;;  %v3505_v26 = vpack.c.bf16 %v5476_v9, %v5476_v9 }
 0x2d2   : > { %6178 = vst [vmem:[#allocation28_spill] sm:$0xff] %v5570_v40  ;;  %v2652_v54 = vadd.f32 %v2644_v16, %v2623_v35  ;;  %v3506_v24 = vpack.c.bf16 %v2188_v36, %v2188_v36  ;;  %v6181_v16 = vld [vmem:[#allocation10_spill] sm:$0xff]  ;;  %v2879_v32 = vmul.f32 %v5553_v28, %v5581_v60  ;;  %v2564_v22 = vadd.f32 %v2556_v4, %v2535_v39 }
 0x2d3   : > { %v5574_v6 = vpop.f32.mrf.mxu1  ;;  %v2731_v35 = vmul.f32 %v5423_v38, %v6181_v16  ;;  %v2624_v2 = vadd.f32 %v5486_v61, %v2595_v23  ;;  %v2858_v9 = vadd.f32 %v2850_v37, %v2829_v11  ;;  %v2614_v12 = vmul.f32 %v5327_v27, %v5395_v50  ;;  %v5615_v37 = vld [vmem:[%s6061_s5 + $0x9] ss:$0 sm:$0xff]  ;;  %v6184_v23 = vld [vmem:[#allocation19_spill] sm:$0xff] }
 0x2d4   : > { %v2681_v43 = vadd.f32 %v2673_v51, %v2652_v54  ;;  %4053 = vmatmul.msk.bf16.vlgmr.msrb.gmra.mxu1 %vm601_vm0, %v3361_v5  ;;  %4059 = vmatmul.msk.bf16.vlgmr.msra.gmra.mxu3 %vm601_vm0, %v3506_v24  ;;  %v2761_v51 = vmul.f32 %v5438_v13, %v5228_v8  ;;  %v5603_v24 = vld [vmem:[%s6061_s5 + $0x4] ss:$0 sm:$0xff]  ;;  %v2790_v4 = vmul.f32 %v5474_v47, %v5243_v46  ;;  %v6185_v5 = vld [vmem:[#allocation21_spill] sm:$0xff] }
 0x2d5   : > { %4052 = vmatmul.msk.bf16.vlgmr.msrb.gmra.mxu0 %vm601_vm0, %v3360_v62  ;;  %3608 = vmatpush.bf16.msrb.mxu1 %v5277_v42  ;;  %v2653_v61 = vadd.f32 %v5490_v20, %v2624_v2  ;;  %v2791_v20 = vmul.f32 %v5474_v47, %v6184_v23  ;;  %v2820_v50 = vmul.f32 %v5507_v0, %v6185_v5 }
 0x2d6   : > { %v2710_v33 = vadd.f32 %v2702_v3, %v2681_v43  ;;  %4058 = vmatmul.msk.bf16.vlgmr.msra.gmra.mxu2 %vm601_vm0, %v3505_v26  ;;  %3592 = vmatpush.bf16.msrb.mxu0 %v5277_v42  ;;  %v6183_v43 = vld [vmem:[#allocation18_spill] sm:$0xff]  ;;  %v2593_v42 = vadd.f32 %v2585_v45, %v2564_v22  ;;  %v2643_v36 = vmul.f32 %v5348_v52, %v5397_v7  ;;  %v5626_v3 = vld [vmem:[%s6061_s5 + $0xe] ss:$0 sm:$0xff] }
 0x2d7   : > { %3706 = vmatpush.bf16.msra.mxu2 %v6183_v43  ;;  %3722 = vmatpush.bf16.msra.mxu3 %v6183_v43  ;;  %v2682_v11 = vadd.f32 %v2674_v15, %v2653_v61  ;;  %v2819_v15 = vmul.f32 %v5507_v0, %v5281_v14  ;;  %v2672_v45 = vmul.f32 %v5369_v53, %v5399_v57  ;;  %v5645_v61 = vld [vmem:[%s6061_s5 + $0x18] ss:$0 sm:$0xff]  ;;  %v6186_v57 = vld [vmem:[#allocation29_spill] sm:$0xff] }
 0x2d8   : > { %v2739_v39 = vadd.f32 %v2731_v35, %v2710_v33  ;;  %v2622_v35 = vadd.f32 %v2614_v12, %v2593_v42  ;;  %v2887_v2 = vadd.f32 %v2879_v32, %v2858_v9  ;;  %v2909_v7 = vmul.f32 %v5603_v24, %v5381_v31  ;;  %v5637_v33 = vld [vmem:[%s6061_s5 + $0x13] ss:$0 sm:$0xff] }
 0x2d9   : > { %v2131_v54 = vpop.f32.mrf.mxu0  ;;  %v2190_v44 = vpop.f32.mrf.mxu3  ;;  %v2711_v22 = vadd.f32 %v5528_v34, %v2682_v11  ;;  %v2878_v32 = vmul.f32 %v5553_v28, %v6186_v57  ;;  %v2908_v11 = vmul.f32 %v5603_v24, %v5462_v1  ;;  %v2848_v31 = vmul.f32 %v5539_v10, %v5299_v25 }
 0x2da   : > { %v2769_v62 = vadd.f32 %v2761_v51, %v2739_v39  ;;  %v2849_v51 = vmul.f32 %v5539_v10, %v5409_v48  ;;  %v2651_v12 = vadd.f32 %v2643_v36, %v2622_v35  ;;  %v6187_v39 = vld [vmem:[#allocation24_spill] sm:$0xff]  ;;  %v6188_v44 = vld [vmem:[#allocation26_spill] sm:$0xff]  ;;  %v2967_v53 = vmul.f32 %v5626_v3, %v5480_v55  ;;  %v6189_v36 = vld [vmem:[#allocation27_spill] sm:$0xff] }
 0x2db   : > { %v2152_v26 = vpop.f32.mrf.mxu1  ;;  %v2701_v42 = vmul.f32 %v5379_v21, %v6187_v39  ;;  %v2740_v34 = vadd.f32 %v5558_v56, %v2711_v22  ;;  %v2917_v35 = vadd.f32 %v2909_v7, %v2887_v2  ;;  %v2996_v39 = vmul.f32 %v5637_v33, %v5496_v49  ;;  %v5679_v7 = vld [vmem:[#allocation2 + $0x80] sm:$0xff] }
 0x2dc   : > { %v2798_v9 = vadd.f32 %v2790_v4, %v2769_v62  ;;  %v2938_v26 = vmul.f32 %v5615_v37, %v6188_v44  ;;  %v2680_v4 = vadd.f32 %v2672_v45, %v2651_v12  ;;  %v2730_v62 = vmul.f32 %v5423_v38, %v6189_v36  ;;  %v5664_v44 = vld [vmem:[#allocation2 + $0x74] sm:$0xff]  ;;  %v5685_v36 = vld [vmem:[#allocation2 + $0x81] sm:$0xff] }
 0x2dd   : > { %6190 = vst [vmem:[#allocation23_spill] sm:$0xff] %v5664_v44  ;;  %v2770_v56 = vadd.f32 %v5562_v19, %v2740_v34  ;;  %v2937_v22 = vmul.f32 %v5615_v37, %v5494_v30  ;;  %v5671_v1 = vmul.f32 %v5645_v61, %v5664_v44  ;;  %v2760_v2 = vmul.f32 %v5438_v13, %v5197_v59  ;;  %v6193_v55 = vld [vmem:[#allocation11_spill] sm:$0xff]  ;;  %v6195_v38 = vld [vmem:[#allocation8_spill] sm:$0xff] }
 0x2de   : > { %v2827_v57 = vadd.f32 %v2819_v15, %v2798_v9  ;;  %v5675_v15 = vmul.f32 %v5626_v3, %v5524_v41  ;;  %v2709_v45 = vadd.f32 %v2701_v42, %v2680_v4  ;;  %v2877_v19 = vmul.f32 %v5553_v28, %v6174_v17  ;;  %6191 = vst [vmem:[#allocation10_spill] sm:$0xff] %v5685_v36  ;;  %v6192_v4 = vld [vmem:[#allocation7_spill] sm:$0xff] }
 0x2df   : > { %v2799_v9 = vadd.f32 %v2791_v20, %v2770_v56  ;;  %v2425_v34 = vadd.f32 %v5522_v63, %v5548_v29  ;;  %v3504_v30 = vpack.c.bf16 %v5574_v6, %v5574_v6  ;;  %v2789_v59 = vmul.f32 %v5474_v47, %v5199_v18  ;;  %v5695_v63 = vld [vmem:[#allocation2 + $0x82] sm:$0xff] }
 0x2e0   : > { %v2856_v12 = vadd.f32 %v2848_v31, %v2827_v57  ;;  %v2738_v42 = vadd.f32 %v2730_v62, %v2709_v45  ;;  %v2446_v20 = vmul.f32 %v6192_v4, %v5664_v44  ;;  %v3503_v31 = vpack.c.bf16 %v2131_v54, %v2131_v54  ;;  %6194 = vst [vmem:[#allocation17_spill] sm:$0xff] %v5695_v63  ;;  %v6196_v62 = vld [vmem:[#allocation12_spill] sm:$0xff] }
 0x2e1   : > { %v2133_v49 = vpop.f32.mrf.mxu0  ;;  %v2946_v57 = vadd.f32 %v2938_v26, %v2917_v35  ;;  %v2828_v56 = vadd.f32 %v2820_v50, %v2799_v9  ;;  %v2476_v13 = vmul.f32 %v6193_v55, %v5679_v7  ;;  %v2818_v6 = vmul.f32 %v5507_v0, %v6195_v38  ;;  %v6197_v54 = vld [vmem:[#allocation16_spill] sm:$0xff]  ;;  %v6198_v26 = vld [vmem:[#allocation9_spill] sm:$0xff] }
 0x2e2   : > { %v2768_v29 = vadd.f32 %v2760_v2, %v2738_v42  ;;  %v2454_v49 = vadd.f32 %v2446_v20, %v2425_v34  ;;  %v2505_v45 = vmul.f32 %v6196_v62, %v5685_v36  ;;  %v2885_v44 = vadd.f32 %v2877_v19, %v2856_v12  ;;  %v5706_v9 = vld [vmem:[#allocation2 + $0x83] sm:$0xff]  ;;  %v6199_v34 = vld [vmem:[#allocation13_spill] sm:$0xff] }
 0x2e3   : > { %v2857_v18 = vadd.f32 %v2849_v51, %v2828_v56  ;;  %v2907_v50 = vmul.f32 %v5603_v24, %v6197_v54  ;;  %v2847_v35 = vmul.f32 %v5539_v10, %v6198_v26  ;;  %v2534_v42 = vmul.f32 %v6199_v34, %v5695_v63  ;;  %v5717_v20 = vld [vmem:[#allocation2 + $0x84] sm:$0xff] }
 0x2e4   : > { %4057 = vmatmul.msk.bf16.vlgmr.msra.gmra.mxu1 %vm601_vm0, %v3504_v30  ;;  %v2797_v38 = vadd.f32 %v2789_v59, %v2768_v29  ;;  %v2484_v2 = vadd.f32 %v2476_v13, %v2454_v49  ;;  %v2975_v30 = vadd.f32 %v2967_v53, %v2946_v57  ;;  %v2995_v12 = vmul.f32 %v5637_v33, %v5570_v40  ;;  %v6201_v29 = vld [vmem:[#allocation14_spill] sm:$0xff] }
 0x2e5   : > { %4056 = vmatmul.msk.bf16.vlgmr.msra.gmra.mxu0 %vm601_vm0, %v3503_v31  ;;  %3690 = vmatpush.bf16.msra.mxu1 %v6183_v43  ;;  %v2886_v51 = vadd.f32 %v2878_v32, %v2857_v18  ;;  %v3024_v19 = vmul.f32 %v5645_v61, %v5581_v60  ;;  %6200 = vst [vmem:[#allocation18_spill] sm:$0xff] %v5717_v20  ;;  %v5725_v18 = vld [vmem:[#allocation2 + $0x90] sm:$0xff] }
 0x2e6   : > { %3674 = vmatpush.bf16.msra.mxu0 %v6183_v43  ;;  %v2826_v56 = vadd.f32 %v2818_v6, %v2797_v38  ;;  %v2876_v13 = vmul.f32 %v5553_v28, %v6181_v16  ;;  %v2513_v59 = vadd.f32 %v2505_v45, %v2484_v2  ;;  %v2563_v49 = vmul.f32 %v6201_v29, %v5706_v9 }
 0x2e7   : > { %v2264_v31 = vpop.f32.mrf.mxu3  ;;  %v2916_v53 = vadd.f32 %v2908_v11, %v2886_v51  ;;  %v2915_v32 = vadd.f32 %v2907_v50, %v2885_v44  ;;  %v2936_v57 = vmul.f32 %v5615_v37, %v6184_v23  ;;  %6202 = vst [vmem:[#allocation19_spill] sm:$0xff] %v5725_v18  ;;  %v2906_v6 = vmul.f32 %v5603_v24, %v5228_v8  ;;  %v5734_v50 = vld [vmem:[#allocation2 + $0x91] sm:$0xff] }
 0x2e8   : > { %v3510_v26 = vpack.c.bf16 %v2264_v31, %v2264_v31  ;;  %v2855_v36 = vadd.f32 %v2847_v35, %v2826_v56  ;;  %v2542_v38 = vadd.f32 %v2534_v42, %v2513_v59  ;;  %v2592_v16 = vmul.f32 %v5314_v58, %v5717_v20  ;;  %6203 = vst [vmem:[#allocation21_spill] sm:$0xff] %v5734_v50  ;;  %v5747_v31 = vld [vmem:[#allocation2 + $0x92] sm:$0xff]  ;;  %v6205_v59 = vld [vmem:[#allocation15_spill] sm:$0xff] }
 0x2e9   : > { %v2245_v63 = vpop.f32.mrf.mxu2  ;;  %v3004_v2 = vadd.f32 %v2996_v39, %v2975_v30  ;;  %v2945_v11 = vadd.f32 %v2937_v22, %v2916_v53  ;;  %v2965_v44 = vmul.f32 %v5626_v3, %v6185_v5  ;;  %v2935_v8 = vmul.f32 %v5615_v37, %v5243_v46  ;;  %v5760_v53 = vld [vmem:[#allocation2 + $0x93] sm:$0xff] }
 0x2ea   : > { %v3509_v45 = vpack.c.bf16 %v2245_v63, %v2245_v63  ;;  %4063 = vmatmul.msk.bf16.vlgmr.msrb.gmra.mxu3 %vm601_vm0, %v3510_v26  ;;  %v2884_v35 = vadd.f32 %v2876_v13, %v2855_v36  ;;  %v2571_v42 = vadd.f32 %v2563_v49, %v2542_v38  ;;  %v2621_v51 = vmul.f32 %v5327_v27, %v5725_v18  ;;  %v6204_v13 = vld [vmem:[#allocation36_spill] sm:$0xff]  ;;  %v5758_v26 = vld [vmem:[%s6062_s6] ss:$0 sm:$0xff] }
 0x2eb   : > { %3786 = vmatpush.bf16.msrb.mxu3 %v6183_v43  ;;  %v2974_v39 = vadd.f32 %v5675_v15, %v2945_v11  ;;  %v2944_v22 = vadd.f32 %v2936_v57, %v2915_v32  ;;  %v2994_v63 = vmul.f32 %v5637_v33, %v5409_v48  ;;  %v2964_v30 = vmul.f32 %v5626_v3, %v5281_v14  ;;  %v6206_v32 = vld [vmem:[#allocation5_spill] sm:$0xff] }
 0x2ec   : > { %4062 = vmatmul.msk.bf16.vlgmr.msrb.gmra.mxu2 %vm601_vm0, %v3509_v45  ;;  %v2914_v46 = vadd.f32 %v2906_v6, %v2884_v35  ;;  %v2600_v36 = vadd.f32 %v2592_v16, %v2571_v42  ;;  %v2650_v56 = vmul.f32 %v5348_v52, %v5734_v50  ;;  %v2366_v49 = vadd.f32 %v6205_v59, %v6204_v13  ;;  %v6207_v6 = vld [vmem:[#allocation6_spill] sm:$0xff]  ;;  %v6208_v45 = vld [vmem:[#allocation29_spill] sm:$0xff] }
 0x2ed   : > { %3770 = vmatpush.bf16.msrb.mxu2 %v6183_v43  ;;  %v3033_v15 = vadd.f32 %v5671_v1, %v3004_v2  ;;  %v3003_v14 = vadd.f32 %v2995_v12, %v2974_v39  ;;  %v2387_v57 = vmul.f32 %v6206_v32, %v5524_v41  ;;  %v2416_v38 = vmul.f32 %v6207_v6, %v5570_v40  ;;  %v6209_v2 = vld [vmem:[#allocation20_spill] sm:$0xff]  ;;  %v5770_v12 = vld [vmem:[#allocation2 + $0x94] sm:$0xff] }
 0x2ee   : > { %v3023_v11 = vmul.f32 %v5645_v61, %v6208_v45  ;;  %v2943_v35 = vadd.f32 %v2935_v8, %v2914_v46  ;;  %v2629_v1 = vadd.f32 %v2621_v51, %v2600_v36  ;;  %v2679_v42 = vmul.f32 %v6209_v2, %v5747_v31  ;;  %v6211_v36 = vld [vmem:[#allocation22_spill] sm:$0xff] }
 0x2ef   : > { %v2266_v16 = vpop.f32.mrf.mxu3  ;;  %v3032_v13 = vadd.f32 %v3024_v19, %v3003_v14  ;;  %v2973_v59 = vadd.f32 %v2965_v44, %v2944_v22  ;;  %v2395_v39 = vadd.f32 %v2387_v57, %v2366_v49  ;;  %v2445_v50 = vmul.f32 %v6192_v4, %v5581_v60  ;;  %v5779_v44 = vld [vmem:[#allocation2 + $0xa0] sm:$0xff] }
 0x2f0   : > { %v2972_v40 = vadd.f32 %v2964_v30, %v2943_v35  ;;  %v2993_v16 = vmul.f32 %v5637_v33, %v5299_v25  ;;  %v2658_v20 = vadd.f32 %v2650_v56, %v2629_v1  ;;  %v2708_v8 = vmul.f32 %v5379_v21, %v5760_v53  ;;  %6210 = vst [vmem:[#allocation24_spill] sm:$0xff] %v5779_v44  ;;  %v6212_v25 = vld [vmem:[#allocation25_spill] sm:$0xff] }
 0x2f1   : > { %v2226_v18 = vpop.f32.mrf.mxu1  ;;  %v2247_v41 = vpop.f32.mrf.mxu2  ;;  %v3045_v19 = vadd.f32 %v5758_v26, %v3033_v15  ;;  %v2424_v22 = vadd.f32 %v2416_v38, %v2395_v39  ;;  %v2475_v49 = vmul.f32 %v6193_v55, %v6211_v36  ;;  %v2737_v56 = vmul.f32 %v6212_v25, %v5770_v12  ;;  %v5789_v15 = vld [vmem:[#allocation2 + $0xa1] sm:$0xff]  ;;  %v6213_v38 = vld [vmem:[#allocation26_spill] sm:$0xff] }
 0x2f2   : > { %v3508_v51 = vpack.c.bf16 %v2226_v18, %v2226_v18  ;;  %v2207_v46 = vpop.f32.mrf.mxu0  ;;  %v3022_v41 = vmul.f32 %v5645_v61, %v6174_v17  ;;  %v2687_v30 = vadd.f32 %v2679_v42, %v2658_v20  ;;  %v3044_v18 = vadd.f32 %v5758_v26, %v3032_v13  ;;  %v6214_v20 = vld [vmem:[#allocation30_spill] sm:$0xff]  ;;  %v5798_v13 = vld [vmem:[#allocation2 + $0xa2] sm:$0xff] }
 0x2f3   : > { %v3507_v14 = vpack.c.bf16 %v2207_v46, %v2207_v46  ;;  %v3002_v57 = vadd.f32 %v2994_v63, %v2973_v59  ;;  %v2453_v35 = vadd.f32 %v2445_v50, %v2424_v22  ;;  %v2504_v1 = vmul.f32 %v6196_v62, %v6213_v38  ;;  %6215 = vst [vmem:[#allocation27_spill] sm:$0xff] %v5798_v13  ;;  %v6216_v59 = vld [vmem:[#allocation32_spill] sm:$0xff] }
 0x2f4   : > { %4061 = vmatmul.msk.bf16.vlgmr.msrb.gmra.mxu1 %vm601_vm0, %v3508_v51  ;;  %v3001_v39 = vadd.f32 %v2993_v16, %v2972_v40  ;;  %v2716_v17 = vadd.f32 %v2708_v8, %v2687_v30  ;;  %v2767_v42 = vmul.f32 %v6214_v20, %v5779_v44  ;;  %v3657_v46 = vpack.c.bf16 %v3045_v19, %v3045_v19  ;;  %v6219_v19 = vld [vmem:[#allocation34_spill] sm:$0xff] }
 0x2f5   : > { %4060 = vmatmul.msk.bf16.vlgmr.msrb.gmra.mxu0 %vm601_vm0, %v3507_v14  ;;  %3754 = vmatpush.bf16.msrb.mxu1 %v6183_v43  ;;  %v2483_v63 = vadd.f32 %v2475_v49, %v2453_v35  ;;  %v2533_v50 = vmul.f32 %v6199_v34, %v6216_v59  ;;  %v2796_v40 = vmul.f32 %v5474_v47, %v5789_v15  ;;  %v5806_v14 = vld [vmem:[#allocation2 + $0xa3] sm:$0xff] }
 0x2f6   : > { %3738 = vmatpush.bf16.msrb.mxu0 %v6183_v43  ;;  %v2745_v22 = vadd.f32 %v2737_v56, %v2716_v17  ;;  %v3656_v16 = vpack.c.bf16 %v3044_v18, %v3044_v18  ;;  %v3031_v8 = vadd.f32 %v3023_v11, %v3002_v57  ;;  %6218 = vst [vmem:[#allocation11_spill] sm:$0xff] %v5806_v14  ;;  %v5814_v56 = vld [vmem:[#allocation2 + $0xa4] sm:$0xff] }
 0x2f7   : > { %v5802_v51 = vpop.f32.mrf.mxu3  ;;  %v2512_v30 = vadd.f32 %v2504_v1, %v2483_v63  ;;  %v2562_v43 = vmul.f32 %v6201_v29, %v6219_v19  ;;  %v3030_v49 = vadd.f32 %v3022_v41, %v3001_v39  ;;  %6221 = vst [vmem:[#allocation12_spill] sm:$0xff] %v5814_v56  ;;  %v6222_v57 = vld [vmem:[#allocation23_spill] sm:$0xff]  ;;  %v2854_v41 = vmul.f32 %v5539_v10, %v5806_v14  ;;  %v6224_v39 = vld [vmem:[#allocation4_spill] sm:$0xff] }
 0x2f8   : > { %6217 = vst [vmem:[#allocation7_spill] sm:$0xff] %v5802_v51  ;;  %v2775_v35 = vadd.f32 %v2767_v42, %v2745_v22  ;;  %v2825_v51 = vmul.f32 %v5507_v0, %v5798_v13  ;;  %v2591_v1 = vmul.f32 %v5314_v58, %v6222_v57  ;;  %v6223_v17 = vld [vmem:[#allocation3_spill] sm:$0xff]  ;;  %v2357_v42 = vmul.f32 %v6224_v39, %v6184_v23 }
 0x2f9   : > { %v2228_v38 = vpop.f32.mrf.mxu1  ;;  %v5810_v44 = vpop.f32.mrf.mxu2  ;;  %v2541_v11 = vadd.f32 %v2533_v50, %v2512_v30  ;;  %v2328_v63 = vmul.f32 %v6223_v17, %v6197_v54  ;;  %v2386_v22 = vmul.f32 %v6206_v32, %v6185_v5  ;;  %v2883_v50 = vmul.f32 %v5553_v28, %v5814_v56  ;;  %v2900_v30 = vld [vmem:[#allocation2 + $0xb0] sm:$0xff] }
 0x2fa   : > { %6220 = vst [vmem:[#allocation8_spill] sm:$0xff] %v5810_v44  ;;  %4067 = vmatmul.msk.bf16.vlgmr.msra.gmra.mxu3 %vm2268_vm4, %v3657_v46  ;;  %v2209_v18 = vpop.f32.mrf.mxu0  ;;  %v2804_v38 = vadd.f32 %v2796_v40, %v2775_v35  ;;  %v3043_v46 = vadd.f32 %v5758_v26, %v3031_v8  ;;  %v2620_v54 = vmul.f32 %v5327_v27, %v5679_v7  ;;  %v2929_v44 = vld [vmem:[#allocation2 + $0xb1] sm:$0xff] }
 0x2fb   : > { %v2570_v18 = vadd.f32 %v2562_v43, %v2541_v11  ;;  %v3042_v40 = vadd.f32 %v5758_v26, %v3030_v49  ;;  %v2365_v23 = vadd.f32 %v2357_v42, %v2328_v63  ;;  %v2415_v5 = vmul.f32 %v6207_v6, %v5409_v48  ;;  %v2958_v43 = vld [vmem:[#allocation2 + $0xb2] sm:$0xff] }
 0x2fc   : > { %4066 = vmatmul.msk.bf16.vlgmr.msra.gmra.mxu2 %vm2268_vm4, %v3656_v16  ;;  %v2833_v35 = vadd.f32 %v2825_v51, %v2804_v38  ;;  %v6225_v16 = vld [vmem:[#allocation10_spill] sm:$0xff]  ;;  %v2913_v56 = vmul.f32 %v5603_v24, %v2900_v30  ;;  %v2444_v19 = vmul.f32 %v6192_v4, %v6208_v45  ;;  %v3655_v49 = vpack.c.bf16 %v3043_v46, %v3043_v46  ;;  %v6226_v38 = vld [vmem:[#allocation17_spill] sm:$0xff] }
 0x2fd   : > { %v2599_v14 = vadd.f32 %v2591_v1, %v2570_v18  ;;  %v2649_v8 = vmul.f32 %v5348_v52, %v6225_v16  ;;  %v2394_v11 = vadd.f32 %v2386_v22, %v2365_v23  ;;  %v2942_v51 = vmul.f32 %v5615_v37, %v2929_v44  ;;  %v2315_v22 = vld [vmem:[#allocation2 + $0x40] sm:$0xff] }
 0x2fe   : > { %v2862_v57 = vadd.f32 %v2854_v41, %v2833_v35  ;;  %v2678_v48 = vmul.f32 %v6209_v2, %v6226_v38  ;;  %v3654_v18 = vpack.c.bf16 %v3042_v40, %v3042_v40  ;;  %v6228_v35 = vld [vmem:[#allocation31_spill] sm:$0xff]  ;;  %v2971_v44 = vmul.f32 %v5626_v3, %v2958_v43  ;;  %v6231_v40 = vld [vmem:[#allocation33_spill] sm:$0xff] }
 0x2ff   : > { %v3131_v13 = vpop.f32.mrf.mxu3  ;;  %v2628_v63 = vadd.f32 %v2620_v54, %v2599_v14  ;;  %v2423_v41 = vadd.f32 %v2415_v5, %v2394_v11  ;;  %v2474_v30 = vmul.f32 %v6193_v55, %v6228_v35  ;;  %v2343_v23 = vld [vmem:[#allocation2 + $0x41] sm:$0xff]  ;;  %v2987_v14 = vld [vmem:[#allocation2 + $0xb3] sm:$0xff]  ;;  %v2707_v54 = vmul.f32 %v5379_v21, %v5706_v9 }
 0x300   : > { %v2891_v13 = vadd.f32 %v2883_v50, %v2862_v57  ;;  %v2372_v16 = vld [vmem:[#allocation2 + $0x42] sm:$0xff]  ;;  %v2503_v5 = vmul.f32 %v6196_v62, %v6231_v40  ;;  %v3016_v35 = vld [vmem:[#allocation2 + $0xb4] sm:$0xff]  ;;  %v2327_v43 = vmul.f32 %v6223_v17, %v2315_v22 }
 0x301   : > { %v5844_v1 = vpop.f32.mrf.mxu1  ;;  %v3115_v42 = vpop.f32.mrf.mxu2  ;;  %v2657_v46 = vadd.f32 %v2649_v8, %v2628_v63  ;;  %v2452_v50 = vadd.f32 %v2444_v19, %v2423_v41  ;;  %v2401_v11 = vld [vmem:[#allocation2 + $0x43] sm:$0xff]  ;;  %v2356_v8 = vmul.f32 %v6224_v39, %v2343_v23  ;;  %v2385_v63 = vmul.f32 %v6206_v32, %v2372_v16  ;;  %v6235_v23 = vld [vmem:[#allocation21_spill] sm:$0xff] }
 0x302   : > { %6227 = vst [vmem:[#allocation16_spill] sm:$0xff] %v5844_v1  ;;  %v5848_v45 = vpop.f32.mrf.mxu0  ;;  %v2921_v1 = vadd.f32 %v2913_v56, %v2891_v13  ;;  %v6230_v42 = vld [vmem:[#allocation18_spill] sm:$0xff]  ;;  %v3000_v13 = vmul.f32 %v5637_v33, %v2987_v14  ;;  %v6232_v41 = vld [vmem:[#allocation35_spill] sm:$0xff]  ;;  %v2414_v17 = vmul.f32 %v6207_v6, %v2401_v11  ;;  %v3029_v16 = vmul.f32 %v5645_v61, %v3016_v35 }
 0x303   : > { %6229 = vst [vmem:[#allocation9_spill] sm:$0xff] %v5848_v45  ;;  %v2736_v57 = vmul.f32 %v6212_v25, %v6230_v42  ;;  %v2686_v45 = vadd.f32 %v2678_v48, %v2657_v46  ;;  %v2482_v19 = vadd.f32 %v2474_v30, %v2452_v50  ;;  %v2532_v40 = vmul.f32 %v6199_v34, %v6232_v41  ;;  %v2430_v25 = vld [vmem:[#allocation2 + $0x44] sm:$0xff]  ;;  %v2460_v30 = vld [vmem:[#allocation2 + $0x50] sm:$0xff] }
 0x304   : > { %4065 = vmatmul.msk.bf16.vlgmr.msra.gmra.mxu1 %vm2268_vm4, %v3655_v49  ;;  %v2950_v56 = vadd.f32 %v2942_v51, %v2921_v1  ;;  %v6233_v49 = vld [vmem:[#allocation19_spill] sm:$0xff]  ;;  %v2364_v46 = vadd.f32 %v2356_v8, %v2327_v43  ;;  %v6234_v1 = vld [vmem:[#allocation28_spill] sm:$0xff] }
 0x305   : > { %4064 = vmatmul.msk.bf16.vlgmr.msra.gmra.mxu0 %vm2268_vm4, %v3654_v18  ;;  %v2715_v42 = vadd.f32 %v2707_v54, %v2686_v45  ;;  %v2766_v48 = vmul.f32 %v6214_v20, %v6233_v49  ;;  %v2511_v51 = vadd.f32 %v2503_v5, %v2482_v19  ;;  %v2561_v18 = vmul.f32 %v6201_v29, %v6234_v1  ;;  %v2489_v5 = vld [vmem:[#allocation2 + $0x51] sm:$0xff] }
 0x306   : > { %v2979_v32 = vadd.f32 %v2971_v44, %v2950_v56  ;;  %v2795_v45 = vmul.f32 %v5474_v47, %v6235_v23  ;;  %v2393_v14 = vadd.f32 %v2385_v63, %v2364_v46  ;;  %v2443_v54 = vmul.f32 %v6192_v4, %v2430_v25  ;;  %v2518_v19 = vld [vmem:[#allocation2 + $0x52] sm:$0xff] }
 0x307   : > { %v5868_v39 = vpop.f32.mrf.mxu3  ;;  %v2744_v22 = vadd.f32 %v2736_v57, %v2715_v42  ;;  %v2540_v11 = vadd.f32 %v2532_v40, %v2511_v51  ;;  %v2590_v44 = vmul.f32 %v5314_v58, %v5581_v60  ;;  %v2824_v42 = vmul.f32 %v5507_v0, %v5747_v31  ;;  %v2547_v46 = vld [vmem:[#allocation2 + $0x53] sm:$0xff] }
 0x308   : > { %v3008_v6 = vadd.f32 %v3000_v13, %v2979_v32  ;;  %v2422_v57 = vadd.f32 %v2414_v17, %v2393_v14  ;;  %v2473_v56 = vmul.f32 %v6193_v55, %v2460_v30  ;;  %v2853_v4 = vmul.f32 %v5539_v10, %v5760_v53  ;;  %v6236_v55 = vld [vmem:[#allocation24_spill] sm:$0xff]  ;;  %v6237_v51 = vld [vmem:[#allocation26_spill] sm:$0xff] }
 0x309   : > { %v3099_v50 = vpop.f32.mrf.mxu1  ;;  %v5876_v43 = vpop.f32.mrf.mxu2  ;;  %v2774_v8 = vadd.f32 %v2766_v48, %v2744_v22  ;;  %v2569_v25 = vadd.f32 %v2561_v18, %v2540_v11  ;;  %v2619_v13 = vmul.f32 %v5327_v27, %v6211_v36  ;;  %v2882_v60 = vmul.f32 %v5553_v28, %v5770_v12 }
 0x30a   : > { %v3083_v35 = vpop.f32.mrf.mxu0  ;;  %v3037_v63 = vadd.f32 %v3029_v16, %v3008_v6  ;;  %v2451_v40 = vadd.f32 %v2443_v54, %v2422_v57  ;;  %v2502_v48 = vmul.f32 %v6196_v62, %v2489_v5  ;;  %v2912_v32 = vmul.f32 %v5603_v24, %v6236_v55  ;;  %v2576_v6 = vld [vmem:[#allocation2 + $0x54] sm:$0xff]  ;;  %v2605_v57 = vld [vmem:[#allocation2 + $0x60] sm:$0xff] }
 0x30b   : > { %v2803_v41 = vadd.f32 %v2795_v45, %v2774_v8  ;;  %v2598_v16 = vadd.f32 %v2590_v44, %v2569_v25  ;;  %v2648_v1 = vmul.f32 %v5348_v52, %v6237_v51  ;;  %v2941_v36 = vmul.f32 %v5615_v37, %v5789_v15  ;;  %v6238_v35 = vld [vmem:[#allocation10_spill] sm:$0xff] }
 0x30c   : > { %v3049_v17 = vadd.f32 %v5758_v26, %v3037_v63  ;;  %v2481_v30 = vadd.f32 %v2473_v56, %v2451_v40  ;;  %v2531_v22 = vmul.f32 %v6199_v34, %v2518_v19  ;;  %v2677_v54 = vmul.f32 %v6209_v2, %v6216_v59  ;;  %v6239_v59 = vld [vmem:[#allocation34_spill] sm:$0xff] }
 0x30d   : > { %v2832_v18 = vadd.f32 %v2824_v42, %v2803_v41  ;;  %v2627_v62 = vadd.f32 %v2619_v13, %v2598_v16  ;;  %v2560_v50 = vmul.f32 %v6201_v29, %v2547_v46  ;;  %v5903_v5 = vmul.f32 %v5603_v24, %v5679_v7  ;;  %v6240_v41 = vld [vmem:[#allocation18_spill] sm:$0xff]  ;;  %v6241_v46 = vld [vmem:[#allocation23_spill] sm:$0xff] }
 0x30e   : > { %v3661_v45 = vpack.c.bf16 %v3049_v17, %v3049_v17  ;;  %v2510_v44 = vadd.f32 %v2502_v48, %v2481_v30  ;;  %v5907_v15 = vmul.f32 %v5615_v37, %v6238_v35  ;;  %v2706_v29 = vmul.f32 %v5379_v21, %v6239_v59  ;;  %v6242_v17 = vld [vmem:[#allocation25_spill] sm:$0xff]  ;;  %v2634_v16 = vld [vmem:[#allocation2 + $0x61] sm:$0xff] }
 0x30f   : > { %v3195_v14 = vpop.f32.mrf.mxu3  ;;  %v2861_v11 = vadd.f32 %v2853_v4, %v2832_v18  ;;  %v2656_v42 = vadd.f32 %v2648_v1, %v2627_v62  ;;  %v5916_v56 = vmul.f32 %v5626_v3, %v6226_v38  ;;  %v5920_v63 = vmul.f32 %v5637_v33, %v5706_v9  ;;  %v6243_v1 = vld [vmem:[#allocation27_spill] sm:$0xff] }
 0x310   : > { %4071 = vmatmul.msk.bf16.vlgmr.msrb.gmra.mxu3 %vm2268_vm4, %v3661_v45  ;;  %v2539_v13 = vadd.f32 %v2531_v22, %v2510_v44  ;;  %v2589_v19 = vmul.f32 %v5314_v58, %v2576_v6  ;;  %v5927_v40 = vmul.f32 %v5645_v61, %v6240_v41  ;;  %v2735_v55 = vmul.f32 %v6242_v17, %v6241_v46  ;;  %v5937_v58 = vld [vmem:[%s6064_s8] ss:$0 sm:$0xff]  ;;  %v2663_v14 = vld [vmem:[#allocation2 + $0x62] sm:$0xff] }
 0x311   : > { %v5910_v34 = vpop.f32.mrf.mxu1  ;;  %v3179_v8 = vpop.f32.mrf.mxu2  ;;  %v2890_v4 = vadd.f32 %v2882_v60, %v2861_v11  ;;  %v2685_v48 = vadd.f32 %v2677_v54, %v2656_v42  ;;  %v2970_v18 = vmul.f32 %v5626_v3, %v6243_v1  ;;  %v2618_v60 = vmul.f32 %v5327_v27, %v2605_v57  ;;  %v6244_v54 = vld [vmem:[#allocation11_spill] sm:$0xff]  ;;  %v6245_v42 = vld [vmem:[#allocation12_spill] sm:$0xff] }
 0x312   : > { %v5922_v25 = vpop.f32.mrf.mxu0  ;;  %v2568_v30 = vadd.f32 %v2560_v50, %v2539_v13  ;;  %v2765_v45 = vmul.f32 %v6214_v20, %v5679_v7  ;;  %v2647_v11 = vmul.f32 %v5348_v52, %v2634_v16  ;;  %v2794_v27 = vmul.f32 %v5474_v47, %v6238_v35  ;;  %v2692_v44 = vld [vmem:[#allocation2 + $0x63] sm:$0xff] }
 0x313   : > { %v2920_v51 = vadd.f32 %v2912_v32, %v2890_v4  ;;  %v2714_v22 = vadd.f32 %v2706_v29, %v2685_v48  ;;  %v2999_v32 = vmul.f32 %v5637_v33, %v6244_v54  ;;  %v3028_v59 = vmul.f32 %v5645_v61, %v6245_v42  ;;  %v6246_v57 = vld [vmem:[#allocation7_spill] sm:$0xff]  ;;  %v6247_v4 = vld [vmem:[#allocation8_spill] sm:$0xff] }
 0x314   : > { %v2597_v6 = vadd.f32 %v2589_v19, %v2568_v30  ;;  %v2676_v7 = vmul.f32 %v6209_v2, %v2663_v14  ;;  %v3199_v13 = vadd.f32 %v5937_v58, %v6247_v4  ;;  %v2823_v52 = vmul.f32 %v5507_v0, %v6226_v38  ;;  %v2721_v48 = vld [vmem:[#allocation2 + $0x64] sm:$0xff]  ;;  %v2751_v30 = vld [vmem:[#allocation2 + $0x70] sm:$0xff] }
 0x315   : > { %v2949_v62 = vadd.f32 %v2941_v36, %v2920_v51  ;;  %v2743_v50 = vadd.f32 %v2735_v55, %v2714_v22  ;;  %v3200_v36 = vadd.f32 %v5937_v58, %v6246_v57  ;;  %v2705_v16 = vmul.f32 %v5379_v21, %v2692_v44  ;;  %v2809_v44 = vld [vmem:[#allocation2 + $0x72] sm:$0xff] }
 0x316   : > { %v2626_v29 = vadd.f32 %v2618_v60, %v2597_v6  ;;  %v2852_v2 = vmul.f32 %v5539_v10, %v5706_v9  ;;  %v2881_v21 = vmul.f32 %v5553_v28, %v6240_v41  ;;  %v2764_v9 = vmul.f32 %v6214_v20, %v2751_v30  ;;  %v2838_v57 = vld [vmem:[#allocation2 + $0x73] sm:$0xff] }
 0x317   : > { %v2978_v8 = vadd.f32 %v2970_v18, %v2949_v62  ;;  %v2773_v19 = vadd.f32 %v2765_v45, %v2743_v50  ;;  %v3280_v51 = vpop.f32.mrf.mxu3  ;;  %v2734_v62 = vmul.f32 %v6242_v17, %v2721_v48  ;;  %v2940_v41 = vmul.f32 %v5615_v37, %v6235_v23  ;;  %v6249_v4 = vld [vmem:[#allocation9_spill] sm:$0xff] }
 0x318   : > { %v2655_v55 = vadd.f32 %v2647_v11, %v2626_v29  ;;  %v5958_v60 = vadd.f32 %v3280_v51, %v3200_v36  ;;  %v3197_v20 = vadd.f32 %v5937_v58, %v6249_v4  ;;  %v2998_v51 = vmul.f32 %v5637_v33, %v5760_v53 }
 0x319   : > { %v3163_v35 = vpop.f32.mrf.mxu1  ;;  %v3007_v46 = vadd.f32 %v2999_v32, %v2978_v8  ;;  %v3264_v1 = vpop.f32.mrf.mxu2  ;;  %v2802_v18 = vadd.f32 %v2794_v27, %v2773_v19  ;;  %v2780_v32 = vld [vmem:[#allocation2 + $0x71] sm:$0xff]  ;;  %v2911_v27 = vmul.f32 %v5603_v24, %v6233_v49  ;;  %v6248_v8 = vld [vmem:[#allocation16_spill] sm:$0xff]  ;;  %v2822_v49 = vmul.f32 %v5507_v0, %v2809_v44 }
 0x31a   : > { %v5960_v22 = vadd.f32 %v3264_v1, %v3199_v13  ;;  %v3147_v45 = vpop.f32.mrf.mxu0  ;;  %v2684_v38 = vadd.f32 %v2676_v7, %v2655_v55  ;;  %v3198_v42 = vadd.f32 %v5937_v58, %v6248_v8  ;;  %v2793_v29 = vmul.f32 %v5474_v47, %v2780_v32  ;;  %v2867_v35 = vld [vmem:[#allocation2 + $0x74] sm:$0xff] }
 0x31b   : > { %v3036_v14 = vadd.f32 %v3028_v59, %v3007_v46  ;;  %v2831_v54 = vadd.f32 %v2823_v52, %v2802_v18  ;;  %v2969_v47 = vmul.f32 %v5626_v3, %v5747_v31  ;;  %v2851_v46 = vmul.f32 %v5539_v10, %v2838_v57 }
 0x31c   : > { %v2713_v11 = vadd.f32 %v2705_v16, %v2684_v38  ;;  %v2880_v1 = vmul.f32 %v5553_v28, %v2867_v35  ;;  %v3204_v3 = vadd.f32 %v5937_v58, %v5868_v39  ;;  %v3203_v10 = vadd.f32 %v5937_v58, %v5876_v43 }
 0x31d   : > { %v3048_v6 = vadd.f32 %v5758_v26, %v3036_v14  ;;  %v2860_v50 = vadd.f32 %v2852_v2, %v2831_v54  ;;  %v3027_v2 = vmul.f32 %v5645_v61, %v5770_v12  ;;  %v3202_v39 = vadd.f32 %v5937_v58, %v5910_v34 }
 0x31e   : > { %v2742_v17 = vadd.f32 %v2734_v62, %v2713_v11  ;;  %v3201_v11 = vadd.f32 %v5937_v58, %v5922_v25 }
 0x31f   : > { %v3660_v59 = vpack.c.bf16 %v3048_v6, %v3048_v6  ;;  %v2889_v7 = vadd.f32 %v2881_v21, %v2860_v50  ;;  %v3282_v13 = vpop.f32.mrf.mxu3 }
 0x320   : > { %v2772_v24 = vadd.f32 %v2764_v9, %v2742_v17 }
 0x321   : > { %v3248_v36 = vpop.f32.mrf.mxu1  ;;  %4070 = vmatmul.msk.bf16.vlgmr.msrb.gmra.mxu2 %vm2268_vm4, %v3660_v59  ;;  %v3266_v52 = vpop.f32.mrf.mxu2  ;;  %v2919_v48 = vadd.f32 %v2911_v27, %v2889_v7 }
 0x322   : > { %v5978_v19 = vadd.f32 %v3248_v36, %v3198_v42  ;;  %v3232_v37 = vpop.f32.mrf.mxu0  ;;  %v2801_v23 = vadd.f32 %v2793_v29, %v2772_v24 }
 0x323   : > { %v5983_v55 = vadd.f32 %v3232_v37, %v3197_v20  ;;  %v2948_v16 = vadd.f32 %v2940_v41, %v2919_v48 }
 0x324   : > { %v2830_v0 = vadd.f32 %v2822_v49, %v2801_v23 }
 0x325   : > { %v2977_v18 = vadd.f32 %v2969_v47, %v2948_v16 }
 0x326   : > { %v2859_v30 = vadd.f32 %v2851_v46, %v2830_v0 }
 0x327   : > { %v3006_v31 = vadd.f32 %v2998_v51, %v2977_v18  ;;  %v3344_v38 = vpop.f32.mrf.mxu3 }
 0x328   : > { %v2888_v14 = vadd.f32 %v2880_v1, %v2859_v30  ;;  %v3355_v53 = vadd.f32 %v3344_v38, %v3204_v3 }
 0x329   : > { %v3250_v45 = vpop.f32.mrf.mxu1  ;;  %v3328_v62 = vpop.f32.mrf.mxu2  ;;  %v3035_v33 = vadd.f32 %v3027_v2, %v3006_v31 }
 0x32a   : > { %v3354_v54 = vadd.f32 %v3328_v62, %v3203_v10  ;;  %v3234_v28 = vpop.f32.mrf.mxu0  ;;  %v2918_v21 = vadd.f32 %v5903_v5, %v2888_v14 }
 0x32b   : > { %v3047_v61 = vadd.f32 %v5758_v26, %v3035_v33  ;;  %v3803_v28 = vld [vmem:[%s6017_s12 + $0x18] sm:$0xff] }
 0x32c   : > { %v2947_v12 = vadd.f32 %v5907_v15, %v2918_v21 }
 0x32d   : > { %v3659_v32 = vpack.c.bf16 %v3047_v61, %v3047_v61 }
 0x32e   : > { %v2976_v43 = vadd.f32 %v5916_v56, %v2947_v12 }
 0x32f   : > { %4069 = vmatmul.msk.bf16.vlgmr.msrb.gmra.mxu1 %vm2268_vm4, %v3659_v32  ;;  %v3346_v50 = vpop.f32.mrf.mxu3  ;;  %v3802_v32 = vld [vmem:[%s6017_s12 + $0x10] sm:$0xff] }
 0x330   : > { %v3005_v9 = vadd.f32 %v5920_v63, %v2976_v43 }
 0x331   : > { %v3312_v6 = vpop.f32.mrf.mxu1  ;;  %v3330_v27 = vpop.f32.mrf.mxu2 }
 0x332   : > { %v3353_v5 = vadd.f32 %v3312_v6, %v3202_v39  ;;  %v3296_v44 = vpop.f32.mrf.mxu0  ;;  %v3034_v15 = vadd.f32 %v5927_v40, %v3005_v9  ;;  %v3801_v9 = vld [vmem:[%s6017_s12 + $0x8] sm:$0xff] }
 0x333   : > { %v3352_v8 = vadd.f32 %v3296_v44, %v3201_v11 }
 0x334   : > { %v3046_v42 = vadd.f32 %v5758_v26, %v3034_v15  ;;  %v3800_v15 = vld [vmem:[%s6017_s12] sm:$0xff] }
 0x336   : > { %v3658_v34 = vpack.c.bf16 %v3046_v42, %v3046_v42 }
 0x337   : > { %v3427_v56 = vpop.f32.mrf.mxu3 }
 0x338   : > { %4068 = vmatmul.msk.bf16.vlgmr.msrb.gmra.mxu0 %vm2268_vm4, %v3658_v34  ;;  %v3498_v62 = vadd.f32 %v3427_v56, %v5958_v60 }
 0x339   : > { %v3314_v59 = vpop.f32.mrf.mxu1  ;;  %v3411_v17 = vpop.f32.mrf.mxu2 }
 0x33a   : > { %v3497_v29 = vadd.f32 %v3411_v17, %v5960_v22  ;;  %v3298_v25 = vpop.f32.mrf.mxu0 }
 0x33f   : > { %v3429_v63 = vpop.f32.mrf.mxu3 }
 0x341   : > { %v3395_v58 = vpop.f32.mrf.mxu1  ;;  %v3413_v7 = vpop.f32.mrf.mxu2 }
 0x342   : > { %v3379_v41 = vpop.f32.mrf.mxu0  ;;  %v3496_v21 = vadd.f32 %v3395_v58, %v5978_v19  ;;  %v3807_v58 = vld [vmem:[%s6017_s12 + $0x38] sm:$0xff] }
 0x343   : > { %v3495_v39 = vadd.f32 %v3379_v41, %v5983_v55 }
 0x347   : > { %v3491_v36 = vpop.f32.mrf.mxu3 }
 0x348   : > { %v3502_v40 = vadd.f32 %v3491_v36, %v3355_v53 }
 0x349   : > { %v3397_v57 = vpop.f32.mrf.mxu1  ;;  %v3475_v4 = vpop.f32.mrf.mxu2 }
 0x34a   : > { %v6008_v20 = vadd.f32 %v3475_v4, %v3354_v54  ;;  %v3381_v26 = vpop.f32.mrf.mxu0  ;;  %v3806_v4 = vld [vmem:[%s6017_s12 + $0x30] sm:$0xff] }
 0x34f   : > { %v3493_v49 = vpop.f32.mrf.mxu3 }
 0x351   : > { %v3459_v24 = vpop.f32.mrf.mxu1  ;;  %v3477_v52 = vpop.f32.mrf.mxu2 }
 0x352   : > { %v6010_v13 = vadd.f32 %v3459_v24, %v3353_v5  ;;  %v3443_v48 = vpop.f32.mrf.mxu0 }
 0x353   : > { %v3499_v47 = vadd.f32 %v3443_v48, %v3352_v8  ;;  %v3805_v48 = vld [vmem:[%s6017_s12 + $0x28] sm:$0xff] }
 0x357   : > { %v3578_v35 = vpop.f32.mrf.mxu3 }
 0x358   : > { %v3649_v53 = vadd.f32 %v3578_v35, %v3498_v62 }
 0x359   : > { %v3461_v22 = vpop.f32.mrf.mxu1  ;;  %v3562_v37 = vpop.f32.mrf.mxu2 }
 0x35a   : > { %v3445_v23 = vpop.f32.mrf.mxu0  ;;  %v3648_v61 = vadd.f32 %v3562_v37, %v3497_v29 }
 0x35b   : > { %v3804_v23 = vld [vmem:[%s6017_s12 + $0x20] sm:$0xff] }
 0x35f   : > { %v3580_v16 = vpop.f32.mrf.mxu3 }
 0x361   : > { %v3546_v46 = vpop.f32.mrf.mxu1  ;;  %v3564_v51 = vpop.f32.mrf.mxu2 }
 0x362   : > { %v3530_v0 = vpop.f32.mrf.mxu0  ;;  %v3647_v43 = vadd.f32 %v3546_v46, %v3496_v21 }
 0x363   : > { %v3646_v50 = vadd.f32 %v3530_v0, %v3495_v39 }
 0x369   : > { %v3548_v1 = vpop.f32.mrf.mxu1 }
 0x36a   : > { %v3532_v18 = vpop.f32.mrf.mxu0 }
 0x36d   : > { %v3642_v2 = vpop.f32.mrf.mxu3 }
 0x36e   : > { %v3653_v29 = vadd.f32 %v3642_v2, %v3502_v40 }
 0x36f   : > { %v3626_v30 = vpop.f32.mrf.mxu2 }
 0x370   : > { %v3652_v57 = vadd.f32 %v3626_v30, %v6008_v20 }
 0x371   : > { %v3610_v3 = vpop.f32.mrf.mxu1 }
 0x372   : > { %v3594_v10 = vpop.f32.mrf.mxu0  ;;  %v3651_v40 = vadd.f32 %v3610_v3, %v6010_v13 }
 0x373   : > { %v3650_v31 = vadd.f32 %v3594_v10, %v3499_v47 }
 0x375   : > { %v3644_v45 = vpop.f32.mrf.mxu3 }
 0x377   : > { %v3628_v14 = vpop.f32.mrf.mxu2 }
 0x379   : > { %v3612_v38 = vpop.f32.mrf.mxu1 }
 0x37a   : > { %v3596_v33 = vpop.f32.mrf.mxu0 }
 0x37d   : > { %v3724_v54 = vpop.f32.mrf.mxu3 }
 0x37e   : > { %v3795_v12 = vadd.f32 %v3724_v54, %v3649_v53 }
 0x37f   : > { %v3708_v60 = vpop.f32.mrf.mxu2 }
 0x380   : > { %v3811_v6 = vadd.f32 %v3803_v28, %v3795_v12  ;;  %v3794_v11 = vadd.f32 %v3708_v60, %v3648_v61 }
 0x381   : > { %v3692_v19 = vpop.f32.mrf.mxu1 }
 0x382   : > { %3819 = vst.msk [vmem:[%s6025_s17 + $0x18] sm:$0xff] %vm2268_vm4, %v3811_v6  ;;  %v3810_v5 = vadd.f32 %v3802_v32, %v3794_v11  ;;  %v3793_v27 = vadd.f32 %v3692_v19, %v3647_v43  ;;  %v3676_v44 = vpop.f32.mrf.mxu0 }
 0x383   : > { %v3792_v55 = vadd.f32 %v3676_v44, %v3646_v50 }
 0x384   : > { %3818 = vst.msk [vmem:[%s6025_s17 + $0x10] sm:$0xff] %vm2268_vm4, %v3810_v5  ;;  %v3809_v8 = vadd.f32 %v3801_v9, %v3793_v27 }
 0x385   : > { %v3726_v42 = vpop.f32.mrf.mxu3  ;;  %v3808_v34 = vadd.f32 %v3800_v15, %v3792_v55 }
 0x386   : > { %3817 = vst.msk [vmem:[%s6025_s17 + $0x8] sm:$0xff] %vm2268_vm4, %v3809_v8 }
 0x387   : > { %v3710_v59 = vpop.f32.mrf.mxu2  ;;  %3816 = vst.msk [vmem:[%s6025_s17] sm:$0xff] %vm2268_vm4, %v3808_v34 }
 0x389   : > { %v3694_v56 = vpop.f32.mrf.mxu1 }
 0x38a   : > { %v3678_v17 = vpop.f32.mrf.mxu0 }
 0x393   : > { %v3788_v25 = vpop.f32.mrf.mxu3 }
 0x394   : > { %v3799_v63 = vadd.f32 %v3788_v25, %v3653_v29 }
 0x396   : > { %v3815_v7 = vadd.f32 %v3807_v58, %v3799_v63 }
 0x398   : > { %3823 = vst.msk [vmem:[%s6025_s17 + $0x38] sm:$0xff] %vm2268_vm4, %v3815_v7 }
 0x39b   : > { %v3790_v41 = vpop.f32.mrf.mxu3 }
 0x3a4   : > { %v3772_v36 = vpop.f32.mrf.mxu2 }
 0x3a5   : > { %v3798_v26 = vadd.f32 %v3772_v36, %v3652_v57 }
 0x3a7   : > { %v3814_v24 = vadd.f32 %v3806_v4, %v3798_v26 }
 0x3a9   : > { %3822 = vst.msk [vmem:[%s6025_s17 + $0x30] sm:$0xff] %vm2268_vm4, %v3814_v24 }
 0x3ac   : > { %v3774_v49 = vpop.f32.mrf.mxu2  ;;  %v3756_v52 = vpop.f32.mrf.mxu1 }
 0x3ad   : > { %v3797_v47 = vadd.f32 %v3756_v52, %v3651_v40 }
 0x3af   : > { %v3813_v22 = vadd.f32 %v3805_v48, %v3797_v47 }
 0x3b1   : > { %3821 = vst.msk [vmem:[%s6025_s17 + $0x28] sm:$0xff] %vm2268_vm4, %v3813_v22 }
 0x3b4   : > { %v3758_v35 = vpop.f32.mrf.mxu1 }
 0x3b5   : > { %v3740_v37 = vpop.f32.mrf.mxu0 }
 0x3b6   : > { %v3796_v20 = vadd.f32 %v3740_v37, %v3650_v31 }
 0x3b8   : > { %v3812_v46 = vadd.f32 %v3804_v23, %v3796_v20 }
 0x3ba   : > { %3820 = vst.msk [vmem:[%s6025_s17 + $0x20] sm:$0xff] %vm2268_vm4, %v3812_v46 }
 0x3bd   : > { %v3742_v16 = vpop.f32.mrf.mxu0 }
 0x3be PF: > { %s20_s13 = sadd.s32 1, %s4250_s13  }
 0x3bf   : > { %p17_p4 = scmp.ge.s32.totalorder %s20_s13, 4  }
 0x3c1   :  { %19 = sbr.rel (!%p17_p4) target bundleno = 1 (0x1), region = 130 }

</bundles_post_ra>
